<compile_context>
chip_gen: v7x
topology: tpu7x:2x2x1
jax: 0.10.0
libtpu: 0.0.40
codegen_flags: <defaults>
</compile_context>

<pallas_src>
import functools

import jax
import jax.numpy as jnp
from jax.experimental import pallas as pl
from jax.experimental.pallas import tpu as pltpu

CP = 128          # channel padding (lane width)
_BN_EPS = 1e-5


# ---------------------------------------------------------------------------
# Fused layer kernel: [prev BN affine + ReLU] -> [pool/unpool] -> 3x3 conv
# ---------------------------------------------------------------------------

def _fused_conv_kernel(x_ref, top_ref, bot_ref, w_ref, b_ref, s_ref, t_ref,
                       o_ref, st_ref, pt_ref, *, TH, W, C,
                       fuse_bn, fuse_pool):
    """One (sample, TH-row slab) per grid step.

    x_ref  : (1, TH, W, C)   bf16  main slab (rows h*TH .. h*TH+TH-1)
    top_ref: (1, 2,  W, C)   bf16  rows h*TH-2, h*TH-1   (clamped at h == 0)
    bot_ref: (1, 2,  W, C)   bf16  rows h*TH+TH, h*TH+TH+1 (clamped at last h)
    w_ref  : (9*C, Cout)     bf16  tap-major weights, k = dy*3 + dx
    b_ref  : (1, Cout)       f32   conv bias
    s_ref  : (1, C)          f32   folded BN scale of the *previous* layer
    t_ref  : (1, C)          f32   folded BN shift of the *previous* layer
    o_ref  : (1, TH, W, Cout)      conv output (pre-BN of *this* layer)
    st_ref : (1, 1, 2, Cout) f32   per-(sample, slab) [sum, sum_of_squares]
    pt_ref : (TH*W, 9*C)     bf16  VMEM scratch: im2col patches
    """
    h = pl.program_id(1)
    nh = pl.num_programs(1)

    def prologue(v):
        v = v.astype(jnp.float32)
        if fuse_bn:
            v = jnp.maximum(v * s_ref[0] + t_ref[0], 0.0)   # prev BN + ReLU
        return v

    main = prologue(x_ref[0])                       # (TH, W, C) f32
    top = prologue(top_ref[0])                      # (2, W, C)
    bot = prologue(bot_ref[0])                      # (2, W, C)
    # Rows outside the image are zero padding of the *post-activation* map.
    top = top * jnp.where(h == 0, 0.0, 1.0)
    bot = bot * jnp.where(h == nh - 1, 0.0, 1.0)

    if fuse_pool:
        # Fused MaxPool2d(2,2,return_indices) + MaxUnpool2d(2,2): keep each
        # 2x2-window max at its argmax (first max in row-major window order
        # wins, matching PyTorch), zero the other 3 positions.  Computed in
        # vregs over the full (TH+4)-row slab; TH even => window-aligned.
        a = jnp.concatenate([top, main, bot], axis=0)          # (TH+4, W, C)
        zc = jnp.zeros_like(a[:, :1, :])
        a_next = jnp.concatenate([a[:, 1:, :], zc], axis=1)    # a[., w+1]
        a_prev = jnp.concatenate([zc, a[:, :-1, :]], axis=1)   # a[., w-1]
        wi = jax.lax.broadcasted_iota(jnp.int32, a.shape, 1)
        hi = jax.lax.broadcasted_iota(jnp.int32, a.shape, 0)
        w_even = (wi % 2) == 0
        h_even = (hi % 2) == 0          # row 0 of `a` is global row h*TH-2
        partner_w = jnp.where(w_even, a_next, a_prev)           # other column
        m_w = jnp.maximum(a, partner_w)                         # col-pair max
        m_dn = jnp.concatenate([m_w[1:], m_w[:1]], axis=0)      # m_w[r+1]
        m_up = jnp.concatenate([m_w[-1:], m_w[:-1]], axis=0)    # m_w[r-1]
        partner_h = jnp.where(h_even, m_dn, m_up)               # other row
        winmax = jnp.maximum(m_w, partner_h)                    # 2x2 max
        keep = jnp.logical_and(
            a == winmax,
            jnp.logical_and(jnp.logical_or(w_even, partner_w < winmax),
                            jnp.logical_or(h_even, partner_h < winmax)))
        a = jnp.where(keep, a, 0.0)
        slab = a[1:TH + 3]                          # rows h*TH-1 .. h*TH+TH
    else:
        slab = jnp.concatenate([top[1:2], main, bot[0:1]], axis=0)

    # 3x3 conv as im2col: pack the 9 shifted taps into the bf16 scratch and
    # contract with one K = 9*C MXU dot (f32 accumulation).
    slab16 = slab.astype(jnp.bfloat16)              # (TH+2, W, C)
    zc16 = jnp.zeros_like(slab16[:, :1, :])
    shifted = (jnp.concatenate([zc16, slab16[:, :W - 1, :]], axis=1),  # w-1
               slab16,                                                 # w
               jnp.concatenate([slab16[:, 1:, :], zc16], axis=1))      # w+1
    M = TH * W
    for k in range(9):
        dy, dx = k // 3, k % 3
        pt_ref[:, k * C:(k + 1) * C] = shifted[dx][dy:dy + TH].reshape(M, C)

    y = jnp.dot(pt_ref[...], w_ref[...], preferred_element_type=jnp.float32)
    y = y + b_ref[...]                              # (M, Cout) f32
    st_ref[0, 0, 0:1, :] = jnp.sum(y, axis=0, keepdims=True)
    st_ref[0, 0, 1:2, :] = jnp.sum(y * y, axis=0, keepdims=True)
    o_ref[0] = y.reshape(TH, W, -1).astype(o_ref.dtype)


# ---------------------------------------------------------------------------
# Wrappers
# ---------------------------------------------------------------------------

def _pick_th(H, W, m_cap=1024):
    """Largest even divisor of H (preferring >= 2 H-tiles) with TH*W <= m_cap."""
    divs = [d for d in range(2, H + 1, 2) if H % d == 0]
    assert divs, f"H={H} must be even"
    proper = [d for d in divs if d < H] or divs
    fitting = [d for d in proper if d * W <= m_cap]
    return max(fitting) if fitting else min(proper)


def fused_conv_layer(x, w, b, scale, shift, *, fuse_bn, fuse_pool, out_dtype):
    """x: (N,H,W,C) bf16; w: (9*C,Cout) bf16; b: (1,Cout); scale/shift: (1,C).

    Returns (y, stats): y = raw conv output (N,H,W,Cout) in out_dtype, stats =
    (N, H//TH, 2, Cout) per-(sample, slab) [sum, sum_of_squares] of y.
    """
    N, H, W, C = x.shape
    K, cout = w.shape
    assert K == 9 * C, (K, C)
    assert H % 2 == 0 and W % 2 == 0, (H, W)
    TH = _pick_th(H, W)
    nh = H // TH
    hb = TH // 2            # halo blocks are 2 rows => block units of 2 along H

    kernel = functools.partial(_fused_conv_kernel, TH=TH, W=W, C=C,
                               fuse_bn=fuse_bn, fuse_pool=fuse_pool)

    # VMEM budget from the actual tile sizes (double-buffered blocks + scratch
    # + f32 prologue temporaries), capped at 48 MiB so it also fits v7x.
    out_b = jnp.dtype(out_dtype).itemsize
    act_b = x.dtype.itemsize
    vmem = 2 * ((TH + 4) * W * C * act_b            # input slab + halos
                + TH * W * cout * out_b             # conv output block
                + 2 * cout * 4)                     # stats block
    vmem += 2 * K * cout * 2                        # weights (bf16)
    vmem += TH * W * K * 2                          # im2col scratch (bf16)
    vmem += 8 * (TH + 4) * W * C * 4                # f32 prologue temporaries
    vmem_limit = int(min(max(2 * vmem, 24 << 20), 48 << 20))

    y, stats = pl.pallas_call(
        kernel,
        out_shape=(jax.ShapeDtypeStruct((N, H, W, cout), out_dtype),
                   jax.ShapeDtypeStruct((N, nh, 2, cout), jnp.float32)),
        grid=(N, nh),
        in_specs=[
            pl.BlockSpec((1, TH, W, C), lambda n, h: (n, h, 0, 0)),
            # 2-row halos: same array, clamped block indices; out-of-image
            # rows are zeroed inside the kernel.
            pl.BlockSpec((1, 2, W, C),
                         lambda n, h: (n, jnp.maximum(h * hb - 1, 0), 0, 0)),
            pl.BlockSpec((1, 2, W, C),
                         lambda n, h: (n, jnp.minimum((h + 1) * hb,
                                                      H // 2 - 1), 0, 0)),
            pl.BlockSpec((K, cout), lambda n, h: (0, 0)),      # grid-invariant
            pl.BlockSpec((1, cout), lambda n, h: (0, 0)),
            pl.BlockSpec((1, C), lambda n, h: (0, 0)),
            pl.BlockSpec((1, C), lambda n, h: (0, 0)),
        ],
        out_specs=(
            pl.BlockSpec((1, TH, W, cout), lambda n, h: (n, h, 0, 0)),
            pl.BlockSpec((1, 1, 2, cout), lambda n, h: (n, h, 0, 0)),
        ),
        scratch_shapes=[pltpu.VMEM((TH * W, K), jnp.bfloat16)],
        compiler_params=pltpu.CompilerParams(
            dimension_semantics=("parallel", "parallel"),
            vmem_limit_bytes=vmem_limit),
    )(x, x, x, w, b, scale, shift)
    return y, stats


def _bn_scale_shift(stats, gamma, beta, count, eps=_BN_EPS):
    """Fold training-mode BatchNorm2d into y = x*scale + shift (per channel).

    stats: (N, nh, 2, C) with per-slab [sum, sum_of_squares] from the conv
    kernel, so no full-tensor re-read is needed for mean/var.
    """
    s = jnp.sum(stats, axis=(0, 1))                      # (2, C)
    mean = s[0] / count
    var = jnp.maximum(s[1] / count - mean * mean, 0.0)   # biased variance
    scale = gamma / jnp.sqrt(var + eps)
    shift = beta - mean * scale
    return scale.reshape(1, -1), shift.reshape(1, -1)


# ---------------------------------------------------------------------------
# Parameters (deterministic, PyTorch-default-style init)
# ---------------------------------------------------------------------------

def _conv_params(key, cin, cout):
    k1, k2 = jax.random.split(key)
    fan_in = cin * 9
    bound = 1.0 / (fan_in ** 0.5)
    w = jax.random.uniform(k1, (cout, cin, 3, 3), jnp.float32, -bound, bound)
    b = jax.random.uniform(k2, (cout,), jnp.float32, -bound, bound)
    # (Cout, Cin, 3, 3) -> (3, 3, Cin, Cout), zero-pad channels to CP, flatten
    # tap-major (k = dy*3 + dx) -> (9*CP, CP) bf16.
    w9 = jnp.transpose(w, (2, 3, 1, 0))
    w9 = jnp.pad(w9, ((0, 0), (0, 0), (0, CP - cin), (0, CP - cout)))
    w9 = w9.reshape(9 * CP, CP).astype(jnp.bfloat16)
    b_p = jnp.pad(b, (0, CP - cout)).reshape(1, CP)
    return w9, b_p


def _bn_params(c_real):
    gamma = jnp.pad(jnp.ones((c_real,), jnp.float32), (0, CP - c_real))
    beta = jnp.zeros((CP,), jnp.float32)
    return gamma, beta


def init_segnet_params(key, n_channels, n_classes):
    ks = jax.random.split(key, 4)
    p = {}
    p["w1"], p["b1"] = _conv_params(ks[0], n_channels, 64)
    p["g1"], p["be1"] = _bn_params(64)
    p["w2"], p["b2"] = _conv_params(ks[1], 64, 64)
    p["g2"], p["be2"] = _bn_params(64)
    p["w3"], p["b3"] = _conv_params(ks[2], 64, 64)
    p["g3"], p["be3"] = _bn_params(64)
    p["w4"], p["b4"] = _conv_params(ks[3], 64, n_classes)
    return p


# ---------------------------------------------------------------------------
# Forward
# ---------------------------------------------------------------------------

@functools.partial(jax.jit, static_argnames=("n_classes",))
def segnet_forward(x_nchw, params, n_classes):
    x = jnp.transpose(x_nchw, (0, 2, 3, 1))                       # NCHW->NHWC
    N, H, W, cin = x.shape
    assert H % 2 == 0 and W % 2 == 0, (H, W)
    x = jnp.pad(x, ((0, 0), (0, 0), (0, 0), (0, CP - cin)))       # lane-pad C
    x = x.astype(jnp.bfloat16)
    count = float(N * H * W)
    ones = jnp.ones((1, CP), jnp.float32)
    zeros = jnp.zeros((1, CP), jnp.float32)

    # encoder
    y1, st1 = fused_conv_layer(x, params["w1"], params["b1"], ones, zeros,
                               fuse_bn=False, fuse_pool=False,
                               out_dtype=jnp.bfloat16)
    s1, t1 = _bn_scale_shift(st1, params["g1"], params["be1"], count)
    y2, st2 = fused_conv_layer(y1, params["w2"], params["b2"], s1, t1,
                               fuse_bn=True, fuse_pool=False,
                               out_dtype=jnp.bfloat16)
    s2, t2 = _bn_scale_shift(st2, params["g2"], params["be2"], count)
    # decoder: BN2 + ReLU2 + MaxPool/MaxUnpool are fused into conv3's prologue
    y3, st3 = fused_conv_layer(y2, params["w3"], params["b3"], s2, t2,
                               fuse_bn=True, fuse_pool=True,
                               out_dtype=jnp.bfloat16)
    s3, t3 = _bn_scale_shift(st3, params["g3"], params["be3"], count)
    y4, _ = fused_conv_layer(y3, params["w4"], params["b4"], s3, t3,
                             fuse_bn=True, fuse_pool=False,
                             out_dtype=jnp.float32)

    out = y4[..., :n_classes]
    return jnp.transpose(out, (0, 3, 1, 2))                       # NHWC->NCHW


if __name__ == "__main__":
    n_channels, n_classes = 4, 3
    N, H, W = 2, 16, 16

    key = jax.random.PRNGKey(0)
    k_x, k_p = jax.random.split(key)
    x = jax.random.normal(k_x, (N, n_channels, H, W), jnp.float32)
    params = init_segnet_params(k_p, n_channels, n_classes)

    y = segnet_forward(x, params, n_classes=n_classes)
    jax.block_until_ready(y)
    assert y.shape == (N, n_classes, H, W), y.shape
    assert bool(jnp.all(jnp.isfinite(y)))
    print("KERNEL_OK")
</pallas_src>

<mosaic_0001>
module attributes {stable_mosaic.version = 11 : i64} {
  func.func @_fused_conv_kernel(%arg0: i32, %arg1: i32, %arg2: memref<1x8x16x128xbf16, #tpu.memory_space<vmem>>, %arg3: memref<1x2x16x128xbf16, #tpu.memory_space<vmem>>, %arg4: memref<1x2x16x128xbf16, #tpu.memory_space<vmem>>, %arg5: memref<1152x128xbf16, #tpu.memory_space<vmem>>, %arg6: memref<1x128xf32, #tpu.memory_space<vmem>>, %arg7: memref<1x128xf32, #tpu.memory_space<vmem>>, %arg8: memref<1x128xf32, #tpu.memory_space<vmem>>, %arg9: memref<1x8x16x128xbf16, #tpu.memory_space<vmem>>, %arg10: memref<1x1x2x128xf32, #tpu.memory_space<vmem>>, %arg11: memref<128x1152xbf16, #tpu.memory_space<vmem>>) attributes {dimension_semantics = [#tpu.dimension_semantics<parallel>, #tpu.dimension_semantics<parallel>], iteration_bounds = array<i64: 2, 2>, scalar_prefetch = 0 : i64, scratch_operands = 1 : i64, tpu.core_type = #tpu.core_type<tc>, window_params = [{transform_indices = @transform_0, window_bounds = array<i64: 1, 8, 16, 128>}, {transform_indices = @transform_1, window_bounds = array<i64: 1, 2, 16, 128>}, {transform_indices = @transform_2, window_bounds = array<i64: 1, 2, 16, 128>}, {pipeline_mode = #tpu.pipeline_mode<synchronous>, transform_indices = @transform_3, window_bounds = array<i64: 1152, 128>}, {pipeline_mode = #tpu.pipeline_mode<synchronous>, transform_indices = @transform_4, window_bounds = array<i64: 1, 128>}, {pipeline_mode = #tpu.pipeline_mode<synchronous>, transform_indices = @transform_5, window_bounds = array<i64: 1, 128>}, {pipeline_mode = #tpu.pipeline_mode<synchronous>, transform_indices = @transform_6, window_bounds = array<i64: 1, 128>}, {transform_indices = @transform_7, window_bounds = array<i64: 1, 8, 16, 128>}, {transform_indices = @transform_8, window_bounds = array<i64: 1, 1, 2, 128>}]} {
    %c0 = arith.constant 0 : index
    %c0_0 = arith.constant 0 : index
    %c0_1 = arith.constant 0 : index
    %c0_2 = arith.constant 0 : index
    %0 = vector.load %arg2[%c0, %c0_0, %c0_1, %c0_2] : memref<1x8x16x128xbf16, #tpu.memory_space<vmem>>, vector<1x8x16x128xbf16>
    %1 = vector.shape_cast %0 : vector<1x8x16x128xbf16> to vector<8x16x128xbf16>
    %2 = arith.extf %1 : vector<8x16x128xbf16> to vector<8x16x128xf32>
    %c0_3 = arith.constant 0 : index
    %c0_4 = arith.constant 0 : index
    %c0_5 = arith.constant 0 : index
    %c0_6 = arith.constant 0 : index
    %3 = vector.load %arg3[%c0_3, %c0_4, %c0_5, %c0_6] : memref<1x2x16x128xbf16, #tpu.memory_space<vmem>>, vector<1x2x16x128xbf16>
    %4 = vector.shape_cast %3 : vector<1x2x16x128xbf16> to vector<2x16x128xbf16>
    %5 = arith.extf %4 : vector<2x16x128xbf16> to vector<2x16x128xf32>
    %c0_7 = arith.constant 0 : index
    %c0_8 = arith.constant 0 : index
    %c0_9 = arith.constant 0 : index
    %c0_10 = arith.constant 0 : index
    %6 = vector.load %arg4[%c0_7, %c0_8, %c0_9, %c0_10] : memref<1x2x16x128xbf16, #tpu.memory_space<vmem>>, vector<1x2x16x128xbf16>
    %7 = vector.shape_cast %6 : vector<1x2x16x128xbf16> to vector<2x16x128xbf16>
    %8 = arith.extf %7 : vector<2x16x128xbf16> to vector<2x16x128xf32>
    %c0_i32 = arith.constant 0 : i32
    %9 = arith.cmpi eq, %arg1, %c0_i32 : i32
    %cst = arith.constant 0.000000e+00 : f32
    %cst_11 = arith.constant 1.000000e+00 : f32
    %10 = arith.select %9, %cst, %cst_11 : f32
    %11 = vector.broadcast %10 : f32 to vector<2x16x128xf32>
    %12 = arith.mulf %5, %11 : vector<2x16x128xf32>
    %c1_i32 = arith.constant 1 : i32
    %13 = arith.cmpi eq, %arg1, %c1_i32 : i32
    %cst_12 = arith.constant 0.000000e+00 : f32
    %cst_13 = arith.constant 1.000000e+00 : f32
    %14 = arith.select %13, %cst_12, %cst_13 : f32
    %15 = vector.broadcast %14 : f32 to vector<2x16x128xf32>
    %16 = arith.mulf %8, %15 : vector<2x16x128xf32>
    %17 = vector.extract_strided_slice %12 {offsets = [1, 0, 0], sizes = [1, 16, 128], strides = [1, 1, 1]} : vector<2x16x128xf32> to vector<1x16x128xf32>
    %18 = vector.extract_strided_slice %16 {offsets = [0, 0, 0], sizes = [1, 16, 128], strides = [1, 1, 1]} : vector<2x16x128xf32> to vector<1x16x128xf32>
    %19 = tpu.concatenate %17, %2, %18 in 0 : vector<1x16x128xf32>, vector<8x16x128xf32>, vector<1x16x128xf32> -> vector<10x16x128xf32>
    %20 = arith.truncf %19 : vector<10x16x128xf32> to vector<10x16x128xbf16>
    %cst_14 = arith.constant 0.000000e+00 : bf16
    %21 = vector.broadcast %cst_14 : bf16 to vector<10x1x128xbf16>
    %22 = vector.extract_strided_slice %20 {offsets = [0, 0, 0], sizes = [10, 15, 128], strides = [1, 1, 1]} : vector<10x16x128xbf16> to vector<10x15x128xbf16>
    %23 = tpu.concatenate %21, %22 in 1 : vector<10x1x128xbf16>, vector<10x15x128xbf16> -> vector<10x16x128xbf16>
    %24 = vector.extract_strided_slice %20 {offsets = [0, 1, 0], sizes = [10, 15, 128], strides = [1, 1, 1]} : vector<10x16x128xbf16> to vector<10x15x128xbf16>
    %25 = tpu.concatenate %24, %21 in 1 : vector<10x15x128xbf16>, vector<10x1x128xbf16> -> vector<10x16x128xbf16>
    %26 = vector.extract_strided_slice %23 {offsets = [0, 0, 0], sizes = [8, 16, 128], strides = [1, 1, 1]} : vector<10x16x128xbf16> to vector<8x16x128xbf16>
    %27 = vector.shape_cast %26 : vector<8x16x128xbf16> to vector<128x128xbf16>
    %c0_15 = arith.constant 0 : index
    %c0_16 = arith.constant 0 : index
    %28 = vector.load %arg11[%c0_15, %c0_16] : memref<128x1152xbf16, #tpu.memory_space<vmem>>, vector<128x128xbf16>
    tpu.vector_store %arg11[%c0_15, %c0_16], %27 {strides = array<i32>} : memref<128x1152xbf16, #tpu.memory_space<vmem>>, vector<128x128xbf16>,
    %29 = vector.extract_strided_slice %20 {offsets = [0, 0, 0], sizes = [8, 16, 128], strides = [1, 1, 1]} : vector<10x16x128xbf16> to vector<8x16x128xbf16>
    %30 = vector.shape_cast %29 : vector<8x16x128xbf16> to vector<128x128xbf16>
    %c0_17 = arith.constant 0 : index
    %c128 = arith.constant 128 : index
    %31 = vector.load %arg11[%c0_17, %c128] : memref<128x1152xbf16, #tpu.memory_space<vmem>>, vector<128x128xbf16>
    tpu.vector_store %arg11[%c0_17, %c128], %30 {strides = array<i32>} : memref<128x1152xbf16, #tpu.memory_space<vmem>>, vector<128x128xbf16>,
    %32 = vector.extract_strided_slice %25 {offsets = [0, 0, 0], sizes = [8, 16, 128], strides = [1, 1, 1]} : vector<10x16x128xbf16> to vector<8x16x128xbf16>
    %33 = vector.shape_cast %32 : vector<8x16x128xbf16> to vector<128x128xbf16>
    %c0_18 = arith.constant 0 : index
    %c256 = arith.constant 256 : index
    %34 = vector.load %arg11[%c0_18, %c256] : memref<128x1152xbf16, #tpu.memory_space<vmem>>, vector<128x128xbf16>
    tpu.vector_store %arg11[%c0_18, %c256], %33 {strides = array<i32>} : memref<128x1152xbf16, #tpu.memory_space<vmem>>, vector<128x128xbf16>,
    %35 = vector.extract_strided_slice %23 {offsets = [1, 0, 0], sizes = [8, 16, 128], strides = [1, 1, 1]} : vector<10x16x128xbf16> to vector<8x16x128xbf16>
    %36 = vector.shape_cast %35 : vector<8x16x128xbf16> to vector<128x128xbf16>
    %c0_19 = arith.constant 0 : index
    %c384 = arith.constant 384 : index
    %37 = vector.load %arg11[%c0_19, %c384] : memref<128x1152xbf16, #tpu.memory_space<vmem>>, vector<128x128xbf16>
    tpu.vector_store %arg11[%c0_19, %c384], %36 {strides = array<i32>} : memref<128x1152xbf16, #tpu.memory_space<vmem>>, vector<128x128xbf16>,
    %38 = vector.extract_strided_slice %20 {offsets = [1, 0, 0], sizes = [8, 16, 128], strides = [1, 1, 1]} : vector<10x16x128xbf16> to vector<8x16x128xbf16>
    %39 = vector.shape_cast %38 : vector<8x16x128xbf16> to vector<128x128xbf16>
    %c0_20 = arith.constant 0 : index
    %c512 = arith.constant 512 : index
    %40 = vector.load %arg11[%c0_20, %c512] : memref<128x1152xbf16, #tpu.memory_space<vmem>>, vector<128x128xbf16>
    tpu.vector_store %arg11[%c0_20, %c512], %39 {strides = array<i32>} : memref<128x1152xbf16, #tpu.memory_space<vmem>>, vector<128x128xbf16>,
    %41 = vector.extract_strided_slice %25 {offsets = [1, 0, 0], sizes = [8, 16, 128], strides = [1, 1, 1]} : vector<10x16x128xbf16> to vector<8x16x128xbf16>
    %42 = vector.shape_cast %41 : vector<8x16x128xbf16> to vector<128x128xbf16>
    %c0_21 = arith.constant 0 : index
    %c640 = arith.constant 640 : index
    %43 = vector.load %arg11[%c0_21, %c640] : memref<128x1152xbf16, #tpu.memory_space<vmem>>, vector<128x128xbf16>
    tpu.vector_store %arg11[%c0_21, %c640], %42 {strides = array<i32>} : memref<128x1152xbf16, #tpu.memory_space<vmem>>, vector<128x128xbf16>,
    %44 = vector.extract_strided_slice %23 {offsets = [2, 0, 0], sizes = [8, 16, 128], strides = [1, 1, 1]} : vector<10x16x128xbf16> to vector<8x16x128xbf16>
    %45 = vector.shape_cast %44 : vector<8x16x128xbf16> to vector<128x128xbf16>
    %c0_22 = arith.constant 0 : index
    %c768 = arith.constant 768 : index
    %46 = vector.load %arg11[%c0_22, %c768] : memref<128x1152xbf16, #tpu.memory_space<vmem>>, vector<128x128xbf16>
    tpu.vector_store %arg11[%c0_22, %c768], %45 {strides = array<i32>} : memref<128x1152xbf16, #tpu.memory_space<vmem>>, vector<128x128xbf16>,
    %47 = vector.extract_strided_slice %20 {offsets = [2, 0, 0], sizes = [8, 16, 128], strides = [1, 1, 1]} : vector<10x16x128xbf16> to vector<8x16x128xbf16>
    %48 = vector.shape_cast %47 : vector<8x16x128xbf16> to vector<128x128xbf16>
    %c0_23 = arith.constant 0 : index
    %c896 = arith.constant 896 : index
    %49 = vector.load %arg11[%c0_23, %c896] : memref<128x1152xbf16, #tpu.memory_space<vmem>>, vector<128x128xbf16>
    tpu.vector_store %arg11[%c0_23, %c896], %48 {strides = array<i32>} : memref<128x1152xbf16, #tpu.memory_space<vmem>>, vector<128x128xbf16>,
    %50 = vector.extract_strided_slice %25 {offsets = [2, 0, 0], sizes = [8, 16, 128], strides = [1, 1, 1]} : vector<10x16x128xbf16> to vector<8x16x128xbf16>
    %51 = vector.shape_cast %50 : vector<8x16x128xbf16> to vector<128x128xbf16>
    %c0_24 = arith.constant 0 : index
    %c1024 = arith.constant 1024 : index
    %52 = vector.load %arg11[%c0_24, %c1024] : memref<128x1152xbf16, #tpu.memory_space<vmem>>, vector<128x128xbf16>
    tpu.vector_store %arg11[%c0_24, %c1024], %51 {strides = array<i32>} : memref<128x1152xbf16, #tpu.memory_space<vmem>>, vector<128x128xbf16>,
    %c0_25 = arith.constant 0 : index
    %c0_26 = arith.constant 0 : index
    %53 = vector.load %arg11[%c0_25, %c0_26] : memref<128x1152xbf16, #tpu.memory_space<vmem>>, vector<128x1152xbf16>
    %c0_27 = arith.constant 0 : index
    %c0_28 = arith.constant 0 : index
    %54 = vector.load %arg5[%c0_27, %c0_28] : memref<1152x128xbf16, #tpu.memory_space<vmem>>, vector<1152x128xbf16>
    %cst_29 = arith.constant dense<0.000000e+00> : vector<128x128xf32>
    %55 = tpu.matmul %53, %54, %cst_29 {dimension_numbers = #tpu.dot_dimension_numbers<[1], [0], [0], [1], [0, 0, 1, 1], [], []>} : vector<128x1152xbf16>, vector<1152x128xbf16>, vector<128x128xf32> -> vector<128x128xf32>
    %c0_30 = arith.constant 0 : index
    %c0_31 = arith.constant 0 : index
    %56 = vector.load %arg6[%c0_30, %c0_31] : memref<1x128xf32, #tpu.memory_space<vmem>>, vector<1x128xf32>
    %57 = vector.broadcast %56 : vector<1x128xf32> to vector<128x128xf32>
    %58 = arith.addf %55, %57 : vector<128x128xf32>
    %cst_32 = arith.constant dense<0.000000e+00> : vector<128xf32>
    %59 = vector.multi_reduction <add>, %58, %cst_32 [0] : vector<128x128xf32> to vector<128xf32>
    %60 = vector.shape_cast %59 : vector<128xf32> to vector<1x128xf32>
    %c0_33 = arith.constant 0 : index
    %c0_34 = arith.constant 0 : index
    %c0_35 = arith.constant 0 : index
    %c0_36 = arith.constant 0 : index
    %61 = vector.load %arg10[%c0_33, %c0_34, %c0_35, %c0_36] : memref<1x1x2x128xf32, #tpu.memory_space<vmem>>, vector<1x1x1x128xf32>
    %62 = vector.shape_cast %61 : vector<1x1x1x128xf32> to vector<1x128xf32>
    %63 = vector.shape_cast %60 : vector<1x128xf32> to vector<1x1x1x128xf32>
    tpu.vector_store %arg10[%c0_33, %c0_34, %c0_35, %c0_36], %63 {strides = array<i32>} : memref<1x1x2x128xf32, #tpu.memory_space<vmem>>, vector<1x1x1x128xf32>,
    %64 = arith.mulf %58, %58 : vector<128x128xf32>
    %cst_37 = arith.constant dense<0.000000e+00> : vector<128xf32>
    %65 = vector.multi_reduction <add>, %64, %cst_37 [0] : vector<128x128xf32> to vector<128xf32>
    %66 = vector.shape_cast %65 : vector<128xf32> to vector<1x128xf32>
    %c0_38 = arith.constant 0 : index
    %c0_39 = arith.constant 0 : index
    %c1 = arith.constant 1 : index
    %c0_40 = arith.constant 0 : index
    %67 = vector.load %arg10[%c0_38, %c0_39, %c1, %c0_40] : memref<1x1x2x128xf32, #tpu.memory_space<vmem>>, vector<1x1x1x128xf32>
    %68 = vector.shape_cast %67 : vector<1x1x1x128xf32> to vector<1x128xf32>
    %69 = vector.shape_cast %66 : vector<1x128xf32> to vector<1x1x1x128xf32>
    tpu.vector_store %arg10[%c0_38, %c0_39, %c1, %c0_40], %69 {strides = array<i32>} : memref<1x1x2x128xf32, #tpu.memory_space<vmem>>, vector<1x1x1x128xf32>,
    %70 = vector.shape_cast %58 : vector<128x128xf32> to vector<8x16x128xf32>
    %71 = arith.truncf %70 : vector<8x16x128xf32> to vector<8x16x128xbf16>
    %c0_41 = arith.constant 0 : index
    %c0_42 = arith.constant 0 : index
    %c0_43 = arith.constant 0 : index
    %c0_44 = arith.constant 0 : index
    %72 = vector.load %arg9[%c0_41, %c0_42, %c0_43, %c0_44] : memref<1x8x16x128xbf16, #tpu.memory_space<vmem>>, vector<1x8x16x128xbf16>
    %73 = vector.shape_cast %72 : vector<1x8x16x128xbf16> to vector<8x16x128xbf16>
    %74 = vector.shape_cast %71 : vector<8x16x128xbf16> to vector<1x8x16x128xbf16>
    tpu.vector_store %arg9[%c0_41, %c0_42, %c0_43, %c0_44], %74 {strides = array<i32>} : memref<1x8x16x128xbf16, #tpu.memory_space<vmem>>, vector<1x8x16x128xbf16>,
    return
  }
  func.func @transform_0(%arg0: i32, %arg1: i32) -> (i32, i32, i32, i32) {
    %c0_i32 = arith.constant 0 : i32
    %c0_i32_0 = arith.constant 0 : i32
    %c0_i32_1 = arith.constant 0 : i32
    return %arg0, %arg1, %c0_i32, %c0_i32_0 : i32, i32, i32, i32
  }
  func.func @transform_1(%arg0: i32, %arg1: i32) -> (i32, i32, i32, i32) {
    %c4_i32 = arith.constant 4 : i32
    %0 = arith.muli %arg1, %c4_i32 : i32
    %c1_i32 = arith.constant 1 : i32
    %1 = arith.subi %0, %c1_i32 : i32
    %c0_i32 = arith.constant 0 : i32
    %2 = arith.maxsi %1, %c0_i32 : i32
    %c0_i32_0 = arith.constant 0 : i32
    %c0_i32_1 = arith.constant 0 : i32
    %c0_i32_2 = arith.constant 0 : i32
    return %arg0, %2, %c0_i32_0, %c0_i32_1 : i32, i32, i32, i32
  }
  func.func @transform_2(%arg0: i32, %arg1: i32) -> (i32, i32, i32, i32) {
    %c1_i32 = arith.constant 1 : i32
    %0 = arith.addi %arg1, %c1_i32 : i32
    %c4_i32 = arith.constant 4 : i32
    %1 = arith.muli %0, %c4_i32 : i32
    %c7_i32 = arith.constant 7 : i32
    %2 = arith.minsi %1, %c7_i32 : i32
    %c0_i32 = arith.constant 0 : i32
    %c0_i32_0 = arith.constant 0 : i32
    %c0_i32_1 = arith.constant 0 : i32
    return %arg0, %2, %c0_i32, %c0_i32_0 : i32, i32, i32, i32
  }
  func.func @transform_3(%arg0: i32, %arg1: i32) -> (i32, i32) {
    %c0_i32 = arith.constant 0 : i32
    %c0_i32_0 = arith.constant 0 : i32
    %c0_i32_1 = arith.constant 0 : i32
    return %c0_i32, %c0_i32_0 : i32, i32
  }
  func.func @transform_4(%arg0: i32, %arg1: i32) -> (i32, i32) {
    %c0_i32 = arith.constant 0 : i32
    %c0_i32_0 = arith.constant 0 : i32
    %c0_i32_1 = arith.constant 0 : i32
    return %c0_i32, %c0_i32_0 : i32, i32
  }
  func.func @transform_5(%arg0: i32, %arg1: i32) -> (i32, i32) {
    %c0_i32 = arith.constant 0 : i32
    %c0_i32_0 = arith.constant 0 : i32
    %c0_i32_1 = arith.constant 0 : i32
    return %c0_i32, %c0_i32_0 : i32, i32
  }
  func.func @transform_6(%arg0: i32, %arg1: i32) -> (i32, i32) {
    %c0_i32 = arith.constant 0 : i32
    %c0_i32_0 = arith.constant 0 : i32
    %c0_i32_1 = arith.constant 0 : i32
    return %c0_i32, %c0_i32_0 : i32, i32
  }
  func.func @transform_7(%arg0: i32, %arg1: i32) -> (i32, i32, i32, i32) {
    %c0_i32 = arith.constant 0 : i32
    %c0_i32_0 = arith.constant 0 : i32
    %c0_i32_1 = arith.constant 0 : i32
    return %arg0, %arg1, %c0_i32, %c0_i32_0 : i32, i32, i32, i32
  }
  func.func @transform_8(%arg0: i32, %arg1: i32) -> (i32, i32, i32, i32) {
    %c0_i32 = arith.constant 0 : i32
    %c0_i32_0 = arith.constant 0 : i32
    %c0_i32_1 = arith.constant 0 : i32
    return %arg0, %arg1, %c0_i32, %c0_i32_0 : i32, i32, i32, i32
  }
}

module attributes {stable_mosaic.version = 11 : i64} {
  func.func @_fused_conv_kernel(%arg0: i32, %arg1: i32, %arg2: memref<1x8x16x128xbf16, #tpu.memory_space<vmem>>, %arg3: memref<1x2x16x128xbf16, #tpu.memory_space<vmem>>, %arg4: memref<1x2x16x128xbf16, #tpu.memory_space<vmem>>, %arg5: memref<1152x128xbf16, #tpu.memory_space<vmem>>, %arg6: memref<1x128xf32, #tpu.memory_space<vmem>>, %arg7: memref<1x128xf32, #tpu.memory_space<vmem>>, %arg8: memref<1x128xf32, #tpu.memory_space<vmem>>, %arg9: memref<1x8x16x128xbf16, #tpu.memory_space<vmem>>, %arg10: memref<1x1x2x128xf32, #tpu.memory_space<vmem>>, %arg11: memref<128x1152xbf16, #tpu.memory_space<vmem>>) attributes {dimension_semantics = [#tpu.dimension_semantics<parallel>, #tpu.dimension_semantics<parallel>], iteration_bounds = array<i64: 2, 2>, scalar_prefetch = 0 : i64, scratch_operands = 1 : i64, tpu.core_type = #tpu.core_type<tc>, window_params = [{transform_indices = @transform_0, window_bounds = array<i64: 1, 8, 16, 128>}, {transform_indices = @transform_1, window_bounds = array<i64: 1, 2, 16, 128>}, {transform_indices = @transform_2, window_bounds = array<i64: 1, 2, 16, 128>}, {pipeline_mode = #tpu.pipeline_mode<synchronous>, transform_indices = @transform_3, window_bounds = array<i64: 1152, 128>}, {pipeline_mode = #tpu.pipeline_mode<synchronous>, transform_indices = @transform_4, window_bounds = array<i64: 1, 128>}, {pipeline_mode = #tpu.pipeline_mode<synchronous>, transform_indices = @transform_5, window_bounds = array<i64: 1, 128>}, {pipeline_mode = #tpu.pipeline_mode<synchronous>, transform_indices = @transform_6, window_bounds = array<i64: 1, 128>}, {transform_indices = @transform_7, window_bounds = array<i64: 1, 8, 16, 128>}, {transform_indices = @transform_8, window_bounds = array<i64: 1, 1, 2, 128>}]} {
    %c0 = arith.constant 0 : index
    %c0_0 = arith.constant 0 : index
    %c0_1 = arith.constant 0 : index
    %c0_2 = arith.constant 0 : index
    %0 = vector.load %arg2[%c0, %c0_0, %c0_1, %c0_2] : memref<1x8x16x128xbf16, #tpu.memory_space<vmem>>, vector<1x8x16x128xbf16>
    %1 = vector.shape_cast %0 : vector<1x8x16x128xbf16> to vector<8x16x128xbf16>
    %2 = arith.extf %1 : vector<8x16x128xbf16> to vector<8x16x128xf32>
    %c0_3 = arith.constant 0 : index
    %c0_4 = arith.constant 0 : index
    %3 = vector.load %arg7[%c0_3, %c0_4] : memref<1x128xf32, #tpu.memory_space<vmem>>, vector<1x128xf32>
    %4 = vector.shape_cast %3 : vector<1x128xf32> to vector<128xf32>
    %5 = vector.shape_cast %4 : vector<128xf32> to vector<1x1x128xf32>
    %6 = vector.broadcast %5 : vector<1x1x128xf32> to vector<8x16x128xf32>
    %7 = arith.mulf %2, %6 : vector<8x16x128xf32>
    %c0_5 = arith.constant 0 : index
    %c0_6 = arith.constant 0 : index
    %8 = vector.load %arg8[%c0_5, %c0_6] : memref<1x128xf32, #tpu.memory_space<vmem>>, vector<1x128xf32>
    %9 = vector.shape_cast %8 : vector<1x128xf32> to vector<128xf32>
    %10 = vector.shape_cast %9 : vector<128xf32> to vector<1x1x128xf32>
    %11 = vector.broadcast %10 : vector<1x1x128xf32> to vector<8x16x128xf32>
    %12 = arith.addf %7, %11 : vector<8x16x128xf32>
    %cst = arith.constant 0.000000e+00 : f32
    %13 = vector.broadcast %cst : f32 to vector<8x16x128xf32>
    %14 = arith.maximumf %12, %13 : vector<8x16x128xf32>
    %c0_7 = arith.constant 0 : index
    %c0_8 = arith.constant 0 : index
    %c0_9 = arith.constant 0 : index
    %c0_10 = arith.constant 0 : index
    %15 = vector.load %arg3[%c0_7, %c0_8, %c0_9, %c0_10] : memref<1x2x16x128xbf16, #tpu.memory_space<vmem>>, vector<1x2x16x128xbf16>
    %16 = vector.shape_cast %15 : vector<1x2x16x128xbf16> to vector<2x16x128xbf16>
    %17 = arith.extf %16 : vector<2x16x128xbf16> to vector<2x16x128xf32>
    %c0_11 = arith.constant 0 : index
    %c0_12 = arith.constant 0 : index
    %18 = vector.load %arg7[%c0_11, %c0_12] : memref<1x128xf32, #tpu.memory_space<vmem>>, vector<1x128xf32>
    %19 = vector.shape_cast %18 : vector<1x128xf32> to vector<128xf32>
    %20 = vector.shape_cast %19 : vector<128xf32> to vector<1x1x128xf32>
    %21 = vector.broadcast %20 : vector<1x1x128xf32> to vector<2x16x128xf32>
    %22 = arith.mulf %17, %21 : vector<2x16x128xf32>
    %c0_13 = arith.constant 0 : index
    %c0_14 = arith.constant 0 : index
    %23 = vector.load %arg8[%c0_13, %c0_14] : memref<1x128xf32, #tpu.memory_space<vmem>>, vector<1x128xf32>
    %24 = vector.shape_cast %23 : vector<1x128xf32> to vector<128xf32>
    %25 = vector.shape_cast %24 : vector<128xf32> to vector<1x1x128xf32>
    %26 = vector.broadcast %25 : vector<1x1x128xf32> to vector<2x16x128xf32>
    %27 = arith.addf %22, %26 : vector<2x16x128xf32>
    %cst_15 = arith.constant 0.000000e+00 : f32
    %28 = vector.broadcast %cst_15 : f32 to vector<2x16x128xf32>
    %29 = arith.maximumf %27, %28 : vector<2x16x128xf32>
    %c0_16 = arith.constant 0 : index
    %c0_17 = arith.constant 0 : index
    %c0_18 = arith.constant 0 : index
    %c0_19 = arith.constant 0 : index
    %30 = vector.load %arg4[%c0_16, %c0_17, %c0_18, %c0_19] : memref<1x2x16x128xbf16, #tpu.memory_space<vmem>>, vector<1x2x16x128xbf16>
    %31 = vector.shape_cast %30 : vector<1x2x16x128xbf16> to vector<2x16x128xbf16>
    %32 = arith.extf %31 : vector<2x16x128xbf16> to vector<2x16x128xf32>
    %c0_20 = arith.constant 0 : index
    %c0_21 = arith.constant 0 : index
    %33 = vector.load %arg7[%c0_20, %c0_21] : memref<1x128xf32, #tpu.memory_space<vmem>>, vector<1x128xf32>
    %34 = vector.shape_cast %33 : vector<1x128xf32> to vector<128xf32>
    %35 = vector.shape_cast %34 : vector<128xf32> to vector<1x1x128xf32>
    %36 = vector.broadcast %35 : vector<1x1x128xf32> to vector<2x16x128xf32>
    %37 = arith.mulf %32, %36 : vector<2x16x128xf32>
    %c0_22 = arith.constant 0 : index
    %c0_23 = arith.constant 0 : index
    %38 = vector.load %arg8[%c0_22, %c0_23] : memref<1x128xf32, #tpu.memory_space<vmem>>, vector<1x128xf32>
    %39 = vector.shape_cast %38 : vector<1x128xf32> to vector<128xf32>
    %40 = vector.shape_cast %39 : vector<128xf32> to vector<1x1x128xf32>
    %41 = vector.broadcast %40 : vector<1x1x128xf32> to vector<2x16x128xf32>
    %42 = arith.addf %37, %41 : vector<2x16x128xf32>
    %cst_24 = arith.constant 0.000000e+00 : f32
    %43 = vector.broadcast %cst_24 : f32 to vector<2x16x128xf32>
    %44 = arith.maximumf %42, %43 : vector<2x16x128xf32>
    %c0_i32 = arith.constant 0 : i32
    %45 = arith.cmpi eq, %arg1, %c0_i32 : i32
    %cst_25 = arith.constant 0.000000e+00 : f32
    %cst_26 = arith.constant 1.000000e+00 : f32
    %46 = arith.select %45, %cst_25, %cst_26 : f32
    %47 = vector.broadcast %46 : f32 to vector<2x16x128xf32>
    %48 = arith.mulf %29, %47 : vector<2x16x128xf32>
    %c1_i32 = arith.constant 1 : i32
    %49 = arith.cmpi eq, %arg1, %c1_i32 : i32
    %cst_27 = arith.constant 0.000000e+00 : f32
    %cst_28 = arith.constant 1.000000e+00 : f32
    %50 = arith.select %49, %cst_27, %cst_28 : f32
    %51 = vector.broadcast %50 : f32 to vector<2x16x128xf32>
    %52 = arith.mulf %44, %51 : vector<2x16x128xf32>
    %53 = vector.extract_strided_slice %48 {offsets = [1, 0, 0], sizes = [1, 16, 128], strides = [1, 1, 1]} : vector<2x16x128xf32> to vector<1x16x128xf32>
    %54 = vector.extract_strided_slice %52 {offsets = [0, 0, 0], sizes = [1, 16, 128], strides = [1, 1, 1]} : vector<2x16x128xf32> to vector<1x16x128xf32>
    %55 = tpu.concatenate %53, %14, %54 in 0 : vector<1x16x128xf32>, vector<8x16x128xf32>, vector<1x16x128xf32> -> vector<10x16x128xf32>
    %56 = arith.truncf %55 : vector<10x16x128xf32> to vector<10x16x128xbf16>
    %cst_29 = arith.constant 0.000000e+00 : bf16
    %57 = vector.broadcast %cst_29 : bf16 to vector<10x1x128xbf16>
    %58 = vector.extract_strided_slice %56 {offsets = [0, 0, 0], sizes = [10, 15, 128], strides = [1, 1, 1]} : vector<10x16x128xbf16> to vector<10x15x128xbf16>
    %59 = tpu.concatenate %57, %58 in 1 : vector<10x1x128xbf16>, vector<10x15x128xbf16> -> vector<10x16x128xbf16>
    %60 = vector.extract_strided_slice %56 {offsets = [0, 1, 0], sizes = [10, 15, 128], strides = [1, 1, 1]} : vector<10x16x128xbf16> to vector<10x15x128xbf16>
    %61 = tpu.concatenate %60, %57 in 1 : vector<10x15x128xbf16>, vector<10x1x128xbf16> -> vector<10x16x128xbf16>
    %62 = vector.extract_strided_slice %59 {offsets = [0, 0, 0], sizes = [8, 16, 128], strides = [1, 1, 1]} : vector<10x16x128xbf16> to vector<8x16x128xbf16>
    %63 = vector.shape_cast %62 : vector<8x16x128xbf16> to vector<128x128xbf16>
    %c0_30 = arith.constant 0 : index
    %c0_31 = arith.constant 0 : index
    %64 = vector.load %arg11[%c0_30, %c0_31] : memref<128x1152xbf16, #tpu.memory_space<vmem>>, vector<128x128xbf16>
    tpu.vector_store %arg11[%c0_30, %c0_31], %63 {strides = array<i32>} : memref<128x1152xbf16, #tpu.memory_space<vmem>>, vector<128x128xbf16>,
    %65 = vector.extract_strided_slice %56 {offsets = [0, 0, 0], sizes = [8, 16, 128], strides = [1, 1, 1]} : vector<10x16x128xbf16> to vector<8x16x128xbf16>
    %66 = vector.shape_cast %65 : vector<8x16x128xbf16> to vector<128x128xbf16>
    %c0_32 = arith.constant 0 : index
    %c128 = arith.constant 128 : index
    %67 = vector.load %arg11[%c0_32, %c128] : memref<128x1152xbf16, #tpu.memory_space<vmem>>, vector<128x128xbf16>
    tpu.vector_store %arg11[%c0_32, %c128], %66 {strides = array<i32>} : memref<128x1152xbf16, #tpu.memory_space<vmem>>, vector<128x128xbf16>,
    %68 = vector.extract_strided_slice %61 {offsets = [0, 0, 0], sizes = [8, 16, 128], strides = [1, 1, 1]} : vector<10x16x128xbf16> to vector<8x16x128xbf16>
    %69 = vector.shape_cast %68 : vector<8x16x128xbf16> to vector<128x128xbf16>
    %c0_33 = arith.constant 0 : index
    %c256 = arith.constant 256 : index
    %70 = vector.load %arg11[%c0_33, %c256] : memref<128x1152xbf16, #tpu.memory_space<vmem>>, vector<128x128xbf16>
    tpu.vector_store %arg11[%c0_33, %c256], %69 {strides = array<i32>} : memref<128x1152xbf16, #tpu.memory_space<vmem>>, vector<128x128xbf16>,
    %71 = vector.extract_strided_slice %59 {offsets = [1, 0, 0], sizes = [8, 16, 128], strides = [1, 1, 1]} : vector<10x16x128xbf16> to vector<8x16x128xbf16>
    %72 = vector.shape_cast %71 : vector<8x16x128xbf16> to vector<128x128xbf16>
    %c0_34 = arith.constant 0 : index
    %c384 = arith.constant 384 : index
    %73 = vector.load %arg11[%c0_34, %c384] : memref<128x1152xbf16, #tpu.memory_space<vmem>>, vector<128x128xbf16>
    tpu.vector_store %arg11[%c0_34, %c384], %72 {strides = array<i32>} : memref<128x1152xbf16, #tpu.memory_space<vmem>>, vector<128x128xbf16>,
    %74 = vector.extract_strided_slice %56 {offsets = [1, 0, 0], sizes = [8, 16, 128], strides = [1, 1, 1]} : vector<10x16x128xbf16> to vector<8x16x128xbf16>
    %75 = vector.shape_cast %74 : vector<8x16x128xbf16> to vector<128x128xbf16>
    %c0_35 = arith.constant 0 : index
    %c512 = arith.constant 512 : index
    %76 = vector.load %arg11[%c0_35, %c512] : memref<128x1152xbf16, #tpu.memory_space<vmem>>, vector<128x128xbf16>
    tpu.vector_store %arg11[%c0_35, %c512], %75 {strides = array<i32>} : memref<128x1152xbf16, #tpu.memory_space<vmem>>, vector<128x128xbf16>,
    %77 = vector.extract_strided_slice %61 {offsets = [1, 0, 0], sizes = [8, 16, 128], strides = [1, 1, 1]} : vector<10x16x128xbf16> to vector<8x16x128xbf16>
    %78 = vector.shape_cast %77 : vector<8x16x128xbf16> to vector<128x128xbf16>
    %c0_36 = arith.constant 0 : index
    %c640 = arith.constant 640 : index
    %79 = vector.load %arg11[%c0_36, %c640] : memref<128x1152xbf16, #tpu.memory_space<vmem>>, vector<128x128xbf16>
    tpu.vector_store %arg11[%c0_36, %c640], %78 {strides = array<i32>} : memref<128x1152xbf16, #tpu.memory_space<vmem>>, vector<128x128xbf16>,
    %80 = vector.extract_strided_slice %59 {offsets = [2, 0, 0], sizes = [8, 16, 128], strides = [1, 1, 1]} : vector<10x16x128xbf16> to vector<8x16x128xbf16>
    %81 = vector.shape_cast %80 : vector<8x16x128xbf16> to vector<128x128xbf16>
    %c0_37 = arith.constant 0 : index
    %c768 = arith.constant 768 : index
    %82 = vector.load %arg11[%c0_37, %c768] : memref<128x1152xbf16, #tpu.memory_space<vmem>>, vector<128x128xbf16>
    tpu.vector_store %arg11[%c0_37, %c768], %81 {strides = array<i32>} : memref<128x1152xbf16, #tpu.memory_space<vmem>>, vector<128x128xbf16>,
    %83 = vector.extract_strided_slice %56 {offsets = [2, 0, 0], sizes = [8, 16, 128], strides = [1, 1, 1]} : vector<10x16x128xbf16> to vector<8x16x128xbf16>
    %84 = vector.shape_cast %83 : vector<8x16x128xbf16> to vector<128x128xbf16>
    %c0_38 = arith.constant 0 : index
    %c896 = arith.constant 896 : index
    %85 = vector.load %arg11[%c0_38, %c896] : memref<128x1152xbf16, #tpu.memory_space<vmem>>, vector<128x128xbf16>
    tpu.vector_store %arg11[%c0_38, %c896], %84 {strides = array<i32>} : memref<128x1152xbf16, #tpu.memory_space<vmem>>, vector<128x128xbf16>,
    %86 = vector.extract_strided_slice %61 {offsets = [2, 0, 0], sizes = [8, 16, 128], strides = [1, 1, 1]} : vector<10x16x128xbf16> to vector<8x16x128xbf16>
    %87 = vector.shape_cast %86 : vector<8x16x128xbf16> to vector<128x128xbf16>
    %c0_39 = arith.constant 0 : index
    %c1024 = arith.constant 1024 : index
    %88 = vector.load %arg11[%c0_39, %c1024] : memref<128x1152xbf16, #tpu.memory_space<vmem>>, vector<128x128xbf16>
    tpu.vector_store %arg11[%c0_39, %c1024], %87 {strides = array<i32>} : memref<128x1152xbf16, #tpu.memory_space<vmem>>, vector<128x128xbf16>,
    %c0_40 = arith.constant 0 : index
    %c0_41 = arith.constant 0 : index
    %89 = vector.load %arg11[%c0_40, %c0_41] : memref<128x1152xbf16, #tpu.memory_space<vmem>>, vector<128x1152xbf16>
    %c0_42 = arith.constant 0 : index
    %c0_43 = arith.constant 0 : index
    %90 = vector.load %arg5[%c0_42, %c0_43] : memref<1152x128xbf16, #tpu.memory_space<vmem>>, vector<1152x128xbf16>
    %cst_44 = arith.constant dense<0.000000e+00> : vector<128x128xf32>
    %91 = tpu.matmul %89, %90, %cst_44 {dimension_numbers = #tpu.dot_dimension_numbers<[1], [0], [0], [1], [0, 0, 1, 1], [], []>} : vector<128x1152xbf16>, vector<1152x128xbf16>, vector<128x128xf32> -> vector<128x128xf32>
    %c0_45 = arith.constant 0 : index
    %c0_46 = arith.constant 0 : index
    %92 = vector.load %arg6[%c0_45, %c0_46] : memref<1x128xf32, #tpu.memory_space<vmem>>, vector<1x128xf32>
    %93 = vector.broadcast %92 : vector<1x128xf32> to vector<128x128xf32>
    %94 = arith.addf %91, %93 : vector<128x128xf32>
    %cst_47 = arith.constant dense<0.000000e+00> : vector<128xf32>
    %95 = vector.multi_reduction <add>, %94, %cst_47 [0] : vector<128x128xf32> to vector<128xf32>
    %96 = vector.shape_cast %95 : vector<128xf32> to vector<1x128xf32>
    %c0_48 = arith.constant 0 : index
    %c0_49 = arith.constant 0 : index
    %c0_50 = arith.constant 0 : index
    %c0_51 = arith.constant 0 : index
    %97 = vector.load %arg10[%c0_48, %c0_49, %c0_50, %c0_51] : memref<1x1x2x128xf32, #tpu.memory_space<vmem>>, vector<1x1x1x128xf32>
    %98 = vector.shape_cast %97 : vector<1x1x1x128xf32> to vector<1x128xf32>
    %99 = vector.shape_cast %96 : vector<1x128xf32> to vector<1x1x1x128xf32>
    tpu.vector_store %arg10[%c0_48, %c0_49, %c0_50, %c0_51], %99 {strides = array<i32>} : memref<1x1x2x128xf32, #tpu.memory_space<vmem>>, vector<1x1x1x128xf32>,
    %100 = arith.mulf %94, %94 : vector<128x128xf32>
    %cst_52 = arith.constant dense<0.000000e+00> : vector<128xf32>
    %101 = vector.multi_reduction <add>, %100, %cst_52 [0] : vector<128x128xf32> to vector<128xf32>
    %102 = vector.shape_cast %101 : vector<128xf32> to vector<1x128xf32>
    %c0_53 = arith.constant 0 : index
    %c0_54 = arith.constant 0 : index
    %c1 = arith.constant 1 : index
    %c0_55 = arith.constant 0 : index
    %103 = vector.load %arg10[%c0_53, %c0_54, %c1, %c0_55] : memref<1x1x2x128xf32, #tpu.memory_space<vmem>>, vector<1x1x1x128xf32>
    %104 = vector.shape_cast %103 : vector<1x1x1x128xf32> to vector<1x128xf32>
    %105 = vector.shape_cast %102 : vector<1x128xf32> to vector<1x1x1x128xf32>
    tpu.vector_store %arg10[%c0_53, %c0_54, %c1, %c0_55], %105 {strides = array<i32>} : memref<1x1x2x128xf32, #tpu.memory_space<vmem>>, vector<1x1x1x128xf32>,
    %106 = vector.shape_cast %94 : vector<128x128xf32> to vector<8x16x128xf32>
    %107 = arith.truncf %106 : vector<8x16x128xf32> to vector<8x16x128xbf16>
    %c0_56 = arith.constant 0 : index
    %c0_57 = arith.constant 0 : index
    %c0_58 = arith.constant 0 : index
    %c0_59 = arith.constant 0 : index
    %108 = vector.load %arg9[%c0_56, %c0_57, %c0_58, %c0_59] : memref<1x8x16x128xbf16, #tpu.memory_space<vmem>>, vector<1x8x16x128xbf16>
    %109 = vector.shape_cast %108 : vector<1x8x16x128xbf16> to vector<8x16x128xbf16>
    %110 = vector.shape_cast %107 : vector<8x16x128xbf16> to vector<1x8x16x128xbf16>
    tpu.vector_store %arg9[%c0_56, %c0_57, %c0_58, %c0_59], %110 {strides = array<i32>} : memref<1x8x16x128xbf16, #tpu.memory_space<vmem>>, vector<1x8x16x128xbf16>,
    return
  }
  func.func @transform_0(%arg0: i32, %arg1: i32) -> (i32, i32, i32, i32) {
    %c0_i32 = arith.constant 0 : i32
    %c0_i32_0 = arith.constant 0 : i32
    %c0_i32_1 = arith.constant 0 : i32
    return %arg0, %arg1, %c0_i32, %c0_i32_0 : i32, i32, i32, i32
  }
  func.func @transform_1(%arg0: i32, %arg1: i32) -> (i32, i32, i32, i32) {
    %c4_i32 = arith.constant 4 : i32
    %0 = arith.muli %arg1, %c4_i32 : i32
    %c1_i32 = arith.constant 1 : i32
    %1 = arith.subi %0, %c1_i32 : i32
    %c0_i32 = arith.constant 0 : i32
    %2 = arith.maxsi %1, %c0_i32 : i32
    %c0_i32_0 = arith.constant 0 : i32
    %c0_i32_1 = arith.constant 0 : i32
    %c0_i32_2 = arith.constant 0 : i32
    return %arg0, %2, %c0_i32_0, %c0_i32_1 : i32, i32, i32, i32
  }
  func.func @transform_2(%arg0: i32, %arg1: i32) -> (i32, i32, i32, i32) {
    %c1_i32 = arith.constant 1 : i32
    %0 = arith.addi %arg1, %c1_i32 : i32
    %c4_i32 = arith.constant 4 : i32
    %1 = arith.muli %0, %c4_i32 : i32
    %c7_i32 = arith.constant 7 : i32
    %2 = arith.minsi %1, %c7_i32 : i32
    %c0_i32 = arith.constant 0 : i32
    %c0_i32_0 = arith.constant 0 : i32
    %c0_i32_1 = arith.constant 0 : i32
    return %arg0, %2, %c0_i32, %c0_i32_0 : i32, i32, i32, i32
  }
  func.func @transform_3(%arg0: i32, %arg1: i32) -> (i32, i32) {
    %c0_i32 = arith.constant 0 : i32
    %c0_i32_0 = arith.constant 0 : i32
    %c0_i32_1 = arith.constant 0 : i32
    return %c0_i32, %c0_i32_0 : i32, i32
  }
  func.func @transform_4(%arg0: i32, %arg1: i32) -> (i32, i32) {
    %c0_i32 = arith.constant 0 : i32
    %c0_i32_0 = arith.constant 0 : i32
    %c0_i32_1 = arith.constant 0 : i32
    return %c0_i32, %c0_i32_0 : i32, i32
  }
  func.func @transform_5(%arg0: i32, %arg1: i32) -> (i32, i32) {
    %c0_i32 = arith.constant 0 : i32
    %c0_i32_0 = arith.constant 0 : i32
    %c0_i32_1 = arith.constant 0 : i32
    return %c0_i32, %c0_i32_0 : i32, i32
  }
  func.func @transform_6(%arg0: i32, %arg1: i32) -> (i32, i32) {
    %c0_i32 = arith.constant 0 : i32
    %c0_i32_0 = arith.constant 0 : i32
    %c0_i32_1 = arith.constant 0 : i32
    return %c0_i32, %c0_i32_0 : i32, i32
  }
  func.func @transform_7(%arg0: i32, %arg1: i32) -> (i32, i32, i32, i32) {
    %c0_i32 = arith.constant 0 : i32
    %c0_i32_0 = arith.constant 0 : i32
    %c0_i32_1 = arith.constant 0 : i32
    return %arg0, %arg1, %c0_i32, %c0_i32_0 : i32, i32, i32, i32
  }
  func.func @transform_8(%arg0: i32, %arg1: i32) -> (i32, i32, i32, i32) {
    %c0_i32 = arith.constant 0 : i32
    %c0_i32_0 = arith.constant 0 : i32
    %c0_i32_1 = arith.constant 0 : i32
    return %arg0, %arg1, %c0_i32, %c0_i32_0 : i32, i32, i32, i32
  }
}

module attributes {stable_mosaic.version = 11 : i64} {
  func.func @_fused_conv_kernel(%arg0: i32, %arg1: i32, %arg2: memref<1x8x16x128xbf16, #tpu.memory_space<vmem>>, %arg3: memref<1x2x16x128xbf16, #tpu.memory_space<vmem>>, %arg4: memref<1x2x16x128xbf16, #tpu.memory_space<vmem>>, %arg5: memref<1152x128xbf16, #tpu.memory_space<vmem>>, %arg6: memref<1x128xf32, #tpu.memory_space<vmem>>, %arg7: memref<1x128xf32, #tpu.memory_space<vmem>>, %arg8: memref<1x128xf32, #tpu.memory_space<vmem>>, %arg9: memref<1x8x16x128xbf16, #tpu.memory_space<vmem>>, %arg10: memref<1x1x2x128xf32, #tpu.memory_space<vmem>>, %arg11: memref<128x1152xbf16, #tpu.memory_space<vmem>>) attributes {dimension_semantics = [#tpu.dimension_semantics<parallel>, #tpu.dimension_semantics<parallel>], iteration_bounds = array<i64: 2, 2>, scalar_prefetch = 0 : i64, scratch_operands = 1 : i64, tpu.core_type = #tpu.core_type<tc>, window_params = [{transform_indices = @transform_0, window_bounds = array<i64: 1, 8, 16, 128>}, {transform_indices = @transform_1, window_bounds = array<i64: 1, 2, 16, 128>}, {transform_indices = @transform_2, window_bounds = array<i64: 1, 2, 16, 128>}, {pipeline_mode = #tpu.pipeline_mode<synchronous>, transform_indices = @transform_3, window_bounds = array<i64: 1152, 128>}, {pipeline_mode = #tpu.pipeline_mode<synchronous>, transform_indices = @transform_4, window_bounds = array<i64: 1, 128>}, {pipeline_mode = #tpu.pipeline_mode<synchronous>, transform_indices = @transform_5, window_bounds = array<i64: 1, 128>}, {pipeline_mode = #tpu.pipeline_mode<synchronous>, transform_indices = @transform_6, window_bounds = array<i64: 1, 128>}, {transform_indices = @transform_7, window_bounds = array<i64: 1, 8, 16, 128>}, {transform_indices = @transform_8, window_bounds = array<i64: 1, 1, 2, 128>}]} {
    %c0 = arith.constant 0 : index
    %c0_0 = arith.constant 0 : index
    %c0_1 = arith.constant 0 : index
    %c0_2 = arith.constant 0 : index
    %0 = vector.load %arg2[%c0, %c0_0, %c0_1, %c0_2] : memref<1x8x16x128xbf16, #tpu.memory_space<vmem>>, vector<1x8x16x128xbf16>
    %1 = vector.shape_cast %0 : vector<1x8x16x128xbf16> to vector<8x16x128xbf16>
    %2 = arith.extf %1 : vector<8x16x128xbf16> to vector<8x16x128xf32>
    %c0_3 = arith.constant 0 : index
    %c0_4 = arith.constant 0 : index
    %3 = vector.load %arg7[%c0_3, %c0_4] : memref<1x128xf32, #tpu.memory_space<vmem>>, vector<1x128xf32>
    %4 = vector.shape_cast %3 : vector<1x128xf32> to vector<128xf32>
    %5 = vector.shape_cast %4 : vector<128xf32> to vector<1x1x128xf32>
    %6 = vector.broadcast %5 : vector<1x1x128xf32> to vector<8x16x128xf32>
    %7 = arith.mulf %2, %6 : vector<8x16x128xf32>
    %c0_5 = arith.constant 0 : index
    %c0_6 = arith.constant 0 : index
    %8 = vector.load %arg8[%c0_5, %c0_6] : memref<1x128xf32, #tpu.memory_space<vmem>>, vector<1x128xf32>
    %9 = vector.shape_cast %8 : vector<1x128xf32> to vector<128xf32>
    %10 = vector.shape_cast %9 : vector<128xf32> to vector<1x1x128xf32>
    %11 = vector.broadcast %10 : vector<1x1x128xf32> to vector<8x16x128xf32>
    %12 = arith.addf %7, %11 : vector<8x16x128xf32>
    %cst = arith.constant 0.000000e+00 : f32
    %13 = vector.broadcast %cst : f32 to vector<8x16x128xf32>
    %14 = arith.maximumf %12, %13 : vector<8x16x128xf32>
    %c0_7 = arith.constant 0 : index
    %c0_8 = arith.constant 0 : index
    %c0_9 = arith.constant 0 : index
    %c0_10 = arith.constant 0 : index
    %15 = vector.load %arg3[%c0_7, %c0_8, %c0_9, %c0_10] : memref<1x2x16x128xbf16, #tpu.memory_space<vmem>>, vector<1x2x16x128xbf16>
    %16 = vector.shape_cast %15 : vector<1x2x16x128xbf16> to vector<2x16x128xbf16>
    %17 = arith.extf %16 : vector<2x16x128xbf16> to vector<2x16x128xf32>
    %c0_11 = arith.constant 0 : index
    %c0_12 = arith.constant 0 : index
    %18 = vector.load %arg7[%c0_11, %c0_12] : memref<1x128xf32, #tpu.memory_space<vmem>>, vector<1x128xf32>
    %19 = vector.shape_cast %18 : vector<1x128xf32> to vector<128xf32>
    %20 = vector.shape_cast %19 : vector<128xf32> to vector<1x1x128xf32>
    %21 = vector.broadcast %20 : vector<1x1x128xf32> to vector<2x16x128xf32>
    %22 = arith.mulf %17, %21 : vector<2x16x128xf32>
    %c0_13 = arith.constant 0 : index
    %c0_14 = arith.constant 0 : index
    %23 = vector.load %arg8[%c0_13, %c0_14] : memref<1x128xf32, #tpu.memory_space<vmem>>, vector<1x128xf32>
    %24 = vector.shape_cast %23 : vector<1x128xf32> to vector<128xf32>
    %25 = vector.shape_cast %24 : vector<128xf32> to vector<1x1x128xf32>
    %26 = vector.broadcast %25 : vector<1x1x128xf32> to vector<2x16x128xf32>
    %27 = arith.addf %22, %26 : vector<2x16x128xf32>
    %cst_15 = arith.constant 0.000000e+00 : f32
    %28 = vector.broadcast %cst_15 : f32 to vector<2x16x128xf32>
    %29 = arith.maximumf %27, %28 : vector<2x16x128xf32>
    %c0_16 = arith.constant 0 : index
    %c0_17 = arith.constant 0 : index
    %c0_18 = arith.constant 0 : index
    %c0_19 = arith.constant 0 : index
    %30 = vector.load %arg4[%c0_16, %c0_17, %c0_18, %c0_19] : memref<1x2x16x128xbf16, #tpu.memory_space<vmem>>, vector<1x2x16x128xbf16>
    %31 = vector.shape_cast %30 : vector<1x2x16x128xbf16> to vector<2x16x128xbf16>
    %32 = arith.extf %31 : vector<2x16x128xbf16> to vector<2x16x128xf32>
    %c0_20 = arith.constant 0 : index
    %c0_21 = arith.constant 0 : index
    %33 = vector.load %arg7[%c0_20, %c0_21] : memref<1x128xf32, #tpu.memory_space<vmem>>, vector<1x128xf32>
    %34 = vector.shape_cast %33 : vector<1x128xf32> to vector<128xf32>
    %35 = vector.shape_cast %34 : vector<128xf32> to vector<1x1x128xf32>
    %36 = vector.broadcast %35 : vector<1x1x128xf32> to vector<2x16x128xf32>
    %37 = arith.mulf %32, %36 : vector<2x16x128xf32>
    %c0_22 = arith.constant 0 : index
    %c0_23 = arith.constant 0 : index
    %38 = vector.load %arg8[%c0_22, %c0_23] : memref<1x128xf32, #tpu.memory_space<vmem>>, vector<1x128xf32>
    %39 = vector.shape_cast %38 : vector<1x128xf32> to vector<128xf32>
    %40 = vector.shape_cast %39 : vector<128xf32> to vector<1x1x128xf32>
    %41 = vector.broadcast %40 : vector<1x1x128xf32> to vector<2x16x128xf32>
    %42 = arith.addf %37, %41 : vector<2x16x128xf32>
    %cst_24 = arith.constant 0.000000e+00 : f32
    %43 = vector.broadcast %cst_24 : f32 to vector<2x16x128xf32>
    %44 = arith.maximumf %42, %43 : vector<2x16x128xf32>
    %c0_i32 = arith.constant 0 : i32
    %45 = arith.cmpi eq, %arg1, %c0_i32 : i32
    %cst_25 = arith.constant 0.000000e+00 : f32
    %cst_26 = arith.constant 1.000000e+00 : f32
    %46 = arith.select %45, %cst_25, %cst_26 : f32
    %47 = vector.broadcast %46 : f32 to vector<2x16x128xf32>
    %48 = arith.mulf %29, %47 : vector<2x16x128xf32>
    %c1_i32 = arith.constant 1 : i32
    %49 = arith.cmpi eq, %arg1, %c1_i32 : i32
    %cst_27 = arith.constant 0.000000e+00 : f32
    %cst_28 = arith.constant 1.000000e+00 : f32
    %50 = arith.select %49, %cst_27, %cst_28 : f32
    %51 = vector.broadcast %50 : f32 to vector<2x16x128xf32>
    %52 = arith.mulf %44, %51 : vector<2x16x128xf32>
    %53 = tpu.concatenate %48, %14, %52 in 0 : vector<2x16x128xf32>, vector<8x16x128xf32>, vector<2x16x128xf32> -> vector<12x16x128xf32>
    %cst_29 = arith.constant 0.000000e+00 : f32
    %54 = vector.broadcast %cst_29 : f32 to vector<12x1x128xf32>
    %55 = vector.extract_strided_slice %53 {offsets = [0, 1, 0], sizes = [12, 15, 128], strides = [1, 1, 1]} : vector<12x16x128xf32> to vector<12x15x128xf32>
    %56 = tpu.concatenate %55, %54 in 1 : vector<12x15x128xf32>, vector<12x1x128xf32> -> vector<12x16x128xf32>
    %57 = vector.extract_strided_slice %53 {offsets = [0, 0, 0], sizes = [12, 15, 128], strides = [1, 1, 1]} : vector<12x16x128xf32> to vector<12x15x128xf32>
    %58 = tpu.concatenate %54, %57 in 1 : vector<12x1x128xf32>, vector<12x15x128xf32> -> vector<12x16x128xf32>
    %59 = tpu.iota {dimensions = array<i32: 1>} : vector<12x16x128xi32>
    %60 = tpu.iota {dimensions = array<i32: 0>} : vector<12x16x128xi32>
    %c2_i32 = arith.constant 2 : i32
    %c0_i32_30 = arith.constant 0 : i32
    %61 = arith.cmpi eq, %c2_i32, %c0_i32_30 : i32
    %c1_i32_31 = arith.constant 1 : i32
    %62 = arith.select %61, %c1_i32_31, %c2_i32 : i32
    %63 = vector.broadcast %62 : i32 to vector<12x16x128xi32>
    %64 = arith.remsi %59, %63 : vector<12x16x128xi32>
    %c0_i32_32 = arith.constant 0 : i32
    %65 = vector.broadcast %c0_i32_32 : i32 to vector<12x16x128xi32>
    %66 = arith.cmpi ne, %64, %65 : vector<12x16x128xi32>
    %c0_i32_33 = arith.constant 0 : i32
    %67 = vector.broadcast %c0_i32_33 : i32 to vector<12x16x128xi32>
    %68 = arith.cmpi slt, %64, %67 : vector<12x16x128xi32>
    %c0_i32_34 = arith.constant 0 : i32
    %69 = arith.cmpi slt, %62, %c0_i32_34 : i32
    %70 = vector.broadcast %69 : i1 to vector<12x16x128xi1>
    %71 = vector.broadcast %70 : vector<12x16x128xi1> to vector<12x16x128xi1>
    %72 = arith.xori %68, %71 : vector<12x16x128xi1>
    %73 = arith.andi %72, %66 : vector<12x16x128xi1>
    %74 = vector.broadcast %62 : i32 to vector<12x16x128xi32>
    %75 = arith.addi %64, %74 : vector<12x16x128xi32>
    %76 = arith.select %73, %75, %64 : vector<12x16x128xi1>, vector<12x16x128xi32>
    %c0_i32_35 = arith.constant 0 : i32
    %77 = vector.broadcast %c0_i32_35 : i32 to vector<12x16x128xi32>
    %78 = arith.cmpi eq, %76, %77 : vector<12x16x128xi32>
    %c2_i32_36 = arith.constant 2 : i32
    %c0_i32_37 = arith.constant 0 : i32
    %79 = arith.cmpi eq, %c2_i32_36, %c0_i32_37 : i32
    %c1_i32_38 = arith.constant 1 : i32
    %80 = arith.select %79, %c1_i32_38, %c2_i32_36 : i32
    %81 = vector.broadcast %80 : i32 to vector<12x16x128xi32>
    %82 = arith.remsi %60, %81 : vector<12x16x128xi32>
    %c0_i32_39 = arith.constant 0 : i32
    %83 = vector.broadcast %c0_i32_39 : i32 to vector<12x16x128xi32>
    %84 = arith.cmpi ne, %82, %83 : vector<12x16x128xi32>
    %c0_i32_40 = arith.constant 0 : i32
    %85 = vector.broadcast %c0_i32_40 : i32 to vector<12x16x128xi32>
    %86 = arith.cmpi slt, %82, %85 : vector<12x16x128xi32>
    %c0_i32_41 = arith.constant 0 : i32
    %87 = arith.cmpi slt, %80, %c0_i32_41 : i32
    %88 = vector.broadcast %87 : i1 to vector<12x16x128xi1>
    %89 = vector.broadcast %88 : vector<12x16x128xi1> to vector<12x16x128xi1>
    %90 = arith.xori %86, %89 : vector<12x16x128xi1>
    %91 = arith.andi %90, %84 : vector<12x16x128xi1>
    %92 = vector.broadcast %80 : i32 to vector<12x16x128xi32>
    %93 = arith.addi %82, %92 : vector<12x16x128xi32>
    %94 = arith.select %91, %93, %82 : vector<12x16x128xi1>, vector<12x16x128xi32>
    %c0_i32_42 = arith.constant 0 : i32
    %95 = vector.broadcast %c0_i32_42 : i32 to vector<12x16x128xi32>
    %96 = arith.cmpi eq, %94, %95 : vector<12x16x128xi32>
    %97 = arith.select %78, %56, %58 : vector<12x16x128xi1>, vector<12x16x128xf32>
    %98 = arith.maximumf %53, %97 : vector<12x16x128xf32>
    %99 = vector.extract_strided_slice %98 {offsets = [1, 0, 0], sizes = [11, 16, 128], strides = [1, 1, 1]} : vector<12x16x128xf32> to vector<11x16x128xf32>
    %100 = vector.extract_strided_slice %98 {offsets = [0, 0, 0], sizes = [1, 16, 128], strides = [1, 1, 1]} : vector<12x16x128xf32> to vector<1x16x128xf32>
    %101 = tpu.concatenate %99, %100 in 0 : vector<11x16x128xf32>, vector<1x16x128xf32> -> vector<12x16x128xf32>
    %102 = vector.extract_strided_slice %98 {offsets = [11, 0, 0], sizes = [1, 16, 128], strides = [1, 1, 1]} : vector<12x16x128xf32> to vector<1x16x128xf32>
    %103 = vector.extract_strided_slice %98 {offsets = [0, 0, 0], sizes = [11, 16, 128], strides = [1, 1, 1]} : vector<12x16x128xf32> to vector<11x16x128xf32>
    %104 = tpu.concatenate %102, %103 in 0 : vector<1x16x128xf32>, vector<11x16x128xf32> -> vector<12x16x128xf32>
    %105 = arith.select %96, %101, %104 : vector<12x16x128xi1>, vector<12x16x128xf32>
    %106 = arith.maximumf %98, %105 : vector<12x16x128xf32>
    %107 = arith.cmpf oeq, %53, %106 : vector<12x16x128xf32>
    %108 = arith.cmpf olt, %97, %106 : vector<12x16x128xf32>
    %109 = arith.ori %78, %108 : vector<12x16x128xi1>
    %110 = arith.cmpf olt, %105, %106 : vector<12x16x128xf32>
    %111 = arith.ori %96, %110 : vector<12x16x128xi1>
    %112 = arith.andi %109, %111 : vector<12x16x128xi1>
    %113 = arith.andi %107, %112 : vector<12x16x128xi1>
    %cst_43 = arith.constant 0.000000e+00 : f32
    %114 = vector.broadcast %cst_43 : f32 to vector<12x16x128xf32>
    %115 = arith.select %113, %53, %114 : vector<12x16x128xi1>, vector<12x16x128xf32>
    %116 = vector.extract_strided_slice %115 {offsets = [1, 0, 0], sizes = [10, 16, 128], strides = [1, 1, 1]} : vector<12x16x128xf32> to vector<10x16x128xf32>
    %117 = arith.truncf %116 : vector<10x16x128xf32> to vector<10x16x128xbf16>
    %cst_44 = arith.constant 0.000000e+00 : bf16
    %118 = vector.broadcast %cst_44 : bf16 to vector<10x1x128xbf16>
    %119 = vector.extract_strided_slice %117 {offsets = [0, 0, 0], sizes = [10, 15, 128], strides = [1, 1, 1]} : vector<10x16x128xbf16> to vector<10x15x128xbf16>
    %120 = tpu.concatenate %118, %119 in 1 : vector<10x1x128xbf16>, vector<10x15x128xbf16> -> vector<10x16x128xbf16>
    %121 = vector.extract_strided_slice %117 {offsets = [0, 1, 0], sizes = [10, 15, 128], strides = [1, 1, 1]} : vector<10x16x128xbf16> to vector<10x15x128xbf16>
    %122 = tpu.concatenate %121, %118 in 1 : vector<10x15x128xbf16>, vector<10x1x128xbf16> -> vector<10x16x128xbf16>
    %123 = vector.extract_strided_slice %120 {offsets = [0, 0, 0], sizes = [8, 16, 128], strides = [1, 1, 1]} : vector<10x16x128xbf16> to vector<8x16x128xbf16>
    %124 = vector.shape_cast %123 : vector<8x16x128xbf16> to vector<128x128xbf16>
    %c0_45 = arith.constant 0 : index
    %c0_46 = arith.constant 0 : index
    %125 = vector.load %arg11[%c0_45, %c0_46] : memref<128x1152xbf16, #tpu.memory_space<vmem>>, vector<128x128xbf16>
    tpu.vector_store %arg11[%c0_45, %c0_46], %124 {strides = array<i32>} : memref<128x1152xbf16, #tpu.memory_space<vmem>>, vector<128x128xbf16>,
    %126 = vector.extract_strided_slice %117 {offsets = [0, 0, 0], sizes = [8, 16, 128], strides = [1, 1, 1]} : vector<10x16x128xbf16> to vector<8x16x128xbf16>
    %127 = vector.shape_cast %126 : vector<8x16x128xbf16> to vector<128x128xbf16>
    %c0_47 = arith.constant 0 : index
    %c128 = arith.constant 128 : index
    %128 = vector.load %arg11[%c0_47, %c128] : memref<128x1152xbf16, #tpu.memory_space<vmem>>, vector<128x128xbf16>
    tpu.vector_store %arg11[%c0_47, %c128], %127 {strides = array<i32>} : memref<128x1152xbf16, #tpu.memory_space<vmem>>, vector<128x128xbf16>,
    %129 = vector.extract_strided_slice %122 {offsets = [0, 0, 0], sizes = [8, 16, 128], strides = [1, 1, 1]} : vector<10x16x128xbf16> to vector<8x16x128xbf16>
    %130 = vector.shape_cast %129 : vector<8x16x128xbf16> to vector<128x128xbf16>
    %c0_48 = arith.constant 0 : index
    %c256 = arith.constant 256 : index
    %131 = vector.load %arg11[%c0_48, %c256] : memref<128x1152xbf16, #tpu.memory_space<vmem>>, vector<128x128xbf16>
    tpu.vector_store %arg11[%c0_48, %c256], %130 {strides = array<i32>} : memref<128x1152xbf16, #tpu.memory_space<vmem>>, vector<128x128xbf16>,
    %132 = vector.extract_strided_slice %120 {offsets = [1, 0, 0], sizes = [8, 16, 128], strides = [1, 1, 1]} : vector<10x16x128xbf16> to vector<8x16x128xbf16>
    %133 = vector.shape_cast %132 : vector<8x16x128xbf16> to vector<128x128xbf16>
    %c0_49 = arith.constant 0 : index
    %c384 = arith.constant 384 : index
    %134 = vector.load %arg11[%c0_49, %c384] : memref<128x1152xbf16, #tpu.memory_space<vmem>>, vector<128x128xbf16>
    tpu.vector_store %arg11[%c0_49, %c384], %133 {strides = array<i32>} : memref<128x1152xbf16, #tpu.memory_space<vmem>>, vector<128x128xbf16>,
    %135 = vector.extract_strided_slice %117 {offsets = [1, 0, 0], sizes = [8, 16, 128], strides = [1, 1, 1]} : vector<10x16x128xbf16> to vector<8x16x128xbf16>
    %136 = vector.shape_cast %135 : vector<8x16x128xbf16> to vector<128x128xbf16>
    %c0_50 = arith.constant 0 : index
    %c512 = arith.constant 512 : index
    %137 = vector.load %arg11[%c0_50, %c512] : memref<128x1152xbf16, #tpu.memory_space<vmem>>, vector<128x128xbf16>
    tpu.vector_store %arg11[%c0_50, %c512], %136 {strides = array<i32>} : memref<128x1152xbf16, #tpu.memory_space<vmem>>, vector<128x128xbf16>,
    %138 = vector.extract_strided_slice %122 {offsets = [1, 0, 0], sizes = [8, 16, 128], strides = [1, 1, 1]} : vector<10x16x128xbf16> to vector<8x16x128xbf16>
    %139 = vector.shape_cast %138 : vector<8x16x128xbf16> to vector<128x128xbf16>
    %c0_51 = arith.constant 0 : index
    %c640 = arith.constant 640 : index
    %140 = vector.load %arg11[%c0_51, %c640] : memref<128x1152xbf16, #tpu.memory_space<vmem>>, vector<128x128xbf16>
    tpu.vector_store %arg11[%c0_51, %c640], %139 {strides = array<i32>} : memref<128x1152xbf16, #tpu.memory_space<vmem>>, vector<128x128xbf16>,
    %141 = vector.extract_strided_slice %120 {offsets = [2, 0, 0], sizes = [8, 16, 128], strides = [1, 1, 1]} : vector<10x16x128xbf16> to vector<8x16x128xbf16>
    %142 = vector.shape_cast %141 : vector<8x16x128xbf16> to vector<128x128xbf16>
    %c0_52 = arith.constant 0 : index
    %c768 = arith.constant 768 : index
    %143 = vector.load %arg11[%c0_52, %c768] : memref<128x1152xbf16, #tpu.memory_space<vmem>>, vector<128x128xbf16>
    tpu.vector_store %arg11[%c0_52, %c768], %142 {strides = array<i32>} : memref<128x1152xbf16, #tpu.memory_space<vmem>>, vector<128x128xbf16>,
    %144 = vector.extract_strided_slice %117 {offsets = [2, 0, 0], sizes = [8, 16, 128], strides = [1, 1, 1]} : vector<10x16x128xbf16> to vector<8x16x128xbf16>
    %145 = vector.shape_cast %144 : vector<8x16x128xbf16> to vector<128x128xbf16>
    %c0_53 = arith.constant 0 : index
    %c896 = arith.constant 896 : index
    %146 = vector.load %arg11[%c0_53, %c896] : memref<128x1152xbf16, #tpu.memory_space<vmem>>, vector<128x128xbf16>
    tpu.vector_store %arg11[%c0_53, %c896], %145 {strides = array<i32>} : memref<128x1152xbf16, #tpu.memory_space<vmem>>, vector<128x128xbf16>,
    %147 = vector.extract_strided_slice %122 {offsets = [2, 0, 0], sizes = [8, 16, 128], strides = [1, 1, 1]} : vector<10x16x128xbf16> to vector<8x16x128xbf16>
    %148 = vector.shape_cast %147 : vector<8x16x128xbf16> to vector<128x128xbf16>
    %c0_54 = arith.constant 0 : index
    %c1024 = arith.constant 1024 : index
    %149 = vector.load %arg11[%c0_54, %c1024] : memref<128x1152xbf16, #tpu.memory_space<vmem>>, vector<128x128xbf16>
    tpu.vector_store %arg11[%c0_54, %c1024], %148 {strides = array<i32>} : memref<128x1152xbf16, #tpu.memory_space<vmem>>, vector<128x128xbf16>,
    %c0_55 = arith.constant 0 : index
    %c0_56 = arith.constant 0 : index
    %150 = vector.load %arg11[%c0_55, %c0_56] : memref<128x1152xbf16, #tpu.memory_space<vmem>>, vector<128x1152xbf16>
    %c0_57 = arith.constant 0 : index
    %c0_58 = arith.constant 0 : index
    %151 = vector.load %arg5[%c0_57, %c0_58] : memref<1152x128xbf16, #tpu.memory_space<vmem>>, vector<1152x128xbf16>
    %cst_59 = arith.constant dense<0.000000e+00> : vector<128x128xf32>
    %152 = tpu.matmul %150, %151, %cst_59 {dimension_numbers = #tpu.dot_dimension_numbers<[1], [0], [0], [1], [0, 0, 1, 1], [], []>} : vector<128x1152xbf16>, vector<1152x128xbf16>, vector<128x128xf32> -> vector<128x128xf32>
    %c0_60 = arith.constant 0 : index
    %c0_61 = arith.constant 0 : index
    %153 = vector.load %arg6[%c0_60, %c0_61] : memref<1x128xf32, #tpu.memory_space<vmem>>, vector<1x128xf32>
    %154 = vector.broadcast %153 : vector<1x128xf32> to vector<128x128xf32>
    %155 = arith.addf %152, %154 : vector<128x128xf32>
    %cst_62 = arith.constant dense<0.000000e+00> : vector<128xf32>
    %156 = vector.multi_reduction <add>, %155, %cst_62 [0] : vector<128x128xf32> to vector<128xf32>
    %157 = vector.shape_cast %156 : vector<128xf32> to vector<1x128xf32>
    %c0_63 = arith.constant 0 : index
    %c0_64 = arith.constant 0 : index
    %c0_65 = arith.constant 0 : index
    %c0_66 = arith.constant 0 : index
    %158 = vector.load %arg10[%c0_63, %c0_64, %c0_65, %c0_66] : memref<1x1x2x128xf32, #tpu.memory_space<vmem>>, vector<1x1x1x128xf32>
    %159 = vector.shape_cast %158 : vector<1x1x1x128xf32> to vector<1x128xf32>
    %160 = vector.shape_cast %157 : vector<1x128xf32> to vector<1x1x1x128xf32>
    tpu.vector_store %arg10[%c0_63, %c0_64, %c0_65, %c0_66], %160 {strides = array<i32>} : memref<1x1x2x128xf32, #tpu.memory_space<vmem>>, vector<1x1x1x128xf32>,
    %161 = arith.mulf %155, %155 : vector<128x128xf32>
    %cst_67 = arith.constant dense<0.000000e+00> : vector<128xf32>
    %162 = vector.multi_reduction <add>, %161, %cst_67 [0] : vector<128x128xf32> to vector<128xf32>
    %163 = vector.shape_cast %162 : vector<128xf32> to vector<1x128xf32>
    %c0_68 = arith.constant 0 : index
    %c0_69 = arith.constant 0 : index
    %c1 = arith.constant 1 : index
    %c0_70 = arith.constant 0 : index
    %164 = vector.load %arg10[%c0_68, %c0_69, %c1, %c0_70] : memref<1x1x2x128xf32, #tpu.memory_space<vmem>>, vector<1x1x1x128xf32>
    %165 = vector.shape_cast %164 : vector<1x1x1x128xf32> to vector<1x128xf32>
    %166 = vector.shape_cast %163 : vector<1x128xf32> to vector<1x1x1x128xf32>
    tpu.vector_store %arg10[%c0_68, %c0_69, %c1, %c0_70], %166 {strides = array<i32>} : memref<1x1x2x128xf32, #tpu.memory_space<vmem>>, vector<1x1x1x128xf32>,
    %167 = vector.shape_cast %155 : vector<128x128xf32> to vector<8x16x128xf32>
    %168 = arith.truncf %167 : vector<8x16x128xf32> to vector<8x16x128xbf16>
    %c0_71 = arith.constant 0 : index
    %c0_72 = arith.constant 0 : index
    %c0_73 = arith.constant 0 : index
    %c0_74 = arith.constant 0 : index
    %169 = vector.load %arg9[%c0_71, %c0_72, %c0_73, %c0_74] : memref<1x8x16x128xbf16, #tpu.memory_space<vmem>>, vector<1x8x16x128xbf16>
    %170 = vector.shape_cast %169 : vector<1x8x16x128xbf16> to vector<8x16x128xbf16>
    %171 = vector.shape_cast %168 : vector<8x16x128xbf16> to vector<1x8x16x128xbf16>
    tpu.vector_store %arg9[%c0_71, %c0_72, %c0_73, %c0_74], %171 {strides = array<i32>} : memref<1x8x16x128xbf16, #tpu.memory_space<vmem>>, vector<1x8x16x128xbf16>,
    return
  }
  func.func @transform_0(%arg0: i32, %arg1: i32) -> (i32, i32, i32, i32) {
    %c0_i32 = arith.constant 0 : i32
    %c0_i32_0 = arith.constant 0 : i32
    %c0_i32_1 = arith.constant 0 : i32
    return %arg0, %arg1, %c0_i32, %c0_i32_0 : i32, i32, i32, i32
  }
  func.func @transform_1(%arg0: i32, %arg1: i32) -> (i32, i32, i32, i32) {
    %c4_i32 = arith.constant 4 : i32
    %0 = arith.muli %arg1, %c4_i32 : i32
    %c1_i32 = arith.constant 1 : i32
    %1 = arith.subi %0, %c1_i32 : i32
    %c0_i32 = arith.constant 0 : i32
    %2 = arith.maxsi %1, %c0_i32 : i32
    %c0_i32_0 = arith.constant 0 : i32
    %c0_i32_1 = arith.constant 0 : i32
    %c0_i32_2 = arith.constant 0 : i32
    return %arg0, %2, %c0_i32_0, %c0_i32_1 : i32, i32, i32, i32
  }
  func.func @transform_2(%arg0: i32, %arg1: i32) -> (i32, i32, i32, i32) {
    %c1_i32 = arith.constant 1 : i32
    %0 = arith.addi %arg1, %c1_i32 : i32
    %c4_i32 = arith.constant 4 : i32
    %1 = arith.muli %0, %c4_i32 : i32
    %c7_i32 = arith.constant 7 : i32
    %2 = arith.minsi %1, %c7_i32 : i32
    %c0_i32 = arith.constant 0 : i32
    %c0_i32_0 = arith.constant 0 : i32
    %c0_i32_1 = arith.constant 0 : i32
    return %arg0, %2, %c0_i32, %c0_i32_0 : i32, i32, i32, i32
  }
  func.func @transform_3(%arg0: i32, %arg1: i32) -> (i32, i32) {
    %c0_i32 = arith.constant 0 : i32
    %c0_i32_0 = arith.constant 0 : i32
    %c0_i32_1 = arith.constant 0 : i32
    return %c0_i32, %c0_i32_0 : i32, i32
  }
  func.func @transform_4(%arg0: i32, %arg1: i32) -> (i32, i32) {
    %c0_i32 = arith.constant 0 : i32
    %c0_i32_0 = arith.constant 0 : i32
    %c0_i32_1 = arith.constant 0 : i32
    return %c0_i32, %c0_i32_0 : i32, i32
  }
  func.func @transform_5(%arg0: i32, %arg1: i32) -> (i32, i32) {
    %c0_i32 = arith.constant 0 : i32
    %c0_i32_0 = arith.constant 0 : i32
    %c0_i32_1 = arith.constant 0 : i32
    return %c0_i32, %c0_i32_0 : i32, i32
  }
  func.func @transform_6(%arg0: i32, %arg1: i32) -> (i32, i32) {
    %c0_i32 = arith.constant 0 : i32
    %c0_i32_0 = arith.constant 0 : i32
    %c0_i32_1 = arith.constant 0 : i32
    return %c0_i32, %c0_i32_0 : i32, i32
  }
  func.func @transform_7(%arg0: i32, %arg1: i32) -> (i32, i32, i32, i32) {
    %c0_i32 = arith.constant 0 : i32
    %c0_i32_0 = arith.constant 0 : i32
    %c0_i32_1 = arith.constant 0 : i32
    return %arg0, %arg1, %c0_i32, %c0_i32_0 : i32, i32, i32, i32
  }
  func.func @transform_8(%arg0: i32, %arg1: i32) -> (i32, i32, i32, i32) {
    %c0_i32 = arith.constant 0 : i32
    %c0_i32_0 = arith.constant 0 : i32
    %c0_i32_1 = arith.constant 0 : i32
    return %arg0, %arg1, %c0_i32, %c0_i32_0 : i32, i32, i32, i32
  }
}

module attributes {stable_mosaic.version = 11 : i64} {
  func.func @_fused_conv_kernel(%arg0: i32, %arg1: i32, %arg2: memref<1x8x16x128xbf16, #tpu.memory_space<vmem>>, %arg3: memref<1x2x16x128xbf16, #tpu.memory_space<vmem>>, %arg4: memref<1x2x16x128xbf16, #tpu.memory_space<vmem>>, %arg5: memref<1152x128xbf16, #tpu.memory_space<vmem>>, %arg6: memref<1x128xf32, #tpu.memory_space<vmem>>, %arg7: memref<1x128xf32, #tpu.memory_space<vmem>>, %arg8: memref<1x128xf32, #tpu.memory_space<vmem>>, %arg9: memref<1x8x16x128xf32, #tpu.memory_space<vmem>>, %arg10: memref<1x1x2x128xf32, #tpu.memory_space<vmem>>, %arg11: memref<128x1152xbf16, #tpu.memory_space<vmem>>) attributes {dimension_semantics = [#tpu.dimension_semantics<parallel>, #tpu.dimension_semantics<parallel>], iteration_bounds = array<i64: 2, 2>, scalar_prefetch = 0 : i64, scratch_operands = 1 : i64, tpu.core_type = #tpu.core_type<tc>, window_params = [{transform_indices = @transform_0, window_bounds = array<i64: 1, 8, 16, 128>}, {transform_indices = @transform_1, window_bounds = array<i64: 1, 2, 16, 128>}, {transform_indices = @transform_2, window_bounds = array<i64: 1, 2, 16, 128>}, {pipeline_mode = #tpu.pipeline_mode<synchronous>, transform_indices = @transform_3, window_bounds = array<i64: 1152, 128>}, {pipeline_mode = #tpu.pipeline_mode<synchronous>, transform_indices = @transform_4, window_bounds = array<i64: 1, 128>}, {pipeline_mode = #tpu.pipeline_mode<synchronous>, transform_indices = @transform_5, window_bounds = array<i64: 1, 128>}, {pipeline_mode = #tpu.pipeline_mode<synchronous>, transform_indices = @transform_6, window_bounds = array<i64: 1, 128>}, {transform_indices = @transform_7, window_bounds = array<i64: 1, 8, 16, 128>}, {transform_indices = @transform_8, window_bounds = array<i64: 1, 1, 2, 128>}]} {
    %c0 = arith.constant 0 : index
    %c0_0 = arith.constant 0 : index
    %c0_1 = arith.constant 0 : index
    %c0_2 = arith.constant 0 : index
    %0 = vector.load %arg2[%c0, %c0_0, %c0_1, %c0_2] : memref<1x8x16x128xbf16, #tpu.memory_space<vmem>>, vector<1x8x16x128xbf16>
    %1 = vector.shape_cast %0 : vector<1x8x16x128xbf16> to vector<8x16x128xbf16>
    %2 = arith.extf %1 : vector<8x16x128xbf16> to vector<8x16x128xf32>
    %c0_3 = arith.constant 0 : index
    %c0_4 = arith.constant 0 : index
    %3 = vector.load %arg7[%c0_3, %c0_4] : memref<1x128xf32, #tpu.memory_space<vmem>>, vector<1x128xf32>
    %4 = vector.shape_cast %3 : vector<1x128xf32> to vector<128xf32>
    %5 = vector.shape_cast %4 : vector<128xf32> to vector<1x1x128xf32>
    %6 = vector.broadcast %5 : vector<1x1x128xf32> to vector<8x16x128xf32>
    %7 = arith.mulf %2, %6 : vector<8x16x128xf32>
    %c0_5 = arith.constant 0 : index
    %c0_6 = arith.constant 0 : index
    %8 = vector.load %arg8[%c0_5, %c0_6] : memref<1x128xf32, #tpu.memory_space<vmem>>, vector<1x128xf32>
    %9 = vector.shape_cast %8 : vector<1x128xf32> to vector<128xf32>
    %10 = vector.shape_cast %9 : vector<128xf32> to vector<1x1x128xf32>
    %11 = vector.broadcast %10 : vector<1x1x128xf32> to vector<8x16x128xf32>
    %12 = arith.addf %7, %11 : vector<8x16x128xf32>
    %cst = arith.constant 0.000000e+00 : f32
    %13 = vector.broadcast %cst : f32 to vector<8x16x128xf32>
    %14 = arith.maximumf %12, %13 : vector<8x16x128xf32>
    %c0_7 = arith.constant 0 : index
    %c0_8 = arith.constant 0 : index
    %c0_9 = arith.constant 0 : index
    %c0_10 = arith.constant 0 : index
    %15 = vector.load %arg3[%c0_7, %c0_8, %c0_9, %c0_10] : memref<1x2x16x128xbf16, #tpu.memory_space<vmem>>, vector<1x2x16x128xbf16>
    %16 = vector.shape_cast %15 : vector<1x2x16x128xbf16> to vector<2x16x128xbf16>
    %17 = arith.extf %16 : vector<2x16x128xbf16> to vector<2x16x128xf32>
    %c0_11 = arith.constant 0 : index
    %c0_12 = arith.constant 0 : index
    %18 = vector.load %arg7[%c0_11, %c0_12] : memref<1x128xf32, #tpu.memory_space<vmem>>, vector<1x128xf32>
    %19 = vector.shape_cast %18 : vector<1x128xf32> to vector<128xf32>
    %20 = vector.shape_cast %19 : vector<128xf32> to vector<1x1x128xf32>
    %21 = vector.broadcast %20 : vector<1x1x128xf32> to vector<2x16x128xf32>
    %22 = arith.mulf %17, %21 : vector<2x16x128xf32>
    %c0_13 = arith.constant 0 : index
    %c0_14 = arith.constant 0 : index
    %23 = vector.load %arg8[%c0_13, %c0_14] : memref<1x128xf32, #tpu.memory_space<vmem>>, vector<1x128xf32>
    %24 = vector.shape_cast %23 : vector<1x128xf32> to vector<128xf32>
    %25 = vector.shape_cast %24 : vector<128xf32> to vector<1x1x128xf32>
    %26 = vector.broadcast %25 : vector<1x1x128xf32> to vector<2x16x128xf32>
    %27 = arith.addf %22, %26 : vector<2x16x128xf32>
    %cst_15 = arith.constant 0.000000e+00 : f32
    %28 = vector.broadcast %cst_15 : f32 to vector<2x16x128xf32>
    %29 = arith.maximumf %27, %28 : vector<2x16x128xf32>
    %c0_16 = arith.constant 0 : index
    %c0_17 = arith.constant 0 : index
    %c0_18 = arith.constant 0 : index
    %c0_19 = arith.constant 0 : index
    %30 = vector.load %arg4[%c0_16, %c0_17, %c0_18, %c0_19] : memref<1x2x16x128xbf16, #tpu.memory_space<vmem>>, vector<1x2x16x128xbf16>
    %31 = vector.shape_cast %30 : vector<1x2x16x128xbf16> to vector<2x16x128xbf16>
    %32 = arith.extf %31 : vector<2x16x128xbf16> to vector<2x16x128xf32>
    %c0_20 = arith.constant 0 : index
    %c0_21 = arith.constant 0 : index
    %33 = vector.load %arg7[%c0_20, %c0_21] : memref<1x128xf32, #tpu.memory_space<vmem>>, vector<1x128xf32>
    %34 = vector.shape_cast %33 : vector<1x128xf32> to vector<128xf32>
    %35 = vector.shape_cast %34 : vector<128xf32> to vector<1x1x128xf32>
    %36 = vector.broadcast %35 : vector<1x1x128xf32> to vector<2x16x128xf32>
    %37 = arith.mulf %32, %36 : vector<2x16x128xf32>
    %c0_22 = arith.constant 0 : index
    %c0_23 = arith.constant 0 : index
    %38 = vector.load %arg8[%c0_22, %c0_23] : memref<1x128xf32, #tpu.memory_space<vmem>>, vector<1x128xf32>
    %39 = vector.shape_cast %38 : vector<1x128xf32> to vector<128xf32>
    %40 = vector.shape_cast %39 : vector<128xf32> to vector<1x1x128xf32>
    %41 = vector.broadcast %40 : vector<1x1x128xf32> to vector<2x16x128xf32>
    %42 = arith.addf %37, %41 : vector<2x16x128xf32>
    %cst_24 = arith.constant 0.000000e+00 : f32
    %43 = vector.broadcast %cst_24 : f32 to vector<2x16x128xf32>
    %44 = arith.maximumf %42, %43 : vector<2x16x128xf32>
    %c0_i32 = arith.constant 0 : i32
    %45 = arith.cmpi eq, %arg1, %c0_i32 : i32
    %cst_25 = arith.constant 0.000000e+00 : f32
    %cst_26 = arith.constant 1.000000e+00 : f32
    %46 = arith.select %45, %cst_25, %cst_26 : f32
    %47 = vector.broadcast %46 : f32 to vector<2x16x128xf32>
    %48 = arith.mulf %29, %47 : vector<2x16x128xf32>
    %c1_i32 = arith.constant 1 : i32
    %49 = arith.cmpi eq, %arg1, %c1_i32 : i32
    %cst_27 = arith.constant 0.000000e+00 : f32
    %cst_28 = arith.constant 1.000000e+00 : f32
    %50 = arith.select %49, %cst_27, %cst_28 : f32
    %51 = vector.broadcast %50 : f32 to vector<2x16x128xf32>
    %52 = arith.mulf %44, %51 : vector<2x16x128xf32>
    %53 = vector.extract_strided_slice %48 {offsets = [1, 0, 0], sizes = [1, 16, 128], strides = [1, 1, 1]} : vector<2x16x128xf32> to vector<1x16x128xf32>
    %54 = vector.extract_strided_slice %52 {offsets = [0, 0, 0], sizes = [1, 16, 128], strides = [1, 1, 1]} : vector<2x16x128xf32> to vector<1x16x128xf32>
    %55 = tpu.concatenate %53, %14, %54 in 0 : vector<1x16x128xf32>, vector<8x16x128xf32>, vector<1x16x128xf32> -> vector<10x16x128xf32>
    %56 = arith.truncf %55 : vector<10x16x128xf32> to vector<10x16x128xbf16>
    %cst_29 = arith.constant 0.000000e+00 : bf16
    %57 = vector.broadcast %cst_29 : bf16 to vector<10x1x128xbf16>
    %58 = vector.extract_strided_slice %56 {offsets = [0, 0, 0], sizes = [10, 15, 128], strides = [1, 1, 1]} : vector<10x16x128xbf16> to vector<10x15x128xbf16>
    %59 = tpu.concatenate %57, %58 in 1 : vector<10x1x128xbf16>, vector<10x15x128xbf16> -> vector<10x16x128xbf16>
    %60 = vector.extract_strided_slice %56 {offsets = [0, 1, 0], sizes = [10, 15, 128], strides = [1, 1, 1]} : vector<10x16x128xbf16> to vector<10x15x128xbf16>
    %61 = tpu.concatenate %60, %57 in 1 : vector<10x15x128xbf16>, vector<10x1x128xbf16> -> vector<10x16x128xbf16>
    %62 = vector.extract_strided_slice %59 {offsets = [0, 0, 0], sizes = [8, 16, 128], strides = [1, 1, 1]} : vector<10x16x128xbf16> to vector<8x16x128xbf16>
    %63 = vector.shape_cast %62 : vector<8x16x128xbf16> to vector<128x128xbf16>
    %c0_30 = arith.constant 0 : index
    %c0_31 = arith.constant 0 : index
    %64 = vector.load %arg11[%c0_30, %c0_31] : memref<128x1152xbf16, #tpu.memory_space<vmem>>, vector<128x128xbf16>
    tpu.vector_store %arg11[%c0_30, %c0_31], %63 {strides = array<i32>} : memref<128x1152xbf16, #tpu.memory_space<vmem>>, vector<128x128xbf16>,
    %65 = vector.extract_strided_slice %56 {offsets = [0, 0, 0], sizes = [8, 16, 128], strides = [1, 1, 1]} : vector<10x16x128xbf16> to vector<8x16x128xbf16>
    %66 = vector.shape_cast %65 : vector<8x16x128xbf16> to vector<128x128xbf16>
    %c0_32 = arith.constant 0 : index
    %c128 = arith.constant 128 : index
    %67 = vector.load %arg11[%c0_32, %c128] : memref<128x1152xbf16, #tpu.memory_space<vmem>>, vector<128x128xbf16>
    tpu.vector_store %arg11[%c0_32, %c128], %66 {strides = array<i32>} : memref<128x1152xbf16, #tpu.memory_space<vmem>>, vector<128x128xbf16>,
    %68 = vector.extract_strided_slice %61 {offsets = [0, 0, 0], sizes = [8, 16, 128], strides = [1, 1, 1]} : vector<10x16x128xbf16> to vector<8x16x128xbf16>
    %69 = vector.shape_cast %68 : vector<8x16x128xbf16> to vector<128x128xbf16>
    %c0_33 = arith.constant 0 : index
    %c256 = arith.constant 256 : index
    %70 = vector.load %arg11[%c0_33, %c256] : memref<128x1152xbf16, #tpu.memory_space<vmem>>, vector<128x128xbf16>
    tpu.vector_store %arg11[%c0_33, %c256], %69 {strides = array<i32>} : memref<128x1152xbf16, #tpu.memory_space<vmem>>, vector<128x128xbf16>,
    %71 = vector.extract_strided_slice %59 {offsets = [1, 0, 0], sizes = [8, 16, 128], strides = [1, 1, 1]} : vector<10x16x128xbf16> to vector<8x16x128xbf16>
    %72 = vector.shape_cast %71 : vector<8x16x128xbf16> to vector<128x128xbf16>
    %c0_34 = arith.constant 0 : index
    %c384 = arith.constant 384 : index
    %73 = vector.load %arg11[%c0_34, %c384] : memref<128x1152xbf16, #tpu.memory_space<vmem>>, vector<128x128xbf16>
    tpu.vector_store %arg11[%c0_34, %c384], %72 {strides = array<i32>} : memref<128x1152xbf16, #tpu.memory_space<vmem>>, vector<128x128xbf16>,
    %74 = vector.extract_strided_slice %56 {offsets = [1, 0, 0], sizes = [8, 16, 128], strides = [1, 1, 1]} : vector<10x16x128xbf16> to vector<8x16x128xbf16>
    %75 = vector.shape_cast %74 : vector<8x16x128xbf16> to vector<128x128xbf16>
    %c0_35 = arith.constant 0 : index
    %c512 = arith.constant 512 : index
    %76 = vector.load %arg11[%c0_35, %c512] : memref<128x1152xbf16, #tpu.memory_space<vmem>>, vector<128x128xbf16>
    tpu.vector_store %arg11[%c0_35, %c512], %75 {strides = array<i32>} : memref<128x1152xbf16, #tpu.memory_space<vmem>>, vector<128x128xbf16>,
    %77 = vector.extract_strided_slice %61 {offsets = [1, 0, 0], sizes = [8, 16, 128], strides = [1, 1, 1]} : vector<10x16x128xbf16> to vector<8x16x128xbf16>
    %78 = vector.shape_cast %77 : vector<8x16x128xbf16> to vector<128x128xbf16>
    %c0_36 = arith.constant 0 : index
    %c640 = arith.constant 640 : index
    %79 = vector.load %arg11[%c0_36, %c640] : memref<128x1152xbf16, #tpu.memory_space<vmem>>, vector<128x128xbf16>
    tpu.vector_store %arg11[%c0_36, %c640], %78 {strides = array<i32>} : memref<128x1152xbf16, #tpu.memory_space<vmem>>, vector<128x128xbf16>,
    %80 = vector.extract_strided_slice %59 {offsets = [2, 0, 0], sizes = [8, 16, 128], strides = [1, 1, 1]} : vector<10x16x128xbf16> to vector<8x16x128xbf16>
    %81 = vector.shape_cast %80 : vector<8x16x128xbf16> to vector<128x128xbf16>
    %c0_37 = arith.constant 0 : index
    %c768 = arith.constant 768 : index
    %82 = vector.load %arg11[%c0_37, %c768] : memref<128x1152xbf16, #tpu.memory_space<vmem>>, vector<128x128xbf16>
    tpu.vector_store %arg11[%c0_37, %c768], %81 {strides = array<i32>} : memref<128x1152xbf16, #tpu.memory_space<vmem>>, vector<128x128xbf16>,
    %83 = vector.extract_strided_slice %56 {offsets = [2, 0, 0], sizes = [8, 16, 128], strides = [1, 1, 1]} : vector<10x16x128xbf16> to vector<8x16x128xbf16>
    %84 = vector.shape_cast %83 : vector<8x16x128xbf16> to vector<128x128xbf16>
    %c0_38 = arith.constant 0 : index
    %c896 = arith.constant 896 : index
    %85 = vector.load %arg11[%c0_38, %c896] : memref<128x1152xbf16, #tpu.memory_space<vmem>>, vector<128x128xbf16>
    tpu.vector_store %arg11[%c0_38, %c896], %84 {strides = array<i32>} : memref<128x1152xbf16, #tpu.memory_space<vmem>>, vector<128x128xbf16>,
    %86 = vector.extract_strided_slice %61 {offsets = [2, 0, 0], sizes = [8, 16, 128], strides = [1, 1, 1]} : vector<10x16x128xbf16> to vector<8x16x128xbf16>
    %87 = vector.shape_cast %86 : vector<8x16x128xbf16> to vector<128x128xbf16>
    %c0_39 = arith.constant 0 : index
    %c1024 = arith.constant 1024 : index
    %88 = vector.load %arg11[%c0_39, %c1024] : memref<128x1152xbf16, #tpu.memory_space<vmem>>, vector<128x128xbf16>
    tpu.vector_store %arg11[%c0_39, %c1024], %87 {strides = array<i32>} : memref<128x1152xbf16, #tpu.memory_space<vmem>>, vector<128x128xbf16>,
    %c0_40 = arith.constant 0 : index
    %c0_41 = arith.constant 0 : index
    %89 = vector.load %arg11[%c0_40, %c0_41] : memref<128x1152xbf16, #tpu.memory_space<vmem>>, vector<128x1152xbf16>
    %c0_42 = arith.constant 0 : index
    %c0_43 = arith.constant 0 : index
    %90 = vector.load %arg5[%c0_42, %c0_43] : memref<1152x128xbf16, #tpu.memory_space<vmem>>, vector<1152x128xbf16>
    %cst_44 = arith.constant dense<0.000000e+00> : vector<128x128xf32>
    %91 = tpu.matmul %89, %90, %cst_44 {dimension_numbers = #tpu.dot_dimension_numbers<[1], [0], [0], [1], [0, 0, 1, 1], [], []>} : vector<128x1152xbf16>, vector<1152x128xbf16>, vector<128x128xf32> -> vector<128x128xf32>
    %c0_45 = arith.constant 0 : index
    %c0_46 = arith.constant 0 : index
    %92 = vector.load %arg6[%c0_45, %c0_46] : memref<1x128xf32, #tpu.memory_space<vmem>>, vector<1x128xf32>
    %93 = vector.broadcast %92 : vector<1x128xf32> to vector<128x128xf32>
    %94 = arith.addf %91, %93 : vector<128x128xf32>
    %cst_47 = arith.constant dense<0.000000e+00> : vector<128xf32>
    %95 = vector.multi_reduction <add>, %94, %cst_47 [0] : vector<128x128xf32> to vector<128xf32>
    %96 = vector.shape_cast %95 : vector<128xf32> to vector<1x128xf32>
    %c0_48 = arith.constant 0 : index
    %c0_49 = arith.constant 0 : index
    %c0_50 = arith.constant 0 : index
    %c0_51 = arith.constant 0 : index
    %97 = vector.load %arg10[%c0_48, %c0_49, %c0_50, %c0_51] : memref<1x1x2x128xf32, #tpu.memory_space<vmem>>, vector<1x1x1x128xf32>
    %98 = vector.shape_cast %97 : vector<1x1x1x128xf32> to vector<1x128xf32>
    %99 = vector.shape_cast %96 : vector<1x128xf32> to vector<1x1x1x128xf32>
    tpu.vector_store %arg10[%c0_48, %c0_49, %c0_50, %c0_51], %99 {strides = array<i32>} : memref<1x1x2x128xf32, #tpu.memory_space<vmem>>, vector<1x1x1x128xf32>,
    %100 = arith.mulf %94, %94 : vector<128x128xf32>
    %cst_52 = arith.constant dense<0.000000e+00> : vector<128xf32>
    %101 = vector.multi_reduction <add>, %100, %cst_52 [0] : vector<128x128xf32> to vector<128xf32>
    %102 = vector.shape_cast %101 : vector<128xf32> to vector<1x128xf32>
    %c0_53 = arith.constant 0 : index
    %c0_54 = arith.constant 0 : index
    %c1 = arith.constant 1 : index
    %c0_55 = arith.constant 0 : index
    %103 = vector.load %arg10[%c0_53, %c0_54, %c1, %c0_55] : memref<1x1x2x128xf32, #tpu.memory_space<vmem>>, vector<1x1x1x128xf32>
    %104 = vector.shape_cast %103 : vector<1x1x1x128xf32> to vector<1x128xf32>
    %105 = vector.shape_cast %102 : vector<1x128xf32> to vector<1x1x1x128xf32>
    tpu.vector_store %arg10[%c0_53, %c0_54, %c1, %c0_55], %105 {strides = array<i32>} : memref<1x1x2x128xf32, #tpu.memory_space<vmem>>, vector<1x1x1x128xf32>,
    %106 = vector.shape_cast %94 : vector<128x128xf32> to vector<8x16x128xf32>
    %c0_56 = arith.constant 0 : index
    %c0_57 = arith.constant 0 : index
    %c0_58 = arith.constant 0 : index
    %c0_59 = arith.constant 0 : index
    %107 = vector.load %arg9[%c0_56, %c0_57, %c0_58, %c0_59] : memref<1x8x16x128xf32, #tpu.memory_space<vmem>>, vector<1x8x16x128xf32>
    %108 = vector.shape_cast %107 : vector<1x8x16x128xf32> to vector<8x16x128xf32>
    %109 = vector.shape_cast %106 : vector<8x16x128xf32> to vector<1x8x16x128xf32>
    tpu.vector_store %arg9[%c0_56, %c0_57, %c0_58, %c0_59], %109 {strides = array<i32>} : memref<1x8x16x128xf32, #tpu.memory_space<vmem>>, vector<1x8x16x128xf32>,
    return
  }
  func.func @transform_0(%arg0: i32, %arg1: i32) -> (i32, i32, i32, i32) {
    %c0_i32 = arith.constant 0 : i32
    %c0_i32_0 = arith.constant 0 : i32
    %c0_i32_1 = arith.constant 0 : i32
    return %arg0, %arg1, %c0_i32, %c0_i32_0 : i32, i32, i32, i32
  }
  func.func @transform_1(%arg0: i32, %arg1: i32) -> (i32, i32, i32, i32) {
    %c4_i32 = arith.constant 4 : i32
    %0 = arith.muli %arg1, %c4_i32 : i32
    %c1_i32 = arith.constant 1 : i32
    %1 = arith.subi %0, %c1_i32 : i32
    %c0_i32 = arith.constant 0 : i32
    %2 = arith.maxsi %1, %c0_i32 : i32
    %c0_i32_0 = arith.constant 0 : i32
    %c0_i32_1 = arith.constant 0 : i32
    %c0_i32_2 = arith.constant 0 : i32
    return %arg0, %2, %c0_i32_0, %c0_i32_1 : i32, i32, i32, i32
  }
  func.func @transform_2(%arg0: i32, %arg1: i32) -> (i32, i32, i32, i32) {
    %c1_i32 = arith.constant 1 : i32
    %0 = arith.addi %arg1, %c1_i32 : i32
    %c4_i32 = arith.constant 4 : i32
    %1 = arith.muli %0, %c4_i32 : i32
    %c7_i32 = arith.constant 7 : i32
    %2 = arith.minsi %1, %c7_i32 : i32
    %c0_i32 = arith.constant 0 : i32
    %c0_i32_0 = arith.constant 0 : i32
    %c0_i32_1 = arith.constant 0 : i32
    return %arg0, %2, %c0_i32, %c0_i32_0 : i32, i32, i32, i32
  }
  func.func @transform_3(%arg0: i32, %arg1: i32) -> (i32, i32) {
    %c0_i32 = arith.constant 0 : i32
    %c0_i32_0 = arith.constant 0 : i32
    %c0_i32_1 = arith.constant 0 : i32
    return %c0_i32, %c0_i32_0 : i32, i32
  }
  func.func @transform_4(%arg0: i32, %arg1: i32) -> (i32, i32) {
    %c0_i32 = arith.constant 0 : i32
    %c0_i32_0 = arith.constant 0 : i32
    %c0_i32_1 = arith.constant 0 : i32
    return %c0_i32, %c0_i32_0 : i32, i32
  }
  func.func @transform_5(%arg0: i32, %arg1: i32) -> (i32, i32) {
    %c0_i32 = arith.constant 0 : i32
    %c0_i32_0 = arith.constant 0 : i32
    %c0_i32_1 = arith.constant 0 : i32
    return %c0_i32, %c0_i32_0 : i32, i32
  }
  func.func @transform_6(%arg0: i32, %arg1: i32) -> (i32, i32) {
    %c0_i32 = arith.constant 0 : i32
    %c0_i32_0 = arith.constant 0 : i32
    %c0_i32_1 = arith.constant 0 : i32
    return %c0_i32, %c0_i32_0 : i32, i32
  }
  func.func @transform_7(%arg0: i32, %arg1: i32) -> (i32, i32, i32, i32) {
    %c0_i32 = arith.constant 0 : i32
    %c0_i32_0 = arith.constant 0 : i32
    %c0_i32_1 = arith.constant 0 : i32
    return %arg0, %arg1, %c0_i32, %c0_i32_0 : i32, i32, i32, i32
  }
  func.func @transform_8(%arg0: i32, %arg1: i32) -> (i32, i32, i32, i32) {
    %c0_i32 = arith.constant 0 : i32
    %c0_i32_0 = arith.constant 0 : i32
    %c0_i32_1 = arith.constant 0 : i32
    return %arg0, %arg1, %c0_i32, %c0_i32_0 : i32, i32, i32, i32
  }
}

</mosaic_0001>

<bundles_post_ra>
// kernel: segnet_forward.4
= control target key start
LH: loop header
LB: loop body
LE: loop exit
PB: predicated region body
PF: predicated region fallthrough
CT: control target
= control target key end

     0   :  { %s2976_s27 = smov 0   ;;  %s2978_s28 = smov 0   ;;  %s3647_s0 = inlined_call_operand.vmem [shape: bf16[2,16,16,128], index: 0, kind: input, shape index: {}, may-alias: {0,1,2}]   ;;  %s3648_s1 = inlined_call_operand.vmem [shape: bf16[2,16,16,128], index: 1, kind: input, shape index: {}, may-alias: {0,1,2}]   ;;  %s3649_s2 = inlined_call_operand.vmem [shape: bf16[2,16,16,128], index: 2, kind: input, shape index: {}, may-alias: {0,1,2}]   ;;  %s3650_s3 = inlined_call_operand.vmem [shape: bf16[1152,128], index: 3, kind: input, shape index: {}]   ;;  %s3651_s4 = inlined_call_operand.vmem [shape: f32[1,128], index: 4, kind: input, shape index: {}]   ;;  %s3652_s5 = inlined_call_operand.vmem [shape: f32[1,128], index: 5, kind: input, shape index: {}]   ;;  %s3653_s6 = inlined_call_operand.vmem [shape: f32[1,128], index: 6, kind: input, shape index: {}]   ;;  %s3654_s7 = inlined_call_operand.vmem [shape: bf16[2,16,16,128], index: 7, kind: output, shape index: {0}]   ;;  %s3655_s8 = inlined_call_operand.vmem [shape: f32[2,2,2,128], index: 8, kind: output, shape index: {1}]  }
   0x1   :  { %s2980_s29 = smov 0   ;;  %s2982_s30 = smov 0  }
   0x2   :  { %s2984_s9 = smov 0  }
   0x3 LB: > { %s28_s5 = sadd.s32 1, %s2921_s29  ;;  %s31_s6 = sadd.s32 1, %s2925_s30  ;;  %s2929_s9 = sphi %s2984_s9, %s19_s9   ;;  %s2925_s30 = sphi %s2982_s30, %s3665_s30   ;;  %s2921_s29 = sphi %s2980_s29, %s3664_s29   ;;  %s2917_s28 = sphi %s2978_s28, %s3663_s28   ;;  %s2913_s27 = sphi %s2976_s27, %s3662_s27  }
   0x4   : > { %p29_p0 = scmp.ge.s32.totalorder %s28_s5, 2  ;;  %p2252_p1 = scmp.ge.s32.totalorder %s2929_s9, 1 }
   0x5   : > { %p357_p2 = scmp.lt.s32.totalorder %s2929_s9, 5 }
   0x6   : > { %s3667_s5 = smov (%p29_p0, %s28_s5), 0  ;;  %s3669_s6 = smov (!%p29_p0, %s31_s6), %s2925_s30 }
   0x7   : > { %p358_p3 = pnand %p2252_p1, %p357_p2  ;;  %p33_p4 = scmp.ge.s32.totalorder %s3669_s6, 2 }
   0x8   : > { %v2811_v0 = vld [vmem:[%s3650_s3 + $0x40] sm:$0xff] (!%p358_p3)   ;;  %s2253_s18 = sshll.u32 (!%p358_p3), %s2913_s27, 3  ;;  %v2815_v4 = vld [vmem:[%s3650_s3 + $0x48] sm:$0xff] (!%p358_p3)   ;;  %s2257_s11 = sshll.u32 (!%p358_p3), %s2913_s27, 2  ;;  %v2819_v8 = vld [vmem:[%s3650_s3 + $0x50] sm:$0xff] (!%p358_p3)   ;;  %vm646_vm0 = vcmask (!%p358_p3), 1040384  }
   0x9   : > { %s3671_s6 = smov (%p33_p4, %s3669_s6), 0  ;;  %361 = sbr.rel (%p358_p3) target bundleno = 434 (0x1b2), region = 48 }
   0xa   : > { %v2812_v1 = vld [vmem:[%s3650_s3 + $0xc0] sm:$0xff] (!%p358_p3)   ;;  %2451 = vmatprep.subr.bf16.mxu0 (!%p358_p3), %v2811_v0  ;;  %v2816_v5 = vld [vmem:[%s3650_s3 + $0xc8] sm:$0xff] (!%p358_p3)   ;;  %p3032_p5 = scmp.lt.s32.totalorder (!%p358_p3), %s2253_s18, 15  ;;  %p438_p6 = scmp.lt.s32.totalorder (!%p358_p3), %s2917_s28, 1  ;;  %v2820_v9 = vld [vmem:[%s3650_s3 + $0xd0] sm:$0xff] (!%p358_p3)   ;;  %vm689_vm4 = vcmask (!%p358_p3), 1047552  }
   0xb   : > { %v2813_v2 = vld [vmem:[%s3650_s3] sm:$0xff] (!%p358_p3)   ;;  %2515 = vmatprep.subr.bf16.mxu1 (!%p358_p3), %v2812_v1  ;;  %v2817_v6 = vld [vmem:[%s3650_s3 + $0x8] sm:$0xff] (!%p358_p3)   ;;  %s2258_s16 = sadd.s32 (!%p358_p3), 4294967295, %s2257_s11  ;;  %v2821_v10 = vld [vmem:[%s3650_s3 + $0x10] sm:$0xff] (!%p358_p3)   ;;  %s2378_s24 = sadd.s32 (!%p358_p3), 4, %s2257_s11 }
   0xc   : > { %v2814_v3 = vld [vmem:[%s3650_s3 + $0x80] sm:$0xff] (!%p358_p3)   ;;  %2452 = vmatpush3.bf16.msra.mxu0 (!%p358_p3), %v2813_v2  ;;  %v2818_v7 = vld [vmem:[%s3650_s3 + $0x88] sm:$0xff] (!%p358_p3)   ;;  %p450_p7 = scmp.gt.s32.totalorder (!%p358_p3), %s2258_s16, 0  ;;  %v2822_v11 = vld [vmem:[%s3650_s3 + $0x90] sm:$0xff] (!%p358_p3)   ;;  %p469_p9 = scmp.lt.s32.totalorder (!%p358_p3), %s2378_s24, 7 }
   0xd   : > { %2516 = vmatpush3.bf16.msra.mxu1 (!%p358_p3), %v2814_v3  ;;  %2453 = vmatprep.subr.bf16.mxu0 (!%p358_p3), %v2815_v4  ;;  %v2823_v12 = vld [vmem:[%s3650_s3 + $0x58] sm:$0xff] (!%p358_p3)   ;;  %v2827_v16 = vld [vmem:[%s3650_s3 + $0x60] sm:$0xff] (!%p358_p3)   ;;  %v2831_v20 = vld [vmem:[%s3650_s3 + $0x68] sm:$0xff] (!%p358_p3)   ;;  %p546_p10 = scmp.eq.s32.totalorder (!%p358_p3), %s2913_s27, 0  ;;  %vm647_vm1 = vsmask.f32 (!%p358_p3), 256 }
   0xe   : > { %2517 = vmatprep.subr.bf16.mxu1 (!%p358_p3), %v2816_v5  ;;  %v2824_v13 = vld [vmem:[%s3650_s3 + $0xd8] sm:$0xff] (!%p358_p3)   ;;  %v2828_v17 = vld [vmem:[%s3650_s3 + $0xe0] sm:$0xff] (!%p358_p3)   ;;  %v2832_v21 = vld [vmem:[%s3650_s3 + $0xe8] sm:$0xff] (!%p358_p3)   ;;  %vm690_vm2 = vsmask.f32 (!%p358_p3), 7424  ;;  %p551_p12 = scmp.eq.s32.totalorder (!%p358_p3), %s2913_s27, 1 }
   0xf   : > { %v2825_v14 = vld [vmem:[%s3650_s3 + $0x18] sm:$0xff] (!%p358_p3)   ;;  %v2829_v18 = vld [vmem:[%s3650_s3 + $0x20] sm:$0xff] (!%p358_p3)   ;;  %v2833_v22 = vld [vmem:[%s3650_s3 + $0x28] sm:$0xff] (!%p358_p3)   ;;  %p499_p13 = scmp.lt.s32.totalorder (!%p358_p3), %s2913_s27, 1 }
  0x10   : > { %2454 = vmatpush3.bf16.msra.mxu0 %v2817_v6  ;;  %s3673_s18 = smov (!%p3032_p5, %s2253_s18), 15  ;;  %s3675_s16 = smov (!%p450_p7, %s2258_s16), 0  ;;  %v2826_v15 = vld [vmem:[%s3650_s3 + $0x98] sm:$0xff]   ;;  %v2830_v19 = vld [vmem:[%s3650_s3 + $0xa0] sm:$0xff]   ;;  %v2834_v23 = vld [vmem:[%s3650_s3 + $0xa8] sm:$0xff]  }
  0x11   : > { %2518 = vmatpush3.bf16.msra.mxu1 %v2818_v7  ;;  %2455 = vmatprep.subr.bf16.mxu0 %v2819_v8  ;;  %s3677_s28 = smov (!%p438_p6, %s2917_s28), 1  ;;  %s2259_s25 = sshll.u32 %s3675_s16, 1  ;;  %v2835_v24 = vld [vmem:[%s3650_s3 + $0x70] sm:$0xff]   ;;  %v2839_v28 = vld [vmem:[%s3650_s3 + $0x78] sm:$0xff]   ;;  %v2844_v41 = vld [vmem:[%s3650_s3 + $0x140] sm:$0xff]  }
  0x12   : > { %2519 = vmatprep.subr.bf16.mxu1 %v2820_v9  ;;  %p455_p8 = scmp.lt.s32.totalorder %s2259_s25, 15  ;;  %s2254_s19 = sshll.u32 %s3673_s18, 1  ;;  %v2836_v25 = vld [vmem:[%s3650_s3 + $0xf0] sm:$0xff]   ;;  %v2840_v29 = vld [vmem:[%s3650_s3 + $0xf8] sm:$0xff]   ;;  %vm3160_vm3 = vmand %vm646_vm0, %vm647_vm1 }
  0x13   : > { %s3087_s26 = sshll.u32 %s3677_s28, 5  ;;  %v2837_v26 = vld [vmem:[%s3650_s3 + $0x30] sm:$0xff]   ;;  %s3681_s24 = smov (!%p469_p9, %s2378_s24), 7  ;;  %v2841_v30 = vld [vmem:[%s3650_s3 + $0x38] sm:$0xff]   ;;  %vm3175_vm5 = vmand %vm689_vm4, %vm690_vm2 }
  0x14   : > { %2456 = vmatpush3.bf16.msra.mxu0 %v2821_v10  ;;  %s3679_s25 = smov (!%p455_p8, %s2259_s25), 15  ;;  %s3093_s12 = sadd.s32 %s3087_s26, %s2254_s19  ;;  %v2838_v27 = vld [vmem:[%s3650_s3 + $0xb0] sm:$0xff]   ;;  %v2842_v31 = vld [vmem:[%s3650_s3 + $0xb8] sm:$0xff]   ;;  %v2845_v56 = vld [vmem:[%s3650_s3 + $0x100] sm:$0xff]  }
  0x15   : > { %2520 = vmatpush3.bf16.msra.mxu1 %v2822_v11  ;;  %2457 = vmatprep.subr.bf16.mxu0 %v2823_v12  ;;  %s2260_s13 = sshll.u32 %s3679_s25, 1  ;;  %s2256_s22 = sshll.u32 %s3093_s12, 2  ;;  %v2851_v59 = vld [vmem:[%s3650_s3 + $0x1c0] sm:$0xff]   ;;  %v2847_v63 = vld [vmem:[%s3650_s3 + $0x148] sm:$0xff]   ;;  %v2850_v12 = vld [vmem:[%s3650_s3 + $0x150] sm:$0xff]  }
  0x16   : > { %2521 = vmatprep.subr.bf16.mxu1 %v2824_v13  ;;  %s459_s19 = sadd.s32 %s2260_s13, %s3087_s26  ;;  %s3130_s23 = scalar_lea.vmem %s3647_s0, %s2256_s22  ;;  %v2853_v3 = vld [vmem:[%s3650_s3 + $0x180] sm:$0xff]   ;;  %v2848_v9 = vld [vmem:[%s3650_s3 + $0x108] sm:$0xff]  }
  0x17   : > { %s2262_s13 = sshll.u32 %s459_s19, 2  ;;  %s2264_s17 = sshll.u32 %s3681_s24, 1  ;;  %v3151_v33 = vld [vmem:[%s3130_s23] sm:$0xff]   ;;  %v3165_v45 = vld [vmem:[%s3130_s23 + $0x8] sm:$0xff]   ;;  %v3183_v58 = vld [vmem:[%s3130_s23 + $0x10] sm:$0xff]  }
  0x18   : > { %2458 = vmatpush3.bf16.msra.mxu0 %v2825_v14  ;;  %s461_s15 = scalar_lea.vmem %s3648_s1, %s2262_s13  ;;  %p3146_p11 = scmp.lt.s32.totalorder %s2264_s17, 15  ;;  %v574_v37 = vshrl.u32 %v3151_v33, 16  ;;  %v577_v38 = vshll.u32 %v3151_v33, 16  ;;  %v581_v49 = vshrl.u32 %v3165_v45, 16  ;;  %v584_v50 = vshll.u32 %v3165_v45, 16  ;;  %v3205_v8 = vld [vmem:[%s3130_s23 + $0x18] sm:$0xff]  }
  0x19   : > { %2522 = vmatpush3.bf16.msra.mxu1 %v2826_v15  ;;  %2459 = vmatprep.subr.bf16.mxu0 %v2827_v16  ;;  %v2443_v32 = vld [vmem:[%s461_s15 + $0x8] sm:$0xff]   ;;  %s547_s19 = scalar_select %p546_p10, 0.0, 1.0  ;;  %v588_v0 = vshrl.u32 %v3183_v58, 16  ;;  %v591_v2 = vshll.u32 %v3183_v58, 16  ;;  %v595_v13 = vshrl.u32 %v3205_v8, 16 }
  0x1a   : > { %2523 = vmatprep.subr.bf16.mxu1 %v2828_v17  ;;  %v2397_v34 = vunpack.c.l.bf16 %v2443_v32  ;;  %v2398_v35 = vunpack.c.h.bf16 %v2443_v32  ;;  %s3683_s17 = smov (!%p3146_p11, %s2264_s17), 15  ;;  %v576_v42 = vrot.slane %v574_v37, 7  ;;  %v661_v52 = vrot.slane %v577_v38, 1  ;;  %v2856_v15 = vld [vmem:[%s3650_s3 + $0x1c8] sm:$0xff]   ;;  %v2852_v16 = vld [vmem:[%s3650_s3 + $0x110] sm:$0xff]   ;;  %s3597_s20 = scalar_lea.vmem %s3654_s7, %s2256_s22 }
  0x1b   : > { %v548_v36 = vstv %s547_s19  ;;  %s2265_s18 = sshll.u32 %s3683_s17, 1  ;;  %v583_v57 = vrot.slane %v581_v49, 7  ;;  %v590_v7 = vrot.slane %v588_v0, 7  ;;  %v663_v11 = vrot.slane %v584_v50, 1  ;;  %v2863_v32 = vld [vmem:[%s3650_s3 + $0x190] sm:$0xff]   ;;  %s3685_s27 = smov (!%p499_p13, %s2913_s27), 1 }
  0x1c   : > { %2460 = vmatpush3.bf16.msra.mxu0 %v2829_v18  ;;  %v549_v39 = vmul.f32 %v2397_v34, %v548_v36  ;;  %v550_v40 = vmul.f32 %v2398_v35, %v548_v36  ;;  %v579_v46 = vor.u32 %v577_v38, %v576_v42  ;;  %s3170_s10 = sadd.s32 %s2265_s18, %s3087_s26  ;;  %v662_v1 = vor.u32 %v661_v52, %v574_v37  ;;  %v3264_v35 = vld [vmem:[%s3130_s23 + $0x28] sm:$0xff]   ;;  %v2862_v37 = vld [vmem:[%s3650_s3 + $0x120] sm:$0xff]   ;;  %v2866_v38 = vld [vmem:[%s3650_s3 + $0x1d8] sm:$0xff]   ;;  %s2272_s12 = sshll.u32 %s3677_s28, 1 }
  0x1d   : > { %2524 = vmatpush3.bf16.msra.mxu1 %v2830_v19  ;;  %2461 = vmatprep.subr.bf16.mxu0 %v2831_v20  ;;  %v586_v62 = vor.u32 %v584_v50, %v583_v57  ;;  %v593_v10 = vor.u32 %v591_v2, %v590_v7  ;;  %v598_v17 = vshll.u32 %v3205_v8, 16  ;;  %v2858_v19 = vld [vmem:[%s3650_s3 + $0x188] sm:$0xff]   ;;  %v597_v20 = vrot.slane %v595_v13, 7  ;;  %v2871_v52 = vld [vmem:[%s3650_s3 + $0x1e0] sm:$0xff]   ;;  %s2267_s13 = sshll.u32 %s3170_s10, 2  ;;  %s502_s22 = sadd.s32 %s2272_s12, %s3685_s27 }
  0x1e   : > { %2525 = vmatprep.subr.bf16.mxu1 %v2832_v21  ;;  %v556_v44 = vpack.c.bf16 %v550_v40, %v549_v39  ;;  %v650_v51 = vsel %vm3160_vm3, 0, %v579_v46  ;;  %v3218_v14 = vsel %vm3175_vm5, %v662_v1, 0  ;;  %v3235_v21 = vld [vmem:[%s3130_s23 + $0x20] sm:$0xff]   ;;  %v609_v46 = vshrl.u32 %v3264_v35, 16  ;;  %s480_s14 = scalar_lea.vmem %s3649_s2, %s2267_s13  ;;  %s2273_s11 = sshll.u32 %s502_s22, 1 }
  0x1f   : > { %1558 = vmatprep.mubr.bf16.mxu1 %v650_v51  ;;  %v3202_v6 = vsel %vm3160_vm3, 0, %v586_v62  ;;  %v3229_v18 = vsel %vm3160_vm3, 0, %v593_v10  ;;  %v667_v42 = vrot.slane %v598_v17, 1  ;;  %v2875_v62 = vld [vmem:[%s3650_s3 + $0x1a8] sm:$0xff]   ;;  %s552_s10 = scalar_select %p551_p12, 0.0, 1.0 }
  0x20   : > { %2462 = vmatpush3.bf16.msra.mxu0 %v2833_v22  ;;  %1461 = vmatprep.mubr.bf16.mxu0 %v556_v44  ;;  %v567_v47 = vshrl.u32 %v556_v44, 16  ;;  %v570_v48 = vshll.u32 %v556_v44, 16  ;;  %v2855_v22 = vld [vmem:[%s3650_s3 + $0x158] sm:$0xff]   ;;  %v611_v57 = vrot.slane %v609_v46, 7  ;;  %s504_s25 = scalar_lea.vmem %s3655_s8, %s2273_s11 }
  0x21   : > { %2526 = vmatpush3.bf16.msra.mxu1 %v2834_v23  ;;  %2463 = vmatprep.subr.bf16.mxu0 %v2835_v24  ;;  %v602_v23 = vshrl.u32 %v3235_v21, 16  ;;  %v2861_v24 = vld [vmem:[%s3650_s3 + $0x1d0] sm:$0xff]   ;;  %v2868_v44 = vld [vmem:[%s3650_s3 + $0x198] sm:$0xff]  }
  0x22   : > { %2527 = vmatprep.subr.bf16.mxu1 %v2836_v25  ;;  %v569_v53 = vrot.slane %v567_v47, 7  ;;  %v659_v54 = vrot.slane %v570_v48, 1  ;;  %v664_v25 = vor.u32 %v663_v11, %v581_v49  ;;  %v2879_v11 = vld [vmem:[%s3650_s3 + $0x138] sm:$0xff]  }
  0x24   : > { %2464 = vmatpush3.bf16.msra.mxu0 %v2837_v26  ;;  %v572_v60 = vor.u32 %v570_v48, %v569_v53  ;;  %v660_v61 = vor.u32 %v659_v54, %v567_v47  ;;  %v665_v26 = vrot.slane %v591_v2, 1  ;;  %v3261_v34 = vsel %vm3175_vm5, %v664_v25, 0  ;;  %v2867_v47 = vld [vmem:[%s3650_s3 + $0x128] sm:$0xff]   ;;  %v3291_v48 = vld [vmem:[%s3130_s23 + $0x30] sm:$0xff]   ;;  %v2877_v2 = vld [vmem:[%s3650_s3 + $0x178] sm:$0xff]  }
  0x25   : > { %2528 = vmatpush3.bf16.msra.mxu1 %v2838_v27  ;;  %2465 = vmatprep.subr.bf16.mxu0 %v2839_v28  ;;  %v2857_v27 = vld [vmem:[%s3650_s3 + $0x118] sm:$0xff]   ;;  %v600_v28 = vor.u32 %v598_v17, %v597_v20  ;;  %v668_v53 = vor.u32 %v667_v42, %v595_v13  ;;  %v612_v54 = vshll.u32 %v3264_v35, 16 }
  0x26   : > { %2529 = vmatprep.subr.bf16.mxu1 %v2840_v29  ;;  %v649_v4 = vsel %vm3160_vm3, 0, %v572_v60  ;;  %v692_v5 = vsel %vm3175_vm5, %v660_v61, 0  ;;  %v605_v29 = vshll.u32 %v3235_v21, 16  ;;  %v666_v39 = vor.u32 %v665_v26, %v588_v0  ;;  %v2874_v61 = vld [vmem:[%s3650_s3 + $0x1e8] sm:$0xff]   ;;  %v3330_v0 = vld [vmem:[%s3130_s23 + $0x38] sm:$0xff]  }
  0x27   : > { %v3268_v36 = vsel %vm3160_vm3, 0, %v600_v28  ;;  %v616_v60 = vshrl.u32 %v3291_v48, 16  ;;  %v626_v7 = vshll.u32 %v3330_v0, 16  ;;  %v623_v10 = vshrl.u32 %v3330_v0, 16  ;;  %v2882_v17 = vld [vmem:[%s3650_s3 + $0x1b8] sm:$0xff]  }
  0x28   : > { %2466 = vmatpush3.bf16.msra.mxu0 %v2841_v30  ;;  %v2860_v30 = vld [vmem:[%s3650_s3 + $0x160] sm:$0xff]   ;;  %v3295_v49 = vsel %vm3175_vm5, %v666_v39, 0  ;;  %v669_v1 = vrot.slane %v605_v29, 1 }
  0x29   : > { %2530 = vmatpush3.bf16.msra.mxu1 %v2842_v31  ;;  %2579 = vmatprep.subr.bf16.mxu0 %v2844_v41  ;;  %v604_v31 = vrot.slane %v602_v23, 7  ;;  %v2865_v41 = vld [vmem:[%s3650_s3 + $0x168] sm:$0xff]   ;;  %v675_v13 = vrot.slane %v626_v7, 1  ;;  %v625_v28 = vrot.slane %v623_v10, 7 }
  0x2a   : > { %2643 = vmatprep.subr.bf16.mxu1 %v2851_v59  ;;  %v2872_v59 = vld [vmem:[%s3650_s3 + $0x130] sm:$0xff]   ;;  %v670_v20 = vor.u32 %v669_v1, %v602_v23 }
  0x2b   : > { %1462 = vmatmul.mubr.bf16.vlgmr.msra.gmra.mrb[0].mxu0 %v649_v4  ;;  %v607_v40 = vor.u32 %v605_v29, %v604_v31  ;;  %v618_v4 = vrot.slane %v616_v60, 7  ;;  %v2400_v29 = vld [vmem:[%s480_s14] sm:$0xff]  }
  0x2c   : > { %1559 = vmatmul.mubr.bf16.vlgmr.msra.gmra.mrb[0].mxu1 %v692_v5  ;;  %2580 = vmatpush3.bf16.msra.mxu0 %v2845_v56  ;;  %v2873_v56 = vld [vmem:[%s3650_s3 + $0x1a0] sm:$0xff]   ;;  %v619_v5 = vshll.u32 %v3291_v48, 16  ;;  %v3381_v23 = vsel %vm3175_vm5, %v670_v20, 0  ;;  %v2402_v31 = vunpack.c.h.bf16 %v2400_v29 }
  0x2d   : > { %1469 = vmatprep.mubr.bf16.mxu0 %v3151_v33  ;;  %1566 = vmatprep.mubr.bf16.mxu1 %v3202_v6  ;;  %v3299_v50 = vsel %vm3160_vm3, 0, %v607_v40  ;;  %v628_v40 = vor.u32 %v626_v7, %v625_v28 }
  0x2e   : > { %2581 = vmatprep.subr.bf16.mxu0 %v2847_v63  ;;  %2644 = vmatpush3.bf16.msra.mxu1 %v2853_v3  ;;  %v3327_v63 = vsel %vm3175_vm5, %v668_v53, 0  ;;  %v614_v3 = vor.u32 %v612_v54, %v611_v57 }
  0x2f   : > { %2645 = vmatprep.subr.bf16.mxu1 %v2856_v15 }
  0x30   : > { %2582 = vmatpush3.bf16.msra.mxu0 %v2848_v9  ;;  %v2878_v9 = vld [vmem:[%s3650_s3 + $0x1f0] sm:$0xff]   ;;  %v3353_v15 = vsel %vm3160_vm3, 0, %v614_v3 }
  0x31   : > { %2583 = vmatprep.subr.bf16.mxu0 %v2850_v12  ;;  %v2880_v12 = vld [vmem:[%s3650_s3 + $0x1b0] sm:$0xff]  }
  0x32   : > { %2646 = vmatpush3.bf16.msra.mxu1 %v2858_v19  ;;  %v676_v19 = vor.u32 %v675_v13, %v623_v10 }
  0x33   : > { %1470 = vmatmul.mubr.bf16.gmra.mrb[4].mxu0 %v650_v51  ;;  %2647 = vmatprep.subr.bf16.mxu1 %v2861_v24  ;;  %v2870_v51 = vld [vmem:[%s3650_s3 + $0x170] sm:$0xff]   ;;  %v621_v24 = vor.u32 %v619_v5, %v618_v4 }
  0x34   : > { %1567 = vmatmul.mubr.bf16.gmra.mrb[4].mxu1 %v3218_v14  ;;  %1477 = vmatprep.mubr.bf16.mxu0 %v3165_v45  ;;  %v3373_v25 = vsel %vm3175_vm5, %v676_v19, 0 }
  0x35   : > { %1574 = vmatprep.mubr.bf16.mxu1 %v3229_v18  ;;  %2584 = vmatpush3.bf16.msra.mxu0 %v2852_v16  ;;  %v2881_v16 = vld [vmem:[%s3650_s3 + $0x1f8] sm:$0xff]   ;;  %v3385_v26 = vsel %vm3160_vm3, 0, %v621_v24 }
  0x36   : > { %2585 = vmatprep.subr.bf16.mxu0 %v2855_v22  ;;  %2648 = vmatpush3.bf16.msra.mxu1 %v2863_v32  ;;  %v2883_v22 = vld [vmem:[%s3650_s3 + $0x200] sm:$0xff]   ;;  %v553_v32 = vstv %s552_s10 }
  0x37   : > { %2649 = vmatprep.subr.bf16.mxu1 %v2866_v38  ;;  %v555_v39 = vmul.f32 %v2402_v31, %v553_v32 }
  0x39   : > { %2586 = vmatpush3.bf16.msra.mxu0 %v2857_v27  ;;  %v671_v27 = vrot.slane %v612_v54, 1 }
  0x3a   : > { %2587 = vmatprep.subr.bf16.mxu0 %v2860_v30  ;;  %2650 = vmatpush3.bf16.msra.mxu1 %v2868_v44  ;;  %v2401_v30 = vunpack.c.l.bf16 %v2400_v29  ;;  %v673_v44 = vrot.slane %v619_v5, 1 }
  0x3b   : > { %1478 = vmatmul.mubr.bf16.gmra.mrb[8].mxu0 %v3202_v6  ;;  %2651 = vmatprep.subr.bf16.mxu1 %v2871_v52  ;;  %v3403_v52 = vsel %vm3160_vm3, 0, %v628_v40 }
  0x3c   : > { %1575 = vmatmul.mubr.bf16.gmra.mrb[8].mxu1 %v3261_v34  ;;  %1485 = vmatprep.mubr.bf16.mxu0 %v3183_v58  ;;  %v554_v38 = vmul.f32 %v2401_v30, %v553_v32  ;;  %v674_v54 = vor.u32 %v673_v44, %v616_v60  ;;  %v2884_v60 = vld [vmem:[%s3650_s3 + $0x208] sm:$0xff]  }
  0x3d   : > { %1582 = vmatprep.mubr.bf16.mxu1 %v3268_v36  ;;  %2588 = vmatpush3.bf16.msra.mxu0 %v2862_v37  ;;  %v672_v37 = vor.u32 %v671_v27, %v609_v46 }
  0x3e   : > { %2589 = vmatprep.subr.bf16.mxu0 %v2865_v41  ;;  %2652 = vmatpush3.bf16.msra.mxu1 %v2873_v56  ;;  %v3393_v41 = vpack.c.bf16 %v555_v39, %v554_v38 }
  0x3f   : > { %2653 = vmatprep.subr.bf16.mxu1 %v2874_v61  ;;  %v3397_v42 = vsel %vm3175_vm5, %v672_v37, 0 }
  0x41   : > { %2590 = vmatpush3.bf16.msra.mxu0 %v2867_v47  ;;  %v630_v47 = vshrl.u32 %v3393_v41, 16 }
  0x42   : > { %2591 = vmatprep.subr.bf16.mxu0 %v2870_v51  ;;  %2654 = vmatpush3.bf16.msra.mxu1 %v2875_v62  ;;  %v633_v51 = vshll.u32 %v3393_v41, 16  ;;  %v3423_v62 = vsel %vm3175_vm5, %v674_v54, 0 }
  0x43   : > { %1486 = vmatmul.mubr.bf16.gmra.mrb[12].mxu0 %v3229_v18  ;;  %2655 = vmatprep.subr.bf16.mxu1 %v2878_v9  ;;  %v632_v53 = vrot.slane %v630_v47, 7 }
  0x44   : > { %1583 = vmatmul.mubr.bf16.gmra.mrb[12].mxu1 %v3295_v49  ;;  %1493 = vmatprep.mubr.bf16.mxu0 %v3205_v8  ;;  %v677_v46 = vrot.slane %v633_v51, 1 }
  0x45   : > { %1590 = vmatprep.mubr.bf16.mxu1 %v3299_v50  ;;  %2592 = vmatpush3.bf16.msra.mxu0 %v2872_v59  ;;  %v3411_v56 = vor.u32 %v633_v51, %v632_v53 }
  0x46   : > { %2593 = vmatprep.subr.bf16.mxu0 %v2877_v2  ;;  %2656 = vmatpush3.bf16.msra.mxu1 %v2880_v12  ;;  %v3413_v57 = vor.u32 %v677_v46, %v630_v47 }
  0x47   : > { %2657 = vmatprep.subr.bf16.mxu1 %v2881_v16  ;;  %v658_v59 = vsel %vm3160_vm3, 0, %v3411_v56 }
  0x48   : > { %v701_v61 = vsel %vm3175_vm5, %v3413_v57, 0 }
  0x49   : > { %2594 = vmatpush3.bf16.msra.mxu0 %v2879_v11 }
  0x4a   : > { %2723 = vmatprep.subr.bf16.mxu0 %v2883_v22  ;;  %2658 = vmatpush3.bf16.msra.mxu1 %v2882_v17 }
  0x4b   : > { %1494 = vmatmul.mubr.bf16.gmra.mrb[16].mxu0 %v3268_v36  ;;  %2755 = vmatprep.subr.bf16.mxu1 %v2883_v22 }
  0x4c   : > { %1591 = vmatmul.mubr.bf16.gmra.mrb[16].mxu1 %v3327_v63  ;;  %1501 = vmatprep.mubr.bf16.mxu0 %v3235_v21 }
  0x4d   : > { %1598 = vmatprep.mubr.bf16.mxu1 %v3353_v15 }
  0x53   : > { %1502 = vmatmul.mubr.bf16.gmra.mrb[20].mxu0 %v3299_v50 }
  0x54   : > { %1599 = vmatmul.mubr.bf16.gmra.mrb[20].mxu1 %v3381_v23  ;;  %1509 = vmatprep.mubr.bf16.mxu0 %v3264_v35 }
  0x55   : > { %1606 = vmatprep.mubr.bf16.mxu1 %v3385_v26 }
  0x5b   : > { %1510 = vmatmul.mubr.bf16.gmra.mrb[24].mxu0 %v3353_v15 }
  0x5c   : > { %1607 = vmatmul.mubr.bf16.gmra.mrb[24].mxu1 %v3397_v42  ;;  %1517 = vmatprep.mubr.bf16.mxu0 %v3291_v48 }
  0x5d   : > { %1614 = vmatprep.mubr.bf16.mxu1 %v3403_v52 }
  0x63   : > { %1518 = vmatmul.mubr.bf16.gmra.mrb[28].mxu0 %v3385_v26 }
  0x64   : > { %1615 = vmatmul.mubr.bf16.gmra.mrb[28].mxu1 %v3423_v62  ;;  %1655 = vmatprep.mubr.bf16.mxu0 %v3218_v14  ;;  %v2885_v14 = vld [vmem:[%s3650_s3 + $0x210] sm:$0xff]  }
  0x65   : > { %1752 = vmatprep.mubr.bf16.mxu1 %v3165_v45 }
  0x6b   : > { %1656 = vmatmul.mubr.bf16.vlgmr.msra.gmra.mrb[32].mxu0 %v3151_v33  ;;  %v2886_v33 = vld [vmem:[%s3650_s3 + $0x218] sm:$0xff]  }
  0x6c   : > { %1753 = vmatmul.mubr.bf16.vlgmr.msra.gmra.mrb[32].mxu1 %v3202_v6  ;;  %2724 = vmatpush3.bf16.msra.mxu0 %v2883_v22  ;;  %v2887_v6 = vld [vmem:[%s3650_s3 + $0x220] sm:$0xff]  }
  0x6d   : > { %1663 = vmatprep.mubr.bf16.mxu0 %v3261_v34  ;;  %1760 = vmatprep.mubr.bf16.mxu1 %v3183_v58 }
  0x6e   : > { %2725 = vmatprep.subr.bf16.mxu0 %v2884_v60  ;;  %2763 = vmatpush3.bf16.msra.mxu1 %v2883_v22 }
  0x6f   : > { %2756 = vmatprep.subr.bf16.mxu1 %v2884_v60 }
  0x70   : > { %2726 = vmatpush3.bf16.msra.mxu0 %v2884_v60 }
  0x71   : > { %2727 = vmatprep.subr.bf16.mxu0 %v2885_v14 }
  0x72   : > { %2764 = vmatpush3.bf16.msra.mxu1 %v2884_v60 }
  0x73   : > { %1664 = vmatmul.mubr.bf16.gmra.mrb[36].mxu0 %v3165_v45  ;;  %2757 = vmatprep.subr.bf16.mxu1 %v2885_v14  ;;  %v2888_v45 = vld [vmem:[%s3650_s3 + $0x228] sm:$0xff]  }
  0x74   : > { %1761 = vmatmul.mubr.bf16.gmra.mrb[36].mxu1 %v3229_v18  ;;  %1671 = vmatprep.mubr.bf16.mxu0 %v3295_v49  ;;  %v2889_v18 = vld [vmem:[%s3650_s3 + $0x230] sm:$0xff]  }
  0x75   : > { %1768 = vmatprep.mubr.bf16.mxu1 %v3205_v8  ;;  %2728 = vmatpush3.bf16.msra.mxu0 %v2885_v14 }
  0x76   : > { %2729 = vmatprep.subr.bf16.mxu0 %v2886_v33  ;;  %2765 = vmatpush3.bf16.msra.mxu1 %v2885_v14 }
  0x77   : > { %2758 = vmatprep.subr.bf16.mxu1 %v2886_v33 }
  0x79   : > { %2730 = vmatpush3.bf16.msra.mxu0 %v2886_v33 }
  0x7a   : > { %2731 = vmatprep.subr.bf16.mxu0 %v2887_v6  ;;  %2766 = vmatpush3.bf16.msra.mxu1 %v2886_v33 }
  0x7b   : > { %1672 = vmatmul.mubr.bf16.gmra.mrb[40].mxu0 %v3183_v58  ;;  %2759 = vmatprep.subr.bf16.mxu1 %v2887_v6  ;;  %v2890_v58 = vld [vmem:[%s3650_s3 + $0x238] sm:$0xff]  }
  0x7c   : > { %1769 = vmatmul.mubr.bf16.gmra.mrb[40].mxu1 %v3268_v36  ;;  %1679 = vmatprep.mubr.bf16.mxu0 %v3327_v63 }
  0x7d   : > { %1776 = vmatprep.mubr.bf16.mxu1 %v3235_v21  ;;  %2732 = vmatpush3.bf16.msra.mxu0 %v2887_v6 }
  0x7e   : > { %2733 = vmatprep.subr.bf16.mxu0 %v2888_v45  ;;  %2767 = vmatpush3.bf16.msra.mxu1 %v2887_v6 }
  0x7f   : > { %2760 = vmatprep.subr.bf16.mxu1 %v2888_v45 }
  0x81   : > { %2734 = vmatpush3.bf16.msra.mxu0 %v2888_v45 }
  0x82   : > { %2735 = vmatprep.subr.bf16.mxu0 %v2889_v18  ;;  %2768 = vmatpush3.bf16.msra.mxu1 %v2888_v45 }
  0x83   : > { %1680 = vmatmul.mubr.bf16.gmra.mrb[44].mxu0 %v3205_v8  ;;  %2761 = vmatprep.subr.bf16.mxu1 %v2889_v18 }
  0x84   : > { %1777 = vmatmul.mubr.bf16.gmra.mrb[44].mxu1 %v3299_v50  ;;  %1687 = vmatprep.mubr.bf16.mxu0 %v3381_v23 }
  0x85   : > { %1784 = vmatprep.mubr.bf16.mxu1 %v3264_v35  ;;  %2736 = vmatpush3.bf16.msra.mxu0 %v2889_v18 }
  0x86   : > { %2737 = vmatprep.subr.bf16.mxu0 %v2890_v58  ;;  %2769 = vmatpush3.bf16.msra.mxu1 %v2889_v18 }
  0x87   : > { %2762 = vmatprep.subr.bf16.mxu1 %v2890_v58 }
  0x89   : > { %2738 = vmatpush3.bf16.msra.mxu0 %v2890_v58 }
  0x8a   : > { %2770 = vmatpush3.bf16.msra.mxu1 %v2890_v58 }
  0x8b   : > { %1688 = vmatmul.mubr.bf16.gmra.mrb[48].mxu0 %v3235_v21  ;;  %v3497_v21 = vld [vmem:[%s3651_s4] ss:$0 sm:$0xff] }
  0x8c   : > { %1785 = vmatmul.mubr.bf16.gmra.mrb[48].mxu1 %v3353_v15  ;;  %1695 = vmatprep.mubr.bf16.mxu0 %v3397_v42 }
  0x8d   : > { %1792 = vmatprep.mubr.bf16.mxu1 %v3291_v48 }
  0x93   : > { %1696 = vmatmul.mubr.bf16.gmra.mrb[52].mxu0 %v3264_v35 }
  0x94   : > { %1793 = vmatmul.mubr.bf16.gmra.mrb[52].mxu1 %v3385_v26  ;;  %1703 = vmatprep.mubr.bf16.mxu0 %v3423_v62 }
  0x95   : > { %1800 = vmatprep.mubr.bf16.mxu1 %v3330_v0 }
  0x9b   : > { %1704 = vmatmul.mubr.bf16.gmra.mrb[56].mxu0 %v3291_v48 }
  0x9c   : > { %1801 = vmatmul.mubr.bf16.gmra.mrb[56].mxu1 %v3403_v52  ;;  %1711 = vmatprep.mubr.bf16.mxu0 %v3373_v25 }
  0x9d   : > { %1808 = vmatprep.mubr.bf16.mxu1 %v3393_v41 }
  0xa3   : > { %1712 = vmatmul.mubr.bf16.gmra.mrb[60].mxu0 %v3330_v0 }
  0xa4   : > { %1809 = vmatmul.mubr.bf16.gmra.mrb[60].mxu1 %v658_v59  ;;  %2739 = vmatprep.mubr.bf16.mxu0 %v3261_v34 }
  0xa5   : > { %2747 = vmatprep.mubr.bf16.mxu1 %v3397_v42 }
  0xab   : > { %2740 = vmatmul.mubr.bf16.vlgmr.msra.gmra.mrb[64].mxu0 %v3295_v49 }
  0xac   : > { %2748 = vmatmul.mubr.bf16.vlgmr.msra.gmra.mrb[64].mxu1 %v3423_v62  ;;  %2743 = vmatprep.mubr.bf16.mxu0 %v3327_v63 }
  0xad   : > { %2751 = vmatprep.mubr.bf16.mxu1 %v3373_v25 }
  0xb3   : > { %2744 = vmatmul.mubr.bf16.gmra.mrb[68].mxu0 %v3381_v23 }
  0xb4   : > { %2752 = vmatmul.mubr.bf16.gmra.mrb[68].mxu1 %v701_v61 }
  0xfe   : > { %v2467_v43 = vpop.f32.mrb[0].mxu0 }
  0xff   : > { %v2531_v8 = vpop.f32.mrb[0].mxu1  ;;  %v2468_v34 = vpop.f32.mrb[1].mxu0 }
 0x100   : > { %v2532_v35 = vpop.f32.mrb[1].mxu1  ;;  %v2469_v36 = vadd.f32 %v2468_v34, %v2467_v43  ;;  %v2470_v48 = vpop.f32.mrb[2].mxu0 }
 0x101   : > { %v2533_v49 = vadd.f32 %v2532_v35, %v2531_v8  ;;  %v2534_v50 = vpop.f32.mrb[2].mxu1  ;;  %v2471_v63 = vpop.f32.mrb[3].mxu0 }
 0x102   : > { %v2535_v0 = vpop.f32.mrb[3].mxu1  ;;  %v1464_v55 = vadd.f32 %v2469_v36, %v3497_v21  ;;  %v2472_v1 = vadd.f32 %v2471_v63, %v2470_v48 }
 0x103   : > { %v2536_v2 = vadd.f32 %v2535_v0, %v2534_v50 }
 0x104   : > { %v1467_v3 = vadd.f32 %v2472_v1, %v3497_v21  ;;  %v3501_v4 = vadd.f32 %v2533_v49, %v1464_v55 }
 0x106   : > { %v3503_v5 = vadd.f32 %v2536_v2, %v1467_v3  ;;  %v2473_v7 = vpop.f32.mrb[4].mxu0 }
 0x107   : > { %v2537_v9 = vpop.f32.mrb[4].mxu1  ;;  %v2474_v10 = vpop.f32.mrb[5].mxu0 }
 0x108   : > { %v2538_v11 = vpop.f32.mrb[5].mxu1  ;;  %v2475_v12 = vadd.f32 %v2474_v10, %v2473_v7  ;;  %v2476_v13 = vpop.f32.mrb[6].mxu0 }
 0x109   : > { %v2539_v15 = vadd.f32 %v2538_v11, %v2537_v9  ;;  %v2540_v16 = vpop.f32.mrb[6].mxu1  ;;  %v2477_v17 = vpop.f32.mrb[7].mxu0 }
 0x10a   : > { %v2541_v19 = vpop.f32.mrb[7].mxu1  ;;  %v1472_v20 = vadd.f32 %v2475_v12, %v3497_v21  ;;  %v2478_v22 = vadd.f32 %v2477_v17, %v2476_v13 }
 0x10b   : > { %v2542_v24 = vadd.f32 %v2541_v19, %v2540_v16 }
 0x10c   : > { %v1475_v25 = vadd.f32 %v2478_v22, %v3497_v21  ;;  %v3507_v23 = vadd.f32 %v2539_v15, %v1472_v20 }
 0x10e   : > { %v3509_v26 = vadd.f32 %v2542_v24, %v1475_v25  ;;  %v2479_v27 = vpop.f32.mrb[8].mxu0 }
 0x10f   : > { %v2543_v28 = vpop.f32.mrb[8].mxu1  ;;  %v2480_v29 = vpop.f32.mrb[9].mxu0 }
 0x110   : > { %v2544_v30 = vpop.f32.mrb[9].mxu1  ;;  %v2481_v31 = vadd.f32 %v2480_v29, %v2479_v27  ;;  %v2482_v32 = vpop.f32.mrb[10].mxu0 }
 0x111   : > { %v2545_v37 = vadd.f32 %v2544_v30, %v2543_v28  ;;  %v2546_v38 = vpop.f32.mrb[10].mxu1  ;;  %v2483_v39 = vpop.f32.mrb[11].mxu0 }
 0x112   : > { %v2547_v40 = vpop.f32.mrb[11].mxu1  ;;  %v1480_v41 = vadd.f32 %v2481_v31, %v3497_v21  ;;  %v2484_v42 = vadd.f32 %v2483_v39, %v2482_v32 }
 0x113   : > { %v2548_v44 = vadd.f32 %v2547_v40, %v2546_v38 }
 0x114   : > { %v1483_v47 = vadd.f32 %v2484_v42, %v3497_v21  ;;  %v3513_v51 = vadd.f32 %v2545_v37, %v1480_v41 }
 0x116   : > { %v3515_v52 = vadd.f32 %v2548_v44, %v1483_v47  ;;  %v2485_v53 = vpop.f32.mrb[12].mxu0 }
 0x117   : > { %v2549_v46 = vpop.f32.mrb[12].mxu1  ;;  %v2486_v54 = vpop.f32.mrb[13].mxu0 }
 0x118   : > { %v2550_v56 = vpop.f32.mrb[13].mxu1  ;;  %v2487_v57 = vadd.f32 %v2486_v54, %v2485_v53  ;;  %v2488_v59 = vpop.f32.mrb[14].mxu0 }
 0x119   : > { %v2551_v61 = vadd.f32 %v2550_v56, %v2549_v46  ;;  %v2552_v62 = vpop.f32.mrb[14].mxu1  ;;  %v2489_v60 = vpop.f32.mrb[15].mxu0 }
 0x11a   : > { %v2553_v14 = vpop.f32.mrb[15].mxu1  ;;  %v1488_v33 = vadd.f32 %v2487_v57, %v3497_v21  ;;  %v2490_v6 = vadd.f32 %v2489_v60, %v2488_v59 }
 0x11b   : > { %v2554_v45 = vadd.f32 %v2553_v14, %v2552_v62 }
 0x11c   : > { %v1491_v18 = vadd.f32 %v2490_v6, %v3497_v21  ;;  %v3519_v58 = vadd.f32 %v2551_v61, %v1488_v33 }
 0x11e   : > { %v3521_v43 = vadd.f32 %v2554_v45, %v1491_v18  ;;  %v2491_v8 = vpop.f32.mrb[16].mxu0 }
 0x11f   : > { %v2555_v34 = vpop.f32.mrb[16].mxu1  ;;  %v2492_v35 = vpop.f32.mrb[17].mxu0 }
 0x120   : > { %v2556_v36 = vpop.f32.mrb[17].mxu1  ;;  %v2493_v48 = vadd.f32 %v2492_v35, %v2491_v8  ;;  %v2494_v49 = vpop.f32.mrb[18].mxu0 }
 0x121   : > { %v2557_v50 = vadd.f32 %v2556_v36, %v2555_v34  ;;  %v2558_v63 = vpop.f32.mrb[18].mxu1  ;;  %v2495_v0 = vpop.f32.mrb[19].mxu0 }
 0x122   : > { %v2559_v55 = vpop.f32.mrb[19].mxu1  ;;  %v1496_v1 = vadd.f32 %v2493_v48, %v3497_v21  ;;  %v2496_v2 = vadd.f32 %v2495_v0, %v2494_v49 }
 0x123   : > { %v2560_v3 = vadd.f32 %v2559_v55, %v2558_v63 }
 0x124   : > { %v1499_v7 = vadd.f32 %v2496_v2, %v3497_v21  ;;  %v3525_v9 = vadd.f32 %v2557_v50, %v1496_v1 }
 0x126   : > { %v3527_v10 = vadd.f32 %v2560_v3, %v1499_v7  ;;  %v2497_v11 = vpop.f32.mrb[20].mxu0 }
 0x127   : > { %v2561_v12 = vpop.f32.mrb[20].mxu1  ;;  %v2498_v13 = vpop.f32.mrb[21].mxu0 }
 0x128   : > { %v2562_v15 = vpop.f32.mrb[21].mxu1  ;;  %v2499_v16 = vadd.f32 %v2498_v13, %v2497_v11  ;;  %v2500_v17 = vpop.f32.mrb[22].mxu0 }
 0x129   : > { %v2563_v19 = vadd.f32 %v2562_v15, %v2561_v12  ;;  %v2564_v20 = vpop.f32.mrb[22].mxu1  ;;  %v2501_v22 = vpop.f32.mrb[23].mxu0 }
 0x12a   : > { %v2565_v24 = vpop.f32.mrb[23].mxu1  ;;  %v1504_v25 = vadd.f32 %v2499_v16, %v3497_v21  ;;  %v2502_v27 = vadd.f32 %v2501_v22, %v2500_v17 }
 0x12b   : > { %v2566_v28 = vadd.f32 %v2565_v24, %v2564_v20 }
 0x12c   : > { %v1507_v29 = vadd.f32 %v2502_v27, %v3497_v21  ;;  %v3531_v30 = vadd.f32 %v2563_v19, %v1504_v25 }
 0x12e   : > { %v3533_v31 = vadd.f32 %v2566_v28, %v1507_v29  ;;  %v2503_v32 = vpop.f32.mrb[24].mxu0 }
 0x12f   : > { %v2567_v37 = vpop.f32.mrb[24].mxu1  ;;  %v2504_v38 = vpop.f32.mrb[25].mxu0 }
 0x130   : > { %v2568_v39 = vpop.f32.mrb[25].mxu1  ;;  %v2505_v40 = vadd.f32 %v2504_v38, %v2503_v32  ;;  %v2506_v41 = vpop.f32.mrb[26].mxu0 }
 0x131   : > { %v2569_v42 = vadd.f32 %v2568_v39, %v2567_v37  ;;  %v2570_v44 = vpop.f32.mrb[26].mxu1  ;;  %v2507_v47 = vpop.f32.mrb[27].mxu0 }
 0x132   : > { %v2571_v53 = vpop.f32.mrb[27].mxu1  ;;  %v1512_v46 = vadd.f32 %v2505_v40, %v3497_v21  ;;  %v2508_v54 = vadd.f32 %v2507_v47, %v2506_v41 }
 0x133   : > { %v2572_v56 = vadd.f32 %v2571_v53, %v2570_v44 }
 0x134   : > { %v1515_v57 = vadd.f32 %v2508_v54, %v3497_v21  ;;  %v3537_v59 = vadd.f32 %v2569_v42, %v1512_v46 }
 0x136   : > { %v3539_v61 = vadd.f32 %v2572_v56, %v1515_v57  ;;  %v2509_v62 = vpop.f32.mrb[28].mxu0 }
 0x137   : > { %v2573_v60 = vpop.f32.mrb[28].mxu1  ;;  %v2510_v14 = vpop.f32.mrb[29].mxu0 }
 0x138   : > { %v2574_v33 = vpop.f32.mrb[29].mxu1  ;;  %v2511_v6 = vadd.f32 %v2510_v14, %v2509_v62  ;;  %v2512_v45 = vpop.f32.mrb[30].mxu0 }
 0x139   : > { %v2575_v18 = vadd.f32 %v2574_v33, %v2573_v60  ;;  %v2576_v8 = vpop.f32.mrb[30].mxu1  ;;  %v2513_v34 = vpop.f32.mrb[31].mxu0 }
 0x13a   : > { %v2577_v35 = vpop.f32.mrb[31].mxu1  ;;  %v1520_v36 = vadd.f32 %v2511_v6, %v3497_v21  ;;  %v2514_v48 = vadd.f32 %v2513_v34, %v2512_v45 }
 0x13b   : > { %v2578_v49 = vadd.f32 %v2577_v35, %v2576_v8 }
 0x13c   : > { %v1523_v50 = vadd.f32 %v2514_v48, %v3497_v21  ;;  %v3543_v63 = vadd.f32 %v2575_v18, %v1520_v36 }
 0x13e   : > { %v3545_v0 = vadd.f32 %v2578_v49, %v1523_v50  ;;  %v2595_v55 = vpop.f32.mrb[32].mxu0 }
 0x13f   : > { %v2659_v1 = vpop.f32.mrb[32].mxu1  ;;  %v2596_v2 = vpop.f32.mrb[33].mxu0 }
 0x140   : > { %v2660_v3 = vpop.f32.mrb[33].mxu1  ;;  %v2597_v7 = vadd.f32 %v2596_v2, %v2595_v55  ;;  %v2598_v11 = vpop.f32.mrb[34].mxu0 }
 0x141   : > { %v2661_v12 = vadd.f32 %v2660_v3, %v2659_v1  ;;  %v2662_v13 = vpop.f32.mrb[34].mxu1  ;;  %v2599_v15 = vpop.f32.mrb[35].mxu0 }
 0x142   : > { %v2663_v16 = vpop.f32.mrb[35].mxu1  ;;  %v1658_v17 = vadd.f32 %v2597_v7, %v3501_v4  ;;  %v2600_v19 = vadd.f32 %v2599_v15, %v2598_v11 }
 0x143   : > { %v2664_v20 = vadd.f32 %v2663_v16, %v2662_v13 }
 0x144   : > { %v1661_v21 = vadd.f32 %v2600_v19, %v3503_v5  ;;  %v3549_v22 = vadd.f32 %v2661_v12, %v1658_v17 }
 0x146   : > { %v2601_v24 = vpop.f32.mrb[36].mxu0  ;;  %v3551_v27 = vadd.f32 %v2664_v20, %v1661_v21 }
 0x147   : > { %v2665_v25 = vpop.f32.mrb[36].mxu1  ;;  %v2602_v28 = vpop.f32.mrb[37].mxu0 }
 0x148   : > { %v2666_v29 = vpop.f32.mrb[37].mxu1  ;;  %v2603_v32 = vadd.f32 %v2602_v28, %v2601_v24  ;;  %v2604_v37 = vpop.f32.mrb[38].mxu0 }
 0x149   : > { %v2667_v38 = vadd.f32 %v2666_v29, %v2665_v25  ;;  %v2668_v39 = vpop.f32.mrb[38].mxu1  ;;  %v2605_v40 = vpop.f32.mrb[39].mxu0 }
 0x14a   : > { %v2669_v41 = vpop.f32.mrb[39].mxu1  ;;  %v1666_v4 = vadd.f32 %v2603_v32, %v3507_v23  ;;  %v2606_v42 = vadd.f32 %v2605_v40, %v2604_v37 }
 0x14b   : > { %v2670_v44 = vadd.f32 %v2669_v41, %v2668_v39 }
 0x14c   : > { %v1669_v5 = vadd.f32 %v2606_v42, %v3509_v26  ;;  %v3555_v47 = vadd.f32 %v2667_v38, %v1666_v4 }
 0x14e   : > { %v2607_v53 = vpop.f32.mrb[40].mxu0  ;;  %v3557_v54 = vadd.f32 %v2670_v44, %v1669_v5 }
 0x14f   : > { %v2671_v46 = vpop.f32.mrb[40].mxu1  ;;  %v2608_v56 = vpop.f32.mrb[41].mxu0 }
 0x150   : > { %v2672_v57 = vpop.f32.mrb[41].mxu1  ;;  %v2609_v62 = vadd.f32 %v2608_v56, %v2607_v53  ;;  %v2610_v60 = vpop.f32.mrb[42].mxu0 }
 0x151   : > { %v2673_v14 = vadd.f32 %v2672_v57, %v2671_v46  ;;  %v2674_v33 = vpop.f32.mrb[42].mxu1  ;;  %v2611_v6 = vpop.f32.mrb[43].mxu0 }
 0x152   : > { %v2675_v45 = vpop.f32.mrb[43].mxu1  ;;  %v1674_v23 = vadd.f32 %v2609_v62, %v3513_v51  ;;  %v2612_v18 = vadd.f32 %v2611_v6, %v2610_v60 }
 0x153   : > { %v2676_v8 = vadd.f32 %v2675_v45, %v2674_v33 }
 0x154   : > { %v1677_v26 = vadd.f32 %v2612_v18, %v3515_v52  ;;  %v3561_v34 = vadd.f32 %v2673_v14, %v1674_v23 }
 0x156   : > { %v2613_v35 = vpop.f32.mrb[44].mxu0  ;;  %v3563_v48 = vadd.f32 %v2676_v8, %v1677_v26 }
 0x157   : > { %v2677_v36 = vpop.f32.mrb[44].mxu1  ;;  %v2614_v49 = vpop.f32.mrb[45].mxu0 }
 0x158   : > { %v2678_v50 = vpop.f32.mrb[45].mxu1  ;;  %v2615_v55 = vadd.f32 %v2614_v49, %v2613_v35  ;;  %v2616_v1 = vpop.f32.mrb[46].mxu0 }
 0x159   : > { %v2679_v2 = vadd.f32 %v2678_v50, %v2677_v36  ;;  %v2680_v3 = vpop.f32.mrb[46].mxu1  ;;  %v2617_v7 = vpop.f32.mrb[47].mxu0 }
 0x15a   : > { %v2681_v11 = vpop.f32.mrb[47].mxu1  ;;  %v1682_v51 = vadd.f32 %v2615_v55, %v3519_v58  ;;  %v2618_v12 = vadd.f32 %v2617_v7, %v2616_v1 }
 0x15b   : > { %v2682_v13 = vadd.f32 %v2681_v11, %v2680_v3 }
 0x15c   : > { %v1685_v52 = vadd.f32 %v2618_v12, %v3521_v43  ;;  %v3567_v15 = vadd.f32 %v2679_v2, %v1682_v51 }
 0x15e   : > { %v2619_v16 = vpop.f32.mrb[48].mxu0  ;;  %v3569_v19 = vadd.f32 %v2682_v13, %v1685_v52 }
 0x15f   : > { %v2683_v17 = vpop.f32.mrb[48].mxu1  ;;  %v2620_v20 = vpop.f32.mrb[49].mxu0 }
 0x160   : > { %v2684_v21 = vpop.f32.mrb[49].mxu1  ;;  %v2621_v24 = vadd.f32 %v2620_v20, %v2619_v16  ;;  %v2622_v25 = vpop.f32.mrb[50].mxu0 }
 0x161   : > { %v2685_v28 = vadd.f32 %v2684_v21, %v2683_v17  ;;  %v2686_v29 = vpop.f32.mrb[50].mxu1  ;;  %v2623_v32 = vpop.f32.mrb[51].mxu0 }
 0x162   : > { %v2687_v37 = vpop.f32.mrb[51].mxu1  ;;  %v1690_v58 = vadd.f32 %v2621_v24, %v3525_v9  ;;  %v2624_v38 = vadd.f32 %v2623_v32, %v2622_v25 }
 0x163   : > { %v2688_v39 = vadd.f32 %v2687_v37, %v2686_v29 }
 0x164   : > { %v1693_v43 = vadd.f32 %v2624_v38, %v3527_v10  ;;  %v1787_v40 = vadd.f32 %v2685_v28, %v1690_v58 }
 0x166   : > { %v2625_v41 = vpop.f32.mrb[52].mxu0  ;;  %v3573_v42 = vadd.f32 %v2688_v39, %v1693_v43 }
 0x167   : > { %v2689_v4 = vpop.f32.mrb[52].mxu1  ;;  %v2626_v44 = vpop.f32.mrb[53].mxu0 }
 0x168   : > { %v2690_v5 = vpop.f32.mrb[53].mxu1  ;;  %v2627_v53 = vadd.f32 %v2626_v44, %v2625_v41  ;;  %v2628_v46 = vpop.f32.mrb[54].mxu0 }
 0x169   : > { %v2691_v56 = vadd.f32 %v2690_v5, %v2689_v4  ;;  %v2692_v57 = vpop.f32.mrb[54].mxu1  ;;  %v2629_v62 = vpop.f32.mrb[55].mxu0 }
 0x16a   : > { %v2693_v60 = vpop.f32.mrb[55].mxu1  ;;  %v1698_v14 = vadd.f32 %v2627_v53, %v3531_v30  ;;  %v2630_v9 = vadd.f32 %v2629_v62, %v2628_v46 }
 0x16b   : > { %v2694_v33 = vadd.f32 %v2693_v60, %v2692_v57 }
 0x16c   : > { %v1701_v6 = vadd.f32 %v2630_v9, %v3533_v31  ;;  %v1795_v10 = vadd.f32 %v2691_v56, %v1698_v14 }
 0x16e   : > { %v2631_v45 = vpop.f32.mrb[56].mxu0  ;;  %v1798_v18 = vadd.f32 %v2694_v33, %v1701_v6 }
 0x16f   : > { %v2695_v23 = vpop.f32.mrb[56].mxu1  ;;  %v2632_v8 = vpop.f32.mrb[57].mxu0 }
 0x170   : > { %v2696_v26 = vpop.f32.mrb[57].mxu1  ;;  %v2633_v35 = vadd.f32 %v2632_v8, %v2631_v45  ;;  %v2634_v36 = vpop.f32.mrb[58].mxu0 }
 0x171   : > { %v2697_v49 = vadd.f32 %v2696_v26, %v2695_v23  ;;  %v2698_v50 = vpop.f32.mrb[58].mxu1  ;;  %v2635_v55 = vpop.f32.mrb[59].mxu0 }
 0x172   : > { %v2699_v1 = vpop.f32.mrb[59].mxu1  ;;  %v1706_v2 = vadd.f32 %v2633_v35, %v3537_v59  ;;  %v2636_v3 = vadd.f32 %v2635_v55, %v2634_v36 }
 0x173   : > { %v2700_v30 = vadd.f32 %v2699_v1, %v2698_v50 }
 0x174   : > { %v1709_v7 = vadd.f32 %v2636_v3, %v3539_v61  ;;  %v1803_v11 = vadd.f32 %v2697_v49, %v1706_v2 }
 0x176   : > { %v2637_v31 = vpop.f32.mrb[60].mxu0  ;;  %v3579_v12 = vadd.f32 %v2700_v30, %v1709_v7 }
 0x177   : > { %v2701_v51 = vpop.f32.mrb[60].mxu1  ;;  %v2638_v13 = vpop.f32.mrb[61].mxu0 }
 0x178   : > { %v2702_v52 = vpop.f32.mrb[61].mxu1  ;;  %v2639_v16 = vadd.f32 %v2638_v13, %v2637_v31  ;;  %v2640_v17 = vpop.f32.mrb[62].mxu0 }
 0x179   : > { %v2703_v20 = vadd.f32 %v2702_v52, %v2701_v51  ;;  %v2704_v21 = vpop.f32.mrb[62].mxu1  ;;  %v2641_v24 = vpop.f32.mrb[63].mxu0 }
 0x17a   : > { %v2705_v25 = vpop.f32.mrb[63].mxu1  ;;  %v1714_v28 = vadd.f32 %v2639_v16, %v3543_v63  ;;  %v2642_v59 = vadd.f32 %v2641_v24, %v2640_v17 }
 0x17b   : > { %v2706_v29 = vadd.f32 %v2705_v25, %v2704_v21 }
 0x17c   : > { %v1717_v32 = vadd.f32 %v2642_v59, %v3545_v0  ;;  %v1811_v61 = vadd.f32 %v2703_v20, %v1714_v28 }
 0x17e   : > { %v2741_v37 = vpop.f32.mrb[64].mxu0  ;;  %v1814_v38 = vadd.f32 %v2706_v29, %v1717_v32 }
 0x17f   : > { %v2749_v58 = vpop.f32.mrb[64].mxu1  ;;  %v1860_v39 = vadd.f32 %v2741_v37, %v3555_v47  ;;  %v1851_v41 = vpop.f32.mrb[65].mxu0 }
 0x180   : > { %v3584_v43 = vadd.f32 %v2749_v58, %v1795_v10  ;;  %v1883_v4 = vpop.f32.mrb[65].mxu1  ;;  %v1852_v44 = vadd.f32 %v1851_v41, %v3549_v22  ;;  %v2742_v63 = vpop.f32.mrb[66].mxu0 }
 0x181   : > { %v3587_v5 = vadd.f32 %v1883_v4, %v1787_v40  ;;  %v2750_v53 = vpop.f32.mrb[66].mxu1  ;;  %v1863_v46 = vadd.f32 %v2742_v63, %v3557_v54  ;;  %v1854_v56 = vpop.f32.mrb[67].mxu0  ;;  %v1938_v6 = vmul.f32 %v1860_v39, %v1860_v39 }
 0x182   : > { %v3590_v0 = vadd.f32 %v2750_v53, %v1798_v18  ;;  %v1886_v57 = vpop.f32.mrb[67].mxu1  ;;  %v1855_v22 = vadd.f32 %v1854_v56, %v3551_v27  ;;  %v1936_v62 = vmul.f32 %v1852_v44, %v1852_v44  ;;  %v1946_v41 = vmul.f32 %v3584_v43, %v3584_v43 }
 0x183   : > { %v1887_v47 = vadd.f32 %v1886_v57, %v3573_v42  ;;  %v2411_v40 = vpack.c.bf16 %v1863_v46, %v1860_v39  ;;  %v1939_v42 = vmul.f32 %v1863_v46, %v1863_v46  ;;  %v1944_v37 = vmul.f32 %v3587_v5, %v3587_v5 }
 0x184   : > { %v2431_v54 = vpack.c.bf16 %v3590_v0, %v3584_v43  ;;  %v1914_v60 = vadd.f32 %v1855_v22, %v1852_v44  ;;  %v1937_v14 = vmul.f32 %v1855_v22, %v1855_v22  ;;  %v2406_v9 = vpack.c.bf16 %v1855_v22, %v1852_v44 }
 0x185   : > { %2444 = vst [vmem:[%s3597_s20 + $0x8] sm:$0xff] %v2411_v40   ;;  %v2426_v33 = vpack.c.bf16 %v1887_v47, %v3587_v5  ;;  %v1945_v58 = vmul.f32 %v1887_v47, %v1887_v47  ;;  %v1947_v63 = vmul.f32 %v3590_v0, %v3590_v0 }
 0x186   : > { %2448 = vst [vmem:[%s3597_s20 + $0x28] sm:$0xff] %v2431_v54   ;;  %v1915_v10 = vadd.f32 %v1914_v60, %v1860_v39  ;;  %v1952_v45 = vadd.f32 %v1937_v14, %v1936_v62  ;;  %2407 = vst [vmem:[%s3597_s20] sm:$0xff] %v2406_v9   ;;  %v2745_v27 = vpop.f32.mrb[68].mxu0 }
 0x187   : > { %v2753_v23 = vpop.f32.mrb[68].mxu1  ;;  %2447 = vst [vmem:[%s3597_s20 + $0x20] sm:$0xff] %v2426_v33   ;;  %v1876_v18 = vadd.f32 %v2745_v27, %v3567_v15  ;;  %v1867_v26 = vpop.f32.mrb[69].mxu0 }
 0x188   : > { %v1908_v8 = vadd.f32 %v2753_v23, %v1811_v61  ;;  %v1899_v35 = vpop.f32.mrb[69].mxu1  ;;  %v1953_v36 = vadd.f32 %v1952_v45, %v1938_v6  ;;  %v1868_v49 = vadd.f32 %v1867_v26, %v3561_v34  ;;  %v1916_v50 = vadd.f32 %v1915_v10, %v1863_v46  ;;  %v2746_v1 = vpop.f32.mrb[70].mxu0 }
 0x189   : > { %v1900_v55 = vadd.f32 %v1899_v35, %v1803_v11  ;;  %v2754_v2 = vpop.f32.mrb[70].mxu1  ;;  %v1879_v3 = vadd.f32 %v2746_v1, %v3569_v19  ;;  %v1870_v7 = vpop.f32.mrb[71].mxu0  ;;  %v1942_v25 = vmul.f32 %v1876_v18, %v1876_v18 }
 0x18a   : > { %v1911_v30 = vadd.f32 %v2754_v2, %v1814_v38  ;;  %v1902_v31 = vpop.f32.mrb[71].mxu1  ;;  %v1917_v51 = vadd.f32 %v1916_v50, %v1868_v49  ;;  %v1940_v13 = vmul.f32 %v1868_v49, %v1868_v49  ;;  %v1954_v15 = vadd.f32 %v1953_v36, %v1939_v42 }
 0x18b   : > { %v2421_v52 = vpack.c.bf16 %v1879_v3, %v1876_v18  ;;  %v1871_v34 = vadd.f32 %v1870_v7, %v3563_v48  ;;  %v1903_v11 = vadd.f32 %v1902_v31, %v3579_v12  ;;  %v1943_v29 = vmul.f32 %v1879_v3, %v1879_v3 }
 0x18c   : > { %v2441_v16 = vpack.c.bf16 %v1911_v30, %v1908_v8  ;;  %v1955_v17 = vadd.f32 %v1954_v15, %v1940_v13  ;;  %v1950_v54 = vmul.f32 %v1908_v8, %v1908_v8 }
 0x18d   : > { %2446 = vst [vmem:[%s3597_s20 + $0x18] sm:$0xff] %v2421_v52   ;;  %v1918_v20 = vadd.f32 %v1917_v51, %v1871_v34  ;;  %v1941_v21 = vmul.f32 %v1871_v34, %v1871_v34  ;;  %v2416_v19 = vpack.c.bf16 %v1871_v34, %v1868_v49  ;;  %v2436_v24 = vpack.c.bf16 %v1903_v11, %v1900_v55 }
 0x18e   : > { %2450 = vst [vmem:[%s3597_s20 + $0x38] sm:$0xff] %v2441_v16   ;;  %v1949_v40 = vmul.f32 %v1903_v11, %v1903_v11 }
 0x18f   : > { %v1919_v28 = vadd.f32 %v1918_v20, %v1876_v18  ;;  %v1956_v59 = vadd.f32 %v1955_v17, %v1941_v21  ;;  %2445 = vst [vmem:[%s3597_s20 + $0x10] sm:$0xff] %v2416_v19   ;;  %2449 = vst [vmem:[%s3597_s20 + $0x30] sm:$0xff] %v2436_v24  }
 0x191   : > { %v1920_v32 = vadd.f32 %v1919_v28, %v1879_v3  ;;  %v1957_v61 = vadd.f32 %v1956_v59, %v1942_v25 }
 0x193   : > { %v1921_v48 = vadd.f32 %v1920_v32, %v3587_v5  ;;  %v1958_v12 = vadd.f32 %v1957_v61, %v1943_v29  ;;  %v1948_v5 = vmul.f32 %v1900_v55, %v1900_v55 }
 0x195   : > { %v1959_v38 = vadd.f32 %v1958_v12, %v1944_v37  ;;  %v1922_v39 = vadd.f32 %v1921_v48, %v1887_v47 }
 0x197   : > { %v1923_v4 = vadd.f32 %v1922_v39, %v3584_v43  ;;  %v1960_v44 = vadd.f32 %v1959_v38, %v1945_v58  ;;  %v1951_v43 = vmul.f32 %v1911_v30, %v1911_v30 }
 0x199   : > { %v1924_v53 = vadd.f32 %v1923_v4, %v3590_v0  ;;  %v1961_v46 = vadd.f32 %v1960_v44, %v1946_v41 }
 0x19b   : > { %v1925_v56 = vadd.f32 %v1924_v53, %v1900_v55  ;;  %v1962_v57 = vadd.f32 %v1961_v46, %v1947_v63 }
 0x19d   : > { %v1926_v22 = vadd.f32 %v1925_v56, %v1903_v11  ;;  %v1963_v47 = vadd.f32 %v1962_v57, %v1948_v5 }
 0x19f   : > { %v1927_v62 = vadd.f32 %v1926_v22, %v1908_v8  ;;  %v1964_v60 = vadd.f32 %v1963_v47, %v1949_v40 }
 0x1a1   : > { %v1928_v14 = vadd.f32 %v1927_v62, %v1911_v30  ;;  %v1965_v9 = vadd.f32 %v1964_v60, %v1950_v54 }
 0x1a3   : > { %v1929_v33 = vrot.slane %v1928_v14, 4  ;;  %v1966_v6 = vadd.f32 %v1965_v9, %v1951_v43 }
 0x1a5   : > { %v1930_v0 = vadd.f32 %v1929_v33, %v1928_v14  ;;  %v1967_v10 = vrot.slane %v1966_v6, 4 }
 0x1a7   : > { %v1931_v45 = vrot.slane %v1930_v0, 2  ;;  %v1968_v27 = vadd.f32 %v1967_v10, %v1966_v6 }
 0x1a9   : > { %v1932_v23 = vadd.f32 %v1931_v45, %v1930_v0  ;;  %v1969_v42 = vrot.slane %v1968_v27, 2 }
 0x1ab   : > { %v1933_v18 = vrot.slane %v1932_v23, 1  ;;  %v1970_v26 = vadd.f32 %v1969_v42, %v1968_v27 }
 0x1ad   : > { %v1934_v8 = vadd.f32 %v1933_v18, %v1932_v23  ;;  %v1971_v35 = vrot.slane %v1970_v26, 1 }
 0x1af   : > { %1935 = vst [vmem:[%s504_s25] sm:$0x1] %v1934_v8  ;;  %v1972_v36 = vadd.f32 %v1971_v35, %v1970_v26 }
 0x1b1   : > { %1973 = vst [vmem:[%s504_s25 + $0x1] sm:$0x1] %v1972_v36 }
 0x1b2 PF: > { %s19_s9 = sadd.s32 1, %s2929_s9   ;;  %s3662_s27 = smov %s2921_s29 }
 0x1b3   : > { %p16_p0 = scmp.ge.s32.totalorder %s19_s9, 6   ;;  %s3663_s28 = smov %s2925_s30 }
 0x1b4   : > { %s3664_s29 = smov %s3667_s5  ;;  %s3665_s30 = smov %s3671_s6 }
 0x1b5   :  { %18 = sbr.rel (!%p16_p0) target bundleno = 3 (0x3), region = 96 }

// kernel: segnet_forward.7
= control target key start
LH: loop header
LB: loop body
LE: loop exit
PB: predicated region body
PF: predicated region fallthrough
CT: control target
= control target key end

     0   :  { %14 = vsyncpa [#allocation4], 0  ;;  %s3843_s0 = inlined_call_operand.vmem [shape: bf16[2,16,16,128], index: 0, kind: input, shape index: {}, may-alias: {0,1,2}]   ;;  %s3844_s1 = inlined_call_operand.vmem [shape: bf16[2,16,16,128], index: 1, kind: input, shape index: {}, may-alias: {0,1,2}]   ;;  %s3845_s2 = inlined_call_operand.vmem [shape: bf16[2,16,16,128], index: 2, kind: input, shape index: {}, may-alias: {0,1,2}]   ;;  %s3846_s3 = inlined_call_operand.vmem [shape: bf16[1152,128], index: 3, kind: input, shape index: {}]   ;;  %s3847_s4 = inlined_call_operand.vmem [shape: f32[1,128], index: 4, kind: input, shape index: {}]   ;;  %s3848_s5 = inlined_call_operand.vmem [shape: f32[1,128], index: 5, kind: input, shape index: {}]   ;;  %s3849_s6 = inlined_call_operand.vmem [shape: f32[1,128], index: 6, kind: input, shape index: {}]   ;;  %s3850_s7 = inlined_call_operand.vmem [shape: f32[2,16,16,128], index: 7, kind: output, shape index: {0}]   ;;  %s3851_s8 = inlined_call_operand.hbm [shape: f32[2,2,2,128], index: 8, kind: output, shape index: {1}]  }
   0x1   :  { %16 = vsyncpa [#allocation4 + $0x1], 0  ;;  %s3021_s27 = smov 0   ;;  %s3023_s28 = smov 0  }
   0x2   :  { %s3025_s29 = smov 0   ;;  %s3027_s30 = smov 0  }
   0x3   :  { %s3029_s9 = smov 0   ;;  %s3031_s10 = smov 0  }
   0x4   :  { %s3033_s11 = smov 0   ;;  %s3035_s12 = smov 0  }
   0x5 LB: > { %3859 = sst [smem:[#allocation6_spill]] %s2953_s29  ;;  %s2251_s13 = sadd.s32 4294967295, %s2973_s12   ;;  %s2973_s12 = sphi %s3035_s12, %s22_s12   ;;  %s2969_s11 = sphi %s3033_s11, %s3880_s11   ;;  %s2965_s10 = sphi %s3031_s10, %s3879_s10   ;;  %s2961_s9 = sphi %s3029_s9, %s3878_s9   ;;  %s2957_s30 = sphi %s3027_s30, %s3877_s30   ;;  %s2953_s29 = sphi %s3025_s29, %s3876_s29   ;;  %s2949_s28 = sphi %s3023_s28, %s3882_s28   ;;  %s2945_s27 = sphi %s3021_s27, %s3881_s27  }
   0x6   : > { %3860 = sst [smem:[#allocation7_spill]] %s2965_s10  ;;  %s2252_s14 = sadd.s32 4294967294, %s2973_s12  }
   0x7   : > { %3861 = sst [smem:[#allocation8_spill]] %s2969_s11  ;;  %s31_s15 = sadd.s32 1, %s2965_s10 }
   0x8   : > { %p32_p0 = scmp.ge.s32.totalorder %s31_s15, 2  ;;  %s34_s16 = sadd.s32 1, %s2969_s11 }
   0x9   : > { %p265_p1 = scmp.ne.s32.totalorder %s2953_s29, %s2949_s28  ;;  %p266_p2 = scmp.eq.s32.totalorder %s2251_s13, 3 }
   0xa   : > { %s3884_s15 = smov (%p32_p0, %s31_s15), 0  ;;  %s3886_s16 = smov (!%p32_p0, %s34_s16), %s2969_s11 }
   0xb   : > { %3862 = sst [smem:[#allocation9_spill]] %s3884_s15  ;;  %s251_s17 = ssub.s32 %s2965_s10, %s3884_s15 }
   0xc   : > { %p3072_p3 = por %p266_p2, %p265_p1  ;;  %p36_p4 = scmp.ge.s32.totalorder %s3886_s16, 2 }
   0xd   : > { %p271_p5 = scmp.ne.s32.totalorder %s2949_s28, %s2945_s27  ;;  %p272_p6 = scmp.eq.s32.totalorder %s2252_s14, 3 }
   0xe   : > { %p2261_p7 = scmp.ge.s32.totalorder %s2973_s12, 1  ;;  %s3888_s16 = smov (%p36_p4, %s3886_s16), 0 }
   0xf   : > { %3864 = sst [smem:[#allocation10_spill]] %s3888_s16  ;;  %p3081_p8 = por %p272_p6, %p271_p5 }
  0x10   : > { %p360_p9 = scmp.lt.s32.totalorder %s2973_s12, 5  ;;  %s250_s20 = ssub.s32 %s2969_s11, %s3888_s16 }
  0x11   : > { %s3865_s19 = scalar_select %p3081_p8, 1, 0 }
  0x12   : > { %s255_s21 = sadd.s32 1, %s2953_s29  ;;  %s252_s22 = sor.u32 %s251_s17, %s250_s20 }
  0x13   : > { %3866 = sst [smem:[#allocation11_spill]] %s3865_s19  ;;  %p361_p10 = pnand %p2261_p7, %p360_p9 }
  0x14   : > { %p253_p11 = scmp.eq.s32.totalorder %s252_s22, 0  ;;  %v2807_v0 = vld [vmem:[%s3846_s3 + $0x40] sm:$0xff] (!%p361_p10)   ;;  %v2811_v4 = vld [vmem:[%s3846_s3 + $0x48] sm:$0xff] (!%p361_p10)   ;;  %p438_p12 = scmp.lt.s32.totalorder (!%p361_p10), %s2961_s9, 1  ;;  %v2815_v8 = vld [vmem:[%s3846_s3 + $0x50] sm:$0xff] (!%p361_p10)   ;;  %vm712_vm0 = vcmask (!%p361_p10), 1040384  }
  0x15   : > { %364 = sbr.rel (%p361_p10) target bundleno = 462 (0x1ce), region = 48  ;;  %v2808_v1 = vld [vmem:[%s3846_s3 + $0xc0] sm:$0xff] (!%p361_p10)   ;;  %2416 = vmatprep.subr.bf16.mxu0 (!%p361_p10), %v2807_v0  ;;  %v2812_v5 = vld [vmem:[%s3846_s3 + $0xc8] sm:$0xff] (!%p361_p10)   ;;  %s3856_s22 = sshll.u32 (!%p361_p10), %s2957_s30, 2  ;;  %v2816_v9 = vld [vmem:[%s3846_s3 + $0xd0] sm:$0xff] (!%p361_p10)   ;;  %vm755_vm3 = vcmask (!%p361_p10), 1047552  }
  0x16   : > { %s3090_s23 = scalar_select %p253_p11, %s2953_s29, %s255_s21  }
  0x17   : > { %v2809_v2 = vld [vmem:[%s3846_s3] sm:$0xff] (!%p361_p10)   ;;  %2480 = vmatprep.subr.bf16.mxu1 (!%p361_p10), %v2808_v1  ;;  %s2263_s21 = sshll.u32 (!%p361_p10), %s2957_s30, 3  ;;  %v2813_v6 = vld [vmem:[%s3846_s3 + $0x8] sm:$0xff] (!%p361_p10)   ;;  %s2268_s15 = sadd.s32 (!%p361_p10), 4294967295, %s3856_s22  ;;  %v2817_v10 = vld [vmem:[%s3846_s3 + $0x10] sm:$0xff] (!%p361_p10)  }
  0x18   : > { %3867 = sst [smem:[#allocation12_spill]] %s3090_s23  ;;  %v2810_v3 = vld [vmem:[%s3846_s3 + $0x80] sm:$0xff] (!%p361_p10)   ;;  %2417 = vmatpush3.bf16.msra.mxu0 (!%p361_p10), %v2809_v2  ;;  %p3115_p13 = scmp.lt.s32.totalorder (!%p361_p10), %s2263_s21, 15  ;;  %v2814_v7 = vld [vmem:[%s3846_s3 + $0x88] sm:$0xff] (!%p361_p10)   ;;  %v2818_v11 = vld [vmem:[%s3846_s3 + $0x90] sm:$0xff] (!%p361_p10)  }
  0x19   : > { %2481 = vmatpush3.bf16.msra.mxu1 (!%p361_p10), %v2810_v3  ;;  %2418 = vmatprep.subr.bf16.mxu0 (!%p361_p10), %v2811_v4  ;;  %p450_p0 = scmp.gt.s32.totalorder (!%p361_p10), %s2268_s15, 0  ;;  %v2819_v12 = vld [vmem:[%s3846_s3 + $0x58] sm:$0xff] (!%p361_p10)   ;;  %v2823_v16 = vld [vmem:[%s3846_s3 + $0x60] sm:$0xff] (!%p361_p10)   ;;  %v2827_v20 = vld [vmem:[%s3846_s3 + $0x68] sm:$0xff] (!%p361_p10)   ;;  %s3869_s16 = sshll.u32 (!%p361_p10), %s2957_s30, 2 }
  0x1a   : > { %2482 = vmatprep.subr.bf16.mxu1 (!%p361_p10), %v2812_v5  ;;  %v2820_v13 = vld [vmem:[%s3846_s3 + $0xd8] sm:$0xff] (!%p361_p10)   ;;  %v2824_v17 = vld [vmem:[%s3846_s3 + $0xe0] sm:$0xff] (!%p361_p10)   ;;  %s2367_s13 = sadd.s32 (!%p361_p10), 4, %s3869_s16  ;;  %v2828_v21 = vld [vmem:[%s3846_s3 + $0xe8] sm:$0xff] (!%p361_p10)   ;;  %p612_p5 = scmp.eq.s32.totalorder (!%p361_p10), %s2957_s30, 0 }
  0x1b   : > { %v2821_v14 = vld [vmem:[%s3846_s3 + $0x18] sm:$0xff] (!%p361_p10)   ;;  %v2825_v18 = vld [vmem:[%s3846_s3 + $0x20] sm:$0xff] (!%p361_p10)   ;;  %v2829_v22 = vld [vmem:[%s3846_s3 + $0x28] sm:$0xff] (!%p361_p10)   ;;  %p469_p2 = scmp.lt.s32.totalorder (!%p361_p10), %s2367_s13, 7  ;;  %vm713_vm1 = vsmask.f32 (!%p361_p10), 256 }
  0x1c   : > { %2419 = vmatpush3.bf16.msra.mxu0 %v2813_v6  ;;  %s439_s26 = scalar_select %p438_p12, %s2961_s9, 1  ;;  %v2822_v15 = vld [vmem:[%s3846_s3 + $0x98] sm:$0xff]   ;;  %v2826_v19 = vld [vmem:[%s3846_s3 + $0xa0] sm:$0xff]   ;;  %v2830_v23 = vld [vmem:[%s3846_s3 + $0xa8] sm:$0xff]   ;;  %vm756_vm2 = vsmask.f32 7424 }
  0x1d   : > { %2483 = vmatpush3.bf16.msra.mxu1 %v2814_v7  ;;  %2420 = vmatprep.subr.bf16.mxu0 %v2815_v8  ;;  %s3890_s21 = smov (!%p3115_p13, %s2263_s21), 15  ;;  %s3892_s15 = smov (!%p450_p0, %s2268_s15), 0  ;;  %v2831_v24 = vld [vmem:[%s3846_s3 + $0x70] sm:$0xff]   ;;  %v2835_v28 = vld [vmem:[%s3846_s3 + $0x78] sm:$0xff]   ;;  %v3221_v32 = vld [vmem:[%s3848_s5] ss:$0 sm:$0xff] }
  0x1e   : > { %2484 = vmatprep.subr.bf16.mxu1 %v2816_v9  ;;  %s3146_s10 = sshll.u32 %s439_s26, 5  ;;  %s2269_s14 = sshll.u32 %s3892_s15, 1  ;;  %v2832_v25 = vld [vmem:[%s3846_s3 + $0xf0] sm:$0xff]   ;;  %v2836_v29 = vld [vmem:[%s3846_s3 + $0xf8] sm:$0xff]   ;;  %v3229_v34 = vld [vmem:[%s3849_s6] ss:$0 sm:$0xff] }
  0x1f   : > { %p455_p1 = scmp.lt.s32.totalorder %s2269_s14, 15  ;;  %s2264_s26 = sshll.u32 %s3890_s21, 1  ;;  %v2833_v26 = vld [vmem:[%s3846_s3 + $0x30] sm:$0xff]   ;;  %v2837_v30 = vld [vmem:[%s3846_s3 + $0x38] sm:$0xff]   ;;  %v2839_v38 = vld [vmem:[%s3846_s3 + $0x140] sm:$0xff]  }
  0x20   : > { %2421 = vmatpush3.bf16.msra.mxu0 %v2817_v10  ;;  %s3170_s25 = sadd.s32 %s3146_s10, %s2264_s26  ;;  %s3896_s13 = smov (!%p469_p2, %s2367_s13), 7  ;;  %v2834_v27 = vld [vmem:[%s3846_s3 + $0xb0] sm:$0xff]   ;;  %v2838_v31 = vld [vmem:[%s3846_s3 + $0xb8] sm:$0xff]   ;;  %v2844_v62 = vld [vmem:[%s3846_s3 + $0x1c0] sm:$0xff]  }
  0x21   : > { %2485 = vmatpush3.bf16.msra.mxu1 %v2818_v11  ;;  %2422 = vmatprep.subr.bf16.mxu0 %v2819_v12  ;;  %s3894_s14 = smov (!%p455_p1, %s2269_s14), 15  ;;  %s2266_s26 = sshll.u32 %s3170_s25, 2  ;;  %vm3267_vm4 = vmand %vm712_vm0, %vm713_vm1 }
  0x22   : > { %2486 = vmatprep.subr.bf16.mxu1 %v2820_v13  ;;  %s2270_s20 = sshll.u32 %s3894_s14, 1  ;;  %s2274_s17 = sshll.u32 %s3896_s13, 1  ;;  %vm3275_vm5 = vmand %vm755_vm3, %vm756_vm2 }
  0x23   : > { %s459_s14 = sadd.s32 %s2270_s20, %s3146_s10  ;;  %p474_p4 = scmp.lt.s32.totalorder %s2274_s17, 15 }
  0x24   : > { %2423 = vmatpush3.bf16.msra.mxu0 %v2821_v14  ;;  %s2272_s22 = sshll.u32 %s459_s14, 2  ;;  %s3212_s24 = scalar_lea.vmem %s3843_s0, %s2266_s26 }
  0x25   : > { %2487 = vmatpush3.bf16.msra.mxu1 %v2822_v15  ;;  %2424 = vmatprep.subr.bf16.mxu0 %v2823_v16  ;;  %s461_s15 = scalar_lea.vmem %s3844_s1, %s2272_s22  ;;  %s3898_s17 = smov (!%p474_p4, %s2274_s17), 15  ;;  %v2369_v37 = vld [vmem:[%s3212_s24] sm:$0xff]   ;;  %v2408_v45 = vld [vmem:[%s3212_s24 + $0x8] sm:$0xff]   ;;  %v2409_v53 = vld [vmem:[%s3212_s24 + $0x10] sm:$0xff]  }
  0x26   : > { %2488 = vmatprep.subr.bf16.mxu1 %v2824_v17  ;;  %s2275_s14 = sshll.u32 %s3898_s17, 1  ;;  %v2415_v33 = vld [vmem:[%s461_s15 + $0x8] sm:$0xff]   ;;  %v2370_v39 = vunpack.c.l.bf16 %v2369_v37  ;;  %v2371_v40 = vunpack.c.h.bf16 %v2369_v37  ;;  %v2374_v48 = vunpack.c.l.bf16 %v2408_v45  ;;  %v2375_v49 = vunpack.c.h.bf16 %v2408_v45  ;;  %v2410_v9 = vld [vmem:[%s3212_s24 + $0x18] sm:$0xff]   ;;  %v2846_v45 = vld [vmem:[%s3846_s3 + $0x180] sm:$0xff]   ;;  %p617_p6 = scmp.eq.s32.totalorder %s2957_s30, 1 }
  0x27   : > { %s3224_s11 = sadd.s32 %s2275_s14, %s3146_s10  ;;  %v2402_v35 = vunpack.c.l.bf16 %v2415_v33  ;;  %v2403_v36 = vunpack.c.h.bf16 %v2415_v33  ;;  %v2378_v60 = vunpack.c.l.bf16 %v2409_v53  ;;  %v2379_v61 = vunpack.c.h.bf16 %v2409_v53  ;;  %v2841_v37 = vld [vmem:[%s3846_s3 + $0x148] sm:$0xff]   ;;  %v2843_v53 = vld [vmem:[%s3846_s3 + $0x150] sm:$0xff]   ;;  %s2281_s21 = sshll.u32 %s3170_s25, 3 }
  0x28   : > { %2425 = vmatpush3.bf16.msra.mxu0 %v2825_v18  ;;  %s613_s13 = scalar_select %p612_p5, 0.0, 1.0  ;;  %v537_v43 = vmul.f32 %v2370_v39, %v3221_v32  ;;  %v538_v44 = vmul.f32 %v2371_v40, %v3221_v32  ;;  %v539_v56 = vmul.f32 %v2374_v48, %v3221_v32  ;;  %v540_v57 = vmul.f32 %v2375_v49, %v3221_v32 }
  0x29   : > { %2489 = vmatpush3.bf16.msra.mxu1 %v2826_v19  ;;  %2426 = vmatprep.subr.bf16.mxu0 %v2827_v20  ;;  %v596_v41 = vmul.f32 %v2402_v35, %v3221_v32  ;;  %v597_v42 = vmul.f32 %v2403_v36, %v3221_v32  ;;  %v541_v4 = vmul.f32 %v2378_v60, %v3221_v32  ;;  %v2382_v20 = vunpack.c.l.bf16 %v2410_v9  ;;  %v2840_v35 = vld [vmem:[%s3846_s3 + $0x100] sm:$0xff]   ;;  %v2412_v60 = vld [vmem:[%s3212_s24 + $0x28] sm:$0xff]   ;;  %s2277_s22 = sshll.u32 %s3224_s11, 2  ;;  %s3738_s14 = scalar_lea.vmem %s3850_s7, %s2281_s21 }
  0x2a   : > { %2490 = vmatprep.subr.bf16.mxu1 %v2828_v21  ;;  %v614_v50 = vstv %s613_s13  ;;  %v560_v51 = vadd.f32 %v3229_v34, %v537_v43  ;;  %v561_v52 = vadd.f32 %v3229_v34, %v538_v44  ;;  %v562_v1 = vadd.f32 %v3229_v34, %v539_v56  ;;  %s480_s17 = scalar_lea.vmem %s3845_s2, %s2277_s22  ;;  %s434_s25 = sand.u32 1, %s2949_s28  }
  0x2b   : > { %v598_v46 = vadd.f32 %v3229_v34, %v596_v41  ;;  %v599_v47 = vadd.f32 %v3229_v34, %v597_v42  ;;  %v563_v2 = vadd.f32 %v3229_v34, %v540_v57  ;;  %v542_v5 = vmul.f32 %v2379_v61, %v3221_v32  ;;  %v2411_v41 = vld [vmem:[%s3212_s24 + $0x20] sm:$0xff]   ;;  %v2850_v61 = vld [vmem:[%s3846_s3 + $0x188] sm:$0xff]   ;;  %s618_s11 = scalar_select %p617_p6, 0.0, 1.0 }
  0x2c   : > { %2427 = vmatpush3.bf16.msra.mxu0 %v2829_v22  ;;  %v576_v58 = vmax.f32 %v560_v51, 0.0  ;;  %v577_v59 = vmax.f32 %v561_v52, 0.0  ;;  %v578_v7 = vmax.f32 %v562_v1, 0.0  ;;  %v564_v12 = vadd.f32 %v3229_v34, %v541_v4  ;;  %v2842_v52 = vld [vmem:[%s3846_s3 + $0x108] sm:$0xff]   ;;  %s2262_s23 = sshll.u32 %s434_s25, 1  ;;  %s2358_s20 = sshll.u32 %s2961_s9, 1 }
  0x2d   : > { %2491 = vmatpush3.bf16.msra.mxu1 %v2830_v23  ;;  %2428 = vmatprep.subr.bf16.mxu0 %v2831_v24  ;;  %v600_v54 = vmax.f32 %v598_v46, 0.0  ;;  %v601_v55 = vmax.f32 %v599_v47, 0.0  ;;  %v579_v8 = vmax.f32 %v563_v2, 0.0  ;;  %v565_v13 = vadd.f32 %v3229_v34, %v542_v5  ;;  %v2845_v2 = vld [vmem:[%s3846_s3 + $0x110] sm:$0xff]   ;;  %s2082_s19 = sadd.s32 %s2957_s30, %s2358_s20  ;;  %s2067_s30 = scalar_lea.sflag [#allocation4], %s434_s25 }
  0x2e   : > { %2492 = vmatprep.subr.bf16.mxu1 %v2832_v25  ;;  %v3254_v3 = vpack.c.bf16 %v577_v59, %v576_v58  ;;  %v580_v18 = vmax.f32 %v564_v12, 0.0  ;;  %v543_v48 = vmul.f32 %v2382_v20, %v3221_v32  ;;  %s2359_s26 = sshll.u32 %s2082_s19, 5 }
  0x2f   : > { %v615_v63 = vmul.f32 %v614_v50, %v600_v54  ;;  %v616_v0 = vmul.f32 %v614_v50, %v601_v55  ;;  %v3263_v16 = vpack.c.bf16 %v579_v8, %v578_v7  ;;  %v581_v19 = vmax.f32 %v565_v13, 0.0  ;;  %v2848_v50 = vld [vmem:[%s3846_s3 + $0x1c8] sm:$0xff]   ;;  %v2847_v8 = vld [vmem:[%s3846_s3 + $0x158] sm:$0xff]   ;;  %s3790_s15 = scalar_lea.hbm %s3851_s8, %s2359_s26 }
  0x30   : > { %2429 = vmatpush3.bf16.msra.mxu0 %v2833_v26  ;;  %v640_v10 = vshrl.u32 %v3254_v3, 16  ;;  %v643_v11 = vshll.u32 %v3254_v3, 16  ;;  %v2386_v54 = vunpack.c.l.bf16 %v2411_v41  ;;  %v2387_v55 = vunpack.c.h.bf16 %v2411_v41 }
  0x31   : > { %2493 = vmatpush3.bf16.msra.mxu1 %v2834_v27  ;;  %2430 = vmatprep.subr.bf16.mxu0 %v2835_v28  ;;  %v622_v6 = vpack.c.bf16 %v616_v0, %v615_v63  ;;  %v647_v24 = vshrl.u32 %v3263_v16, 16  ;;  %v650_v25 = vshll.u32 %v3263_v16, 16  ;;  %v566_v58 = vadd.f32 %v3229_v34, %v543_v48 }
  0x32   : > { %2494 = vmatprep.subr.bf16.mxu1 %v2836_v29  ;;  %v642_v17 = vrot.slane %v640_v10, 7  ;;  %v727_v28 = vrot.slane %v643_v11, 1  ;;  %v3279_v29 = vpack.c.bf16 %v581_v19, %v580_v18  ;;  %v546_v63 = vmul.f32 %v2387_v55, %v3221_v32  ;;  %v2854_v19 = vld [vmem:[%s3846_s3 + $0x190] sm:$0xff]   ;;  %v2855_v55 = vld [vmem:[%s3846_s3 + $0x168] sm:$0xff]  }
  0x33   : > { %1527 = vmatprep.mubr.bf16.mxu0 %v622_v6  ;;  %v633_v14 = vshrl.u32 %v622_v6, 16  ;;  %v636_v15 = vshll.u32 %v622_v6, 16  ;;  %v649_v36 = vrot.slane %v647_v24, 7  ;;  %v729_v57 = vrot.slane %v650_v25, 1 }
  0x34   : > { %2431 = vmatpush3.bf16.msra.mxu0 %v2837_v30  ;;  %v645_v26 = vor.u32 %v643_v11, %v642_v17  ;;  %v2383_v30 = vunpack.c.h.bf16 %v2410_v9  ;;  %v654_v39 = vshrl.u32 %v3279_v29, 16  ;;  %v657_v40 = vshll.u32 %v3279_v29, 16  ;;  %v2852_v11 = vld [vmem:[%s3846_s3 + $0x1d0] sm:$0xff]  }
  0x35   : > { %2495 = vmatpush3.bf16.msra.mxu1 %v2838_v31  ;;  %2544 = vmatprep.subr.bf16.mxu0 %v2839_v38  ;;  %v635_v22 = vrot.slane %v633_v14, 7  ;;  %v725_v23 = vrot.slane %v636_v15, 1  ;;  %v652_v44 = vor.u32 %v650_v25, %v649_v36  ;;  %v728_v46 = vor.u32 %v727_v28, %v640_v10  ;;  %v2849_v25 = vld [vmem:[%s3846_s3 + $0x118] sm:$0xff]  }
  0x36   : > { %2608 = vmatprep.subr.bf16.mxu1 %v2844_v62  ;;  %v716_v38 = vsel %vm3267_vm4, 0, %v645_v26  ;;  %v656_v47 = vrot.slane %v654_v39, 7  ;;  %v544_v49 = vmul.f32 %v2383_v30, %v3221_v32  ;;  %v545_v62 = vmul.f32 %v2386_v54, %v3221_v32  ;;  %v2856_v28 = vld [vmem:[%s3846_s3 + $0x1d8] sm:$0xff]  }
  0x37   : > { %v638_v31 = vor.u32 %v636_v15, %v635_v22  ;;  %v726_v33 = vor.u32 %v725_v23, %v633_v14  ;;  %1624 = vmatprep.mubr.bf16.mxu1 %v716_v38  ;;  %v3309_v51 = vsel %vm3267_vm4, 0, %v652_v44  ;;  %v2390_v0 = vunpack.c.l.bf16 %v2412_v60  ;;  %v2413_v22 = vld [vmem:[%s3212_s24 + $0x30] sm:$0xff]  }
  0x38   : > { %v659_v56 = vor.u32 %v657_v40, %v656_v47  ;;  %v567_v59 = vadd.f32 %v3229_v34, %v544_v49  ;;  %v3330_v1 = vsel %vm3275_vm5, %v728_v46, 0  ;;  %v582_v4 = vmax.f32 %v566_v58, 0.0  ;;  %v2853_v49 = vld [vmem:[%s3846_s3 + $0x120] sm:$0xff]  }
  0x39   : > { %v715_v42 = vsel %vm3267_vm4, 0, %v638_v31  ;;  %v758_v43 = vsel %vm3275_vm5, %v726_v33, 0  ;;  %v2391_v6 = vunpack.c.h.bf16 %v2412_v60  ;;  %v568_v9 = vadd.f32 %v3229_v34, %v545_v62  ;;  %v2862_v58 = vld [vmem:[%s3846_s3 + $0x1a0] sm:$0xff]   ;;  %v2863_v60 = vld [vmem:[%s3846_s3 + $0x1e8] sm:$0xff]  }
  0x3a   : > { %1528 = vmatmul.mubr.bf16.vlgmr.msra.gmra.mrb[0].mxu0 %v715_v42  ;;  %1625 = vmatmul.mubr.bf16.vlgmr.msra.gmra.mrb[0].mxu1 %v758_v43  ;;  %v583_v5 = vmax.f32 %v567_v59, 0.0  ;;  %v3337_v7 = vsel %vm3267_vm4, 0, %v659_v56  ;;  %v569_v10 = vadd.f32 %v3229_v34, %v546_v63  ;;  %v547_v12 = vmul.f32 %v2390_v0, %v3221_v32  ;;  %v2860_v56 = vld [vmem:[%s3846_s3 + $0x1e0] sm:$0xff]   ;;  %v2414_v59 = vld [vmem:[%s3212_s24 + $0x38] sm:$0xff]   ;;  %v2857_v0 = vld [vmem:[%s3846_s3 + $0x128] sm:$0xff]  }
  0x3b   : > { %2545 = vmatpush3.bf16.msra.mxu0 %v2840_v35  ;;  %1535 = vmatprep.mubr.bf16.mxu0 %v3254_v3  ;;  %v730_v13 = vor.u32 %v729_v57, %v647_v24  ;;  %v548_v15 = vmul.f32 %v2391_v6, %v3221_v32  ;;  %v584_v17 = vmax.f32 %v568_v9, 0.0  ;;  %v2394_v30 = vunpack.c.l.bf16 %v2413_v22  ;;  %v2851_v35 = vld [vmem:[%s3846_s3 + $0x160] sm:$0xff]   ;;  %v2859_v9 = vld [vmem:[%s3846_s3 + $0x170] sm:$0xff]  }
  0x3c   : > { %1632 = vmatprep.mubr.bf16.mxu1 %v3309_v51  ;;  %2546 = vmatprep.subr.bf16.mxu0 %v2841_v37  ;;  %v3348_v14 = vpack.c.bf16 %v583_v5, %v582_v4  ;;  %v585_v18 = vmax.f32 %v569_v10, 0.0  ;;  %v570_v20 = vadd.f32 %v3229_v34, %v547_v12  ;;  %v731_v31 = vrot.slane %v657_v40, 1  ;;  %v2858_v40 = vld [vmem:[%s3846_s3 + $0x198] sm:$0xff]   ;;  %v2864_v10 = vld [vmem:[%s3846_s3 + $0x1a8] sm:$0xff]  }
  0x3d   : > { %2609 = vmatpush3.bf16.msra.mxu1 %v2846_v45  ;;  %v571_v26 = vadd.f32 %v3229_v34, %v548_v15  ;;  %v2395_v37 = vunpack.c.h.bf16 %v2413_v22  ;;  %v549_v43 = vmul.f32 %v2394_v30, %v3221_v32  ;;  %v2399_v62 = vunpack.c.h.bf16 %v2414_v59  ;;  %v2865_v22 = vld [vmem:[%s3846_s3 + $0x178] sm:$0xff]   ;;  %v2868_v30 = vld [vmem:[%s3846_s3 + $0x1b0] sm:$0xff]  }
  0x3e   : > { %2610 = vmatprep.subr.bf16.mxu1 %v2848_v50  ;;  %v661_v23 = vshrl.u32 %v3348_v14, 16  ;;  %v664_v24 = vshll.u32 %v3348_v14, 16  ;;  %v3370_v33 = vpack.c.bf16 %v585_v18, %v584_v17  ;;  %v586_v36 = vmax.f32 %v570_v20, 0.0 }
  0x3f   : > { %2547 = vmatpush3.bf16.msra.mxu0 %v2842_v52  ;;  %v587_v42 = vmax.f32 %v571_v26, 0.0  ;;  %v550_v46 = vmul.f32 %v2395_v37, %v3221_v32  ;;  %v572_v52 = vadd.f32 %v3229_v34, %v549_v43  ;;  %v732_v57 = vor.u32 %v731_v31, %v654_v39  ;;  %v2869_v31 = vld [vmem:[%s3846_s3 + $0x1f8] sm:$0xff]  }
  0x40   : > { %2548 = vmatprep.subr.bf16.mxu0 %v2843_v53  ;;  %v663_v41 = vrot.slane %v661_v23, 7  ;;  %v668_v44 = vshrl.u32 %v3370_v33, 16  ;;  %v671_v45 = vshll.u32 %v3370_v33, 16  ;;  %v2867_v37 = vld [vmem:[%s3846_s3 + $0x138] sm:$0xff]  }
  0x41   : > { %2611 = vmatpush3.bf16.msra.mxu1 %v2850_v61  ;;  %v3393_v50 = vpack.c.bf16 %v587_v42, %v586_v36  ;;  %v573_v53 = vadd.f32 %v3229_v34, %v550_v46  ;;  %v2398_v61 = vunpack.c.l.bf16 %v2414_v59  ;;  %v3430_v6 = vsel %vm3275_vm5, %v732_v57, 0  ;;  %v2870_v43 = vld [vmem:[%s3846_s3 + $0x1b8] sm:$0xff]  }
  0x42   : > { %1536 = vmatmul.mubr.bf16.gmra.mrb[4].mxu0 %v716_v38  ;;  %1633 = vmatmul.mubr.bf16.gmra.mrb[4].mxu1 %v3330_v1  ;;  %v3377_v38 = vsel %vm3275_vm5, %v730_v13, 0  ;;  %v666_v47 = vor.u32 %v664_v24, %v663_v41  ;;  %v670_v48 = vrot.slane %v668_v44, 7  ;;  %v2861_v13 = vld [vmem:[%s3846_s3 + $0x130] sm:$0xff]  }
  0x43   : > { %1543 = vmatprep.mubr.bf16.mxu0 %v3263_v16  ;;  %1640 = vmatprep.mubr.bf16.mxu1 %v3337_v7  ;;  %v675_v63 = vshrl.u32 %v3393_v50, 16  ;;  %v589_v4 = vmax.f32 %v573_v53, 0.0  ;;  %v551_v5 = vmul.f32 %v2398_v61, %v3221_v32  ;;  %v678_v12 = vshll.u32 %v3393_v50, 16 }
  0x44   : > { %2549 = vmatpush3.bf16.msra.mxu0 %v2845_v2  ;;  %2612 = vmatprep.subr.bf16.mxu1 %v2852_v11  ;;  %v3399_v54 = vsel %vm3267_vm4, 0, %v666_v47  ;;  %v673_v39 = vor.u32 %v671_v45, %v670_v48  ;;  %v588_v2 = vmax.f32 %v572_v52, 0.0  ;;  %v552_v11 = vmul.f32 %v2399_v62, %v3221_v32 }
  0x45   : > { %2550 = vmatprep.subr.bf16.mxu0 %v2847_v8  ;;  %2613 = vmatpush3.bf16.msra.mxu1 %v2854_v19  ;;  %v733_v8 = vrot.slane %v664_v24, 1  ;;  %v574_v15 = vadd.f32 %v3229_v34, %v551_v5  ;;  %v677_v18 = vrot.slane %v675_v63, 7 }
  0x46   : > { %2614 = vmatprep.subr.bf16.mxu1 %v2856_v28  ;;  %v3446_v17 = vsel %vm3267_vm4, 0, %v673_v39  ;;  %v3450_v19 = vpack.c.bf16 %v589_v4, %v588_v2  ;;  %v575_v20 = vadd.f32 %v3229_v34, %v552_v11  ;;  %v619_v2 = vstv %s618_s11  ;;  %s2975_s11 = smov [#allocation3]  }
  0x47   : > { %v590_v24 = vmax.f32 %v574_v15, 0.0  ;;  %v734_v26 = vor.u32 %v733_v8, %v661_v23  ;;  %v735_v23 = vrot.slane %v671_v45, 1  ;;  %v680_v41 = vor.u32 %v678_v12, %v677_v18  ;;  %v3498_v45 = vld [vmem:[%s3846_s3 + $0x200] sm:$0xff]   ;;  %s2883_s22 = sshll.u32 %s2975_s11, 4  ;;  %s2884_s22 = int_to_ptr.vmem [resolvable:$false] %s2883_s22 }
  0x48   : > { %2551 = vmatpush3.bf16.msra.mxu0 %v2849_v25  ;;  %v2866_v25 = vld [vmem:[%s3846_s3 + $0x1f0] sm:$0xff]   ;;  %v591_v28 = vmax.f32 %v575_v20, 0.0  ;;  %v685_v46 = vshll.u32 %v3450_v19, 16  ;;  %s2885_s21 = scalar_lea.vmem %s2884_s22, 64 }
  0x49   : > { %2552 = vmatprep.subr.bf16.mxu0 %v2851_v35  ;;  %2615 = vmatpush3.bf16.msra.mxu1 %v2858_v40  ;;  %v682_v35 = vshrl.u32 %v3450_v19, 16  ;;  %v3489_v42 = vsel %vm3275_vm5, %v734_v26, 0  ;;  %v3504_v52 = vsel %vm3267_vm4, 0, %v680_v41  ;;  %v2872_v41 = vld [vmem:[%s3846_s3 + $0x208] sm:$0xff]  }
  0x4a   : > { %1544 = vmatmul.mubr.bf16.gmra.mrb[8].mxu0 %v3309_v51  ;;  %1641 = vmatmul.mubr.bf16.gmra.mrb[8].mxu1 %v3377_v38  ;;  %v3474_v36 = vpack.c.bf16 %v591_v28, %v590_v24 }
  0x4b   : > { %1551 = vmatprep.mubr.bf16.mxu0 %v3279_v29  ;;  %1648 = vmatprep.mubr.bf16.mxu1 %v3399_v54  ;;  %v684_v53 = vrot.slane %v682_v35, 7 }
  0x4c   : > { %2553 = vmatpush3.bf16.msra.mxu0 %v2853_v49  ;;  %2616 = vmatprep.subr.bf16.mxu1 %v2860_v56  ;;  %v692_v40 = vshll.u32 %v3474_v36, 16  ;;  %v689_v47 = vshrl.u32 %v3474_v36, 16  ;;  %v2405_v49 = vld [vmem:[%s480_s17] sm:$0xff]   ;;  %s436_s17 = scalar_lea.vmem [#allocation3], %s2262_s23 }
  0x4d   : > { %2554 = vmatprep.subr.bf16.mxu0 %v2855_v55  ;;  %2617 = vmatpush3.bf16.msra.mxu1 %v2862_v58  ;;  %v2406_v55 = vunpack.c.l.bf16 %v2405_v49  ;;  %v2407_v56 = vunpack.c.h.bf16 %v2405_v49  ;;  %v687_v62 = vor.u32 %v685_v46, %v684_v53  ;;  %s2086_s29 = sshll.u32 %s436_s17, 4  ;;  %s3792_s29 = int_to_ptr.vmem [resolvable:$true] %s2086_s29 }
  0x4e   : > { %2618 = vmatprep.subr.bf16.mxu1 %v2863_v60  ;;  %v741_v48 = vrot.slane %v692_v40, 1  ;;  %v736_v60 = vor.u32 %v735_v23, %v668_v44  ;;  %v737_v44 = vrot.slane %v678_v12, 1  ;;  %s2879_s9 = scalar_lea.vmem %s3792_s29, 32  ;;  %p2886_p11 = scmp.lt.s32.totalorder %s3792_s29, %s2884_s22 }
  0x4f   : > { %v606_v58 = vmul.f32 %v2406_v55, %v3221_v32  ;;  %v607_v59 = vmul.f32 %v2407_v56, %v3221_v32  ;;  %v3534_v8 = vsel %vm3267_vm4, 0, %v687_v62  ;;  %p2880_p7 = scmp.ne.s32.totalorder %s3792_s29, %s2879_s9  ;;  %p2887_p12 = scmp.lt.s32.totalorder %s2885_s21, %s2879_s9 }
  0x50   : > { %2555 = vmatpush3.bf16.msra.mxu0 %v2857_v0  ;;  %v742_v57 = vor.u32 %v741_v48, %v689_v47  ;;  %v3528_v5 = vsel %vm3275_vm5, %v736_v60, 0  ;;  %v738_v12 = vor.u32 %v737_v44, %v675_v63 }
  0x51   : > { %2556 = vmatprep.subr.bf16.mxu0 %v2859_v9  ;;  %2619 = vmatpush3.bf16.msra.mxu1 %v2864_v10  ;;  %v608_v39 = vadd.f32 %v3229_v34, %v606_v58  ;;  %v609_v0 = vadd.f32 %v3229_v34, %v607_v59  ;;  %v691_v9 = vrot.slane %v689_v47, 7  ;;  %p2881_p9 = pnand %p2880_p7, %p3072_p3  ;;  %p2888_p13 = por %p2887_p12, %p2886_p11 }
  0x52   : > { %1552 = vmatmul.mubr.bf16.gmra.mrb[12].mxu0 %v3337_v7  ;;  %1649 = vmatmul.mubr.bf16.gmra.mrb[12].mxu1 %v3430_v6  ;;  %v3521_v61 = vsel %vm3275_vm5, %v742_v57, 0  ;;  %v3548_v24 = vsel %vm3275_vm5, %v738_v12, 0 }
  0x53   : > { %1559 = vmatprep.mubr.bf16.mxu0 %v3348_v14  ;;  %1656 = vmatprep.mubr.bf16.mxu1 %v3446_v17  ;;  %v610_v32 = vmax.f32 %v608_v39, 0.0  ;;  %v611_v4 = vmax.f32 %v609_v0, 0.0  ;;  %p2882_p10 = pneg %p2881_p9 }
  0x54   : > { %2557 = vmatpush3.bf16.msra.mxu0 %v2861_v13  ;;  %2620 = vmatprep.subr.bf16.mxu1 %v2866_v25  ;;  %v694_v13 = vor.u32 %v692_v40, %v691_v9  ;;  %v739_v25 = vrot.slane %v685_v46, 1 }
  0x55   : > { %2558 = vmatprep.subr.bf16.mxu0 %v2865_v22  ;;  %2621 = vmatpush3.bf16.msra.mxu1 %v2868_v30  ;;  %v620_v10 = vmul.f32 %v619_v2, %v610_v32  ;;  %v621_v11 = vmul.f32 %v619_v2, %v611_v4  ;;  %p2889_p0 = pnand %p2888_p13, %p2882_p10 }
  0x56   : > { %2622 = vmatprep.subr.bf16.mxu1 %v2869_v31  ;;  %v3552_v26 = vsel %vm3267_vm4, 0, %v694_v13  ;;  %v740_v23 = vor.u32 %v739_v25, %v682_v35 }
  0x57   : > { %v3538_v34 = vpack.c.bf16 %v621_v11, %v620_v10 }
  0x58   : > { %2559 = vmatpush3.bf16.msra.mxu0 %v2867_v37  ;;  %v3572_v37 = vsel %vm3275_vm5, %v740_v23, 0 }
  0x59   : > { %2623 = vmatpush3.bf16.msra.mxu1 %v2870_v43  ;;  %2688 = vmatprep.subr.bf16.mxu0 %v3498_v45  ;;  %v696_v15 = vshrl.u32 %v3538_v34, 16  ;;  %v699_v18 = vshll.u32 %v3538_v34, 16 }
  0x5a   : > { %1560 = vmatmul.mubr.bf16.gmra.mrb[16].mxu0 %v3399_v54  ;;  %1657 = vmatmul.mubr.bf16.gmra.mrb[16].mxu1 %v3489_v42 }
  0x5b   : > { %1567 = vmatprep.mubr.bf16.mxu0 %v3370_v33  ;;  %1664 = vmatprep.mubr.bf16.mxu1 %v3504_v52  ;;  %v698_v20 = vrot.slane %v696_v15, 7  ;;  %v743_v22 = vrot.slane %v699_v18, 1 }
  0x5c   : > { %2720 = vmatprep.subr.bf16.mxu1 %v3498_v45 }
  0x5d   : > { %v3554_v28 = vor.u32 %v699_v18, %v698_v20  ;;  %v3556_v30 = vor.u32 %v743_v22, %v696_v15 }
  0x5f   : > { %v724_v63 = vsel %vm3267_vm4, 0, %v3554_v28  ;;  %v767_v31 = vsel %vm3275_vm5, %v3556_v30, 0 }
  0x62   : > { %1568 = vmatmul.mubr.bf16.gmra.mrb[20].mxu0 %v3446_v17  ;;  %1665 = vmatmul.mubr.bf16.gmra.mrb[20].mxu1 %v3528_v5 }
  0x63   : > { %1575 = vmatprep.mubr.bf16.mxu0 %v3393_v50  ;;  %1672 = vmatprep.mubr.bf16.mxu1 %v3534_v8 }
  0x6a   : > { %1576 = vmatmul.mubr.bf16.gmra.mrb[24].mxu0 %v3504_v52  ;;  %1673 = vmatmul.mubr.bf16.gmra.mrb[24].mxu1 %v3548_v24 }
  0x6b   : > { %1583 = vmatprep.mubr.bf16.mxu0 %v3450_v19  ;;  %1680 = vmatprep.mubr.bf16.mxu1 %v3552_v26 }
  0x72   : > { %1584 = vmatmul.mubr.bf16.gmra.mrb[28].mxu0 %v3534_v8  ;;  %1681 = vmatmul.mubr.bf16.gmra.mrb[28].mxu1 %v3572_v37 }
  0x73   : > { %1721 = vmatprep.mubr.bf16.mxu0 %v3330_v1  ;;  %1818 = vmatprep.mubr.bf16.mxu1 %v3263_v16  ;;  %v2873_v1 = vld [vmem:[%s3846_s3 + $0x210] sm:$0xff]  }
  0x7a   : > { %1722 = vmatmul.mubr.bf16.vlgmr.msra.gmra.mrb[32].mxu0 %v3254_v3  ;;  %1819 = vmatmul.mubr.bf16.vlgmr.msra.gmra.mrb[32].mxu1 %v3309_v51  ;;  %v2874_v3 = vld [vmem:[%s3846_s3 + $0x218] sm:$0xff]   ;;  %v2875_v51 = vld [vmem:[%s3846_s3 + $0x220] sm:$0xff]  }
  0x7b   : > { %2689 = vmatpush3.bf16.msra.mxu0 %v3498_v45  ;;  %1729 = vmatprep.mubr.bf16.mxu0 %v3377_v38 }
  0x7c   : > { %1826 = vmatprep.mubr.bf16.mxu1 %v3279_v29  ;;  %2690 = vmatprep.subr.bf16.mxu0 %v2872_v41 }
  0x7d   : > { %2728 = vmatpush3.bf16.msra.mxu1 %v3498_v45 }
  0x7e   : > { %2721 = vmatprep.subr.bf16.mxu1 %v2872_v41 }
  0x7f   : > { %2691 = vmatpush3.bf16.msra.mxu0 %v2872_v41 }
  0x80   : > { %2692 = vmatprep.subr.bf16.mxu0 %v2873_v1 }
  0x81   : > { %2729 = vmatpush3.bf16.msra.mxu1 %v2872_v41 }
  0x82   : > { %1730 = vmatmul.mubr.bf16.gmra.mrb[36].mxu0 %v3263_v16  ;;  %1827 = vmatmul.mubr.bf16.gmra.mrb[36].mxu1 %v3337_v7  ;;  %v2876_v16 = vld [vmem:[%s3846_s3 + $0x228] sm:$0xff]   ;;  %v2877_v7 = vld [vmem:[%s3846_s3 + $0x230] sm:$0xff]  }
  0x83   : > { %1737 = vmatprep.mubr.bf16.mxu0 %v3430_v6  ;;  %1834 = vmatprep.mubr.bf16.mxu1 %v3348_v14 }
  0x84   : > { %2693 = vmatpush3.bf16.msra.mxu0 %v2873_v1  ;;  %2722 = vmatprep.subr.bf16.mxu1 %v2873_v1 }
  0x85   : > { %2694 = vmatprep.subr.bf16.mxu0 %v2874_v3  ;;  %2730 = vmatpush3.bf16.msra.mxu1 %v2873_v1 }
  0x86   : > { %2723 = vmatprep.subr.bf16.mxu1 %v2874_v3 }
  0x88   : > { %2695 = vmatpush3.bf16.msra.mxu0 %v2874_v3 }
  0x89   : > { %2696 = vmatprep.subr.bf16.mxu0 %v2875_v51  ;;  %2731 = vmatpush3.bf16.msra.mxu1 %v2874_v3 }
  0x8a   : > { %1738 = vmatmul.mubr.bf16.gmra.mrb[40].mxu0 %v3279_v29  ;;  %1835 = vmatmul.mubr.bf16.gmra.mrb[40].mxu1 %v3399_v54  ;;  %v2878_v29 = vld [vmem:[%s3846_s3 + $0x238] sm:$0xff]  }
  0x8b   : > { %1745 = vmatprep.mubr.bf16.mxu0 %v3489_v42  ;;  %1842 = vmatprep.mubr.bf16.mxu1 %v3370_v33 }
  0x8c   : > { %2697 = vmatpush3.bf16.msra.mxu0 %v2875_v51  ;;  %2724 = vmatprep.subr.bf16.mxu1 %v2875_v51 }
  0x8d   : > { %2698 = vmatprep.subr.bf16.mxu0 %v2876_v16  ;;  %2732 = vmatpush3.bf16.msra.mxu1 %v2875_v51 }
  0x8e   : > { %2725 = vmatprep.subr.bf16.mxu1 %v2876_v16 }
  0x90   : > { %2699 = vmatpush3.bf16.msra.mxu0 %v2876_v16 }
  0x91   : > { %2700 = vmatprep.subr.bf16.mxu0 %v2877_v7  ;;  %2733 = vmatpush3.bf16.msra.mxu1 %v2876_v16 }
  0x92   : > { %1746 = vmatmul.mubr.bf16.gmra.mrb[44].mxu0 %v3348_v14  ;;  %1843 = vmatmul.mubr.bf16.gmra.mrb[44].mxu1 %v3446_v17 }
  0x93   : > { %1753 = vmatprep.mubr.bf16.mxu0 %v3528_v5  ;;  %1850 = vmatprep.mubr.bf16.mxu1 %v3393_v50 }
  0x94   : > { %2701 = vmatpush3.bf16.msra.mxu0 %v2877_v7  ;;  %2726 = vmatprep.subr.bf16.mxu1 %v2877_v7 }
  0x95   : > { %2702 = vmatprep.subr.bf16.mxu0 %v2878_v29  ;;  %2734 = vmatpush3.bf16.msra.mxu1 %v2877_v7 }
  0x96   : > { %2727 = vmatprep.subr.bf16.mxu1 %v2878_v29 }
  0x98   : > { %2703 = vmatpush3.bf16.msra.mxu0 %v2878_v29 }
  0x99   : > { %2735 = vmatpush3.bf16.msra.mxu1 %v2878_v29 }
  0x9a   : > { %1754 = vmatmul.mubr.bf16.gmra.mrb[48].mxu0 %v3370_v33  ;;  %1851 = vmatmul.mubr.bf16.gmra.mrb[48].mxu1 %v3504_v52  ;;  %v3648_v33 = vld [vmem:[%s3847_s4] ss:$0 sm:$0xff] }
  0x9b   : > { %1761 = vmatprep.mubr.bf16.mxu0 %v3548_v24  ;;  %1858 = vmatprep.mubr.bf16.mxu1 %v3450_v19 }
  0xa2   : > { %1762 = vmatmul.mubr.bf16.gmra.mrb[52].mxu0 %v3393_v50  ;;  %1859 = vmatmul.mubr.bf16.gmra.mrb[52].mxu1 %v3534_v8 }
  0xa3   : > { %1769 = vmatprep.mubr.bf16.mxu0 %v3572_v37  ;;  %1866 = vmatprep.mubr.bf16.mxu1 %v3474_v36 }
  0xaa   : > { %1770 = vmatmul.mubr.bf16.gmra.mrb[56].mxu0 %v3450_v19  ;;  %1867 = vmatmul.mubr.bf16.gmra.mrb[56].mxu1 %v3552_v26 }
  0xab   : > { %1777 = vmatprep.mubr.bf16.mxu0 %v3521_v61  ;;  %1874 = vmatprep.mubr.bf16.mxu1 %v3538_v34 }
  0xb2   : > { %1778 = vmatmul.mubr.bf16.gmra.mrb[60].mxu0 %v3474_v36  ;;  %1875 = vmatmul.mubr.bf16.gmra.mrb[60].mxu1 %v724_v63 }
  0xb3   : > { %2704 = vmatprep.mubr.bf16.mxu0 %v3377_v38  ;;  %2712 = vmatprep.mubr.bf16.mxu1 %v3548_v24 }
  0xba   : > { %2705 = vmatmul.mubr.bf16.vlgmr.msra.gmra.mrb[64].mxu0 %v3430_v6  ;;  %2713 = vmatmul.mubr.bf16.vlgmr.msra.gmra.mrb[64].mxu1 %v3572_v37 }
  0xbb   : > { %2708 = vmatprep.mubr.bf16.mxu0 %v3489_v42  ;;  %2716 = vmatprep.mubr.bf16.mxu1 %v3521_v61 }
  0xc2   : > { %2709 = vmatmul.mubr.bf16.gmra.mrb[68].mxu0 %v3528_v5  ;;  %2717 = vmatmul.mubr.bf16.gmra.mrb[68].mxu1 %v767_v31 }
 0x10d   : > { %v2432_v21 = vpop.f32.mrb[0].mxu0  ;;  %v2496_v14 = vpop.f32.mrb[0].mxu1 }
 0x10e   : > { %v2433_v38 = vpop.f32.mrb[1].mxu0  ;;  %v2497_v50 = vpop.f32.mrb[1].mxu1 }
 0x10f   : > { %v2434_v54 = vadd.f32 %v2433_v38, %v2432_v21  ;;  %v2435_v6 = vpop.f32.mrb[2].mxu0  ;;  %v2498_v17 = vadd.f32 %v2497_v50, %v2496_v14  ;;  %v2499_v19 = vpop.f32.mrb[2].mxu1 }
 0x110   : > { %v2436_v35 = vpop.f32.mrb[3].mxu0  ;;  %v2500_v36 = vpop.f32.mrb[3].mxu1 }
 0x111   : > { %v1530_v27 = vadd.f32 %v2434_v54, %v3648_v33  ;;  %v2437_v42 = vadd.f32 %v2436_v35, %v2435_v6  ;;  %v2501_v40 = vadd.f32 %v2500_v36, %v2499_v19 }
 0x113   : > { %v1533_v43 = vadd.f32 %v2437_v42, %v3648_v33  ;;  %v3652_v45 = vadd.f32 %v2498_v17, %v1530_v27 }
 0x115   : > { %v3654_v46 = vadd.f32 %v2501_v40, %v1533_v43  ;;  %v2438_v47 = vpop.f32.mrb[4].mxu0  ;;  %v2502_v48 = vpop.f32.mrb[4].mxu1 }
 0x116   : > { %v2439_v49 = vpop.f32.mrb[5].mxu0  ;;  %v2503_v52 = vpop.f32.mrb[5].mxu1 }
 0x117   : > { %v2440_v53 = vadd.f32 %v2439_v49, %v2438_v47  ;;  %v2441_v55 = vpop.f32.mrb[6].mxu0  ;;  %v2504_v56 = vadd.f32 %v2503_v52, %v2502_v48  ;;  %v2505_v57 = vpop.f32.mrb[6].mxu1 }
 0x118   : > { %v2442_v58 = vpop.f32.mrb[7].mxu0  ;;  %v2506_v59 = vpop.f32.mrb[7].mxu1 }
 0x119   : > { %v1538_v60 = vadd.f32 %v2440_v53, %v3648_v33  ;;  %v2443_v61 = vadd.f32 %v2442_v58, %v2441_v55  ;;  %v2507_v62 = vadd.f32 %v2506_v59, %v2505_v57 }
 0x11b   : > { %v1541_v39 = vadd.f32 %v2443_v61, %v3648_v33  ;;  %v3658_v0 = vadd.f32 %v2504_v56, %v1538_v60 }
 0x11d   : > { %v3660_v2 = vadd.f32 %v2507_v62, %v1541_v39  ;;  %v2444_v32 = vpop.f32.mrb[8].mxu0  ;;  %v2508_v4 = vpop.f32.mrb[8].mxu1 }
 0x11e   : > { %v2445_v5 = vpop.f32.mrb[9].mxu0  ;;  %v2509_v44 = vpop.f32.mrb[9].mxu1 }
 0x11f   : > { %v2446_v8 = vadd.f32 %v2445_v5, %v2444_v32  ;;  %v2447_v9 = vpop.f32.mrb[10].mxu0  ;;  %v2510_v10 = vadd.f32 %v2509_v44, %v2508_v4  ;;  %v2511_v11 = vpop.f32.mrb[10].mxu1 }
 0x120   : > { %v2448_v34 = vpop.f32.mrb[11].mxu0  ;;  %v2512_v12 = vpop.f32.mrb[11].mxu1 }
 0x121   : > { %v1546_v13 = vadd.f32 %v2446_v8, %v3648_v33  ;;  %v2449_v15 = vadd.f32 %v2448_v34, %v2447_v9  ;;  %v2513_v18 = vadd.f32 %v2512_v12, %v2511_v11 }
 0x123   : > { %v1549_v20 = vadd.f32 %v2449_v15, %v3648_v33  ;;  %v3664_v22 = vadd.f32 %v2510_v10, %v1546_v13 }
 0x125   : > { %v3666_v24 = vadd.f32 %v2513_v18, %v1549_v20  ;;  %v2450_v25 = vpop.f32.mrb[12].mxu0  ;;  %v2514_v26 = vpop.f32.mrb[12].mxu1 }
 0x126   : > { %v2451_v28 = vpop.f32.mrb[13].mxu0  ;;  %v2515_v30 = vpop.f32.mrb[13].mxu1 }
 0x127   : > { %v2452_v63 = vadd.f32 %v2451_v28, %v2450_v25  ;;  %v2453_v31 = vpop.f32.mrb[14].mxu0  ;;  %v2516_v23 = vadd.f32 %v2515_v30, %v2514_v26  ;;  %v2517_v37 = vpop.f32.mrb[14].mxu1 }
 0x128   : > { %v2454_v41 = vpop.f32.mrb[15].mxu0  ;;  %v2518_v1 = vpop.f32.mrb[15].mxu1 }
 0x129   : > { %v1554_v3 = vadd.f32 %v2452_v63, %v3648_v33  ;;  %v2455_v51 = vadd.f32 %v2454_v41, %v2453_v31  ;;  %v2519_v16 = vadd.f32 %v2518_v1, %v2517_v37 }
 0x12b   : > { %v1557_v7 = vadd.f32 %v2455_v51, %v3648_v33  ;;  %v3670_v29 = vadd.f32 %v2516_v23, %v1554_v3 }
 0x12d   : > { %v3672_v21 = vadd.f32 %v2519_v16, %v1557_v7  ;;  %v2456_v14 = vpop.f32.mrb[16].mxu0  ;;  %v2520_v38 = vpop.f32.mrb[16].mxu1 }
 0x12e   : > { %v2457_v50 = vpop.f32.mrb[17].mxu0  ;;  %v2521_v54 = vpop.f32.mrb[17].mxu1 }
 0x12f   : > { %v2458_v6 = vadd.f32 %v2457_v50, %v2456_v14  ;;  %v2459_v17 = vpop.f32.mrb[18].mxu0  ;;  %v2522_v19 = vadd.f32 %v2521_v54, %v2520_v38  ;;  %v2523_v35 = vpop.f32.mrb[18].mxu1 }
 0x130   : > { %v2460_v36 = vpop.f32.mrb[19].mxu0  ;;  %v2524_v27 = vpop.f32.mrb[19].mxu1 }
 0x131   : > { %v1562_v42 = vadd.f32 %v2458_v6, %v3648_v33  ;;  %v2461_v40 = vadd.f32 %v2460_v36, %v2459_v17  ;;  %v2525_v43 = vadd.f32 %v2524_v27, %v2523_v35 }
 0x133   : > { %v1565_v47 = vadd.f32 %v2461_v40, %v3648_v33  ;;  %v3676_v48 = vadd.f32 %v2522_v19, %v1562_v42 }
 0x135   : > { %v3678_v49 = vadd.f32 %v2525_v43, %v1565_v47  ;;  %v2462_v52 = vpop.f32.mrb[20].mxu0  ;;  %v2526_v53 = vpop.f32.mrb[20].mxu1 }
 0x136   : > { %v2463_v55 = vpop.f32.mrb[21].mxu0  ;;  %v2527_v56 = vpop.f32.mrb[21].mxu1 }
 0x137   : > { %v2464_v57 = vadd.f32 %v2463_v55, %v2462_v52  ;;  %v2465_v58 = vpop.f32.mrb[22].mxu0  ;;  %v2528_v59 = vadd.f32 %v2527_v56, %v2526_v53  ;;  %v2529_v60 = vpop.f32.mrb[22].mxu1 }
 0x138   : > { %v2466_v61 = vpop.f32.mrb[23].mxu0  ;;  %v2530_v62 = vpop.f32.mrb[23].mxu1 }
 0x139   : > { %v1570_v39 = vadd.f32 %v2464_v57, %v3648_v33  ;;  %v2467_v32 = vadd.f32 %v2466_v61, %v2465_v58  ;;  %v2531_v4 = vadd.f32 %v2530_v62, %v2529_v60 }
 0x13b   : > { %v1573_v5 = vadd.f32 %v2467_v32, %v3648_v33  ;;  %v3682_v44 = vadd.f32 %v2528_v59, %v1570_v39 }
 0x13d   : > { %v3684_v8 = vadd.f32 %v2531_v4, %v1573_v5  ;;  %v2468_v9 = vpop.f32.mrb[24].mxu0  ;;  %v2532_v10 = vpop.f32.mrb[24].mxu1 }
 0x13e   : > { %v2469_v11 = vpop.f32.mrb[25].mxu0  ;;  %v2533_v34 = vpop.f32.mrb[25].mxu1 }
 0x13f   : > { %v2470_v12 = vadd.f32 %v2469_v11, %v2468_v9  ;;  %v2471_v13 = vpop.f32.mrb[26].mxu0  ;;  %v2534_v15 = vadd.f32 %v2533_v34, %v2532_v10  ;;  %v2535_v18 = vpop.f32.mrb[26].mxu1 }
 0x140   : > { %v2472_v20 = vpop.f32.mrb[27].mxu0  ;;  %v2536_v25 = vpop.f32.mrb[27].mxu1 }
 0x141   : > { %v1578_v26 = vadd.f32 %v2470_v12, %v3648_v33  ;;  %v2473_v28 = vadd.f32 %v2472_v20, %v2471_v13  ;;  %v2537_v30 = vadd.f32 %v2536_v25, %v2535_v18 }
 0x143   : > { %v1581_v63 = vadd.f32 %v2473_v28, %v3648_v33  ;;  %v3688_v31 = vadd.f32 %v2534_v15, %v1578_v26 }
 0x145   : > { %v3690_v23 = vadd.f32 %v2537_v30, %v1581_v63  ;;  %v2474_v37 = vpop.f32.mrb[28].mxu0  ;;  %v2538_v41 = vpop.f32.mrb[28].mxu1 }
 0x146   : > { %v2475_v1 = vpop.f32.mrb[29].mxu0  ;;  %v2539_v3 = vpop.f32.mrb[29].mxu1 }
 0x147   : > { %v2476_v51 = vadd.f32 %v2475_v1, %v2474_v37  ;;  %v2477_v16 = vpop.f32.mrb[30].mxu0  ;;  %v2540_v7 = vadd.f32 %v2539_v3, %v2538_v41  ;;  %v2541_v14 = vpop.f32.mrb[30].mxu1 }
 0x148   : > { %v2478_v38 = vpop.f32.mrb[31].mxu0  ;;  %v2542_v50 = vpop.f32.mrb[31].mxu1 }
 0x149   : > { %v1586_v54 = vadd.f32 %v2476_v51, %v3648_v33  ;;  %v2479_v6 = vadd.f32 %v2478_v38, %v2477_v16  ;;  %v2543_v17 = vadd.f32 %v2542_v50, %v2541_v14 }
 0x14b   : > { %v1589_v19 = vadd.f32 %v2479_v6, %v3648_v33  ;;  %v3694_v35 = vadd.f32 %v2540_v7, %v1586_v54 }
 0x14d   : > { %v3696_v36 = vadd.f32 %v2543_v17, %v1589_v19  ;;  %v2560_v27 = vpop.f32.mrb[32].mxu0  ;;  %v2624_v42 = vpop.f32.mrb[32].mxu1 }
 0x14e   : > { %v2561_v40 = vpop.f32.mrb[33].mxu0  ;;  %v2625_v43 = vpop.f32.mrb[33].mxu1 }
 0x14f   : > { %v2562_v47 = vadd.f32 %v2561_v40, %v2560_v27  ;;  %v2563_v52 = vpop.f32.mrb[34].mxu0  ;;  %v2626_v53 = vadd.f32 %v2625_v43, %v2624_v42  ;;  %v2627_v55 = vpop.f32.mrb[34].mxu1 }
 0x150   : > { %v2564_v56 = vpop.f32.mrb[35].mxu0  ;;  %v2628_v57 = vpop.f32.mrb[35].mxu1 }
 0x151   : > { %v1724_v58 = vadd.f32 %v2562_v47, %v3652_v45  ;;  %v2565_v59 = vadd.f32 %v2564_v56, %v2563_v52  ;;  %v2629_v60 = vadd.f32 %v2628_v57, %v2627_v55 }
 0x153   : > { %v1727_v33 = vadd.f32 %v2565_v59, %v3654_v46  ;;  %v3700_v61 = vadd.f32 %v2626_v53, %v1724_v58 }
 0x155   : > { %v2566_v62 = vpop.f32.mrb[36].mxu0  ;;  %v2630_v39 = vpop.f32.mrb[36].mxu1  ;;  %v3702_v32 = vadd.f32 %v2629_v60, %v1727_v33 }
 0x156   : > { %v2567_v4 = vpop.f32.mrb[37].mxu0  ;;  %v2631_v5 = vpop.f32.mrb[37].mxu1 }
 0x157   : > { %v2568_v9 = vadd.f32 %v2567_v4, %v2566_v62  ;;  %v2569_v10 = vpop.f32.mrb[38].mxu0  ;;  %v2632_v11 = vadd.f32 %v2631_v5, %v2630_v39  ;;  %v2633_v34 = vpop.f32.mrb[38].mxu1 }
 0x158   : > { %v2570_v12 = vpop.f32.mrb[39].mxu0  ;;  %v2634_v13 = vpop.f32.mrb[39].mxu1 }
 0x159   : > { %v1732_v45 = vadd.f32 %v2568_v9, %v3658_v0  ;;  %v2571_v15 = vadd.f32 %v2570_v12, %v2569_v10  ;;  %v2635_v18 = vadd.f32 %v2634_v13, %v2633_v34 }
 0x15b   : > { %v1735_v46 = vadd.f32 %v2571_v15, %v3660_v2  ;;  %v3706_v20 = vadd.f32 %v2632_v11, %v1732_v45 }
 0x15d   : > { %v2572_v25 = vpop.f32.mrb[40].mxu0  ;;  %v2636_v26 = vpop.f32.mrb[40].mxu1  ;;  %v3708_v28 = vadd.f32 %v2635_v18, %v1735_v46 }
 0x15e   : > { %v2573_v30 = vpop.f32.mrb[41].mxu0  ;;  %v2637_v63 = vpop.f32.mrb[41].mxu1 }
 0x15f   : > { %v2574_v37 = vadd.f32 %v2573_v30, %v2572_v25  ;;  %v2575_v41 = vpop.f32.mrb[42].mxu0  ;;  %v2638_v1 = vadd.f32 %v2637_v63, %v2636_v26  ;;  %v2639_v3 = vpop.f32.mrb[42].mxu1 }
 0x160   : > { %v2576_v51 = vpop.f32.mrb[43].mxu0  ;;  %v2640_v16 = vpop.f32.mrb[43].mxu1 }
 0x161   : > { %v1740_v0 = vadd.f32 %v2574_v37, %v3664_v22  ;;  %v2577_v7 = vadd.f32 %v2576_v51, %v2575_v41  ;;  %v2641_v14 = vadd.f32 %v2640_v16, %v2639_v3 }
 0x163   : > { %v1743_v2 = vadd.f32 %v2577_v7, %v3666_v24  ;;  %v3712_v38 = vadd.f32 %v2638_v1, %v1740_v0 }
 0x165   : > { %v2578_v50 = vpop.f32.mrb[44].mxu0  ;;  %v2642_v54 = vpop.f32.mrb[44].mxu1  ;;  %v3714_v6 = vadd.f32 %v2641_v14, %v1743_v2 }
 0x166   : > { %v2579_v17 = vpop.f32.mrb[45].mxu0  ;;  %v2643_v19 = vpop.f32.mrb[45].mxu1 }
 0x167   : > { %v2580_v27 = vadd.f32 %v2579_v17, %v2578_v50  ;;  %v2581_v42 = vpop.f32.mrb[46].mxu0  ;;  %v2644_v40 = vadd.f32 %v2643_v19, %v2642_v54  ;;  %v2645_v43 = vpop.f32.mrb[46].mxu1 }
 0x168   : > { %v2582_v47 = vpop.f32.mrb[47].mxu0  ;;  %v2646_v52 = vpop.f32.mrb[47].mxu1 }
 0x169   : > { %v1748_v22 = vadd.f32 %v2580_v27, %v3670_v29  ;;  %v2583_v53 = vadd.f32 %v2582_v47, %v2581_v42  ;;  %v2647_v55 = vadd.f32 %v2646_v52, %v2645_v43 }
 0x16b   : > { %v1751_v24 = vadd.f32 %v2583_v53, %v3672_v21  ;;  %v3718_v56 = vadd.f32 %v2644_v40, %v1748_v22 }
 0x16d   : > { %v2584_v57 = vpop.f32.mrb[48].mxu0  ;;  %v2648_v58 = vpop.f32.mrb[48].mxu1  ;;  %v3720_v59 = vadd.f32 %v2647_v55, %v1751_v24 }
 0x16e   : > { %v2585_v60 = vpop.f32.mrb[49].mxu0  ;;  %v2649_v33 = vpop.f32.mrb[49].mxu1 }
 0x16f   : > { %v2586_v62 = vadd.f32 %v2585_v60, %v2584_v57  ;;  %v2587_v39 = vpop.f32.mrb[50].mxu0  ;;  %v2650_v4 = vadd.f32 %v2649_v33, %v2648_v58  ;;  %v2651_v5 = vpop.f32.mrb[50].mxu1 }
 0x170   : > { %v2588_v9 = vpop.f32.mrb[51].mxu0  ;;  %v2652_v10 = vpop.f32.mrb[51].mxu1 }
 0x171   : > { %v1756_v29 = vadd.f32 %v2586_v62, %v3676_v48  ;;  %v2589_v11 = vadd.f32 %v2588_v9, %v2587_v39  ;;  %v2653_v34 = vadd.f32 %v2652_v10, %v2651_v5 }
 0x173   : > { %v1759_v21 = vadd.f32 %v2589_v11, %v3678_v49  ;;  %v1853_v12 = vadd.f32 %v2650_v4, %v1756_v29 }
 0x175   : > { %v2590_v13 = vpop.f32.mrb[52].mxu0  ;;  %v2654_v45 = vpop.f32.mrb[52].mxu1  ;;  %v3724_v15 = vadd.f32 %v2653_v34, %v1759_v21 }
 0x176   : > { %v2591_v18 = vpop.f32.mrb[53].mxu0  ;;  %v2655_v46 = vpop.f32.mrb[53].mxu1 }
 0x177   : > { %v2592_v25 = vadd.f32 %v2591_v18, %v2590_v13  ;;  %v2593_v26 = vpop.f32.mrb[54].mxu0  ;;  %v2656_v30 = vadd.f32 %v2655_v46, %v2654_v45  ;;  %v2657_v63 = vpop.f32.mrb[54].mxu1 }
 0x178   : > { %v2594_v37 = vpop.f32.mrb[55].mxu0  ;;  %v2658_v41 = vpop.f32.mrb[55].mxu1 }
 0x179   : > { %v1764_v1 = vadd.f32 %v2592_v25, %v3682_v44  ;;  %v2595_v48 = vadd.f32 %v2594_v37, %v2593_v26  ;;  %v2659_v3 = vadd.f32 %v2658_v41, %v2657_v63 }
 0x17b   : > { %v1767_v51 = vadd.f32 %v2595_v48, %v3684_v8  ;;  %v1861_v49 = vadd.f32 %v2656_v30, %v1764_v1 }
 0x17d   : > { %v2596_v16 = vpop.f32.mrb[56].mxu0  ;;  %v2660_v0 = vpop.f32.mrb[56].mxu1  ;;  %v1864_v7 = vadd.f32 %v2659_v3, %v1767_v51 }
 0x17e   : > { %v2597_v14 = vpop.f32.mrb[57].mxu0  ;;  %v2661_v2 = vpop.f32.mrb[57].mxu1 }
 0x17f   : > { %v2598_v50 = vadd.f32 %v2597_v14, %v2596_v16  ;;  %v2599_v54 = vpop.f32.mrb[58].mxu0  ;;  %v2662_v17 = vadd.f32 %v2661_v2, %v2660_v0  ;;  %v2663_v19 = vpop.f32.mrb[58].mxu1 }
 0x180   : > { %v2600_v27 = vpop.f32.mrb[59].mxu0  ;;  %v2664_v42 = vpop.f32.mrb[59].mxu1 }
 0x181   : > { %v1772_v40 = vadd.f32 %v2598_v50, %v3688_v31  ;;  %v2601_v43 = vadd.f32 %v2600_v27, %v2599_v54  ;;  %v2665_v44 = vadd.f32 %v2664_v42, %v2663_v19 }
 0x183   : > { %v1775_v47 = vadd.f32 %v2601_v43, %v3690_v23  ;;  %v1869_v8 = vadd.f32 %v2662_v17, %v1772_v40 }
 0x185   : > { %v2602_v52 = vpop.f32.mrb[60].mxu0  ;;  %v2666_v22 = vpop.f32.mrb[60].mxu1  ;;  %v3730_v53 = vadd.f32 %v2665_v44, %v1775_v47 }
 0x186   : > { %v2603_v55 = vpop.f32.mrb[61].mxu0  ;;  %v2667_v24 = vpop.f32.mrb[61].mxu1 }
 0x187   : > { %v2604_v57 = vadd.f32 %v2603_v55, %v2602_v52  ;;  %v2605_v58 = vpop.f32.mrb[62].mxu0  ;;  %v2668_v60 = vadd.f32 %v2667_v24, %v2666_v22  ;;  %v2669_v33 = vpop.f32.mrb[62].mxu1 }
 0x188   : > { %v2606_v62 = vpop.f32.mrb[63].mxu0  ;;  %v2670_v39 = vpop.f32.mrb[63].mxu1 }
 0x189   : > { %v1780_v31 = vadd.f32 %v2604_v57, %v3694_v35  ;;  %v2607_v4 = vadd.f32 %v2606_v62, %v2605_v58  ;;  %v2671_v5 = vadd.f32 %v2670_v39, %v2669_v33 }
 0x18b   : > { %v1783_v23 = vadd.f32 %v2607_v4, %v3696_v36  ;;  %v1877_v9 = vadd.f32 %v2668_v60, %v1780_v31 }
 0x18d   : > { %v2706_v10 = vpop.f32.mrb[64].mxu0  ;;  %v2714_v29 = vpop.f32.mrb[64].mxu1  ;;  %v1880_v11 = vadd.f32 %v2671_v5, %v1783_v23 }
 0x18e   : > { %v1926_v35 = vadd.f32 %v2706_v10, %v3706_v20  ;;  %v3741_v34 = vadd.f32 %v2714_v29, %v1861_v49  ;;  %v1917_v21 = vpop.f32.mrb[65].mxu0  ;;  %v1949_v36 = vpop.f32.mrb[65].mxu1 }
 0x18f   : > { %v1918_v13 = vadd.f32 %v1917_v21, %v3700_v61  ;;  %v3744_v45 = vadd.f32 %v1949_v36, %v1853_v12  ;;  %v2707_v18 = vpop.f32.mrb[66].mxu0  ;;  %v2715_v46 = vpop.f32.mrb[66].mxu1 }
 0x190   : > { %2042 = vst [vmem:[%s3738_s14 + $0x10] sm:$0xff] %v1926_v35  ;;  %2050 = vst [vmem:[%s3738_s14 + $0x50] sm:$0xff] %v3741_v34  ;;  %v1929_v25 = vadd.f32 %v2707_v18, %v3708_v28  ;;  %v3750_v20 = vadd.f32 %v2715_v46, %v1864_v7  ;;  %v1920_v26 = vpop.f32.mrb[67].mxu0  ;;  %v1952_v30 = vpop.f32.mrb[67].mxu1  ;;  %v2004_v28 = vmul.f32 %v1926_v35, %v1926_v35 }
 0x191   : > { %2040 = vst [vmem:[%s3738_s14] sm:$0xff] %v1918_v13  ;;  %2048 = vst [vmem:[%s3738_s14 + $0x40] sm:$0xff] %v3744_v45  ;;  %v1921_v61 = vadd.f32 %v1920_v26, %v3702_v32  ;;  %v1953_v12 = vadd.f32 %v1952_v30, %v3724_v15  ;;  %v2002_v63 = vmul.f32 %v1918_v13, %v1918_v13 }
 0x192   : > { %2043 = vst [vmem:[%s3738_s14 + $0x18] sm:$0xff] %v1929_v25  ;;  %2051 = vst [vmem:[%s3738_s14 + $0x58] sm:$0xff] %v3750_v20  ;;  %v2005_v49 = vmul.f32 %v1929_v25, %v1929_v25  ;;  %v2010_v33 = vmul.f32 %v3744_v45, %v3744_v45  ;;  %v2012_v4 = vmul.f32 %v3741_v34, %v3741_v34 }
 0x193   : > { %v1980_v37 = vadd.f32 %v1921_v61, %v1918_v13  ;;  %v2003_v41 = vmul.f32 %v1921_v61, %v1921_v61  ;;  %2041 = vst [vmem:[%s3738_s14 + $0x8] sm:$0xff] %v1921_v61  ;;  %2049 = vst [vmem:[%s3738_s14 + $0x48] sm:$0xff] %v1953_v12 }
 0x195   : > { %v1981_v1 = vadd.f32 %v1980_v37, %v1926_v35  ;;  %v2018_v48 = vadd.f32 %v2003_v41, %v2002_v63  ;;  %v2710_v3 = vpop.f32.mrb[68].mxu0  ;;  %v2718_v51 = vpop.f32.mrb[68].mxu1 }
 0x196   : > { %v1942_v32 = vadd.f32 %v2710_v3, %v3718_v56  ;;  %v1974_v16 = vadd.f32 %v2718_v51, %v1877_v9  ;;  %v1933_v15 = vpop.f32.mrb[69].mxu0  ;;  %v1965_v0 = vpop.f32.mrb[69].mxu1  ;;  %v2013_v9 = vmul.f32 %v3750_v20, %v3750_v20 }
 0x197   : > { %v2019_v7 = vadd.f32 %v2018_v48, %v2004_v28  ;;  %v1934_v14 = vadd.f32 %v1933_v15, %v3712_v38  ;;  %v1982_v2 = vadd.f32 %v1981_v1, %v1929_v25  ;;  %v1966_v50 = vadd.f32 %v1965_v0, %v1869_v8  ;;  %v2711_v54 = vpop.f32.mrb[70].mxu0  ;;  %v2719_v17 = vpop.f32.mrb[70].mxu1 }
 0x198   : > { %2046 = vst [vmem:[%s3738_s14 + $0x30] sm:$0xff] %v1942_v32  ;;  %2054 = vst [vmem:[%s3738_s14 + $0x70] sm:$0xff] %v1974_v16  ;;  %v1945_v19 = vadd.f32 %v2711_v54, %v3720_v59  ;;  %v1977_v56 = vadd.f32 %v2719_v17, %v1880_v11  ;;  %v1936_v27 = vpop.f32.mrb[71].mxu0  ;;  %v1968_v42 = vpop.f32.mrb[71].mxu1  ;;  %v2008_v59 = vmul.f32 %v1942_v32, %v1942_v32 }
 0x199   : > { %v1983_v40 = vadd.f32 %v1982_v2, %v1934_v14  ;;  %v2006_v43 = vmul.f32 %v1934_v14, %v1934_v14  ;;  %v2020_v44 = vadd.f32 %v2019_v7, %v2005_v49  ;;  %2044 = vst [vmem:[%s3738_s14 + $0x20] sm:$0xff] %v1934_v14  ;;  %2052 = vst [vmem:[%s3738_s14 + $0x60] sm:$0xff] %v1966_v50 }
 0x19a   : > { %2047 = vst [vmem:[%s3738_s14 + $0x38] sm:$0xff] %v1945_v19  ;;  %2055 = vst [vmem:[%s3738_s14 + $0x78] sm:$0xff] %v1977_v56  ;;  %v1937_v38 = vadd.f32 %v1936_v27, %v3714_v6  ;;  %v1969_v47 = vadd.f32 %v1968_v42, %v3730_v53  ;;  %v2009_v57 = vmul.f32 %v1945_v19, %v1945_v19 }
 0x19b   : > { %v2021_v8 = vadd.f32 %v2020_v44, %v2006_v43  ;;  %v2011_v6 = vmul.f32 %v1953_v12, %v1953_v12  ;;  %v2014_v11 = vmul.f32 %v1966_v50, %v1966_v50  ;;  %v2016_v18 = vmul.f32 %v1974_v16, %v1974_v16 }
 0x19c   : > { %v1984_v52 = vadd.f32 %v1983_v40, %v1937_v38  ;;  %v2007_v22 = vmul.f32 %v1937_v38, %v1937_v38  ;;  %2045 = vst [vmem:[%s3738_s14 + $0x28] sm:$0xff] %v1937_v38  ;;  %2053 = vst [vmem:[%s3738_s14 + $0x68] sm:$0xff] %v1969_v47  ;;  %v2015_v13 = vmul.f32 %v1969_v47, %v1969_v47 }
 0x19e   : > { %v1985_v55 = vadd.f32 %v1984_v52, %v1942_v32  ;;  %v2022_v24 = vadd.f32 %v2021_v8, %v2007_v22 }
 0x1a0   : > { %v1986_v58 = vadd.f32 %v1985_v55, %v1945_v19  ;;  %v2023_v60 = vadd.f32 %v2022_v24, %v2008_v59 }
 0x1a2   : > { %v1987_v62 = vadd.f32 %v1986_v58, %v3744_v45  ;;  %v2024_v39 = vadd.f32 %v2023_v60, %v2009_v57 }
 0x1a4   : > { %v2025_v31 = vadd.f32 %v2024_v39, %v2010_v33  ;;  %v1988_v53 = vadd.f32 %v1987_v62, %v1953_v12 }
 0x1a6   : > { %v1989_v5 = vadd.f32 %v1988_v53, %v3741_v34  ;;  %v2026_v23 = vadd.f32 %v2025_v31, %v2011_v6  ;;  %v2017_v34 = vmul.f32 %v1977_v56, %v1977_v56 }
 0x1a8   : > { %v1990_v10 = vadd.f32 %v1989_v5, %v3750_v20  ;;  %v2027_v29 = vadd.f32 %v2026_v23, %v2012_v4 }
 0x1aa   : > { %v1991_v35 = vadd.f32 %v1990_v10, %v1966_v50  ;;  %v2028_v21 = vadd.f32 %v2027_v29, %v2013_v9 }
 0x1ac   : > { %v1992_v36 = vadd.f32 %v1991_v35, %v1969_v47  ;;  %v2029_v45 = vadd.f32 %v2028_v21, %v2014_v11 }
 0x1ae   : > { %v1993_v46 = vadd.f32 %v1992_v36, %v1974_v16  ;;  %v2030_v25 = vadd.f32 %v2029_v45, %v2015_v13 }
 0x1b0   : > { %v1994_v26 = vadd.f32 %v1993_v46, %v1977_v56  ;;  %v2031_v30 = vadd.f32 %v2030_v25, %v2016_v18 }
 0x1b2   : > { %v1995_v61 = vrot.slane %v1994_v26, 4  ;;  %v2032_v12 = vadd.f32 %v2031_v30, %v2017_v34 }
 0x1b4   : > { %v1996_v20 = vadd.f32 %v1995_v61, %v1994_v26  ;;  %v2033_v63 = vrot.slane %v2032_v12, 4 }
 0x1b6   : > { %v1997_v37 = vrot.slane %v1996_v20, 2  ;;  %v2034_v41 = vadd.f32 %v2033_v63, %v2032_v12 }
 0x1b8   : > { %v1998_v28 = vadd.f32 %v1997_v37, %v1996_v20  ;;  %v2035_v1 = vrot.slane %v2034_v41, 2 }
 0x1ba   : > { %v1999_v48 = vrot.slane %v1998_v28, 1  ;;  %v2036_v3 = vadd.f32 %v2035_v1, %v2034_v41 }
 0x1bc   : > { %v2000_v51 = vadd.f32 %v1999_v48, %v1998_v28  ;;  %v2037_v49 = vrot.slane %v2036_v3, 1 }
 0x1be   : > { %2001 = vst [vmem:[%s436_s17] sm:$0x1] %v2000_v51  ;;  %v2038_v32 = vadd.f32 %v2037_v49, %v2036_v3 }
 0x1c0   : > { %2039 = vst [vmem:[%s436_s17 + $0x1] sm:$0x1] %v2038_v32 }
 0x1c1   : > { %2892 = shalt.err (!%p2889_p0)
}
 0x1c2   : > { %s2893_s24 = scalar_lea.hbm %s3790_s15, 32  ;;  %s2897_s25 = scalar_lea.hbm %s3851_s8, 128 }
 0x1c3   : > { %p2894_p1 = scmp.ne.s32.totalorder %s3790_s15, %s2893_s24  ;;  %p2898_p5 = scmp.lt.u32.totalorder %s3790_s15, %s3851_s8 }
 0x1c4   : > { %p2899_p6 = scmp.lt.u32.totalorder %s2897_s25, %s2893_s24  ;;  %p2901_p9 = scmp.lt.u32.totalorder %s2893_s24, %s3790_s15 }
 0x1c5   : > { %p2895_p2 = pnand %p2894_p1, %p3072_p3 }
 0x1c6   : > { %p2900_p7 = por %p2899_p6, %p2898_p5 }
 0x1c7   : > { %p2896_p4 = pneg %p2895_p2 }
 0x1c8   : > { %p2902_p10 = por %p2901_p9, %p2900_p7 }
 0x1ca   : > { %p2903_p11 = pnand %p2902_p10, %p2896_p4 }
 0x1cc   : > { %2906 = shalt.err (!%p2903_p11)
}
 0x1cd   : > { %2736 = dma.vmem_to_hbm [thread:$0]  (%p3072_p3), %s3792_s29, 32, %s3790_s15, %s2067_s30  }
 0x1ce PF: > { %p2742_p12 = scmp.ge.s32.totalorder %s2973_s12, 2  ;;  %s2111_s26 = sand.u32 1, %s2945_s27  }
 0x1cf   : > { %s2112_s17 = scalar_lea.sflag [#allocation4], %s2111_s26 }
 0x1d0   : > { %p2739_p13 = pnand %p2742_p12, %p3081_p8 }
 0x1d2   : > { %2940 = dma.done.wait (!%p2739_p13), %s2112_s17, 32  }
 0x1d3   : > { %2942 = vsyncadd (!%p2739_p13), %s2112_s17, 4294967264  ;;  %s22_s12 = sadd.s32 1, %s2973_s12   ;;  %s3875_s13 = sld [smem:[#allocation6_spill]] }
 0x1d4   : > { %p19_p0 = scmp.ge.s32.totalorder %s22_s12, 6   ;;  %s3876_s29 = sld [smem:[#allocation12_spill]] }
 0x1d5   : > { %s3877_s30 = sld [smem:[#allocation7_spill]]  ;;  %s3878_s9 = sld [smem:[#allocation8_spill]] }
 0x1d6   : > { %s3879_s10 = sld [smem:[#allocation9_spill]]  ;;  %s3880_s11 = sld [smem:[#allocation10_spill]] }
 0x1d7   : > { %s3881_s27 = smov %s2949_s28  ;;  %21 = sbr.rel (!%p19_p0) target bundleno = 5 (0x5), region = 101 }
 0x1d9   : > { %s3882_s28 = smov %s3875_s13 }
 0x1de   :  { %2117 = vsyncpa [#allocation4], 1 }
 0x1df   :  { %2119 = vsyncpa [#allocation4 + $0x1], 1 }

// kernel: segnet_forward.5
= control target key start
LH: loop header
LB: loop body
LE: loop exit
PB: predicated region body
PF: predicated region fallthrough
CT: control target
= control target key end

     0   :  { %s3075_s27 = smov 0   ;;  %s3077_s28 = smov 0   ;;  %s3825_s0 = inlined_call_operand.vmem [shape: bf16[2,16,16,128], index: 0, kind: input, shape index: {}, may-alias: {0,1,2}]   ;;  %s3826_s1 = inlined_call_operand.vmem [shape: bf16[2,16,16,128], index: 1, kind: input, shape index: {}, may-alias: {0,1,2}]   ;;  %s3827_s2 = inlined_call_operand.vmem [shape: bf16[2,16,16,128], index: 2, kind: input, shape index: {}, may-alias: {0,1,2}]   ;;  %s3828_s3 = inlined_call_operand.vmem [shape: bf16[1152,128], index: 3, kind: input, shape index: {}]   ;;  %s3829_s4 = inlined_call_operand.vmem [shape: f32[1,128], index: 4, kind: input, shape index: {}]   ;;  %s3830_s5 = inlined_call_operand.vmem [shape: f32[1,128], index: 5, kind: input, shape index: {}]   ;;  %s3831_s6 = inlined_call_operand.vmem [shape: f32[1,128], index: 6, kind: input, shape index: {}]   ;;  %s3832_s7 = inlined_call_operand.vmem [shape: bf16[2,16,16,128], index: 7, kind: output, shape index: {0}]   ;;  %s3833_s8 = inlined_call_operand.vmem [shape: f32[2,2,2,128], index: 8, kind: output, shape index: {1}]  }
   0x1   :  { %s3079_s29 = smov 0   ;;  %s3081_s30 = smov 0  }
   0x2   :  { %s3083_s9 = smov 0  }
   0x3 LB: > { %s28_s10 = sadd.s32 1, %s3020_s29  ;;  %s31_s11 = sadd.s32 1, %s3024_s30  ;;  %s3028_s9 = sphi %s3083_s9, %s19_s9   ;;  %s3024_s30 = sphi %s3081_s30, %s3844_s30   ;;  %s3020_s29 = sphi %s3079_s29, %s3843_s29   ;;  %s3016_s28 = sphi %s3077_s28, %s3842_s28   ;;  %s3012_s27 = sphi %s3075_s27, %s3841_s27  }
   0x4   : > { %p29_p0 = scmp.ge.s32.totalorder %s28_s10, 2  ;;  %p2326_p1 = scmp.ge.s32.totalorder %s3028_s9, 1 }
   0x5   : > { %p357_p2 = scmp.lt.s32.totalorder %s3028_s9, 5 }
   0x6   : > { %s3846_s10 = smov (%p29_p0, %s28_s10), 0  ;;  %s3848_s11 = smov (!%p29_p0, %s31_s11), %s3024_s30 }
   0x7   : > { %p358_p3 = pnand %p2326_p1, %p357_p2  ;;  %p33_p4 = scmp.ge.s32.totalorder %s3848_s11, 2 }
   0x8   : > { %v2918_v0 = vld [vmem:[%s3828_s3 + $0x40] sm:$0xff] (!%p358_p3)   ;;  %v2922_v4 = vld [vmem:[%s3828_s3 + $0x48] sm:$0xff] (!%p358_p3)   ;;  %s2327_s24 = sshll.u32 (!%p358_p3), %s3012_s27, 3  ;;  %p438_p5 = scmp.lt.s32.totalorder (!%p358_p3), %s3016_s28, 1  ;;  %v2926_v8 = vld [vmem:[%s3828_s3 + $0x50] sm:$0xff] (!%p358_p3)   ;;  %vm720_vm0 = vcmask (!%p358_p3), 1040384  }
   0x9   : > { %s3850_s11 = smov (%p33_p4, %s3848_s11), 0  ;;  %361 = sbr.rel (%p358_p3) target bundleno = 435 (0x1b3), region = 48 }
   0xa   : > { %3834 = sst [smem:[#allocation3_spill]] %s3850_s11  ;;  %v2919_v1 = vld [vmem:[%s3828_s3 + $0xc0] sm:$0xff] (!%p358_p3)   ;;  %2558 = vmatprep.subr.bf16.mxu0 (!%p358_p3), %v2918_v0  ;;  %v2923_v5 = vld [vmem:[%s3828_s3 + $0xc8] sm:$0xff] (!%p358_p3)   ;;  %s2331_s14 = sshll.u32 (!%p358_p3), %s3012_s27, 2  ;;  %v2927_v9 = vld [vmem:[%s3828_s3 + $0xd0] sm:$0xff] (!%p358_p3)   ;;  %vm763_vm3 = vcmask (!%p358_p3), 1047552  }
   0xb   : > { %v2920_v2 = vld [vmem:[%s3828_s3] sm:$0xff] (!%p358_p3)   ;;  %2622 = vmatprep.subr.bf16.mxu1 (!%p358_p3), %v2919_v1  ;;  %v2924_v6 = vld [vmem:[%s3828_s3 + $0x8] sm:$0xff] (!%p358_p3)   ;;  %p3139_p6 = scmp.lt.s32.totalorder (!%p358_p3), %s2327_s24, 15  ;;  %s2332_s20 = sadd.s32 (!%p358_p3), 4294967295, %s2331_s14  ;;  %v2928_v10 = vld [vmem:[%s3828_s3 + $0x10] sm:$0xff] (!%p358_p3)  }
   0xc   : > { %v2921_v3 = vld [vmem:[%s3828_s3 + $0x80] sm:$0xff] (!%p358_p3)   ;;  %2559 = vmatpush3.bf16.msra.mxu0 (!%p358_p3), %v2920_v2  ;;  %v2925_v7 = vld [vmem:[%s3828_s3 + $0x88] sm:$0xff] (!%p358_p3)   ;;  %p450_p7 = scmp.gt.s32.totalorder (!%p358_p3), %s2332_s20, 0  ;;  %v2929_v11 = vld [vmem:[%s3828_s3 + $0x90] sm:$0xff] (!%p358_p3)   ;;  %s2446_s15 = sadd.s32 (!%p358_p3), 4, %s2331_s14 }
   0xd   : > { %2623 = vmatpush3.bf16.msra.mxu1 (!%p358_p3), %v2921_v3  ;;  %2560 = vmatprep.subr.bf16.mxu0 (!%p358_p3), %v2922_v4  ;;  %v2930_v12 = vld [vmem:[%s3828_s3 + $0x58] sm:$0xff] (!%p358_p3)   ;;  %v2934_v16 = vld [vmem:[%s3828_s3 + $0x60] sm:$0xff] (!%p358_p3)   ;;  %v2938_v20 = vld [vmem:[%s3828_s3 + $0x68] sm:$0xff] (!%p358_p3)   ;;  %p469_p9 = scmp.lt.s32.totalorder (!%p358_p3), %s2446_s15, 7  ;;  %p620_p11 = scmp.eq.s32.totalorder (!%p358_p3), %s3012_s27, 0 }
   0xe   : > { %2624 = vmatprep.subr.bf16.mxu1 (!%p358_p3), %v2923_v5  ;;  %v2931_v13 = vld [vmem:[%s3828_s3 + $0xd8] sm:$0xff] (!%p358_p3)   ;;  %v2935_v17 = vld [vmem:[%s3828_s3 + $0xe0] sm:$0xff] (!%p358_p3)   ;;  %v2939_v21 = vld [vmem:[%s3828_s3 + $0xe8] sm:$0xff] (!%p358_p3)   ;;  %vm721_vm1 = vsmask.f32 (!%p358_p3), 256  ;;  %p625_p12 = scmp.eq.s32.totalorder (!%p358_p3), %s3012_s27, 1 }
   0xf   : > { %v2932_v14 = vld [vmem:[%s3828_s3 + $0x18] sm:$0xff] (!%p358_p3)   ;;  %v2936_v18 = vld [vmem:[%s3828_s3 + $0x20] sm:$0xff] (!%p358_p3)   ;;  %v2940_v22 = vld [vmem:[%s3828_s3 + $0x28] sm:$0xff] (!%p358_p3)   ;;  %vm764_vm2 = vsmask.f32 (!%p358_p3), 7424  ;;  %p499_p13 = scmp.lt.s32.totalorder (!%p358_p3), %s3012_s27, 1 }
  0x10   : > { %2561 = vmatpush3.bf16.msra.mxu0 %v2924_v6  ;;  %s3852_s28 = smov (!%p438_p5, %s3016_s28), 1  ;;  %s3854_s20 = smov (!%p450_p7, %s2332_s20), 0  ;;  %v2933_v15 = vld [vmem:[%s3828_s3 + $0x98] sm:$0xff]   ;;  %v2937_v19 = vld [vmem:[%s3828_s3 + $0xa0] sm:$0xff]   ;;  %v2941_v23 = vld [vmem:[%s3828_s3 + $0xa8] sm:$0xff]  }
  0x11   : > { %2625 = vmatpush3.bf16.msra.mxu1 %v2925_v7  ;;  %2562 = vmatprep.subr.bf16.mxu0 %v2926_v8  ;;  %s3856_s24 = smov (!%p3139_p6, %s2327_s24), 15  ;;  %s2333_s19 = sshll.u32 %s3854_s20, 1  ;;  %v2942_v24 = vld [vmem:[%s3828_s3 + $0x70] sm:$0xff]   ;;  %v2946_v28 = vld [vmem:[%s3828_s3 + $0x78] sm:$0xff]   ;;  %v3251_v32 = vld [vmem:[%s3830_s5] ss:$0 sm:$0xff] }
  0x12   : > { %2626 = vmatprep.subr.bf16.mxu1 %v2927_v9  ;;  %p455_p8 = scmp.lt.s32.totalorder %s2333_s19, 15  ;;  %s3179_s17 = sshll.u32 %s3852_s28, 5  ;;  %v2943_v25 = vld [vmem:[%s3828_s3 + $0xf0] sm:$0xff]   ;;  %v2947_v29 = vld [vmem:[%s3828_s3 + $0xf8] sm:$0xff]   ;;  %v3256_v34 = vld [vmem:[%s3831_s6] ss:$0 sm:$0xff] }
  0x13   : > { %s2328_s12 = sshll.u32 %s3856_s24, 1  ;;  %s3860_s15 = smov (!%p469_p9, %s2446_s15), 7  ;;  %v2944_v26 = vld [vmem:[%s3828_s3 + $0x30] sm:$0xff]   ;;  %v2948_v30 = vld [vmem:[%s3828_s3 + $0x38] sm:$0xff]   ;;  %v2950_v38 = vld [vmem:[%s3828_s3 + $0x140] sm:$0xff]  }
  0x14   : > { %2563 = vmatpush3.bf16.msra.mxu0 %v2928_v10  ;;  %s3858_s19 = smov (!%p455_p8, %s2333_s19), 15  ;;  %s3210_s23 = sadd.s32 %s3179_s17, %s2328_s12  ;;  %v2945_v27 = vld [vmem:[%s3828_s3 + $0xb0] sm:$0xff]   ;;  %v2949_v31 = vld [vmem:[%s3828_s3 + $0xb8] sm:$0xff]   ;;  %v2955_v62 = vld [vmem:[%s3828_s3 + $0x1c0] sm:$0xff]  }
  0x15   : > { %2627 = vmatpush3.bf16.msra.mxu1 %v2929_v11  ;;  %2564 = vmatprep.subr.bf16.mxu0 %v2930_v12  ;;  %s2334_s21 = sshll.u32 %s3858_s19, 1  ;;  %s2338_s26 = sshll.u32 %s3860_s15, 1  ;;  %vm3294_vm4 = vmand %vm720_vm0, %vm721_vm1 }
  0x16   : > { %2628 = vmatprep.subr.bf16.mxu1 %v2931_v13  ;;  %s459_s14 = sadd.s32 %s2334_s21, %s3179_s17  ;;  %p474_p10 = scmp.lt.s32.totalorder %s2338_s26, 15  ;;  %vm3302_vm5 = vmand %vm763_vm3, %vm764_vm2 }
  0x17   : > { %s2336_s24 = sshll.u32 %s459_s14, 2  ;;  %s2330_s14 = sshll.u32 %s3210_s23, 2 }
  0x18   : > { %2565 = vmatpush3.bf16.msra.mxu0 %v2932_v14  ;;  %s3862_s26 = smov (!%p474_p10, %s2338_s26), 15  ;;  %s461_s20 = scalar_lea.vmem %s3826_s1, %s2336_s24 }
  0x19   : > { %2629 = vmatpush3.bf16.msra.mxu1 %v2933_v15  ;;  %2566 = vmatprep.subr.bf16.mxu0 %v2934_v16  ;;  %s3240_s18 = scalar_lea.vmem %s3825_s0, %s2330_s14  ;;  %s2339_s15 = sshll.u32 %s3862_s26, 1  ;;  %v2550_v33 = vld [vmem:[%s461_s20 + $0x8] sm:$0xff]  }
  0x1a   : > { %2630 = vmatprep.subr.bf16.mxu1 %v2935_v17  ;;  %s3246_s24 = sadd.s32 %s2339_s15, %s3179_s17  ;;  %v2497_v35 = vunpack.c.l.bf16 %v2550_v33  ;;  %v2498_v36 = vunpack.c.h.bf16 %v2550_v33  ;;  %v2464_v37 = vld [vmem:[%s3240_s18] sm:$0xff]   ;;  %v2543_v45 = vld [vmem:[%s3240_s18 + $0x8] sm:$0xff]   ;;  %v2544_v53 = vld [vmem:[%s3240_s18 + $0x10] sm:$0xff]   ;;  %s3775_s17 = scalar_lea.vmem %s3832_s7, %s2330_s14 }
  0x1b   : > { %s621_s26 = scalar_select %p620_p11, 0.0, 1.0  ;;  %v2465_v39 = vunpack.c.l.bf16 %v2464_v37  ;;  %v2466_v40 = vunpack.c.h.bf16 %v2464_v37  ;;  %v2469_v48 = vunpack.c.l.bf16 %v2543_v45  ;;  %v2470_v49 = vunpack.c.h.bf16 %v2543_v45  ;;  %v2545_v9 = vld [vmem:[%s3240_s18 + $0x18] sm:$0xff]   ;;  %v2952_v37 = vld [vmem:[%s3828_s3 + $0x148] sm:$0xff]   ;;  %v2957_v45 = vld [vmem:[%s3828_s3 + $0x180] sm:$0xff]  }
  0x1c   : > { %2567 = vmatpush3.bf16.msra.mxu0 %v2936_v18  ;;  %v604_v41 = vmul.f32 %v2497_v35, %v3251_v32  ;;  %v605_v42 = vmul.f32 %v2498_v36, %v3251_v32  ;;  %v2473_v60 = vunpack.c.l.bf16 %v2544_v53  ;;  %v2474_v61 = vunpack.c.h.bf16 %v2544_v53  ;;  %v2951_v35 = vld [vmem:[%s3828_s3 + $0x100] sm:$0xff]   ;;  %v2954_v53 = vld [vmem:[%s3828_s3 + $0x150] sm:$0xff]   ;;  %s2341_s25 = sshll.u32 %s3246_s24, 2  ;;  %s3864_s27 = smov (!%p499_p13, %s3012_s27), 1 }
  0x1d   : > { %2631 = vmatpush3.bf16.msra.mxu1 %v2937_v19  ;;  %2568 = vmatprep.subr.bf16.mxu0 %v2938_v20  ;;  %v545_v43 = vmul.f32 %v2465_v39, %v3251_v32  ;;  %v546_v44 = vmul.f32 %v2466_v40, %v3251_v32  ;;  %v622_v50 = vstv %s621_s26  ;;  %v547_v56 = vmul.f32 %v2469_v48, %v3251_v32  ;;  %s480_s16 = scalar_lea.vmem %s3827_s2, %s2341_s25  ;;  %s2346_s23 = sshll.u32 %s3852_s28, 1 }
  0x1e   : > { %2632 = vmatprep.subr.bf16.mxu1 %v2939_v21  ;;  %v606_v46 = vadd.f32 %v3256_v34, %v604_v41  ;;  %v607_v47 = vadd.f32 %v3256_v34, %v605_v42  ;;  %v548_v57 = vmul.f32 %v2470_v49, %v3251_v32  ;;  %v549_v4 = vmul.f32 %v2473_v60, %v3251_v32  ;;  %v2546_v41 = vld [vmem:[%s3240_s18 + $0x20] sm:$0xff]   ;;  %v2547_v60 = vld [vmem:[%s3240_s18 + $0x28] sm:$0xff]   ;;  %s626_s24 = scalar_select %p625_p12, 0.0, 1.0 }
  0x1f   : > { %v568_v51 = vadd.f32 %v3256_v34, %v545_v43  ;;  %v569_v52 = vadd.f32 %v3256_v34, %v546_v44  ;;  %v570_v1 = vadd.f32 %v3256_v34, %v547_v56  ;;  %v550_v5 = vmul.f32 %v2474_v61, %v3251_v32  ;;  %v2961_v61 = vld [vmem:[%s3828_s3 + $0x188] sm:$0xff]   ;;  %s502_s14 = sadd.s32 %s2346_s23, %s3864_s27 }
  0x20   : > { %2569 = vmatpush3.bf16.msra.mxu0 %v2940_v22  ;;  %v608_v54 = vmax.f32 %v606_v46, 0.0  ;;  %v609_v55 = vmax.f32 %v607_v47, 0.0  ;;  %v571_v2 = vadd.f32 %v3256_v34, %v548_v57  ;;  %v572_v12 = vadd.f32 %v3256_v34, %v549_v4  ;;  %s2347_s26 = sshll.u32 %s502_s14, 1 }
  0x21   : > { %2633 = vmatpush3.bf16.msra.mxu1 %v2941_v23  ;;  %2570 = vmatprep.subr.bf16.mxu0 %v2942_v24  ;;  %v584_v58 = vmax.f32 %v568_v51, 0.0  ;;  %v585_v59 = vmax.f32 %v569_v52, 0.0  ;;  %v586_v7 = vmax.f32 %v570_v1, 0.0  ;;  %v573_v13 = vadd.f32 %v3256_v34, %v550_v5  ;;  %v2953_v52 = vld [vmem:[%s3828_s3 + $0x108] sm:$0xff]  }
  0x22   : > { %2634 = vmatprep.subr.bf16.mxu1 %v2943_v25  ;;  %v623_v63 = vmul.f32 %v622_v50, %v608_v54  ;;  %v624_v0 = vmul.f32 %v622_v50, %v609_v55  ;;  %v587_v8 = vmax.f32 %v571_v2, 0.0  ;;  %v588_v18 = vmax.f32 %v572_v12, 0.0  ;;  %v2959_v50 = vld [vmem:[%s3828_s3 + $0x1c8] sm:$0xff]   ;;  %v2956_v2 = vld [vmem:[%s3828_s3 + $0x110] sm:$0xff]  }
  0x23   : > { %v3281_v3 = vpack.c.bf16 %v585_v59, %v584_v58  ;;  %v589_v19 = vmax.f32 %v573_v13, 0.0  ;;  %v2477_v20 = vunpack.c.l.bf16 %v2545_v9  ;;  %v2481_v54 = vunpack.c.l.bf16 %v2546_v41 }
  0x24   : > { %2571 = vmatpush3.bf16.msra.mxu0 %v2944_v26  ;;  %v630_v6 = vpack.c.bf16 %v624_v0, %v623_v63  ;;  %v3290_v16 = vpack.c.bf16 %v587_v8, %v586_v7  ;;  %v2482_v55 = vunpack.c.h.bf16 %v2546_v41  ;;  %v2485_v0 = vunpack.c.l.bf16 %v2547_v60  ;;  %v2958_v8 = vld [vmem:[%s3828_s3 + $0x158] sm:$0xff]  }
  0x25   : > { %2635 = vmatpush3.bf16.msra.mxu1 %v2945_v27  ;;  %2572 = vmatprep.subr.bf16.mxu0 %v2946_v28  ;;  %v648_v10 = vshrl.u32 %v3281_v3, 16  ;;  %v651_v11 = vshll.u32 %v3281_v3, 16  ;;  %v551_v48 = vmul.f32 %v2477_v20, %v3251_v32 }
  0x26   : > { %2636 = vmatprep.subr.bf16.mxu1 %v2947_v29  ;;  %1535 = vmatprep.mubr.bf16.mxu0 %v630_v6  ;;  %v641_v14 = vshrl.u32 %v630_v6, 16  ;;  %v644_v15 = vshll.u32 %v630_v6, 16  ;;  %v655_v24 = vshrl.u32 %v3290_v16, 16  ;;  %v658_v25 = vshll.u32 %v3290_v16, 16 }
  0x27   : > { %v650_v17 = vrot.slane %v648_v10, 7  ;;  %v735_v28 = vrot.slane %v651_v11, 1  ;;  %v3306_v29 = vpack.c.bf16 %v589_v19, %v588_v18  ;;  %v574_v58 = vadd.f32 %v3256_v34, %v551_v48  ;;  %v2965_v19 = vld [vmem:[%s3828_s3 + $0x190] sm:$0xff]  }
  0x28   : > { %2573 = vmatpush3.bf16.msra.mxu0 %v2948_v30  ;;  %v643_v22 = vrot.slane %v641_v14, 7  ;;  %v733_v23 = vrot.slane %v644_v15, 1  ;;  %v2478_v30 = vunpack.c.h.bf16 %v2545_v9  ;;  %v657_v36 = vrot.slane %v655_v24, 7 }
  0x29   : > { %2637 = vmatpush3.bf16.msra.mxu1 %v2949_v31  ;;  %2686 = vmatprep.subr.bf16.mxu0 %v2950_v38  ;;  %v653_v26 = vor.u32 %v651_v11, %v650_v17  ;;  %v662_v39 = vshrl.u32 %v3306_v29, 16  ;;  %v665_v40 = vshll.u32 %v3306_v29, 16  ;;  %v736_v46 = vor.u32 %v735_v28, %v648_v10  ;;  %v2963_v11 = vld [vmem:[%s3828_s3 + $0x1d0] sm:$0xff]   ;;  %v2967_v28 = vld [vmem:[%s3828_s3 + $0x1d8] sm:$0xff]  }
  0x2a   : > { %2750 = vmatprep.subr.bf16.mxu1 %v2955_v62  ;;  %v646_v31 = vor.u32 %v644_v15, %v643_v22  ;;  %v734_v33 = vor.u32 %v733_v23, %v641_v14  ;;  %v660_v44 = vor.u32 %v658_v25, %v657_v36  ;;  %v552_v49 = vmul.f32 %v2478_v30, %v3251_v32  ;;  %v2548_v22 = vld [vmem:[%s3240_s18 + $0x30] sm:$0xff]  }
  0x2b   : > { %v724_v38 = vsel %vm3294_vm4, 0, %v653_v26  ;;  %v664_v47 = vrot.slane %v662_v39, 7  ;;  %v737_v57 = vrot.slane %v658_v25, 1  ;;  %v553_v62 = vmul.f32 %v2481_v54, %v3251_v32  ;;  %v2960_v25 = vld [vmem:[%s3828_s3 + $0x118] sm:$0xff]  }
  0x2c   : > { %1632 = vmatprep.mubr.bf16.mxu1 %v724_v38  ;;  %v723_v42 = vsel %vm3294_vm4, 0, %v646_v31  ;;  %v766_v43 = vsel %vm3302_vm5, %v734_v33, 0  ;;  %v3336_v51 = vsel %vm3294_vm4, 0, %v660_v44  ;;  %v575_v59 = vadd.f32 %v3256_v34, %v552_v49  ;;  %v2964_v49 = vld [vmem:[%s3828_s3 + $0x120] sm:$0xff]  }
  0x2d   : > { %1536 = vmatmul.mubr.bf16.vlgmr.msra.gmra.mrb[0].mxu0 %v723_v42  ;;  %1633 = vmatmul.mubr.bf16.vlgmr.msra.gmra.mrb[0].mxu1 %v766_v43  ;;  %v667_v56 = vor.u32 %v665_v40, %v664_v47  ;;  %v554_v63 = vmul.f32 %v2482_v55, %v3251_v32  ;;  %v3357_v1 = vsel %vm3302_vm5, %v736_v46, 0  ;;  %v590_v4 = vmax.f32 %v574_v58, 0.0  ;;  %v2966_v55 = vld [vmem:[%s3828_s3 + $0x168] sm:$0xff]   ;;  %v2973_v58 = vld [vmem:[%s3828_s3 + $0x1a0] sm:$0xff]  }
  0x2e   : > { %2687 = vmatpush3.bf16.msra.mxu0 %v2951_v35  ;;  %1543 = vmatprep.mubr.bf16.mxu0 %v3281_v3  ;;  %v591_v5 = vmax.f32 %v575_v59, 0.0  ;;  %v2486_v6 = vunpack.c.h.bf16 %v2547_v60  ;;  %v576_v9 = vadd.f32 %v3256_v34, %v553_v62  ;;  %v555_v12 = vmul.f32 %v2485_v0, %v3251_v32  ;;  %v2962_v35 = vld [vmem:[%s3828_s3 + $0x160] sm:$0xff]   ;;  %v2549_v59 = vld [vmem:[%s3240_s18 + $0x38] sm:$0xff]   ;;  %v2974_v60 = vld [vmem:[%s3828_s3 + $0x1e8] sm:$0xff]  }
  0x2f   : > { %1640 = vmatprep.mubr.bf16.mxu1 %v3336_v51  ;;  %2688 = vmatprep.subr.bf16.mxu0 %v2952_v37  ;;  %v3364_v7 = vsel %vm3294_vm4, 0, %v667_v56  ;;  %v577_v10 = vadd.f32 %v3256_v34, %v554_v63  ;;  %v738_v13 = vor.u32 %v737_v57, %v655_v24  ;;  %v2489_v30 = vunpack.c.l.bf16 %v2548_v22  ;;  %v2971_v56 = vld [vmem:[%s3828_s3 + $0x1e0] sm:$0xff]   ;;  %v2968_v0 = vld [vmem:[%s3828_s3 + $0x128] sm:$0xff]  }
  0x30   : > { %2751 = vmatpush3.bf16.msra.mxu1 %v2957_v45  ;;  %v3375_v14 = vpack.c.bf16 %v591_v5, %v590_v4  ;;  %v556_v15 = vmul.f32 %v2486_v6, %v3251_v32  ;;  %v592_v17 = vmax.f32 %v576_v9, 0.0  ;;  %v578_v20 = vadd.f32 %v3256_v34, %v555_v12  ;;  %v2970_v9 = vld [vmem:[%s3828_s3 + $0x170] sm:$0xff]  }
  0x31   : > { %2752 = vmatprep.subr.bf16.mxu1 %v2959_v50  ;;  %v593_v18 = vmax.f32 %v577_v10, 0.0  ;;  %v739_v31 = vrot.slane %v665_v40, 1  ;;  %v2490_v37 = vunpack.c.h.bf16 %v2548_v22  ;;  %v2969_v40 = vld [vmem:[%s3828_s3 + $0x198] sm:$0xff]   ;;  %v557_v43 = vmul.f32 %v2489_v30, %v3251_v32  ;;  %v2975_v10 = vld [vmem:[%s3828_s3 + $0x1a8] sm:$0xff]   ;;  %v2979_v30 = vld [vmem:[%s3828_s3 + $0x1b0] sm:$0xff]  }
  0x32   : > { %2689 = vmatpush3.bf16.msra.mxu0 %v2953_v52  ;;  %v669_v23 = vshrl.u32 %v3375_v14, 16  ;;  %v672_v24 = vshll.u32 %v3375_v14, 16  ;;  %v579_v26 = vadd.f32 %v3256_v34, %v556_v15  ;;  %v594_v36 = vmax.f32 %v578_v20, 0.0  ;;  %v2976_v22 = vld [vmem:[%s3828_s3 + $0x178] sm:$0xff]  }
  0x33   : > { %2690 = vmatprep.subr.bf16.mxu0 %v2954_v53  ;;  %v3397_v33 = vpack.c.bf16 %v593_v18, %v592_v17  ;;  %v558_v46 = vmul.f32 %v2490_v37, %v3251_v32  ;;  %v580_v52 = vadd.f32 %v3256_v34, %v557_v43  ;;  %v740_v57 = vor.u32 %v739_v31, %v662_v39  ;;  %v2980_v31 = vld [vmem:[%s3828_s3 + $0x1f8] sm:$0xff]  }
  0x34   : > { %2753 = vmatpush3.bf16.msra.mxu1 %v2961_v61  ;;  %v671_v41 = vrot.slane %v669_v23, 7  ;;  %v595_v42 = vmax.f32 %v579_v26, 0.0  ;;  %v2493_v61 = vunpack.c.l.bf16 %v2549_v59  ;;  %v2494_v62 = vunpack.c.h.bf16 %v2549_v59  ;;  %v2978_v37 = vld [vmem:[%s3828_s3 + $0x138] sm:$0xff]  }
  0x35   : > { %1544 = vmatmul.mubr.bf16.gmra.mrb[4].mxu0 %v724_v38  ;;  %1641 = vmatmul.mubr.bf16.gmra.mrb[4].mxu1 %v3357_v1  ;;  %v3404_v38 = vsel %vm3302_vm5, %v738_v13, 0  ;;  %v676_v44 = vshrl.u32 %v3397_v33, 16  ;;  %v679_v45 = vshll.u32 %v3397_v33, 16  ;;  %v581_v53 = vadd.f32 %v3256_v34, %v558_v46  ;;  %v2972_v13 = vld [vmem:[%s3828_s3 + $0x130] sm:$0xff]   ;;  %v2981_v43 = vld [vmem:[%s3828_s3 + $0x1b8] sm:$0xff]  }
  0x36   : > { %1551 = vmatprep.mubr.bf16.mxu0 %v3290_v16  ;;  %1648 = vmatprep.mubr.bf16.mxu1 %v3364_v7  ;;  %v674_v47 = vor.u32 %v672_v24, %v671_v41  ;;  %v3420_v50 = vpack.c.bf16 %v595_v42, %v594_v36  ;;  %v559_v5 = vmul.f32 %v2493_v61, %v3251_v32  ;;  %v3457_v6 = vsel %vm3302_vm5, %v740_v57, 0 }
  0x37   : > { %2691 = vmatpush3.bf16.msra.mxu0 %v2956_v2  ;;  %2754 = vmatprep.subr.bf16.mxu1 %v2963_v11  ;;  %v678_v48 = vrot.slane %v676_v44, 7  ;;  %v596_v2 = vmax.f32 %v580_v52, 0.0  ;;  %v597_v4 = vmax.f32 %v581_v53, 0.0  ;;  %v560_v11 = vmul.f32 %v2494_v62, %v3251_v32 }
  0x38   : > { %2692 = vmatprep.subr.bf16.mxu0 %v2958_v8  ;;  %2755 = vmatpush3.bf16.msra.mxu1 %v2965_v19  ;;  %v3426_v54 = vsel %vm3294_vm4, 0, %v674_v47  ;;  %v683_v63 = vshrl.u32 %v3420_v50, 16  ;;  %v741_v8 = vrot.slane %v672_v24, 1  ;;  %v686_v12 = vshll.u32 %v3420_v50, 16 }
  0x39   : > { %2756 = vmatprep.subr.bf16.mxu1 %v2967_v28  ;;  %v681_v39 = vor.u32 %v679_v45, %v678_v48  ;;  %v582_v15 = vadd.f32 %v3256_v34, %v559_v5  ;;  %v3477_v19 = vpack.c.bf16 %v597_v4, %v596_v2  ;;  %v583_v20 = vadd.f32 %v3256_v34, %v560_v11 }
  0x3a   : > { %v685_v18 = vrot.slane %v683_v63, 7  ;;  %v742_v26 = vor.u32 %v741_v8, %v669_v23  ;;  %v743_v23 = vrot.slane %v679_v45, 1  ;;  %v3525_v45 = vld [vmem:[%s3828_s3 + $0x200] sm:$0xff]   ;;  %v627_v2 = vstv %s626_s24 }
  0x3b   : > { %2693 = vmatpush3.bf16.msra.mxu0 %v2960_v25  ;;  %v3473_v17 = vsel %vm3294_vm4, 0, %v681_v39  ;;  %v598_v24 = vmax.f32 %v582_v15, 0.0  ;;  %v2977_v25 = vld [vmem:[%s3828_s3 + $0x1f0] sm:$0xff]   ;;  %v599_v28 = vmax.f32 %v583_v20, 0.0  ;;  %v693_v46 = vshll.u32 %v3477_v19, 16 }
  0x3c   : > { %2694 = vmatprep.subr.bf16.mxu0 %v2962_v35  ;;  %2757 = vmatpush3.bf16.msra.mxu1 %v2969_v40  ;;  %v690_v35 = vshrl.u32 %v3477_v19, 16  ;;  %v688_v41 = vor.u32 %v686_v12, %v685_v18  ;;  %v3516_v42 = vsel %vm3302_vm5, %v742_v26, 0 }
  0x3d   : > { %1552 = vmatmul.mubr.bf16.gmra.mrb[8].mxu0 %v3336_v51  ;;  %1649 = vmatmul.mubr.bf16.gmra.mrb[8].mxu1 %v3404_v38  ;;  %v3501_v36 = vpack.c.bf16 %v599_v28, %v598_v24 }
  0x3e   : > { %1559 = vmatprep.mubr.bf16.mxu0 %v3306_v29  ;;  %1656 = vmatprep.mubr.bf16.mxu1 %v3426_v54  ;;  %v3531_v52 = vsel %vm3294_vm4, 0, %v688_v41  ;;  %v692_v53 = vrot.slane %v690_v35, 7  ;;  %v2983_v41 = vld [vmem:[%s3828_s3 + $0x208] sm:$0xff]  }
  0x3f   : > { %2695 = vmatpush3.bf16.msra.mxu0 %v2964_v49  ;;  %2758 = vmatprep.subr.bf16.mxu1 %v2971_v56  ;;  %v700_v40 = vshll.u32 %v3501_v36, 16  ;;  %v697_v47 = vshrl.u32 %v3501_v36, 16  ;;  %v2500_v49 = vld [vmem:[%s480_s16] sm:$0xff]   ;;  %s504_s16 = scalar_lea.vmem %s3833_s8, %s2347_s26 }
  0x40   : > { %2696 = vmatprep.subr.bf16.mxu0 %v2966_v55  ;;  %2759 = vmatpush3.bf16.msra.mxu1 %v2973_v58  ;;  %v2501_v55 = vunpack.c.l.bf16 %v2500_v49  ;;  %v2502_v56 = vunpack.c.h.bf16 %v2500_v49  ;;  %v695_v62 = vor.u32 %v693_v46, %v692_v53 }
  0x41   : > { %2760 = vmatprep.subr.bf16.mxu1 %v2974_v60  ;;  %v749_v48 = vrot.slane %v700_v40, 1  ;;  %v744_v60 = vor.u32 %v743_v23, %v676_v44  ;;  %v745_v44 = vrot.slane %v686_v12, 1 }
  0x42   : > { %v614_v58 = vmul.f32 %v2501_v55, %v3251_v32  ;;  %v615_v59 = vmul.f32 %v2502_v56, %v3251_v32  ;;  %v3561_v8 = vsel %vm3294_vm4, 0, %v695_v62 }
  0x43   : > { %2697 = vmatpush3.bf16.msra.mxu0 %v2968_v0  ;;  %v750_v57 = vor.u32 %v749_v48, %v697_v47  ;;  %v3555_v5 = vsel %vm3302_vm5, %v744_v60, 0  ;;  %v746_v12 = vor.u32 %v745_v44, %v683_v63 }
  0x44   : > { %2698 = vmatprep.subr.bf16.mxu0 %v2970_v9  ;;  %2761 = vmatpush3.bf16.msra.mxu1 %v2975_v10  ;;  %v616_v39 = vadd.f32 %v3256_v34, %v614_v58  ;;  %v617_v0 = vadd.f32 %v3256_v34, %v615_v59  ;;  %v699_v9 = vrot.slane %v697_v47, 7 }
  0x45   : > { %1560 = vmatmul.mubr.bf16.gmra.mrb[12].mxu0 %v3364_v7  ;;  %1657 = vmatmul.mubr.bf16.gmra.mrb[12].mxu1 %v3457_v6  ;;  %v3548_v61 = vsel %vm3302_vm5, %v750_v57, 0  ;;  %v3575_v24 = vsel %vm3302_vm5, %v746_v12, 0 }
  0x46   : > { %1567 = vmatprep.mubr.bf16.mxu0 %v3375_v14  ;;  %1664 = vmatprep.mubr.bf16.mxu1 %v3473_v17  ;;  %v618_v32 = vmax.f32 %v616_v39, 0.0  ;;  %v619_v4 = vmax.f32 %v617_v0, 0.0 }
  0x47   : > { %2699 = vmatpush3.bf16.msra.mxu0 %v2972_v13  ;;  %2762 = vmatprep.subr.bf16.mxu1 %v2977_v25  ;;  %v702_v13 = vor.u32 %v700_v40, %v699_v9  ;;  %v747_v25 = vrot.slane %v693_v46, 1 }
  0x48   : > { %2700 = vmatprep.subr.bf16.mxu0 %v2976_v22  ;;  %2763 = vmatpush3.bf16.msra.mxu1 %v2979_v30  ;;  %v628_v10 = vmul.f32 %v627_v2, %v618_v32  ;;  %v629_v11 = vmul.f32 %v627_v2, %v619_v4 }
  0x49   : > { %2764 = vmatprep.subr.bf16.mxu1 %v2980_v31  ;;  %v3579_v26 = vsel %vm3294_vm4, 0, %v702_v13  ;;  %v748_v23 = vor.u32 %v747_v25, %v690_v35 }
  0x4a   : > { %v3565_v34 = vpack.c.bf16 %v629_v11, %v628_v10 }
  0x4b   : > { %2701 = vmatpush3.bf16.msra.mxu0 %v2978_v37  ;;  %v3599_v37 = vsel %vm3302_vm5, %v748_v23, 0 }
  0x4c   : > { %2765 = vmatpush3.bf16.msra.mxu1 %v2981_v43  ;;  %2830 = vmatprep.subr.bf16.mxu0 %v3525_v45  ;;  %v704_v15 = vshrl.u32 %v3565_v34, 16  ;;  %v707_v18 = vshll.u32 %v3565_v34, 16 }
  0x4d   : > { %1568 = vmatmul.mubr.bf16.gmra.mrb[16].mxu0 %v3426_v54  ;;  %1665 = vmatmul.mubr.bf16.gmra.mrb[16].mxu1 %v3516_v42 }
  0x4e   : > { %1575 = vmatprep.mubr.bf16.mxu0 %v3397_v33  ;;  %1672 = vmatprep.mubr.bf16.mxu1 %v3531_v52  ;;  %v706_v20 = vrot.slane %v704_v15, 7  ;;  %v751_v22 = vrot.slane %v707_v18, 1 }
  0x4f   : > { %2862 = vmatprep.subr.bf16.mxu1 %v3525_v45 }
  0x50   : > { %v3581_v28 = vor.u32 %v707_v18, %v706_v20  ;;  %v3583_v30 = vor.u32 %v751_v22, %v704_v15 }
  0x52   : > { %v732_v63 = vsel %vm3294_vm4, 0, %v3581_v28  ;;  %v775_v31 = vsel %vm3302_vm5, %v3583_v30, 0 }
  0x55   : > { %1576 = vmatmul.mubr.bf16.gmra.mrb[20].mxu0 %v3473_v17  ;;  %1673 = vmatmul.mubr.bf16.gmra.mrb[20].mxu1 %v3555_v5 }
  0x56   : > { %1583 = vmatprep.mubr.bf16.mxu0 %v3420_v50  ;;  %1680 = vmatprep.mubr.bf16.mxu1 %v3561_v8 }
  0x5d   : > { %1584 = vmatmul.mubr.bf16.gmra.mrb[24].mxu0 %v3531_v52  ;;  %1681 = vmatmul.mubr.bf16.gmra.mrb[24].mxu1 %v3575_v24 }
  0x5e   : > { %1591 = vmatprep.mubr.bf16.mxu0 %v3477_v19  ;;  %1688 = vmatprep.mubr.bf16.mxu1 %v3579_v26 }
  0x65   : > { %1592 = vmatmul.mubr.bf16.gmra.mrb[28].mxu0 %v3561_v8  ;;  %1689 = vmatmul.mubr.bf16.gmra.mrb[28].mxu1 %v3599_v37 }
  0x66   : > { %1729 = vmatprep.mubr.bf16.mxu0 %v3357_v1  ;;  %1826 = vmatprep.mubr.bf16.mxu1 %v3290_v16  ;;  %v2984_v1 = vld [vmem:[%s3828_s3 + $0x210] sm:$0xff]  }
  0x6d   : > { %1730 = vmatmul.mubr.bf16.vlgmr.msra.gmra.mrb[32].mxu0 %v3281_v3  ;;  %1827 = vmatmul.mubr.bf16.vlgmr.msra.gmra.mrb[32].mxu1 %v3336_v51  ;;  %v2985_v3 = vld [vmem:[%s3828_s3 + $0x218] sm:$0xff]   ;;  %v2986_v51 = vld [vmem:[%s3828_s3 + $0x220] sm:$0xff]  }
  0x6e   : > { %2831 = vmatpush3.bf16.msra.mxu0 %v3525_v45  ;;  %1737 = vmatprep.mubr.bf16.mxu0 %v3404_v38 }
  0x6f   : > { %1834 = vmatprep.mubr.bf16.mxu1 %v3306_v29  ;;  %2832 = vmatprep.subr.bf16.mxu0 %v2983_v41 }
  0x70   : > { %2870 = vmatpush3.bf16.msra.mxu1 %v3525_v45 }
  0x71   : > { %2863 = vmatprep.subr.bf16.mxu1 %v2983_v41 }
  0x72   : > { %2833 = vmatpush3.bf16.msra.mxu0 %v2983_v41 }
  0x73   : > { %2834 = vmatprep.subr.bf16.mxu0 %v2984_v1 }
  0x74   : > { %2871 = vmatpush3.bf16.msra.mxu1 %v2983_v41 }
  0x75   : > { %1738 = vmatmul.mubr.bf16.gmra.mrb[36].mxu0 %v3290_v16  ;;  %1835 = vmatmul.mubr.bf16.gmra.mrb[36].mxu1 %v3364_v7  ;;  %v2987_v16 = vld [vmem:[%s3828_s3 + $0x228] sm:$0xff]   ;;  %v2988_v7 = vld [vmem:[%s3828_s3 + $0x230] sm:$0xff]  }
  0x76   : > { %1745 = vmatprep.mubr.bf16.mxu0 %v3457_v6  ;;  %1842 = vmatprep.mubr.bf16.mxu1 %v3375_v14 }
  0x77   : > { %2835 = vmatpush3.bf16.msra.mxu0 %v2984_v1  ;;  %2864 = vmatprep.subr.bf16.mxu1 %v2984_v1 }
  0x78   : > { %2836 = vmatprep.subr.bf16.mxu0 %v2985_v3  ;;  %2872 = vmatpush3.bf16.msra.mxu1 %v2984_v1 }
  0x79   : > { %2865 = vmatprep.subr.bf16.mxu1 %v2985_v3 }
  0x7b   : > { %2837 = vmatpush3.bf16.msra.mxu0 %v2985_v3 }
  0x7c   : > { %2838 = vmatprep.subr.bf16.mxu0 %v2986_v51  ;;  %2873 = vmatpush3.bf16.msra.mxu1 %v2985_v3 }
  0x7d   : > { %1746 = vmatmul.mubr.bf16.gmra.mrb[40].mxu0 %v3306_v29  ;;  %1843 = vmatmul.mubr.bf16.gmra.mrb[40].mxu1 %v3426_v54  ;;  %v2989_v29 = vld [vmem:[%s3828_s3 + $0x238] sm:$0xff]  }
  0x7e   : > { %1753 = vmatprep.mubr.bf16.mxu0 %v3516_v42  ;;  %1850 = vmatprep.mubr.bf16.mxu1 %v3397_v33 }
  0x7f   : > { %2839 = vmatpush3.bf16.msra.mxu0 %v2986_v51  ;;  %2866 = vmatprep.subr.bf16.mxu1 %v2986_v51 }
  0x80   : > { %2840 = vmatprep.subr.bf16.mxu0 %v2987_v16  ;;  %2874 = vmatpush3.bf16.msra.mxu1 %v2986_v51 }
  0x81   : > { %2867 = vmatprep.subr.bf16.mxu1 %v2987_v16 }
  0x83   : > { %2841 = vmatpush3.bf16.msra.mxu0 %v2987_v16 }
  0x84   : > { %2842 = vmatprep.subr.bf16.mxu0 %v2988_v7  ;;  %2875 = vmatpush3.bf16.msra.mxu1 %v2987_v16 }
  0x85   : > { %1754 = vmatmul.mubr.bf16.gmra.mrb[44].mxu0 %v3375_v14  ;;  %1851 = vmatmul.mubr.bf16.gmra.mrb[44].mxu1 %v3473_v17 }
  0x86   : > { %1761 = vmatprep.mubr.bf16.mxu0 %v3555_v5  ;;  %1858 = vmatprep.mubr.bf16.mxu1 %v3420_v50 }
  0x87   : > { %2843 = vmatpush3.bf16.msra.mxu0 %v2988_v7  ;;  %2868 = vmatprep.subr.bf16.mxu1 %v2988_v7 }
  0x88   : > { %2844 = vmatprep.subr.bf16.mxu0 %v2989_v29  ;;  %2876 = vmatpush3.bf16.msra.mxu1 %v2988_v7 }
  0x89   : > { %2869 = vmatprep.subr.bf16.mxu1 %v2989_v29 }
  0x8b   : > { %2845 = vmatpush3.bf16.msra.mxu0 %v2989_v29 }
  0x8c   : > { %2877 = vmatpush3.bf16.msra.mxu1 %v2989_v29 }
  0x8d   : > { %1762 = vmatmul.mubr.bf16.gmra.mrb[48].mxu0 %v3397_v33  ;;  %1859 = vmatmul.mubr.bf16.gmra.mrb[48].mxu1 %v3531_v52  ;;  %v3675_v33 = vld [vmem:[%s3829_s4] ss:$0 sm:$0xff] }
  0x8e   : > { %1769 = vmatprep.mubr.bf16.mxu0 %v3575_v24  ;;  %1866 = vmatprep.mubr.bf16.mxu1 %v3477_v19 }
  0x95   : > { %1770 = vmatmul.mubr.bf16.gmra.mrb[52].mxu0 %v3420_v50  ;;  %1867 = vmatmul.mubr.bf16.gmra.mrb[52].mxu1 %v3561_v8 }
  0x96   : > { %1777 = vmatprep.mubr.bf16.mxu0 %v3599_v37  ;;  %1874 = vmatprep.mubr.bf16.mxu1 %v3501_v36 }
  0x9d   : > { %1778 = vmatmul.mubr.bf16.gmra.mrb[56].mxu0 %v3477_v19  ;;  %1875 = vmatmul.mubr.bf16.gmra.mrb[56].mxu1 %v3579_v26 }
  0x9e   : > { %1785 = vmatprep.mubr.bf16.mxu0 %v3548_v61  ;;  %1882 = vmatprep.mubr.bf16.mxu1 %v3565_v34 }
  0xa5   : > { %1786 = vmatmul.mubr.bf16.gmra.mrb[60].mxu0 %v3501_v36  ;;  %1883 = vmatmul.mubr.bf16.gmra.mrb[60].mxu1 %v732_v63 }
  0xa6   : > { %2846 = vmatprep.mubr.bf16.mxu0 %v3404_v38  ;;  %2854 = vmatprep.mubr.bf16.mxu1 %v3575_v24 }
  0xad   : > { %2847 = vmatmul.mubr.bf16.vlgmr.msra.gmra.mrb[64].mxu0 %v3457_v6  ;;  %2855 = vmatmul.mubr.bf16.vlgmr.msra.gmra.mrb[64].mxu1 %v3599_v37 }
  0xae   : > { %2850 = vmatprep.mubr.bf16.mxu0 %v3516_v42  ;;  %2858 = vmatprep.mubr.bf16.mxu1 %v3548_v61 }
  0xb5   : > { %2851 = vmatmul.mubr.bf16.gmra.mrb[68].mxu0 %v3555_v5  ;;  %2859 = vmatmul.mubr.bf16.gmra.mrb[68].mxu1 %v775_v31 }
 0x100   : > { %v2574_v21 = vpop.f32.mrb[0].mxu0  ;;  %v2638_v14 = vpop.f32.mrb[0].mxu1 }
 0x101   : > { %v2575_v38 = vpop.f32.mrb[1].mxu0  ;;  %v2639_v50 = vpop.f32.mrb[1].mxu1 }
 0x102   : > { %v2576_v54 = vadd.f32 %v2575_v38, %v2574_v21  ;;  %v2577_v6 = vpop.f32.mrb[2].mxu0  ;;  %v2640_v17 = vadd.f32 %v2639_v50, %v2638_v14  ;;  %v2641_v19 = vpop.f32.mrb[2].mxu1 }
 0x103   : > { %v2578_v35 = vpop.f32.mrb[3].mxu0  ;;  %v2642_v36 = vpop.f32.mrb[3].mxu1 }
 0x104   : > { %v1538_v27 = vadd.f32 %v2576_v54, %v3675_v33  ;;  %v2579_v42 = vadd.f32 %v2578_v35, %v2577_v6  ;;  %v2643_v40 = vadd.f32 %v2642_v36, %v2641_v19 }
 0x106   : > { %v1541_v43 = vadd.f32 %v2579_v42, %v3675_v33  ;;  %v3679_v45 = vadd.f32 %v2640_v17, %v1538_v27 }
 0x108   : > { %v3681_v46 = vadd.f32 %v2643_v40, %v1541_v43  ;;  %v2580_v47 = vpop.f32.mrb[4].mxu0  ;;  %v2644_v48 = vpop.f32.mrb[4].mxu1 }
 0x109   : > { %v2581_v49 = vpop.f32.mrb[5].mxu0  ;;  %v2645_v52 = vpop.f32.mrb[5].mxu1 }
 0x10a   : > { %v2582_v53 = vadd.f32 %v2581_v49, %v2580_v47  ;;  %v2583_v55 = vpop.f32.mrb[6].mxu0  ;;  %v2646_v56 = vadd.f32 %v2645_v52, %v2644_v48  ;;  %v2647_v57 = vpop.f32.mrb[6].mxu1 }
 0x10b   : > { %v2584_v58 = vpop.f32.mrb[7].mxu0  ;;  %v2648_v59 = vpop.f32.mrb[7].mxu1 }
 0x10c   : > { %v1546_v60 = vadd.f32 %v2582_v53, %v3675_v33  ;;  %v2585_v61 = vadd.f32 %v2584_v58, %v2583_v55  ;;  %v2649_v62 = vadd.f32 %v2648_v59, %v2647_v57 }
 0x10e   : > { %v1549_v39 = vadd.f32 %v2585_v61, %v3675_v33  ;;  %v3685_v0 = vadd.f32 %v2646_v56, %v1546_v60 }
 0x110   : > { %v3687_v2 = vadd.f32 %v2649_v62, %v1549_v39  ;;  %v2586_v32 = vpop.f32.mrb[8].mxu0  ;;  %v2650_v4 = vpop.f32.mrb[8].mxu1 }
 0x111   : > { %v2587_v5 = vpop.f32.mrb[9].mxu0  ;;  %v2651_v44 = vpop.f32.mrb[9].mxu1 }
 0x112   : > { %v2588_v8 = vadd.f32 %v2587_v5, %v2586_v32  ;;  %v2589_v9 = vpop.f32.mrb[10].mxu0  ;;  %v2652_v10 = vadd.f32 %v2651_v44, %v2650_v4  ;;  %v2653_v11 = vpop.f32.mrb[10].mxu1 }
 0x113   : > { %v2590_v34 = vpop.f32.mrb[11].mxu0  ;;  %v2654_v12 = vpop.f32.mrb[11].mxu1 }
 0x114   : > { %v1554_v13 = vadd.f32 %v2588_v8, %v3675_v33  ;;  %v2591_v15 = vadd.f32 %v2590_v34, %v2589_v9  ;;  %v2655_v18 = vadd.f32 %v2654_v12, %v2653_v11 }
 0x116   : > { %v1557_v20 = vadd.f32 %v2591_v15, %v3675_v33  ;;  %v3691_v22 = vadd.f32 %v2652_v10, %v1554_v13 }
 0x118   : > { %v3693_v24 = vadd.f32 %v2655_v18, %v1557_v20  ;;  %v2592_v25 = vpop.f32.mrb[12].mxu0  ;;  %v2656_v26 = vpop.f32.mrb[12].mxu1 }
 0x119   : > { %v2593_v28 = vpop.f32.mrb[13].mxu0  ;;  %v2657_v30 = vpop.f32.mrb[13].mxu1 }
 0x11a   : > { %v2594_v63 = vadd.f32 %v2593_v28, %v2592_v25  ;;  %v2595_v31 = vpop.f32.mrb[14].mxu0  ;;  %v2658_v23 = vadd.f32 %v2657_v30, %v2656_v26  ;;  %v2659_v37 = vpop.f32.mrb[14].mxu1 }
 0x11b   : > { %v2596_v41 = vpop.f32.mrb[15].mxu0  ;;  %v2660_v1 = vpop.f32.mrb[15].mxu1 }
 0x11c   : > { %v1562_v3 = vadd.f32 %v2594_v63, %v3675_v33  ;;  %v2597_v51 = vadd.f32 %v2596_v41, %v2595_v31  ;;  %v2661_v16 = vadd.f32 %v2660_v1, %v2659_v37 }
 0x11e   : > { %v1565_v7 = vadd.f32 %v2597_v51, %v3675_v33  ;;  %v3697_v29 = vadd.f32 %v2658_v23, %v1562_v3 }
 0x120   : > { %v3699_v21 = vadd.f32 %v2661_v16, %v1565_v7  ;;  %v2598_v14 = vpop.f32.mrb[16].mxu0  ;;  %v2662_v38 = vpop.f32.mrb[16].mxu1 }
 0x121   : > { %v2599_v50 = vpop.f32.mrb[17].mxu0  ;;  %v2663_v54 = vpop.f32.mrb[17].mxu1 }
 0x122   : > { %v2600_v6 = vadd.f32 %v2599_v50, %v2598_v14  ;;  %v2601_v17 = vpop.f32.mrb[18].mxu0  ;;  %v2664_v19 = vadd.f32 %v2663_v54, %v2662_v38  ;;  %v2665_v35 = vpop.f32.mrb[18].mxu1 }
 0x123   : > { %v2602_v36 = vpop.f32.mrb[19].mxu0  ;;  %v2666_v27 = vpop.f32.mrb[19].mxu1 }
 0x124   : > { %v1570_v42 = vadd.f32 %v2600_v6, %v3675_v33  ;;  %v2603_v40 = vadd.f32 %v2602_v36, %v2601_v17  ;;  %v2667_v43 = vadd.f32 %v2666_v27, %v2665_v35 }
 0x126   : > { %v1573_v47 = vadd.f32 %v2603_v40, %v3675_v33  ;;  %v3703_v48 = vadd.f32 %v2664_v19, %v1570_v42 }
 0x128   : > { %v3705_v49 = vadd.f32 %v2667_v43, %v1573_v47  ;;  %v2604_v52 = vpop.f32.mrb[20].mxu0  ;;  %v2668_v53 = vpop.f32.mrb[20].mxu1 }
 0x129   : > { %v2605_v55 = vpop.f32.mrb[21].mxu0  ;;  %v2669_v56 = vpop.f32.mrb[21].mxu1 }
 0x12a   : > { %v2606_v57 = vadd.f32 %v2605_v55, %v2604_v52  ;;  %v2607_v58 = vpop.f32.mrb[22].mxu0  ;;  %v2670_v59 = vadd.f32 %v2669_v56, %v2668_v53  ;;  %v2671_v60 = vpop.f32.mrb[22].mxu1 }
 0x12b   : > { %v2608_v61 = vpop.f32.mrb[23].mxu0  ;;  %v2672_v62 = vpop.f32.mrb[23].mxu1 }
 0x12c   : > { %v1578_v39 = vadd.f32 %v2606_v57, %v3675_v33  ;;  %v2609_v32 = vadd.f32 %v2608_v61, %v2607_v58  ;;  %v2673_v4 = vadd.f32 %v2672_v62, %v2671_v60 }
 0x12e   : > { %v1581_v5 = vadd.f32 %v2609_v32, %v3675_v33  ;;  %v3709_v44 = vadd.f32 %v2670_v59, %v1578_v39 }
 0x130   : > { %v3711_v8 = vadd.f32 %v2673_v4, %v1581_v5  ;;  %v2610_v9 = vpop.f32.mrb[24].mxu0  ;;  %v2674_v10 = vpop.f32.mrb[24].mxu1 }
 0x131   : > { %v2611_v11 = vpop.f32.mrb[25].mxu0  ;;  %v2675_v34 = vpop.f32.mrb[25].mxu1 }
 0x132   : > { %v2612_v12 = vadd.f32 %v2611_v11, %v2610_v9  ;;  %v2613_v13 = vpop.f32.mrb[26].mxu0  ;;  %v2676_v15 = vadd.f32 %v2675_v34, %v2674_v10  ;;  %v2677_v18 = vpop.f32.mrb[26].mxu1 }
 0x133   : > { %v2614_v20 = vpop.f32.mrb[27].mxu0  ;;  %v2678_v25 = vpop.f32.mrb[27].mxu1 }
 0x134   : > { %v1586_v26 = vadd.f32 %v2612_v12, %v3675_v33  ;;  %v2615_v28 = vadd.f32 %v2614_v20, %v2613_v13  ;;  %v2679_v30 = vadd.f32 %v2678_v25, %v2677_v18 }
 0x136   : > { %v1589_v63 = vadd.f32 %v2615_v28, %v3675_v33  ;;  %v3715_v31 = vadd.f32 %v2676_v15, %v1586_v26 }
 0x138   : > { %v3717_v23 = vadd.f32 %v2679_v30, %v1589_v63  ;;  %v2616_v37 = vpop.f32.mrb[28].mxu0  ;;  %v2680_v41 = vpop.f32.mrb[28].mxu1 }
 0x139   : > { %v2617_v1 = vpop.f32.mrb[29].mxu0  ;;  %v2681_v3 = vpop.f32.mrb[29].mxu1 }
 0x13a   : > { %v2618_v51 = vadd.f32 %v2617_v1, %v2616_v37  ;;  %v2619_v16 = vpop.f32.mrb[30].mxu0  ;;  %v2682_v7 = vadd.f32 %v2681_v3, %v2680_v41  ;;  %v2683_v14 = vpop.f32.mrb[30].mxu1 }
 0x13b   : > { %v2620_v38 = vpop.f32.mrb[31].mxu0  ;;  %v2684_v50 = vpop.f32.mrb[31].mxu1 }
 0x13c   : > { %v1594_v54 = vadd.f32 %v2618_v51, %v3675_v33  ;;  %v2621_v6 = vadd.f32 %v2620_v38, %v2619_v16  ;;  %v2685_v17 = vadd.f32 %v2684_v50, %v2683_v14 }
 0x13e   : > { %v1597_v19 = vadd.f32 %v2621_v6, %v3675_v33  ;;  %v3721_v35 = vadd.f32 %v2682_v7, %v1594_v54 }
 0x140   : > { %v3723_v36 = vadd.f32 %v2685_v17, %v1597_v19  ;;  %v2702_v27 = vpop.f32.mrb[32].mxu0  ;;  %v2766_v42 = vpop.f32.mrb[32].mxu1 }
 0x141   : > { %v2703_v40 = vpop.f32.mrb[33].mxu0  ;;  %v2767_v43 = vpop.f32.mrb[33].mxu1 }
 0x142   : > { %v2704_v47 = vadd.f32 %v2703_v40, %v2702_v27  ;;  %v2705_v52 = vpop.f32.mrb[34].mxu0  ;;  %v2768_v53 = vadd.f32 %v2767_v43, %v2766_v42  ;;  %v2769_v55 = vpop.f32.mrb[34].mxu1 }
 0x143   : > { %v2706_v56 = vpop.f32.mrb[35].mxu0  ;;  %v2770_v57 = vpop.f32.mrb[35].mxu1 }
 0x144   : > { %v1732_v58 = vadd.f32 %v2704_v47, %v3679_v45  ;;  %v2707_v59 = vadd.f32 %v2706_v56, %v2705_v52  ;;  %v2771_v60 = vadd.f32 %v2770_v57, %v2769_v55 }
 0x146   : > { %v1735_v33 = vadd.f32 %v2707_v59, %v3681_v46  ;;  %v3727_v61 = vadd.f32 %v2768_v53, %v1732_v58 }
 0x148   : > { %v2708_v62 = vpop.f32.mrb[36].mxu0  ;;  %v2772_v39 = vpop.f32.mrb[36].mxu1  ;;  %v3729_v32 = vadd.f32 %v2771_v60, %v1735_v33 }
 0x149   : > { %v2709_v4 = vpop.f32.mrb[37].mxu0  ;;  %v2773_v5 = vpop.f32.mrb[37].mxu1 }
 0x14a   : > { %v2710_v9 = vadd.f32 %v2709_v4, %v2708_v62  ;;  %v2711_v10 = vpop.f32.mrb[38].mxu0  ;;  %v2774_v11 = vadd.f32 %v2773_v5, %v2772_v39  ;;  %v2775_v34 = vpop.f32.mrb[38].mxu1 }
 0x14b   : > { %v2712_v12 = vpop.f32.mrb[39].mxu0  ;;  %v2776_v13 = vpop.f32.mrb[39].mxu1 }
 0x14c   : > { %v1740_v45 = vadd.f32 %v2710_v9, %v3685_v0  ;;  %v2713_v15 = vadd.f32 %v2712_v12, %v2711_v10  ;;  %v2777_v18 = vadd.f32 %v2776_v13, %v2775_v34 }
 0x14e   : > { %v1743_v46 = vadd.f32 %v2713_v15, %v3687_v2  ;;  %v3733_v20 = vadd.f32 %v2774_v11, %v1740_v45 }
 0x150   : > { %v2714_v25 = vpop.f32.mrb[40].mxu0  ;;  %v2778_v26 = vpop.f32.mrb[40].mxu1  ;;  %v3735_v28 = vadd.f32 %v2777_v18, %v1743_v46 }
 0x151   : > { %v2715_v30 = vpop.f32.mrb[41].mxu0  ;;  %v2779_v63 = vpop.f32.mrb[41].mxu1 }
 0x152   : > { %v2716_v37 = vadd.f32 %v2715_v30, %v2714_v25  ;;  %v2717_v41 = vpop.f32.mrb[42].mxu0  ;;  %v2780_v1 = vadd.f32 %v2779_v63, %v2778_v26  ;;  %v2781_v3 = vpop.f32.mrb[42].mxu1 }
 0x153   : > { %v2718_v51 = vpop.f32.mrb[43].mxu0  ;;  %v2782_v16 = vpop.f32.mrb[43].mxu1 }
 0x154   : > { %v1748_v0 = vadd.f32 %v2716_v37, %v3691_v22  ;;  %v2719_v7 = vadd.f32 %v2718_v51, %v2717_v41  ;;  %v2783_v14 = vadd.f32 %v2782_v16, %v2781_v3 }
 0x156   : > { %v1751_v2 = vadd.f32 %v2719_v7, %v3693_v24  ;;  %v3739_v38 = vadd.f32 %v2780_v1, %v1748_v0 }
 0x158   : > { %v2720_v50 = vpop.f32.mrb[44].mxu0  ;;  %v2784_v54 = vpop.f32.mrb[44].mxu1  ;;  %v3741_v6 = vadd.f32 %v2783_v14, %v1751_v2 }
 0x159   : > { %v2721_v17 = vpop.f32.mrb[45].mxu0  ;;  %v2785_v19 = vpop.f32.mrb[45].mxu1 }
 0x15a   : > { %v2722_v27 = vadd.f32 %v2721_v17, %v2720_v50  ;;  %v2723_v42 = vpop.f32.mrb[46].mxu0  ;;  %v2786_v40 = vadd.f32 %v2785_v19, %v2784_v54  ;;  %v2787_v43 = vpop.f32.mrb[46].mxu1 }
 0x15b   : > { %v2724_v47 = vpop.f32.mrb[47].mxu0  ;;  %v2788_v52 = vpop.f32.mrb[47].mxu1 }
 0x15c   : > { %v1756_v22 = vadd.f32 %v2722_v27, %v3697_v29  ;;  %v2725_v53 = vadd.f32 %v2724_v47, %v2723_v42  ;;  %v2789_v55 = vadd.f32 %v2788_v52, %v2787_v43 }
 0x15e   : > { %v1759_v24 = vadd.f32 %v2725_v53, %v3699_v21  ;;  %v3745_v56 = vadd.f32 %v2786_v40, %v1756_v22 }
 0x160   : > { %v2726_v57 = vpop.f32.mrb[48].mxu0  ;;  %v2790_v58 = vpop.f32.mrb[48].mxu1  ;;  %v3747_v59 = vadd.f32 %v2789_v55, %v1759_v24 }
 0x161   : > { %v2727_v60 = vpop.f32.mrb[49].mxu0  ;;  %v2791_v33 = vpop.f32.mrb[49].mxu1 }
 0x162   : > { %v2728_v62 = vadd.f32 %v2727_v60, %v2726_v57  ;;  %v2729_v39 = vpop.f32.mrb[50].mxu0  ;;  %v2792_v4 = vadd.f32 %v2791_v33, %v2790_v58  ;;  %v2793_v5 = vpop.f32.mrb[50].mxu1 }
 0x163   : > { %v2730_v9 = vpop.f32.mrb[51].mxu0  ;;  %v2794_v10 = vpop.f32.mrb[51].mxu1 }
 0x164   : > { %v1764_v29 = vadd.f32 %v2728_v62, %v3703_v48  ;;  %v2731_v11 = vadd.f32 %v2730_v9, %v2729_v39  ;;  %v2795_v34 = vadd.f32 %v2794_v10, %v2793_v5 }
 0x166   : > { %v1767_v21 = vadd.f32 %v2731_v11, %v3705_v49  ;;  %v1861_v12 = vadd.f32 %v2792_v4, %v1764_v29 }
 0x168   : > { %v2732_v13 = vpop.f32.mrb[52].mxu0  ;;  %v2796_v45 = vpop.f32.mrb[52].mxu1  ;;  %v3751_v15 = vadd.f32 %v2795_v34, %v1767_v21 }
 0x169   : > { %v2733_v18 = vpop.f32.mrb[53].mxu0  ;;  %v2797_v46 = vpop.f32.mrb[53].mxu1 }
 0x16a   : > { %v2734_v25 = vadd.f32 %v2733_v18, %v2732_v13  ;;  %v2735_v26 = vpop.f32.mrb[54].mxu0  ;;  %v2798_v30 = vadd.f32 %v2797_v46, %v2796_v45  ;;  %v2799_v63 = vpop.f32.mrb[54].mxu1 }
 0x16b   : > { %v2736_v37 = vpop.f32.mrb[55].mxu0  ;;  %v2800_v41 = vpop.f32.mrb[55].mxu1 }
 0x16c   : > { %v1772_v1 = vadd.f32 %v2734_v25, %v3709_v44  ;;  %v2737_v48 = vadd.f32 %v2736_v37, %v2735_v26  ;;  %v2801_v3 = vadd.f32 %v2800_v41, %v2799_v63 }
 0x16e   : > { %v1775_v51 = vadd.f32 %v2737_v48, %v3711_v8  ;;  %v1869_v49 = vadd.f32 %v2798_v30, %v1772_v1 }
 0x170   : > { %v2738_v16 = vpop.f32.mrb[56].mxu0  ;;  %v2802_v0 = vpop.f32.mrb[56].mxu1  ;;  %v1872_v7 = vadd.f32 %v2801_v3, %v1775_v51 }
 0x171   : > { %v2739_v14 = vpop.f32.mrb[57].mxu0  ;;  %v2803_v2 = vpop.f32.mrb[57].mxu1 }
 0x172   : > { %v2740_v50 = vadd.f32 %v2739_v14, %v2738_v16  ;;  %v2741_v54 = vpop.f32.mrb[58].mxu0  ;;  %v2804_v17 = vadd.f32 %v2803_v2, %v2802_v0  ;;  %v2805_v19 = vpop.f32.mrb[58].mxu1 }
 0x173   : > { %v2742_v27 = vpop.f32.mrb[59].mxu0  ;;  %v2806_v42 = vpop.f32.mrb[59].mxu1 }
 0x174   : > { %v1780_v40 = vadd.f32 %v2740_v50, %v3715_v31  ;;  %v2743_v43 = vadd.f32 %v2742_v27, %v2741_v54  ;;  %v2807_v44 = vadd.f32 %v2806_v42, %v2805_v19 }
 0x176   : > { %v1783_v47 = vadd.f32 %v2743_v43, %v3717_v23  ;;  %v1877_v52 = vadd.f32 %v2804_v17, %v1780_v40 }
 0x178   : > { %v2744_v8 = vpop.f32.mrb[60].mxu0  ;;  %v2808_v22 = vpop.f32.mrb[60].mxu1  ;;  %v3757_v53 = vadd.f32 %v2807_v44, %v1783_v47 }
 0x179   : > { %v2745_v55 = vpop.f32.mrb[61].mxu0  ;;  %v2809_v24 = vpop.f32.mrb[61].mxu1 }
 0x17a   : > { %v2746_v57 = vadd.f32 %v2745_v55, %v2744_v8  ;;  %v2747_v58 = vpop.f32.mrb[62].mxu0  ;;  %v2810_v60 = vadd.f32 %v2809_v24, %v2808_v22  ;;  %v2811_v33 = vpop.f32.mrb[62].mxu1 }
 0x17b   : > { %v2748_v62 = vpop.f32.mrb[63].mxu0  ;;  %v2812_v39 = vpop.f32.mrb[63].mxu1 }
 0x17c   : > { %v1788_v4 = vadd.f32 %v2746_v57, %v3721_v35  ;;  %v2749_v31 = vadd.f32 %v2748_v62, %v2747_v58  ;;  %v2813_v5 = vadd.f32 %v2812_v39, %v2811_v33 }
 0x17e   : > { %v1791_v9 = vadd.f32 %v2749_v31, %v3723_v36  ;;  %v1885_v23 = vadd.f32 %v2810_v60, %v1788_v4 }
 0x180   : > { %v2848_v10 = vpop.f32.mrb[64].mxu0  ;;  %v2856_v29 = vpop.f32.mrb[64].mxu1  ;;  %v1888_v11 = vadd.f32 %v2813_v5, %v1791_v9 }
 0x181   : > { %v1934_v34 = vadd.f32 %v2848_v10, %v3733_v20  ;;  %v3762_v21 = vadd.f32 %v2856_v29, %v1869_v49  ;;  %v1925_v13 = vpop.f32.mrb[65].mxu0  ;;  %v1957_v45 = vpop.f32.mrb[65].mxu1 }
 0x182   : > { %v1926_v18 = vadd.f32 %v1925_v13, %v3727_v61  ;;  %v3765_v46 = vadd.f32 %v1957_v45, %v1861_v12  ;;  %v2849_v35 = vpop.f32.mrb[66].mxu0  ;;  %v2857_v25 = vpop.f32.mrb[66].mxu1 }
 0x183   : > { %v1937_v26 = vadd.f32 %v2849_v35, %v3735_v28  ;;  %v3768_v36 = vadd.f32 %v2857_v25, %v1872_v7  ;;  %v1928_v30 = vpop.f32.mrb[67].mxu0  ;;  %v1960_v63 = vpop.f32.mrb[67].mxu1  ;;  %v2012_v51 = vmul.f32 %v1934_v34, %v1934_v34  ;;  %v2020_v13 = vmul.f32 %v3762_v21, %v3762_v21 }
 0x184   : > { %v1929_v61 = vadd.f32 %v1928_v30, %v3729_v32  ;;  %v1961_v20 = vadd.f32 %v1960_v63, %v3751_v15  ;;  %v2010_v37 = vmul.f32 %v1926_v18, %v1926_v18  ;;  %v2018_v10 = vmul.f32 %v3765_v46, %v3765_v46 }
 0x185   : > { %v2511_v12 = vpack.c.bf16 %v1937_v26, %v1934_v34  ;;  %v2531_v28 = vpack.c.bf16 %v3768_v36, %v3762_v21  ;;  %v2013_v15 = vmul.f32 %v1937_v26, %v1937_v26  ;;  %v2021_v35 = vmul.f32 %v3768_v36, %v3768_v36 }
 0x186   : > { %v1988_v41 = vadd.f32 %v1929_v61, %v1926_v18  ;;  %v2011_v1 = vmul.f32 %v1929_v61, %v1929_v61  ;;  %v2506_v48 = vpack.c.bf16 %v1929_v61, %v1926_v18  ;;  %v2526_v3 = vpack.c.bf16 %v1961_v20, %v3765_v46 }
 0x187   : > { %2551 = vst [vmem:[%s3775_s17 + $0x8] sm:$0xff] %v2511_v12   ;;  %2555 = vst [vmem:[%s3775_s17 + $0x28] sm:$0xff] %v2531_v28   ;;  %v2019_v29 = vmul.f32 %v1961_v20, %v1961_v20 }
 0x188   : > { %v1989_v49 = vadd.f32 %v1988_v41, %v1934_v34  ;;  %v2026_v16 = vadd.f32 %v2011_v1, %v2010_v37  ;;  %2507 = vst [vmem:[%s3775_s17] sm:$0xff] %v2506_v48   ;;  %v2852_v32 = vpop.f32.mrb[68].mxu0  ;;  %v2860_v0 = vpop.f32.mrb[68].mxu1  ;;  %2554 = vst [vmem:[%s3775_s17 + $0x20] sm:$0xff] %v2526_v3  }
 0x189   : > { %v1950_v7 = vadd.f32 %v2852_v32, %v3745_v56  ;;  %v1982_v14 = vadd.f32 %v2860_v0, %v1885_v23  ;;  %v1941_v2 = vpop.f32.mrb[69].mxu0  ;;  %v1973_v50 = vpop.f32.mrb[69].mxu1 }
 0x18a   : > { %v2027_v54 = vadd.f32 %v2026_v16, %v2012_v51  ;;  %v1942_v17 = vadd.f32 %v1941_v2, %v3739_v38  ;;  %v1990_v19 = vadd.f32 %v1989_v49, %v1937_v26  ;;  %v1974_v27 = vadd.f32 %v1973_v50, %v1877_v52  ;;  %v2853_v42 = vpop.f32.mrb[70].mxu0  ;;  %v2861_v40 = vpop.f32.mrb[70].mxu1 }
 0x18b   : > { %v1953_v43 = vadd.f32 %v2853_v42, %v3747_v59  ;;  %v1985_v44 = vadd.f32 %v2861_v40, %v1888_v11  ;;  %v1944_v47 = vpop.f32.mrb[71].mxu0  ;;  %v1976_v8 = vpop.f32.mrb[71].mxu1  ;;  %v2016_v39 = vmul.f32 %v1950_v7, %v1950_v7  ;;  %v2024_v28 = vmul.f32 %v1982_v14, %v1982_v14 }
 0x18c   : > { %v1991_v22 = vadd.f32 %v1990_v19, %v1942_v17  ;;  %v2014_v55 = vmul.f32 %v1942_v17, %v1942_v17  ;;  %v2028_v56 = vadd.f32 %v2027_v54, %v2013_v15  ;;  %v1945_v38 = vadd.f32 %v1944_v47, %v3741_v6 }
 0x18d   : > { %v2521_v24 = vpack.c.bf16 %v1953_v43, %v1950_v7  ;;  %v2541_v57 = vpack.c.bf16 %v1985_v44, %v1982_v14  ;;  %v1977_v52 = vadd.f32 %v1976_v8, %v3757_v53  ;;  %v2017_v5 = vmul.f32 %v1953_v43, %v1953_v43 }
 0x18e   : > { %v2029_v58 = vadd.f32 %v2028_v56, %v2014_v55  ;;  %v1992_v60 = vadd.f32 %v1991_v22, %v1945_v38  ;;  %v2015_v33 = vmul.f32 %v1945_v38, %v1945_v38  ;;  %v2516_v59 = vpack.c.bf16 %v1945_v38, %v1942_v17 }
 0x18f   : > { %2553 = vst [vmem:[%s3775_s17 + $0x18] sm:$0xff] %v2521_v24   ;;  %2557 = vst [vmem:[%s3775_s17 + $0x38] sm:$0xff] %v2541_v57   ;;  %v2536_v62 = vpack.c.bf16 %v1977_v52, %v1974_v27  ;;  %v2023_v12 = vmul.f32 %v1977_v52, %v1977_v52 }
 0x190   : > { %v1993_v4 = vadd.f32 %v1992_v60, %v1950_v7  ;;  %v2030_v31 = vadd.f32 %v2029_v58, %v2015_v33  ;;  %2552 = vst [vmem:[%s3775_s17 + $0x10] sm:$0xff] %v2516_v59  }
 0x191   : > { %2556 = vst [vmem:[%s3775_s17 + $0x30] sm:$0xff] %v2536_v62  }
 0x192   : > { %v1994_v9 = vadd.f32 %v1993_v4, %v1953_v43  ;;  %v2031_v23 = vadd.f32 %v2030_v31, %v2016_v39 }
 0x194   : > { %v1995_v6 = vadd.f32 %v1994_v9, %v3765_v46  ;;  %v2032_v53 = vadd.f32 %v2031_v23, %v2017_v5  ;;  %v2022_v46 = vmul.f32 %v1974_v27, %v1974_v27 }
 0x196   : > { %v2033_v11 = vadd.f32 %v2032_v53, %v2018_v10  ;;  %v1996_v34 = vadd.f32 %v1995_v6, %v1961_v20 }
 0x198   : > { %v1997_v45 = vadd.f32 %v1996_v34, %v3762_v21  ;;  %v2034_v18 = vadd.f32 %v2033_v11, %v2019_v29  ;;  %v2025_v21 = vmul.f32 %v1985_v44, %v1985_v44 }
 0x19a   : > { %v1998_v25 = vadd.f32 %v1997_v45, %v3768_v36  ;;  %v2035_v26 = vadd.f32 %v2034_v18, %v2020_v13 }
 0x19c   : > { %v1999_v30 = vadd.f32 %v1998_v25, %v1974_v27  ;;  %v2036_v63 = vadd.f32 %v2035_v26, %v2021_v35 }
 0x19e   : > { %v2000_v61 = vadd.f32 %v1999_v30, %v1977_v52  ;;  %v2037_v20 = vadd.f32 %v2036_v63, %v2022_v46 }
 0x1a0   : > { %v2001_v37 = vadd.f32 %v2000_v61, %v1982_v14  ;;  %v2038_v41 = vadd.f32 %v2037_v20, %v2023_v12 }
 0x1a2   : > { %v2002_v1 = vadd.f32 %v2001_v37, %v1985_v44  ;;  %v2039_v48 = vadd.f32 %v2038_v41, %v2024_v28 }
 0x1a4   : > { %v2003_v3 = vrot.slane %v2002_v1, 4  ;;  %v2040_v51 = vadd.f32 %v2039_v48, %v2025_v21 }
 0x1a6   : > { %v2004_v36 = vadd.f32 %v2003_v3, %v2002_v1  ;;  %v2041_v49 = vrot.slane %v2040_v51, 4 }
 0x1a8   : > { %v2005_v16 = vrot.slane %v2004_v36, 2  ;;  %v2042_v32 = vadd.f32 %v2041_v49, %v2040_v51 }
 0x1aa   : > { %v2006_v0 = vadd.f32 %v2005_v16, %v2004_v36  ;;  %v2043_v15 = vrot.slane %v2042_v32, 2 }
 0x1ac   : > { %v2007_v7 = vrot.slane %v2006_v0, 1  ;;  %v2044_v2 = vadd.f32 %v2043_v15, %v2042_v32 }
 0x1ae   : > { %v2008_v14 = vadd.f32 %v2007_v7, %v2006_v0  ;;  %v2045_v50 = vrot.slane %v2044_v2, 1 }
 0x1b0   : > { %2009 = vst [vmem:[%s504_s16] sm:$0x1] %v2008_v14  ;;  %v2046_v54 = vadd.f32 %v2045_v50, %v2044_v2 }
 0x1b2   : > { %2047 = vst [vmem:[%s504_s16 + $0x1] sm:$0x1] %v2046_v54 }
 0x1b3 PF: > { %s19_s9 = sadd.s32 1, %s3028_s9   ;;  %s3840_s15 = sld [smem:[#allocation3_spill]] }
 0x1b4   : > { %p16_p0 = scmp.ge.s32.totalorder %s19_s9, 6   ;;  %s3841_s27 = smov %s3020_s29 }
 0x1b5   : > { %s3842_s28 = smov %s3024_s30  ;;  %s3843_s29 = smov %s3846_s10 }
 0x1b6   :  { %18 = sbr.rel (!%p16_p0) target bundleno = 3 (0x3), region = 96 }
 0x1b9   : > { %s3844_s30 = smov %s3840_s15 }

// kernel: segnet_forward.6
= control target key start
LH: loop header
LB: loop body
LE: loop exit
PB: predicated region body
PF: predicated region fallthrough
CT: control target
= control target key end

     0   :  { %s3629_s27 = smov 0   ;;  %s3631_s28 = smov 0   ;;  %s4961_s0 = inlined_call_operand.vmem [shape: bf16[2,16,16,128], index: 0, kind: input, shape index: {}, may-alias: {0,1,2}]   ;;  %s4962_s1 = inlined_call_operand.vmem [shape: bf16[2,16,16,128], index: 1, kind: input, shape index: {}, may-alias: {0,1,2}]   ;;  %s4963_s2 = inlined_call_operand.vmem [shape: bf16[2,16,16,128], index: 2, kind: input, shape index: {}, may-alias: {0,1,2}]   ;;  %s4964_s3 = inlined_call_operand.vmem [shape: bf16[1152,128], index: 3, kind: input, shape index: {}]   ;;  %s4965_s4 = inlined_call_operand.vmem [shape: f32[1,128], index: 4, kind: input, shape index: {}]   ;;  %s4966_s5 = inlined_call_operand.vmem [shape: f32[1,128], index: 5, kind: input, shape index: {}]   ;;  %s4967_s6 = inlined_call_operand.vmem [shape: f32[1,128], index: 6, kind: input, shape index: {}]   ;;  %s4968_s7 = inlined_call_operand.vmem [shape: bf16[2,16,16,128], index: 7, kind: output, shape index: {0}]   ;;  %s4969_s8 = inlined_call_operand.vmem [shape: f32[2,2,2,128], index: 8, kind: output, shape index: {1}]  }
   0x1   :  { %s3633_s29 = smov 0   ;;  %s3635_s30 = smov 0  }
   0x2   :  { %s3637_s9 = smov 0  }
   0x3 LB: > { %s28_s10 = sadd.s32 1, %s3574_s29  ;;  %s31_s11 = sadd.s32 1, %s3578_s30  ;;  %s3582_s9 = sphi %s3637_s9, %s19_s9   ;;  %s3578_s30 = sphi %s3635_s30, %s5092_s30   ;;  %s3574_s29 = sphi %s3633_s29, %s5091_s29   ;;  %s3570_s28 = sphi %s3631_s28, %s5090_s28   ;;  %s3566_s27 = sphi %s3629_s27, %s5089_s27  }
   0x4   : > { %p29_p0 = scmp.ge.s32.totalorder %s28_s10, 2  ;;  %p2797_p1 = scmp.ge.s32.totalorder %s3582_s9, 1 }
   0x5   : > { %p357_p2 = scmp.lt.s32.totalorder %s3582_s9, 5 }
   0x6   : > { %s5094_s10 = smov (%p29_p0, %s28_s10), 0  ;;  %s5096_s11 = smov (!%p29_p0, %s31_s11), %s3578_s30 }
   0x7   : > { %p358_p3 = pnand %p2797_p1, %p357_p2  ;;  %p33_p4 = scmp.ge.s32.totalorder %s5096_s11, 2 }
   0x8   : > { %v3470_v0 = vld [vmem:[%s4964_s3 + $0x40] sm:$0xff] (!%p358_p3)   ;;  %v3474_v4 = vld [vmem:[%s4964_s3 + $0x48] sm:$0xff] (!%p358_p3)   ;;  %s2798_s26 = sshll.u32 (!%p358_p3), %s3566_s27, 3  ;;  %s2802_s14 = sshll.u32 (!%p358_p3), %s3566_s27, 2  ;;  %v3478_v8 = vld [vmem:[%s4964_s3 + $0x50] sm:$0xff] (!%p358_p3)   ;;  %v824_v21 = vlaneseq (!%p358_p3)  ;;  %vm4971_vm0 = vcmask (!%p358_p3), 1046528  }
   0x9   : > { %s5098_s11 = smov (%p33_p4, %s5096_s11), 0  ;;  %361 = sbr.rel (%p358_p3) target bundleno = 472 (0x1d8), region = 48 }
   0xa   : > { %v3471_v1 = vld [vmem:[%s4964_s3] sm:$0xff] (!%p358_p3)   ;;  %3110 = vmatprep.subr.bf16.mxu0 (!%p358_p3), %v3470_v0  ;;  %v3475_v5 = vld [vmem:[%s4964_s3 + $0x8] sm:$0xff] (!%p358_p3)   ;;  %p438_p5 = scmp.lt.s32.totalorder (!%p358_p3), %s3570_s28, 1  ;;  %v3479_v9 = vld [vmem:[%s4964_s3 + $0x10] sm:$0xff] (!%p358_p3)   ;;  %s2803_s19 = sadd.s32 (!%p358_p3), 4294967295, %s2802_s14  ;;  %v825_v26 = vshrl.u32 (!%p358_p3), %v824_v21, 7 }
   0xb   : > { %v3472_v2 = vld [vmem:[%s4964_s3 + $0xc0] sm:$0xff] (!%p358_p3)   ;;  %3111 = vmatpush3.bf16.msra.mxu0 (!%p358_p3), %v3471_v1  ;;  %v3476_v6 = vld [vmem:[%s4964_s3 + $0xc8] sm:$0xff] (!%p358_p3)   ;;  %v3480_v10 = vld [vmem:[%s4964_s3 + $0xd0] sm:$0xff] (!%p358_p3)   ;;  %p450_p6 = scmp.gt.s32.totalorder (!%p358_p3), %s2803_s19, 0  ;;  %p3706_p7 = scmp.lt.s32.totalorder (!%p358_p3), %s2798_s26, 15  ;;  %vm4970_vm1 = vcmask (!%p358_p3), 1040384  }
   0xc   : > { %v3473_v3 = vld [vmem:[%s4964_s3 + $0x80] sm:$0xff] (!%p358_p3)   ;;  %3174 = vmatprep.subr.bf16.mxu1 (!%p358_p3), %v3472_v2  ;;  %3112 = vmatprep.subr.bf16.mxu0 (!%p358_p3), %v3474_v4  ;;  %v3477_v7 = vld [vmem:[%s4964_s3 + $0x88] sm:$0xff] (!%p358_p3)   ;;  %v3481_v11 = vld [vmem:[%s4964_s3 + $0x90] sm:$0xff] (!%p358_p3)   ;;  %v826_v31 = vadd.s32 (!%p358_p3), 8, %v825_v26  ;;  %p640_p9 = scmp.eq.s32.totalorder (!%p358_p3), %s3566_s27, 0  ;;  %s3797_s24 = sadd.s32 (!%p358_p3), 4, %s2802_s14 }
   0xd   : > { %3175 = vmatpush3.bf16.msra.mxu1 (!%p358_p3), %v3473_v3  ;;  %v3482_v12 = vld [vmem:[%s4964_s3 + $0x58] sm:$0xff] (!%p358_p3)   ;;  %v3486_v16 = vld [vmem:[%s4964_s3 + $0x60] sm:$0xff] (!%p358_p3)   ;;  %v3490_v20 = vld [vmem:[%s4964_s3 + $0x68] sm:$0xff] (!%p358_p3)   ;;  %v831_v35 = vand.u32 (!%p358_p3), 1, %v825_v26  ;;  %p469_p10 = scmp.lt.s32.totalorder (!%p358_p3), %s3797_s24, 7  ;;  %vm1234_vm4 = vcmask (!%p358_p3), 1047552  }
   0xe   : > { %3176 = vmatprep.subr.bf16.mxu1 (!%p358_p3), %v3476_v6  ;;  %v3483_v13 = vld [vmem:[%s4964_s3 + $0x18] sm:$0xff] (!%p358_p3)   ;;  %v3487_v17 = vld [vmem:[%s4964_s3 + $0x20] sm:$0xff] (!%p358_p3)   ;;  %v3491_v22 = vld [vmem:[%s4964_s3 + $0x28] sm:$0xff] (!%p358_p3)   ;;  %v838_v39 = vand.u32 (!%p358_p3), 1, %v826_v31  ;;  %vm1192_vm14 = vsmask.f32 (!%p358_p3), 256 }
   0xf   : > { %3113 = vmatpush3.bf16.msra.mxu0 (!%p358_p3), %v3475_v5  ;;  %v3484_v14 = vld [vmem:[%s4964_s3 + $0xd8] sm:$0xff] (!%p358_p3)   ;;  %v3488_v18 = vld [vmem:[%s4964_s3 + $0xe0] sm:$0xff] (!%p358_p3)   ;;  %v3492_v23 = vld [vmem:[%s4964_s3 + $0xe8] sm:$0xff] (!%p358_p3)   ;;  %vm3824_vm2 = vcmp.eq.s32.totalorder (!%p358_p3), %v831_v35, 0  ;;  %p647_p12 = scmp.eq.s32.totalorder (!%p358_p3), %s3566_s27, 1  ;;  %p499_p13 = scmp.lt.s32.totalorder (!%p358_p3), %s3566_s27, 1 }
  0x10   : > { %3114 = vmatprep.subr.bf16.mxu0 %v3478_v8  ;;  %s5100_s19 = smov (!%p450_p6, %s2803_s19), 0  ;;  %s5102_s28 = smov (!%p438_p5, %s3570_s28), 1  ;;  %v3485_v15 = vld [vmem:[%s4964_s3 + $0x98] sm:$0xff]   ;;  %v3489_v19 = vld [vmem:[%s4964_s3 + $0xa0] sm:$0xff]   ;;  %v3493_v24 = vld [vmem:[%s4964_s3 + $0xa8] sm:$0xff]   ;;  %vm3828_vm3 = vcmp.eq.s32.totalorder %v838_v39, 0 }
  0x11   : > { %3177 = vmatpush3.bf16.msra.mxu1 %v3477_v7  ;;  %s2804_s18 = sshll.u32 %s5100_s19, 1  ;;  %s5104_s26 = smov (!%p3706_p7, %s2798_s26), 15  ;;  %v3494_v25 = vld [vmem:[%s4964_s3 + $0x70] sm:$0xff]   ;;  %v3498_v30 = vld [vmem:[%s4964_s3 + $0x78] sm:$0xff]   ;;  %v3805_v36 = vld [vmem:[%s4966_s5] ss:$0 sm:$0xff] }
  0x12   : > { %3178 = vmatprep.subr.bf16.mxu1 %v3480_v10  ;;  %p455_p8 = scmp.lt.s32.totalorder %s2804_s18, 15  ;;  %s3744_s17 = sshll.u32 %s5102_s28, 5  ;;  %v3495_v27 = vld [vmem:[%s4964_s3 + $0x30] sm:$0xff]   ;;  %v3499_v32 = vld [vmem:[%s4964_s3 + $0x38] sm:$0xff]   ;;  %v3810_v37 = vld [vmem:[%s4967_s6] ss:$0 sm:$0xff] }
  0x13   : > { %3115 = vmatpush3.bf16.msra.mxu0 %v3479_v9  ;;  %s2799_s25 = sshll.u32 %s5104_s26, 1  ;;  %v3496_v28 = vld [vmem:[%s4964_s3 + $0xf0] sm:$0xff]   ;;  %v3500_v33 = vld [vmem:[%s4964_s3 + $0xf8] sm:$0xff]   ;;  %v3502_v49 = vld [vmem:[%s4964_s3 + $0x140] sm:$0xff]   ;;  %s5108_s24 = smov (!%p469_p10, %s3797_s24), 7 }
  0x14   : > { %3116 = vmatprep.subr.bf16.mxu0 %v3482_v12  ;;  %s5106_s18 = smov (!%p455_p8, %s2804_s18), 15  ;;  %s3763_s20 = sadd.s32 %s3744_s17, %s2799_s25  ;;  %v3497_v29 = vld [vmem:[%s4964_s3 + $0xb0] sm:$0xff]   ;;  %v3501_v34 = vld [vmem:[%s4964_s3 + $0xb8] sm:$0xff]   ;;  %v3507_v8 = vld [vmem:[%s4964_s3 + $0x1c0] sm:$0xff]  }
  0x15   : > { %3179 = vmatpush3.bf16.msra.mxu1 %v3481_v11  ;;  %s2805_s21 = sshll.u32 %s5106_s18, 1  ;;  %s2801_s13 = sshll.u32 %s3763_s20, 2 }
  0x16   : > { %3180 = vmatprep.subr.bf16.mxu1 %v3484_v14  ;;  %s459_s16 = sadd.s32 %s2805_s21, %s3744_s17  ;;  %s3793_s18 = scalar_lea.vmem %s4961_s0, %s2801_s13 }
  0x17   : > { %3117 = vmatpush3.bf16.msra.mxu0 %v3483_v13  ;;  %s2807_s21 = sshll.u32 %s459_s16, 2  ;;  %v2935_v43 = vld [vmem:[%s3793_s18] sm:$0xff]   ;;  %v3022_v44 = vld [vmem:[%s3793_s18 + $0x8] sm:$0xff]   ;;  %s2809_s26 = sshll.u32 %s5108_s24, 1 }
  0x18   : > { %3118 = vmatprep.subr.bf16.mxu0 %v3486_v16  ;;  %s461_s16 = scalar_lea.vmem %s4962_s1, %s2807_s21  ;;  %v2936_v47 = vunpack.c.l.bf16 %v2935_v43  ;;  %v2937_v48 = vunpack.c.h.bf16 %v2935_v43  ;;  %v2940_v53 = vunpack.c.l.bf16 %v3022_v44  ;;  %v2941_v58 = vunpack.c.h.bf16 %v3022_v44  ;;  %p3891_p11 = scmp.lt.s32.totalorder %s2809_s26, 15 }
  0x19   : > { %3181 = vmatpush3.bf16.msra.mxu1 %v3485_v15  ;;  %v2967_v38 = vld [vmem:[%s461_s16] sm:$0xff]   ;;  %v3029_v42 = vld [vmem:[%s461_s16 + $0x8] sm:$0xff]   ;;  %s641_s14 = scalar_select %p640_p9, 0.0, 1.0 }
  0x1a   : > { %3182 = vmatprep.subr.bf16.mxu1 %v3488_v18  ;;  %v2968_v40 = vunpack.c.l.bf16 %v2967_v38  ;;  %v2969_v41 = vunpack.c.h.bf16 %v2967_v38  ;;  %v2972_v45 = vunpack.c.l.bf16 %v3029_v42  ;;  %v2973_v46 = vunpack.c.h.bf16 %v3029_v42  ;;  %s5110_s26 = smov (!%p3891_p11, %s2809_s26), 15  ;;  %s4921_s15 = scalar_lea.vmem %s4968_s7, %s2801_s13 }
  0x1b   : > { %3119 = vmatpush3.bf16.msra.mxu0 %v3487_v17  ;;  %v642_v52 = vstv %s641_s14  ;;  %v545_v59 = vmul.f32 %v2936_v47, %v3805_v36  ;;  %v546_v62 = vmul.f32 %v2937_v48, %v3805_v36  ;;  %v547_v63 = vmul.f32 %v2940_v53, %v3805_v36  ;;  %s2810_s24 = sshll.u32 %s5110_s26, 1  ;;  %s5112_s27 = smov (!%p499_p13, %s3566_s27), 1 }
  0x1c   : > { %3120 = vmatprep.subr.bf16.mxu0 %v3490_v20  ;;  %v608_v50 = vmul.f32 %v2968_v40, %v3805_v36  ;;  %v609_v51 = vmul.f32 %v2969_v41, %v3805_v36  ;;  %v610_v54 = vmul.f32 %v2972_v45, %v3805_v36  ;;  %v611_v55 = vmul.f32 %v2973_v46, %v3805_v36  ;;  %s3946_s23 = sadd.s32 %s2810_s24, %s3744_s17  ;;  %s2817_s20 = sshll.u32 %s5102_s28, 1 }
  0x1d   : > { %3183 = vmatpush3.bf16.msra.mxu1 %v3489_v19  ;;  %v548_v2 = vmul.f32 %v2941_v58, %v3805_v36  ;;  %v568_v3 = vadd.f32 %v3810_v37, %v545_v59  ;;  %v569_v6 = vadd.f32 %v3810_v37, %v546_v62  ;;  %v570_v7 = vadd.f32 %v3810_v37, %v547_v63  ;;  %s2812_s25 = sshll.u32 %s3946_s23, 2  ;;  %s502_s13 = sadd.s32 %s2817_s20, %s5112_s27 }
  0x1e   : > { %3184 = vmatprep.subr.bf16.mxu1 %v3492_v23  ;;  %v612_v60 = vadd.f32 %v3810_v37, %v608_v50  ;;  %v613_v61 = vadd.f32 %v3810_v37, %v609_v51  ;;  %v614_v0 = vadd.f32 %v3810_v37, %v610_v54  ;;  %v615_v1 = vadd.f32 %v3810_v37, %v611_v55  ;;  %s480_s21 = scalar_lea.vmem %s4963_s2, %s2812_s25  ;;  %s2818_s16 = sshll.u32 %s502_s13, 1 }
  0x1f   : > { %3121 = vmatpush3.bf16.msra.mxu0 %v3491_v22  ;;  %v571_v11 = vadd.f32 %v3810_v37, %v548_v2  ;;  %v3847_v12 = vmax.f32 %v568_v3, 0.0  ;;  %v3854_v15 = vmax.f32 %v569_v6, 0.0  ;;  %v3856_v16 = vmax.f32 %v570_v7, 0.0  ;;  %v3023_v2 = vld [vmem:[%s3793_s18 + $0x10] sm:$0xff]   ;;  %s648_s14 = scalar_select %p647_p12, 0.0, 1.0 }
  0x20   : > { %3122 = vmatprep.subr.bf16.mxu0 %v3494_v25  ;;  %v616_v4 = vmax.f32 %v612_v60, 0.0  ;;  %v617_v5 = vmax.f32 %v613_v61, 0.0  ;;  %v618_v9 = vmax.f32 %v614_v0, 0.0  ;;  %v619_v10 = vmax.f32 %v615_v1, 0.0  ;;  %s504_s26 = scalar_lea.vmem %s4969_s8, %s2818_s16 }
  0x21   : > { %3185 = vmatpush3.bf16.msra.mxu1 %v3493_v24  ;;  %v3862_v19 = vmax.f32 %v571_v11, 0.0  ;;  %v685_v20 = vrot.slane %v3847_v12, 1  ;;  %v686_v47 = vrot.slane %v3854_v15, 1  ;;  %v688_v48 = vrot.slane %v3856_v16, 1 }
  0x22   : > { %3186 = vmatprep.subr.bf16.mxu1 %v3496_v28  ;;  %v643_v13 = vmul.f32 %v642_v52, %v616_v4  ;;  %v644_v14 = vmul.f32 %v642_v52, %v617_v5  ;;  %v3858_v17 = vmul.f32 %v642_v52, %v618_v9  ;;  %v3860_v18 = vmul.f32 %v642_v52, %v619_v10  ;;  %v3024_v9 = vld [vmem:[%s3793_s18 + $0x18] sm:$0xff]  }
  0x23   : > { %3123 = vmatpush3.bf16.msra.mxu0 %v3495_v27  ;;  %v758_v52 = vrot.slane %v3847_v12, 7  ;;  %v759_v53 = vrot.slane %v3854_v15, 7  ;;  %v687_v55 = vsel %vm4971_vm0, %v685_v20, %v686_v47  ;;  %v741_v58 = vsel %vm4971_vm0, %v686_v47, 0.0 }
  0x24   : > { %3124 = vmatprep.subr.bf16.mxu0 %v3498_v30  ;;  %v679_v21 = vrot.slane %v643_v13, 1  ;;  %v680_v22 = vrot.slane %v644_v14, 1  ;;  %v752_v23 = vrot.slane %v643_v13, 7  ;;  %v753_v24 = vrot.slane %v644_v14, 7 }
  0x25   : > { %3187 = vmatpush3.bf16.msra.mxu1 %v3497_v29  ;;  %v682_v25 = vrot.slane %v3858_v17, 1  ;;  %v683_v26 = vrot.slane %v3860_v18, 1  ;;  %v755_v27 = vrot.slane %v3858_v17, 7  ;;  %v756_v28 = vrot.slane %v3860_v18, 7 }
  0x26   : > { %3188 = vmatprep.subr.bf16.mxu1 %v3500_v33  ;;  %v681_v29 = vsel %vm4971_vm0, %v679_v21, %v680_v22  ;;  %v739_v30 = vsel %vm4971_vm0, %v680_v22, 0.0  ;;  %v754_v31 = vsel %vm4970_vm1, %v752_v23, %v753_v24  ;;  %v3039_v54 = vpack.c.bf16 %v3860_v18, %v3858_v17 }
  0x27   : > { %3125 = vmatpush3.bf16.msra.mxu0 %v3499_v32  ;;  %v812_v32 = vsel %vm4970_vm1, 0.0, %v752_v23  ;;  %v684_v33 = vsel %vm4971_vm0, %v682_v25, %v683_v26  ;;  %v757_v35 = vsel %vm4970_vm1, %v755_v27, %v756_v28  ;;  %v813_v38 = vsel %vm4970_vm1, 0.0, %v755_v27 }
  0x28   : > { %3238 = vmatprep.subr.bf16.mxu0 %v3502_v49  ;;  %v853_v39 = vsel %vm3824_vm2, %v681_v29, %v812_v32  ;;  %v854_v40 = vsel %vm3828_vm3, %v739_v30, %v754_v31  ;;  %v855_v41 = vsel %vm3824_vm2, %v684_v33, %v813_v38  ;;  %v689_v49 = vrot.slane %v3862_v19, 1 }
  0x29   : > { %3189 = vmatpush3.bf16.msra.mxu1 %v3501_v34  ;;  %v740_v34 = vsel %vm4971_vm0, %v683_v26, 0.0  ;;  %v877_v43 = vmax.f32 %v643_v13, %v853_v39  ;;  %v878_v44 = vmax.f32 %v644_v14, %v854_v40  ;;  %v879_v45 = vmax.f32 %v3858_v17, %v855_v41 }
  0x2a   : > { %3302 = vmatprep.subr.bf16.mxu1 %v3507_v8  ;;  %v856_v42 = vsel %vm3828_vm3, %v740_v34, %v757_v35  ;;  %v742_v59 = vsel %vm4971_vm0, %v689_v49, 0.0  ;;  %v690_v60 = vsel %vm4971_vm0, %v688_v48, %v689_v49  ;;  %v760_v61 = vsel %vm4970_vm1, %v758_v52, %v759_v53  ;;  %v4019_v48 = vld [vmem:[%s3793_s18 + $0x20] sm:$0xff]  }
  0x2b   : > { %v880_v46 = vmax.f32 %v3860_v18, %v856_v42  ;;  %v921_v50 = vmax.f32 %v879_v45, %v877_v43  ;;  %v761_v62 = vrot.slane %v3856_v16, 7  ;;  %v762_v63 = vrot.slane %v3862_v19, 7 }
  0x2c   : > { %v814_v0 = vsel %vm4970_vm1, 0.0, %v758_v52  ;;  %v858_v1 = vsel %vm3828_vm3, %v741_v58, %v760_v61  ;;  %v3943_v14 = vpack.c.bf16 %v3854_v15, %v3847_v12  ;;  %v2944_v20 = vunpack.c.l.bf16 %v3023_v2 }
  0x2d   : > { %v922_v51 = vmax.f32 %v880_v46, %v878_v44  ;;  %vm941_vm5 = vcmp.eq.f32.partialorder %v3858_v17, %v921_v50  ;;  %vm961_vm6 = vcmp.lt.f32.partialorder %v855_v41, %v921_v50  ;;  %vm1001_vm9 = vcmp.lt.f32.partialorder %v877_v43, %v921_v50  ;;  %v3503_v41 = vld [vmem:[%s4964_s3 + $0x100] sm:$0xff]  }
  0x2e   : > { %vm981_vm8 = vmor %vm3824_vm2, %vm961_vm6  ;;  %v815_v3 = vsel %vm4970_vm1, 0.0, %v761_v62  ;;  %v857_v4 = vsel %vm3824_vm2, %v687_v55, %v814_v0  ;;  %v3922_v5 = vmax.f32 %v3854_v15, %v858_v1  ;;  %v763_v6 = vsel %vm4970_vm1, %v761_v62, %v762_v63 }
  0x2f   : > { %vm962_vm7 = vcmp.lt.f32.partialorder %v856_v42, %v922_v51  ;;  %vm1002_vm10 = vcmp.lt.f32.partialorder %v878_v44, %v922_v51  ;;  %vm942_vm11 = vcmp.eq.f32.partialorder %v3860_v18, %v922_v51  ;;  %vm1041_vm13 = vmand %vm981_vm8, %vm1001_vm9  ;;  %v859_v7 = vsel %vm3824_vm2, %v690_v60, %v815_v3 }
  0x30   : > { %vm982_vm12 = vmor %vm3828_vm3, %vm962_vm7  ;;  %v3929_v8 = vmax.f32 %v3847_v12, %v857_v4  ;;  %vm1235_vm6 = vsmask.f32 7424  ;;  %v860_v11 = vsel %vm3828_vm3, %v742_v59, %v763_v6  ;;  %v883_v13 = vmax.f32 %v3856_v16, %v859_v7 }
  0x31   : > { %vm1042_vm15 = vmand %vm982_vm12, %vm1002_vm10  ;;  %v884_v22 = vmax.f32 %v3862_v19, %v860_v11  ;;  %v3956_v23 = vpack.c.bf16 %v3862_v19, %v3856_v16  ;;  %v2945_v24 = vunpack.c.h.bf16 %v3023_v2  ;;  %v2948_v28 = vunpack.c.l.bf16 %v3024_v9  ;;  %v3505_v2 = vld [vmem:[%s4964_s3 + $0x108] sm:$0xff]  }
  0x32   : > { %vm3934_vm7 = vmand %vm941_vm5, %vm1041_vm13  ;;  %v923_v26 = vmax.f32 %v3929_v8, %v883_v13  ;;  %v3963_v27 = vmax.f32 %v883_v13, %v3929_v8  ;;  %v4997_v30 = vmov 0  ;;  %v2949_v31 = vunpack.c.h.bf16 %v3024_v9 }
  0x33   : > { %vm1062_vm8 = vmand %vm942_vm11, %vm1042_vm15  ;;  %v1081_v21 = vsel %vm3934_vm7, %v3858_v17, 0.0  ;;  %v924_v17 = vmax.f32 %v3922_v5, %v884_v22  ;;  %v4999_v32 = vmov 0  ;;  %v549_v33 = vmul.f32 %v2944_v20, %v3805_v36 }
  0x34   : > { %v1082_v25 = vsel %vm1062_vm8, %v3860_v18, 0.0  ;;  %vm3038_vm5 = vmpackc.low %vm1062_vm8, %vm3934_vm7  ;;  %v3973_v18 = vmax.f32 %v884_v22, %v3922_v5  ;;  %vm943_vm10 = vcmp.eq.f32.partialorder %v3847_v12, %v923_v26  ;;  %vm963_vm11 = vcmp.lt.f32.partialorder %v857_v4, %v923_v26 }
  0x35   : > { %v1101_v29 = vpack.c.bf16 %v1082_v25, %v1081_v21  ;;  %3040 = vmatprep.mubr.msk.bf16.mxu0 %vm3038_vm5, %v3039_v54  ;;  %vm3968_vm9 = vmand %vm4970_vm1, %vm1192_vm14  ;;  %vm945_vm13 = vcmp.eq.f32.partialorder %v3856_v16, %v3963_v27  ;;  %vm944_vm14 = vcmp.eq.f32.partialorder %v3854_v15, %v924_v17  ;;  %vm964_vm15 = vcmp.lt.f32.partialorder %v858_v1, %v924_v17  ;;  %v3508_v17 = vld [vmem:[%s4964_s3 + $0x110] sm:$0xff]  }
  0x36   : > { %v4998_v30 = vsel %vm3968_vm9, 4294967295, %v4997_v30  ;;  %vm3978_vm12 = vmand %vm1234_vm4, %vm1235_vm6  ;;  %vm946_vm4 = vcmp.eq.f32.partialorder %v3862_v19, %v3973_v18  ;;  %vm965_vm6 = vcmp.lt.f32.partialorder %v859_v7, %v3963_v27  ;;  %vm966_vm5 = vcmp.lt.f32.partialorder %v860_v11, %v3973_v18 }
  0x37   : > { %v5000_v32 = vsel %vm3978_vm12, 4294967295, %v4999_v32  ;;  %v1112_v34 = vshrl.u32 %v1101_v29, 16  ;;  %v1115_v35 = vshll.u32 %v1101_v29, 16  ;;  %vm983_vm7 = vmor %vm3824_vm2, %vm963_vm11  ;;  %vm1005_vm1 = vcmp.lt.f32.partialorder %v3929_v8, %v3963_v27  ;;  %v3506_v8 = vld [vmem:[%s4964_s3 + $0x150] sm:$0xff]  }
  0x38   : > { %vm984_vm8 = vmor %vm3828_vm3, %vm964_vm15  ;;  %v5001_v38 = vmov 0  ;;  %v550_v42 = vmul.f32 %v2945_v24, %v3805_v36  ;;  %v551_v43 = vmul.f32 %v2948_v28, %v3805_v36  ;;  %v5003_v44 = vmov 0 }
  0x39   : > { %vm3998_vm0 = vmand %vm943_vm10, %vm983_vm7  ;;  %v1114_v39 = vrot.slane %v1112_v34, 7  ;;  %v1204_v40 = vrot.slane %v1115_v35, 1  ;;  %vm1006_vm10 = vcmp.lt.f32.partialorder %v3922_v5, %v3973_v18  ;;  %v552_v46 = vmul.f32 %v2949_v31, %v3805_v36 }
  0x3a   : > { %v5002_v38 = vsel %vm3998_vm0, 4294967295, %v5001_v38  ;;  %vm4007_vm11 = vmand %vm944_vm14, %vm984_vm8  ;;  %v1083_v45 = vsel %vm3998_vm0, %v3847_v12, 0.0  ;;  %v572_v47 = vadd.f32 %v3810_v37, %v549_v33  ;;  %v3504_v12 = vld [vmem:[%s4964_s3 + $0x148] sm:$0xff]   ;;  %v573_v52 = vadd.f32 %v3810_v37, %v550_v42 }
  0x3b   : > { %v5004_v44 = vsel %vm4007_vm11, 4294967295, %v5003_v44  ;;  %v1084_v49 = vsel %vm4007_vm11, %v3854_v15, 0.0  ;;  %v1117_v50 = vor.u32 %v1115_v35, %v1114_v39  ;;  %v4024_v51 = vor.u32 %v1204_v40, %v1112_v34  ;;  %vm4972_vm14 = vmpackc.low %vm4007_vm11, %vm3998_vm0  ;;  %v3510_v34 = vld [vmem:[%s4964_s3 + $0x158] sm:$0xff]  }
  0x3c   : > { %v1102_v53 = vpack.c.bf16 %v1084_v49, %v1083_v45  ;;  %vm985_vm15 = vmor %vm3824_vm2, %vm965_vm6  ;;  %v574_v15 = vadd.f32 %v3810_v37, %v551_v43  ;;  %v575_v54 = vadd.f32 %v3810_v37, %v552_v46  ;;  %v4040_v55 = vmax.f32 %v572_v47, 0.0  ;;  %v3511_v43 = vld [vmem:[%s4964_s3 + $0x1c8] sm:$0xff]  }
  0x3d   : > { %v1194_v58 = vsel %vm3968_vm9, 0, %v1117_v50  ;;  %v1237_v59 = vsel %vm3978_vm12, %v4024_v51, 0  ;;  %vm986_vm7 = vmor %vm3828_vm3, %vm966_vm5  ;;  %v4051_v60 = vmax.f32 %v573_v52, 0.0  ;;  %v2952_v61 = vunpack.c.l.bf16 %v4019_v48  ;;  %v3512_v50 = vld [vmem:[%s4964_s3 + $0x118] sm:$0xff]   ;;  %v3026_v51 = vld [vmem:[%s3793_s18 + $0x28] sm:$0xff]  }
  0x3e   : > { %v1119_v62 = vshrl.u32 %v1102_v53, 16  ;;  %v1122_v63 = vshll.u32 %v1102_v53, 16  ;;  %2007 = vmatmul.mubr.bf16.vlgmr.msra.gmra.mrb[0].mxu0 %v1194_v58  ;;  %vm1045_vm8 = vmand %vm985_vm15, %vm1005_vm1  ;;  %v4057_v0 = vmax.f32 %v574_v15, 0.0  ;;  %v4059_v1 = vmax.f32 %v575_v54, 0.0 }
  0x3f   : > { %3239 = vmatpush3.bf16.msra.mxu0 %v3503_v41  ;;  %3043 = vmatprep.mubr.msk.bf16.mxu0 %vm4972_vm14, %v3943_v14  ;;  %vm1046_vm6 = vmand %vm986_vm7, %vm1006_vm10  ;;  %v691_v3 = vrot.slane %v4040_v55, 1  ;;  %v692_v4 = vrot.slane %v4051_v60, 1  ;;  %v764_v6 = vrot.slane %v4040_v55, 7  ;;  %v765_v7 = vrot.slane %v4051_v60, 7 }
  0x40   : > { %v1121_v9 = vrot.slane %v1119_v62, 7  ;;  %vm4083_vm1 = vmand %vm945_vm13, %vm1045_vm8  ;;  %3240 = vmatprep.subr.bf16.mxu0 %v3504_v12  ;;  %v1206_v10 = vrot.slane %v1122_v63, 1  ;;  %v694_v11 = vrot.slane %v4057_v0, 1  ;;  %v695_v13 = vrot.slane %v4059_v1, 1 }
  0x41   : > { %vm4092_vm5 = vmand %vm946_vm4, %vm1046_vm6  ;;  %v1085_v21 = vsel %vm4083_vm1, %v3856_v16, 0.0  ;;  %vm5009_vm13 = vcmask 1046528   ;;  %vm5011_vm15 = vcmask 1040384   ;;  %v3509_v16 = vld [vmem:[%s4964_s3 + $0x180] sm:$0xff]   ;;  %v767_v33 = vrot.slane %v4057_v0, 7 }
  0x42   : > { %v693_v22 = vsel %vm5009_vm13, %v691_v3, %v692_v4  ;;  %vm5010_vm10 = vmmov %vm5009_vm13  ;;  %v766_v25 = vsel %vm5011_vm15, %v764_v6, %v765_v7  ;;  %v1124_v26 = vor.u32 %v1122_v63, %v1121_v9  ;;  %v1086_v27 = vsel %vm4092_vm5, %v3862_v19, 0.0  ;;  %v3513_v63 = vld [vmem:[%s4964_s3 + $0x188] sm:$0xff]   ;;  %v3514_v7 = vld [vmem:[%s4964_s3 + $0x160] sm:$0xff]  }
  0x43   : > { %v743_v24 = vsel %vm5010_vm10, %v692_v4, 0.0  ;;  %v1207_v28 = vor.u32 %v1206_v10, %v1119_v62  ;;  %vm5012_vm4 = vmmov %vm5010_vm10  ;;  %v1103_v18 = vpack.c.bf16 %v1086_v27, %v1085_v21  ;;  %3241 = vmatpush3.bf16.msra.mxu0 %v3505_v2  ;;  %v768_v19 = vrot.slane %v4059_v1, 7 }
  0x44   : > { %v696_v29 = vsel %vm5012_vm4, %v694_v11, %v695_v13  ;;  %vm5013_vm7 = vmmov %vm5012_vm4  ;;  %v1195_v35 = vsel %vm3968_vm9, 0, %v1124_v26  ;;  %v5014_v40 = vmov 0  ;;  %v862_v42 = vsel %vm3828_vm3, %v743_v24, %v766_v25  ;;  %3242 = vmatprep.subr.bf16.mxu0 %v3506_v8  ;;  %v3515_v11 = vld [vmem:[%s4964_s3 + $0x1d0] sm:$0xff]   ;;  %v3518_v26 = vld [vmem:[%s4964_s3 + $0x168] sm:$0xff]  }
  0x45   : > { %v744_v31 = vsel %vm5013_vm7, %v695_v13, 0.0  ;;  %v4122_v39 = vsel %vm3978_vm12, %v1207_v28, 0  ;;  %vm4128_vm8 = vmpackc.low %vm4092_vm5, %vm4083_vm1  ;;  %2103 = vmatprep.mubr.bf16.mxu1 %v1195_v35  ;;  %v1126_v45 = vshrl.u32 %v1103_v18, 16  ;;  %v1129_v46 = vshll.u32 %v1103_v18, 16  ;;  %v3516_v13 = vld [vmem:[%s4964_s3 + $0x120] sm:$0xff]   ;;  %v3517_v25 = vld [vmem:[%s4964_s3 + $0x190] sm:$0xff]  }
  0x46   : > { %v5015_v40 = vsel %vm4128_vm8, 4294967295, %v5014_v40  ;;  %vm5016_vm6 = vmmov %vm5011_vm15  ;;  %2104 = vmatmul.mubr.bf16.vlgmr.msra.gmra.mrb[0].mxu1 %v1237_v59  ;;  %2015 = vmatmul.mubr.bf16.gmra.mrb[4].mxu0 %v1195_v35  ;;  %v2953_v15 = vunpack.c.h.bf16 %v4019_v48  ;;  %v4162_v59 = vmax.f32 %v4051_v60, %v862_v42  ;;  %v4173_v4 = vpack.c.bf16 %v4051_v60, %v4040_v55  ;;  %v4242_v18 = vld [vmem:[%s3793_s18 + $0x38] sm:$0xff]  }
  0x47   : > { %v816_v41 = vsel %vm5016_vm6, 0.0, %v764_v6  ;;  %vm5017_vm13 = vmmov %vm5016_vm6  ;;  %v1128_v54 = vrot.slane %v1126_v45, 7  ;;  %3046 = vmatprep.mubr.msk.bf16.mxu0 %vm4128_vm8, %v3956_v23  ;;  %3243 = vmatpush3.bf16.msra.mxu0 %v3508_v17  ;;  %v1208_v3 = vrot.slane %v1129_v46, 1  ;;  %v2956_v6 = vunpack.c.l.bf16 %v3026_v51  ;;  %v4214_v17 = vld [vmem:[%s3793_s18 + $0x30] sm:$0xff]   ;;  %v3521_v35 = vld [vmem:[%s4964_s3 + $0x198] sm:$0xff]  }
  0x48   : > { %v769_v47 = vsel %vm5017_vm13, %v767_v33, %v768_v19  ;;  %vm5018_vm10 = vmmov %vm5016_vm6  ;;  %v861_v12 = vsel %vm3824_vm2, %v693_v22, %v816_v41  ;;  %3303 = vmatpush3.bf16.msra.mxu1 %v3509_v16  ;;  %3244 = vmatprep.subr.bf16.mxu0 %v3510_v34  ;;  %v4184_v10 = vpack.c.bf16 %v4059_v1, %v4057_v0  ;;  %v2957_v24 = vunpack.c.h.bf16 %v3026_v51  ;;  %v3520_v16 = vld [vmem:[%s4964_s3 + $0x128] sm:$0xff]   ;;  %v3523_v51 = vld [vmem:[%s4964_s3 + $0x1e0] sm:$0xff]  }
  0x49   : > { %v817_v49 = vsel %vm5018_vm10, 0.0, %v767_v33  ;;  %v4152_v53 = vsel %vm3828_vm3, %v744_v31, %v769_v47  ;;  %v4159_v58 = vmax.f32 %v4040_v55, %v861_v12  ;;  %v1131_v8 = vor.u32 %v1129_v46, %v1128_v54  ;;  %3304 = vmatprep.subr.bf16.mxu1 %v3511_v43 }
  0x4a   : > { %v4148_v52 = vsel %vm3824_vm2, %v696_v29, %v817_v49  ;;  %v888_v2 = vmax.f32 %v4059_v1, %v4152_v53  ;;  %v1209_v21 = vor.u32 %v1208_v3, %v1126_v45  ;;  %v553_v28 = vmul.f32 %v2952_v61, %v3805_v36  ;;  %v3519_v29 = vld [vmem:[%s4964_s3 + $0x1d8] sm:$0xff]  }
  0x4b   : > { %v887_v62 = vmax.f32 %v4057_v0, %v4148_v52  ;;  %v4204_v27 = vsel %vm3968_vm9, 0, %v1131_v8  ;;  %3245 = vmatpush3.bf16.msra.mxu0 %v3512_v50  ;;  %v554_v33 = vmul.f32 %v2953_v15, %v3805_v36  ;;  %v555_v19 = vmul.f32 %v2956_v6, %v3805_v36 }
  0x4c   : > { %v928_v20 = vmax.f32 %v4162_v59, %v888_v2  ;;  %v4194_v22 = vmax.f32 %v888_v2, %v4162_v59  ;;  %2111 = vmatprep.mubr.bf16.mxu1 %v4204_v27  ;;  %3305 = vmatpush3.bf16.msra.mxu1 %v3513_v63  ;;  %v4230_v61 = vsel %vm3978_vm12, %v1209_v21, 0  ;;  %v556_v34 = vmul.f32 %v2957_v24, %v3805_v36  ;;  %v3524_v63 = vld [vmem:[%s4964_s3 + $0x130] sm:$0xff]  }
  0x4d   : > { %v927_v9 = vmax.f32 %v4159_v58, %v887_v62  ;;  %v4180_v5 = vmax.f32 %v887_v62, %v4159_v58  ;;  %3246 = vmatprep.subr.bf16.mxu0 %v3514_v7  ;;  %v2960_v41 = vunpack.c.l.bf16 %v4214_v17  ;;  %v576_v45 = vadd.f32 %v3810_v37, %v553_v28  ;;  %3306 = vmatprep.subr.bf16.mxu1 %v3515_v11  ;;  %v3525_v7 = vld [vmem:[%s4964_s3 + $0x1a0] sm:$0xff]  }
  0x4e   : > { %vm948_vm15 = vcmp.eq.f32.partialorder %v4051_v60, %v928_v20  ;;  %vm968_vm4 = vcmp.lt.f32.partialorder %v862_v42, %v928_v20  ;;  %vm970_vm14 = vcmp.lt.f32.partialorder %v4152_v53, %v4194_v22  ;;  %2112 = vmatmul.mubr.bf16.gmra.mrb[4].mxu1 %v4122_v39  ;;  %2023 = vmatmul.mubr.bf16.gmra.mrb[8].mxu0 %v4204_v27  ;;  %v3522_v42 = vld [vmem:[%s4964_s3 + $0x170] sm:$0xff]   ;;  %v5023_v47 = vmov 0  ;;  %v3528_v53 = vld [vmem:[%s4964_s3 + $0x178] sm:$0xff]  }
  0x4f   : > { %vm947_vm1 = vcmp.eq.f32.partialorder %v4040_v55, %v927_v9  ;;  %vm967_vm5 = vcmp.lt.f32.partialorder %v861_v12, %v927_v9  ;;  %vm4224_vm13 = vmor %vm3828_vm3, %vm968_vm4  ;;  %vm1010_vm10 = vcmp.lt.f32.partialorder %v4162_v59, %v4194_v22  ;;  %3247 = vmatpush3.bf16.msra.mxu0 %v3516_v13  ;;  %v578_v49 = vadd.f32 %v3810_v37, %v555_v19 }
  0x50   : > { %vm987_vm7 = vmor %vm3824_vm2, %vm967_vm5  ;;  %vm969_vm5 = vcmp.lt.f32.partialorder %v4148_v52, %v4180_v5  ;;  %v579_v50 = vadd.f32 %v3810_v37, %v556_v34  ;;  %3307 = vmatpush3.bf16.msra.mxu1 %v3517_v25  ;;  %3248 = vmatprep.subr.bf16.mxu0 %v3518_v26  ;;  %v4299_v15 = vmax.f32 %v576_v45, 0.0  ;;  %v2961_v54 = vunpack.c.h.bf16 %v4214_v17  ;;  %v3526_v17 = vld [vmem:[%s4964_s3 + $0x1e8] sm:$0xff]   ;;  %v3529_v45 = vld [vmem:[%s4964_s3 + $0x138] sm:$0xff]  }
  0x51   : > { %vm4247_vm4 = vmand %vm947_vm1, %vm987_vm7  ;;  %vm1009_vm7 = vcmp.lt.f32.partialorder %v4159_v58, %v4180_v5  ;;  %3308 = vmatprep.subr.bf16.mxu1 %v3519_v29  ;;  %v2964_v62 = vunpack.c.l.bf16 %v4242_v18  ;;  %v4313_v2 = vmax.f32 %v578_v49, 0.0  ;;  %v4318_v6 = vmul.f32 %v2960_v41, %v3805_v36 }
  0x52   : > { %vm1068_vm1 = vmand %vm948_vm15, %vm4224_vm13  ;;  %v1087_v43 = vsel %vm4247_vm4, %v4040_v55, 0.0  ;;  %v577_v55 = vadd.f32 %v3810_v37, %v554_v33  ;;  %v4315_v3 = vmax.f32 %v579_v50, 0.0  ;;  %v697_v11 = vrot.slane %v4299_v15, 1 }
  0x53   : > { %v1088_v46 = vsel %vm1068_vm1, %v4051_v60, 0.0  ;;  %vm4277_vm6 = vmpackc.low %vm1068_vm1, %vm4247_vm4  ;;  %v770_v13 = vrot.slane %v4299_v15, 7  ;;  %3249 = vmatpush3.bf16.msra.mxu0 %v3520_v16  ;;  %v700_v21 = vrot.slane %v4313_v2, 1  ;;  %vm5027_vm4 = vcmp.eq.f32.partialorder %v4057_v0, %v4180_v5 }
  0x54   : > { %v5024_v47 = vsel %vm4277_vm6, 4294967295, %v5023_v47  ;;  %v1104_v12 = vpack.c.bf16 %v1088_v46, %v1087_v43  ;;  %3049 = vmatprep.mubr.msk.bf16.mxu0 %vm4277_vm6, %v4173_v4  ;;  %vm4295_vm15 = vmor %vm3824_vm2, %vm969_vm5  ;;  %v4311_v52 = vmax.f32 %v577_v55, 0.0  ;;  %v701_v24 = vrot.slane %v4315_v3, 1  ;;  %3309 = vmatpush3.bf16.msra.mxu1 %v3521_v35 }
  0x55   : > { %vm990_vm13 = vmor %vm3828_vm3, %vm970_vm14  ;;  %3250 = vmatprep.subr.bf16.mxu0 %v3522_v42  ;;  %v773_v28 = vrot.slane %v4313_v2, 7  ;;  %v774_v29 = vrot.slane %v4315_v3, 7  ;;  %3310 = vmatprep.subr.bf16.mxu1 %v3523_v51  ;;  %v558_v31 = vmul.f32 %v2961_v54, %v3805_v36  ;;  %v3530_v51 = vld [vmem:[%s4964_s3 + $0x1f0] sm:$0xff]   ;;  %vm5053_vm0 = vcmask 1040384  }
  0x56   : > { %v1133_v8 = vshrl.u32 %v1104_v12, 16  ;;  %v1136_v9 = vshll.u32 %v1104_v12, 16  ;;  %vm1049_vm14 = vmand %vm4295_vm15, %vm1009_vm7  ;;  %v698_v20 = vrot.slane %v4311_v52, 1  ;;  %v771_v58 = vrot.slane %v4311_v52, 7 }
  0x57   : > { %vm1050_vm5 = vmand %vm990_vm13, %vm1010_vm10  ;;  %vm5030_vm10 = vcmp.eq.f32.partialorder %v4059_v1, %v4194_v22  ;;  %vm5031_vm15 = vcmask 1046528   ;;  %3251 = vmatpush3.bf16.msra.mxu0 %v3524_v63  ;;  %v4434_v26 = vpack.c.bf16 %v4311_v52, %v4299_v15 }
  0x58   : > { %v1135_v25 = vrot.slane %v1133_v8, 7  ;;  %vm4343_vm1 = vmand %vm5027_vm4, %vm1049_vm14  ;;  %v1210_v59 = vrot.slane %v1136_v9, 1  ;;  %v699_v48 = vsel %vm5031_vm15, %v697_v11, %v698_v20  ;;  %3311 = vmatpush3.bf16.msra.mxu1 %v3525_v7  ;;  %3252 = vmatprep.subr.bf16.mxu0 %v3528_v53  ;;  %v4404_v7 = vld [vmem:[%s4964_s3 + $0x200] sm:$0xff]   ;;  %v2965_v11 = vunpack.c.h.bf16 %v4242_v18 }
  0x59   : > { %vm1070_vm7 = vmand %vm5030_vm10, %vm1050_vm5  ;;  %v1089_v5 = vsel %vm4343_vm1, %v4057_v0, 0.0  ;;  %v5035_v0 = vmov 0  ;;  %vm5037_vm10 = vcmask 1040384   ;;  %3312 = vmatprep.subr.bf16.mxu1 %v3526_v17 }
  0x5a   : > { %vm5032_vm13 = vmmov %vm5031_vm15  ;;  %v1138_v33 = vor.u32 %v1136_v9, %v1135_v25  ;;  %v1090_v19 = vsel %vm1070_vm7, %v4059_v1, 0.0  ;;  %v772_v41 = vsel %vm5037_vm10, %v770_v13, %v771_v58  ;;  %v3527_v1 = vld [vmem:[%s4964_s3 + $0x1a8] sm:$0xff]   ;;  %v1211_v55 = vor.u32 %v1210_v59, %v1133_v8  ;;  %v3532_v59 = vld [vmem:[%s4964_s3 + $0x1f8] sm:$0xff]  }
  0x5b   : > { %v702_v16 = vsel %vm5032_vm13, %v700_v21, %v701_v24  ;;  %vm5033_vm14 = vmmov %vm5032_vm13  ;;  %v4364_v22 = vpack.c.bf16 %v1090_v19, %v1089_v5  ;;  %3253 = vmatpush3.bf16.msra.mxu0 %v3529_v45  ;;  %v559_v5 = vmul.f32 %v2964_v62, %v3805_v36  ;;  %v581_v19 = vadd.f32 %v3810_v37, %v558_v31  ;;  %v3533_v62 = vld [vmem:[%s4964_s3 + $0x1b8] sm:$0xff]  }
  0x5c   : > { %v745_v34 = vsel %vm5033_vm14, %v698_v20, 0.0  ;;  %vm5034_vm4 = vmmov %vm5032_vm13  ;;  %v4383_v46 = vsel %vm3968_vm9, 0, %v1138_v33  ;;  %3313 = vmatpush3.bf16.msra.mxu1 %v3527_v1  ;;  %v4430_v58 = vsel %vm3978_vm12, %v1211_v55, 0  ;;  %3382 = vmatprep.subr.bf16.mxu0 %v4404_v7  ;;  %v580_v33 = vadd.f32 %v3810_v37, %v4318_v6 }
  0x5d   : > { %v746_v35 = vsel %vm5034_vm4, %v701_v24, 0.0  ;;  %vm4368_vm5 = vmpackc.low %vm1070_vm7, %vm4343_vm1  ;;  %2119 = vmatprep.mubr.bf16.mxu1 %v4383_v46  ;;  %v1140_v12 = vshrl.u32 %v4364_v22, 16  ;;  %v1143_v60 = vshll.u32 %v4364_v22, 16  ;;  %2031 = vmatmul.mubr.bf16.gmra.mrb[12].mxu0 %v4383_v46  ;;  %v866_v54 = vsel %vm3828_vm3, %v745_v34, %v772_v41  ;;  %v3531_v24 = vld [vmem:[%s4964_s3 + $0x1b0] sm:$0xff]  }
  0x5e   : > { %v5036_v0 = vsel %vm4368_vm5, 4294967295, %v5035_v0  ;;  %vm5038_vm15 = vmmov %vm5037_vm10  ;;  %2120 = vmatmul.mubr.bf16.gmra.mrb[8].mxu1 %v4230_v61  ;;  %3052 = vmatprep.mubr.msk.bf16.mxu0 %vm4368_vm5, %v4184_v10  ;;  %v4418_v9 = vmax.f32 %v4311_v52, %v866_v54  ;;  %v4482_v41 = vmax.f32 %v580_v33, 0.0  ;;  %v5045_v1 = vmov 0 }
  0x5f   : > { %v775_v42 = vsel %vm5038_vm15, %v773_v28, %v774_v29  ;;  %vm5039_vm13 = vmmov %vm5037_vm10  ;;  %v1212_v25 = vrot.slane %v1143_v60, 1  ;;  %3314 = vmatprep.subr.bf16.mxu1 %v3530_v51  ;;  %v5060_v31 = vmov 0 }
  0x60   : > { %v818_v43 = vsel %vm5039_vm13, 0.0, %v770_v13  ;;  %vm5040_vm1 = vmmov %vm5037_vm10  ;;  %v4412_v53 = vsel %vm3828_vm3, %v746_v35, %v775_v42  ;;  %v1142_v13 = vrot.slane %v1140_v12, 7  ;;  %3315 = vmatpush3.bf16.msra.mxu1 %v3531_v24  ;;  %v582_v35 = vadd.f32 %v3810_v37, %v559_v5 }
  0x61   : > { %v819_v49 = vsel %vm5040_vm1, 0.0, %v773_v28  ;;  %v865_v50 = vsel %vm3824_vm2, %v699_v48, %v818_v43  ;;  %v892_v21 = vmax.f32 %v4315_v3, %v4412_v53  ;;  %3316 = vmatprep.subr.bf16.mxu1 %v3532_v59  ;;  %v1213_v6 = vor.u32 %v1212_v25, %v1140_v12  ;;  %vm5054_vm11 = vmmov %vm5053_vm0 }
  0x62   : > { %v4399_v63 = vsel %vm3824_vm2, %v702_v16, %v819_v49  ;;  %v4415_v8 = vmax.f32 %v4299_v15, %v865_v50  ;;  %v1145_v28 = vor.u32 %v1143_v60, %v1142_v13  ;;  %v560_v16 = vmul.f32 %v2965_v11, %v3805_v36 }
  0x63   : > { %v891_v20 = vmax.f32 %v4313_v2, %v4399_v63  ;;  %v932_v17 = vmax.f32 %v4418_v9, %v892_v21  ;;  %v934_v18 = vmax.f32 %v892_v21, %v4418_v9  ;;  %v4465_v36 = vpack.c.bf16 %v4315_v3, %v4313_v2 }
  0x64   : > { %v4452_v34 = vsel %vm3968_vm9, 0, %v1145_v28  ;;  %v583_v22 = vadd.f32 %v3810_v37, %v560_v16  ;;  %v4484_v42 = vmax.f32 %v581_v19, 0.0  ;;  %3317 = vmatpush3.bf16.msra.mxu1 %v3533_v62  ;;  %v4501_v45 = vmax.f32 %v582_v35, 0.0 }
  0x65   : > { %v931_v29 = vmax.f32 %v4415_v8, %v891_v20  ;;  %v933_v48 = vmax.f32 %v891_v20, %v4415_v8  ;;  %2127 = vmatprep.mubr.bf16.mxu1 %v4452_v34  ;;  %vm972_vm10 = vcmp.lt.f32.partialorder %v866_v54, %v932_v17  ;;  %2039 = vmatmul.mubr.bf16.gmra.mrb[16].mxu0 %v4452_v34 }
  0x66   : > { %vm992_vm13 = vmor %vm3828_vm3, %vm972_vm10  ;;  %2128 = vmatmul.mubr.bf16.gmra.mrb[12].mxu1 %v4430_v58  ;;  %vm5044_vm10 = vcmp.eq.f32.partialorder %v4311_v52, %v932_v17  ;;  %v4503_v55 = vmax.f32 %v583_v22, 0.0  ;;  %3414 = vmatprep.subr.bf16.mxu1 %v4404_v7  ;;  %v777_v51 = vrot.slane %v4484_v42, 7  ;;  %v706_v12 = vrot.slane %v4501_v45, 1 }
  0x67   : > { %vm971_vm14 = vcmp.lt.f32.partialorder %v865_v50, %v931_v29  ;;  %vm1072_vm7 = vmand %vm5044_vm10, %vm992_vm13  ;;  %vm5047_vm13 = vcmp.lt.f32.partialorder %v4399_v63, %v933_v48  ;;  %v776_v50 = vrot.slane %v4482_v41, 7  ;;  %v779_v54 = vrot.slane %v4501_v45, 7 }
  0x68   : > { %vm991_vm15 = vmor %vm3824_vm2, %vm971_vm14  ;;  %vm5041_vm14 = vcmp.eq.f32.partialorder %v4299_v15, %v931_v29  ;;  %v1092_v37 = vsel %vm1072_vm7, %v4311_v52, 0.0  ;;  %v704_v52 = vrot.slane %v4484_v42, 1  ;;  %v707_v60 = vrot.slane %v4503_v55, 1 }
  0x69   : > { %vm4476_vm5 = vmand %vm5041_vm14, %vm991_vm15  ;;  %vm974_vm15 = vcmp.lt.f32.partialorder %v4412_v53, %v934_v18  ;;  %vm1013_vm14 = vcmp.lt.f32.partialorder %v4415_v8, %v933_v48  ;;  %v780_v63 = vrot.slane %v4503_v55, 7  ;;  %v778_v25 = vsel %vm5053_vm0, %v776_v50, %v777_v51 }
  0x6a   : > { %v1091_v43 = vsel %vm4476_vm5, %v4299_v15, 0.0  ;;  %vm4497_vm4 = vmpackc.low %vm1072_vm7, %vm4476_vm5  ;;  %v703_v15 = vrot.slane %v4482_v41, 1  ;;  %vm5055_vm9 = vcmp.eq.f32.partialorder %v4313_v2, %v933_v48 }
  0x6b   : > { %v5046_v1 = vsel %vm4497_vm4, 4294967295, %v5045_v1  ;;  %v1106_v49 = vpack.c.bf16 %v1092_v37, %v1091_v43  ;;  %3055 = vmatprep.mubr.msk.bf16.mxu0 %vm4497_vm4, %v4434_v26  ;;  %vm993_vm5 = vmor %vm3824_vm2, %vm5047_vm13  ;;  %vm5048_vm13 = vcmask 1046528   ;;  %vm5050_vm4 = vcmp.lt.f32.partialorder %v4418_v9, %v934_v18 }
  0x6c   : > { %vm994_vm7 = vmor %vm3828_vm3, %vm974_vm15  ;;  %v705_v20 = vsel %vm5048_vm13, %v703_v15, %v704_v52  ;;  %v781_v59 = vsel %vm5054_vm11, %v779_v54, %v780_v63  ;;  %vm5062_vm11 = vnez %v4998_v30 }
  0x6d   : > { %v1147_v11 = vshrl.u32 %v1106_v49, 16  ;;  %v1150_v13 = vshll.u32 %v1106_v49, 16  ;;  %vm1053_vm10 = vmand %vm993_vm5, %vm1013_vm14 }
  0x6e   : > { %vm5049_vm1 = vmmov %vm5048_vm13 }
  0x6f   : > { %v747_v53 = vsel %vm5049_vm1, %v704_v52, 0.0  ;;  %vm1054_vm15 = vmand %vm994_vm7, %vm5050_vm4  ;;  %v1149_v28 = vrot.slane %v1147_v11, 7  ;;  %v1214_v8 = vrot.slane %v1150_v13, 1 }
  0x70   : > { %vm5051_vm6 = vmmov %vm5049_vm1  ;;  %v870_v16 = vsel %vm3828_vm3, %v747_v53, %v778_v25 }
  0x71   : > { %v708_v21 = vsel %vm5051_vm6, %v706_v12, %v707_v60  ;;  %vm5052_vm8 = vmmov %vm5049_vm1  ;;  %vm5058_vm1 = vcmp.eq.f32.partialorder %v4315_v3, %v934_v18  ;;  %v1152_v33 = vor.u32 %v1150_v13, %v1149_v28  ;;  %v894_v22 = vmax.f32 %v4484_v42, %v870_v16 }
  0x72   : > { %v748_v24 = vsel %vm5052_vm8, %v707_v60, 0.0  ;;  %vm1073_vm12 = vmand %vm5055_vm9, %vm1053_vm10  ;;  %v1215_v49 = vor.u32 %v1214_v8, %v1147_v11  ;;  %v4575_v12 = vpack.c.bf16 %v4503_v55, %v4501_v45  ;;  %v4585_v11 = vpack.c.bf16 %v4484_v42, %v4482_v41 }
  0x73   : > { %vm5056_vm14 = vmmov %vm5053_vm0  ;;  %v1093_v9 = vsel %vm1073_vm12, %v4313_v2, 0.0  ;;  %v872_v18 = vsel %vm3828_vm3, %v748_v24, %v781_v59 }
  0x74   : > { %v820_v29 = vsel %vm5056_vm14, 0.0, %v776_v50  ;;  %vm5057_vm5 = vmmov %vm5053_vm0  ;;  %vm5059_vm0 = vnez %v5000_v32 }
  0x75   : > { %v821_v17 = vsel %vm5057_vm5, 0.0, %v779_v54  ;;  %vm1074_vm4 = vmand %vm5058_vm1, %vm1054_vm15  ;;  %v869_v5 = vsel %vm3824_vm2, %v705_v20, %v820_v29  ;;  %v4550_v19 = vsel %vm5059_vm0, %v1213_v6, 0  ;;  %v4564_v6 = vsel %vm5062_vm11, 0, %v1152_v33 }
  0x76   : > { %v871_v48 = vsel %vm3824_vm2, %v708_v21, %v821_v17  ;;  %v1094_v62 = vsel %vm1074_vm4, %v4315_v3, 0.0  ;;  %vm4555_vm9 = vmpackc.low %vm1074_vm4, %vm1073_vm12  ;;  %v893_v35 = vmax.f32 %v4482_v41, %v869_v5  ;;  %v896_v3 = vmax.f32 %v4503_v55, %v872_v18  ;;  %2135 = vmatprep.mubr.bf16.mxu1 %v4564_v6  ;;  %2047 = vmatmul.mubr.bf16.gmra.mrb[20].mxu0 %v4564_v6 }
  0x77   : > { %v1107_v2 = vpack.c.bf16 %v1094_v62, %v1093_v9  ;;  %v5061_v31 = vsel %vm4555_vm9, 4294967295, %v5060_v31  ;;  %v895_v43 = vmax.f32 %v4501_v45, %v871_v48  ;;  %2136 = vmatmul.mubr.bf16.gmra.mrb[16].mxu1 %v4550_v19  ;;  %3058 = vmatprep.mubr.msk.bf16.mxu0 %vm4555_vm9, %v4465_v36  ;;  %v4593_v20 = vsel %vm5059_vm0, %v1215_v49, 0 }
  0x78   : > { %v936_v50 = vmax.f32 %v894_v22, %v896_v3  ;;  %v938_v54 = vmax.f32 %v896_v3, %v894_v22 }
  0x79   : > { %v1154_v37 = vshrl.u32 %v1107_v2, 16  ;;  %v1157_v15 = vshll.u32 %v1107_v2, 16  ;;  %v935_v52 = vmax.f32 %v893_v35, %v895_v43  ;;  %v937_v51 = vmax.f32 %v895_v43, %v893_v35 }
  0x7a   : > { %vm956_vm6 = vcmp.eq.f32.partialorder %v4484_v42, %v936_v50  ;;  %vm976_vm7 = vcmp.lt.f32.partialorder %v870_v16, %v936_v50  ;;  %vm978_vm1 = vcmp.lt.f32.partialorder %v872_v18, %v938_v54 }
  0x7b   : > { %v1156_v60 = vrot.slane %v1154_v37, 7  ;;  %vm955_vm12 = vcmp.eq.f32.partialorder %v4482_v41, %v935_v52  ;;  %vm975_vm8 = vcmp.lt.f32.partialorder %v869_v5, %v935_v52  ;;  %vm996_vm13 = vmor %vm3828_vm3, %vm976_vm7  ;;  %vm977_vm14 = vcmp.lt.f32.partialorder %v871_v48, %v937_v51 }
  0x7c   : > { %vm995_vm10 = vmor %vm3824_vm2, %vm975_vm8  ;;  %v1216_v24 = vrot.slane %v1157_v15, 1  ;;  %vm957_vm7 = vcmp.eq.f32.partialorder %v4501_v45, %v937_v51 }
  0x7d   : > { %v1159_v63 = vor.u32 %v1157_v15, %v1156_v60  ;;  %vm1075_vm15 = vmand %vm955_vm12, %vm995_vm10  ;;  %vm1017_vm12 = vcmp.lt.f32.partialorder %v893_v35, %v937_v51 }
  0x7e   : > { %vm1076_vm5 = vmand %vm956_vm6, %vm996_vm13  ;;  %v1095_v53 = vsel %vm1075_vm15, %v4482_v41, 0.0  ;;  %vm1018_vm6 = vcmp.lt.f32.partialorder %v894_v22, %v938_v54  ;;  %vm958_vm13 = vcmp.eq.f32.partialorder %v4503_v55, %v938_v54  ;;  %v1217_v28 = vor.u32 %v1216_v24, %v1154_v37  ;;  %v3536_v24 = vld [vmem:[%s4964_s3 + $0x210] sm:$0xff]  }
  0x7f   : > { %v4589_v13 = vsel %vm5062_vm11, 0, %v1159_v63  ;;  %v1096_v21 = vsel %vm1076_vm5, %v4484_v42, 0.0  ;;  %vm4598_vm4 = vmpackc.low %vm1076_vm5, %vm1075_vm15  ;;  %v3535_v63 = vld [vmem:[%s4964_s3 + $0x208] sm:$0xff]  }
  0x80   : > { %2143 = vmatprep.mubr.bf16.mxu1 %v4589_v13  ;;  %v1108_v59 = vpack.c.bf16 %v1096_v21, %v1095_v53  ;;  %2055 = vmatmul.mubr.bf16.gmra.mrb[24].mxu0 %v4589_v13  ;;  %vm997_vm8 = vmor %vm3824_vm2, %vm977_vm14  ;;  %v4633_v48 = vsel %vm5059_vm0, %v1217_v28, 0 }
  0x81   : > { %2144 = vmatmul.mubr.bf16.gmra.mrb[20].mxu1 %v4593_v20  ;;  %3061 = vmatprep.mubr.msk.bf16.mxu0 %vm4598_vm4, %v4585_v11  ;;  %vm998_vm10 = vmor %vm3828_vm3, %vm978_vm1  ;;  %vm5069_vm1 = vnez %v5004_v44 }
  0x82   : > { %v1161_v41 = vshrl.u32 %v1108_v59, 16  ;;  %v1164_v42 = vshll.u32 %v1108_v59, 16  ;;  %vm1057_vm15 = vmand %vm997_vm8, %vm1017_vm12  ;;  %vm5070_vm12 = vnez %v5002_v38  ;;  %v3543_v38 = vld [vmem:[%s4967_s6] ss:$0 sm:$0xff] }
  0x83   : > { %vm1058_vm14 = vmand %vm998_vm10, %vm1018_vm6  ;;  %vm5072_vm6 = vnez %v5015_v40  ;;  %vm5074_vm10 = vnez %v5036_v0 }
  0x84   : > { %v1163_v8 = vrot.slane %v1161_v41, 7  ;;  %vm4614_vm5 = vmand %vm957_vm7, %vm1057_vm15  ;;  %v1218_v62 = vrot.slane %v1164_v42, 1  ;;  %vm5073_vm7 = vnez %v5024_v47 }
  0x85   : > { %vm4618_vm9 = vmand %vm958_vm13, %vm1058_vm14  ;;  %v1097_v9 = vsel %vm4614_vm5, %v4501_v45, 0.0  ;;  %v2975_v45 = vld [vmem:[%s480_s21] sm:$0xff]   ;;  %vm5075_vm13 = vcmask 1046528   ;;  %vm5077_vm14 = vcmask 1040384  }
  0x86   : > { %v1166_v5 = vor.u32 %v1164_v42, %v1163_v8  ;;  %v1098_v16 = vsel %vm4618_vm9, %v4503_v55, 0.0  ;;  %v3030_v55 = vld [vmem:[%s480_s21 + $0x8] sm:$0xff]   ;;  %v1219_v43 = vor.u32 %v1218_v62, %v1161_v41  ;;  %v2976_v3 = vunpack.c.l.bf16 %v2975_v45  ;;  %vm5071_vm8 = vmpackc.low %vm5069_vm1, %vm5070_vm12 }
  0x87   : > { %v4635_v33 = vpack.c.bf16 %v1098_v16, %v1097_v9  ;;  %v2977_v37 = vunpack.c.h.bf16 %v2975_v45  ;;  %v2980_v15 = vunpack.c.l.bf16 %v3030_v55  ;;  %v2981_v49 = vunpack.c.h.bf16 %v3030_v55  ;;  %v3537_v16 = vld [vmem:[%s4964_s3 + $0x218] sm:$0xff]   ;;  %vm5076_vm15 = vmmov %vm5075_vm13 }
  0x88   : > { %v4639_v18 = vsel %vm5062_vm11, 0, %v1166_v5  ;;  %v4657_v51 = vsel %vm5059_vm0, %v1219_v43, 0  ;;  %v649_v5 = vstv %s648_s14  ;;  %vm5078_vm1 = vmmov %vm5077_vm14 }
  0x89   : > { %2151 = vmatprep.mubr.bf16.mxu1 %v4639_v18  ;;  %v1168_v2 = vshrl.u32 %v4635_v33, 16  ;;  %v1171_v35 = vshll.u32 %v4635_v33, 16  ;;  %2063 = vmatmul.mubr.bf16.gmra.mrb[28].mxu0 %v4639_v18  ;;  %vm5079_vm12 = vmmov %vm5075_vm13 }
  0x8a   : > { %2152 = vmatmul.mubr.bf16.gmra.mrb[24].mxu1 %v4633_v48  ;;  %2200 = vmatprep.mubr.bf16.mxu0 %v4122_v39  ;;  %v3542_v39 = vld [vmem:[%s4966_s5] ss:$0 sm:$0xff] }
  0x8b   : > { %v1170_v22 = vrot.slane %v1168_v2, 7  ;;  %v628_v60 = vmul.f32 %v3542_v39, %v2976_v3  ;;  %v629_v54 = vmul.f32 %v3542_v39, %v2977_v37  ;;  %v630_v53 = vmul.f32 %v3542_v39, %v2980_v15  ;;  %v3539_v15 = vld [vmem:[%s4964_s3 + $0x228] sm:$0xff]  }
  0x8c   : > { %v631_v21 = vmul.f32 %v3542_v39, %v2981_v49 }
  0x8d   : > { %v1173_v52 = vor.u32 %v1171_v35, %v1170_v22  ;;  %v632_v44 = vadd.f32 %v3543_v38, %v628_v60  ;;  %v634_v59 = vadd.f32 %v3543_v38, %v630_v53 }
  0x8e   : > { %v635_v41 = vadd.f32 %v3543_v38, %v631_v21 }
  0x8f   : > { %v4653_v50 = vsel %vm5062_vm11, 0, %v1173_v52  ;;  %v636_v42 = vmax.f32 %v632_v44, 0.0  ;;  %v638_v8 = vmax.f32 %v634_v59, 0.0  ;;  %v3541_v59 = vld [vmem:[%s4964_s3 + $0x238] sm:$0xff]  }
  0x90   : > { %2159 = vmatprep.mubr.bf16.mxu1 %v4653_v50  ;;  %v639_v9 = vmax.f32 %v635_v41, 0.0 }
  0x91   : > { %3064 = vmatmul.mubr.msk.bf16.vlgmr.msra.gmra.mrb[32].mxu0 %vm5071_vm8, %v3943_v14  ;;  %v633_v14 = vadd.f32 %v3543_v38, %v629_v54  ;;  %v4697_v62 = vmul.f32 %v649_v5, %v636_v42  ;;  %vm5080_vm8 = vmmov %vm5079_vm12 }
  0x92   : > { %2160 = vmatmul.mubr.bf16.gmra.mrb[28].mxu1 %v4657_v51  ;;  %3383 = vmatpush3.bf16.msra.mxu0 %v4404_v7  ;;  %v653_v40 = vmul.f32 %v649_v5, %v639_v9 }
  0x93   : > { %3088 = vmatprep.mubr.msk.bf16.mxu1 %vm5072_vm6, %v3956_v23  ;;  %2208 = vmatprep.mubr.bf16.mxu0 %v4230_v61  ;;  %v637_v28 = vmax.f32 %v633_v14, 0.0  ;;  %v709_v55 = vrot.slane %v4697_v62, 1  ;;  %v782_v3 = vrot.slane %v4697_v62, 7 }
  0x94   : > { %3384 = vmatprep.subr.bf16.mxu0 %v3535_v63  ;;  %v713_v43 = vrot.slane %v653_v40, 1  ;;  %v786_v52 = vrot.slane %v653_v40, 7 }
  0x95   : > { %v4699_v45 = vmul.f32 %v649_v5, %v637_v28  ;;  %v822_v39 = vsel %vm5077_vm14, 0.0, %v782_v3 }
  0x96   : > { %3385 = vmatpush3.bf16.msra.mxu0 %v3535_v63 }
  0x97   : > { %3386 = vmatprep.subr.bf16.mxu0 %v3536_v24  ;;  %v710_v22 = vrot.slane %v4699_v45, 1  ;;  %v783_v49 = vrot.slane %v4699_v45, 7  ;;  %v3108_v33 = vpack.c.bf16 %v4699_v45, %v4697_v62 }
  0x99   : > { %3067 = vmatmul.mubr.msk.bf16.gmra.mrb[36].mxu0 %vm5072_vm6, %v3956_v23  ;;  %v652_v23 = vmul.f32 %v649_v5, %v638_v8  ;;  %v749_v54 = vsel %vm5079_vm12, %v710_v22, 0.0  ;;  %vm5081_vm6 = vmmov %vm5078_vm1 }
  0x9a   : > { %2298 = vmatmul.mubr.bf16.vlgmr.msra.gmra.mrb[32].mxu1 %v4204_v27  ;;  %2216 = vmatprep.mubr.bf16.mxu0 %v4430_v58  ;;  %v3538_v27 = vld [vmem:[%s4964_s3 + $0x220] sm:$0xff]   ;;  %v784_v53 = vsel %vm5081_vm6, %v782_v3, %v783_v49 }
  0x9b   : > { %3091 = vmatprep.mubr.msk.bf16.mxu1 %vm5073_vm7, %v4173_v4  ;;  %3422 = vmatpush3.bf16.msra.mxu1 %v4404_v7  ;;  %v712_v7 = vrot.slane %v652_v23, 1  ;;  %v785_v37 = vrot.slane %v652_v23, 7  ;;  %v874_v44 = vsel %vm3828_vm3, %v749_v54, %v784_v53 }
  0x9c   : > { %3387 = vmatpush3.bf16.msra.mxu0 %v3536_v24  ;;  %3415 = vmatprep.subr.bf16.mxu1 %v3535_v63  ;;  %v898_v0 = vmax.f32 %v4699_v45, %v874_v44 }
  0x9d   : > { %3388 = vmatprep.subr.bf16.mxu0 %v3537_v16  ;;  %v714_v47 = vsel %vm5076_vm15, %v712_v7, %v713_v43  ;;  %v823_v60 = vsel %vm5078_vm1, 0.0, %v785_v37  ;;  %vm5084_vm15 = vnez %v5061_v31 }
  0x9e   : > { %v875_v38 = vsel %vm3824_vm2, %v714_v47, %v823_v60 }
  0x9f   : > { %3423 = vmatpush3.bf16.msra.mxu1 %v3535_v63  ;;  %v750_v63 = vsel %vm5080_vm8, %v713_v43, 0.0  ;;  %v899_v42 = vmax.f32 %v652_v23, %v875_v38 }
  0xa0   : > { %3389 = vmatpush3.bf16.msra.mxu0 %v3537_v16  ;;  %3416 = vmatprep.subr.bf16.mxu1 %v3536_v24 }
  0xa1   : > { %3070 = vmatmul.mubr.msk.bf16.gmra.mrb[40].mxu0 %vm5073_vm7, %v4173_v4  ;;  %3390 = vmatprep.subr.bf16.mxu0 %v3538_v27  ;;  %v711_v4 = vsel %vm5075_vm13, %v709_v55, %v710_v22  ;;  %vm5082_vm7 = vmmov %vm5078_vm1  ;;  %vm5083_vm13 = vnez %v5046_v1 }
  0xa2   : > { %2306 = vmatmul.mubr.bf16.gmra.mrb[36].mxu1 %v4383_v46  ;;  %2224 = vmatprep.mubr.bf16.mxu0 %v4550_v19  ;;  %v3540_v46 = vld [vmem:[%s4964_s3 + $0x230] sm:$0xff]   ;;  %v787_v21 = vsel %vm5082_vm7, %v785_v37, %v786_v52 }
  0xa3   : > { %3094 = vmatprep.mubr.msk.bf16.mxu1 %vm5074_vm10, %v4184_v10  ;;  %3424 = vmatpush3.bf16.msra.mxu1 %v3536_v24  ;;  %v873_v24 = vsel %vm3824_vm2, %v711_v4, %v822_v39  ;;  %v876_v14 = vsel %vm3828_vm3, %v750_v63, %v787_v21 }
  0xa4   : > { %3391 = vmatpush3.bf16.msra.mxu0 %v3538_v27  ;;  %3417 = vmatprep.subr.bf16.mxu1 %v3537_v16  ;;  %v897_v41 = vmax.f32 %v4697_v62, %v873_v24 }
  0xa5   : > { %3392 = vmatprep.subr.bf16.mxu0 %v3539_v15 }
  0xa6   : > { %v939_v28 = vmax.f32 %v897_v41, %v899_v42 }
  0xa7   : > { %3425 = vmatpush3.bf16.msra.mxu1 %v3537_v16 }
  0xa8   : > { %3393 = vmatpush3.bf16.msra.mxu0 %v3539_v15  ;;  %3418 = vmatprep.subr.bf16.mxu1 %v3538_v27  ;;  %vm959_vm1 = vcmp.eq.f32.partialorder %v4697_v62, %v939_v28 }
  0xa9   : > { %3073 = vmatmul.mubr.msk.bf16.gmra.mrb[44].mxu0 %vm5074_vm10, %v4184_v10  ;;  %3394 = vmatprep.subr.bf16.mxu0 %v3540_v46  ;;  %v900_v10 = vmax.f32 %v653_v40, %v876_v14  ;;  %vm979_vm10 = vcmp.lt.f32.partialorder %v873_v24, %v939_v28 }
  0xaa   : > { %2314 = vmatmul.mubr.bf16.gmra.mrb[40].mxu1 %v4452_v34  ;;  %2232 = vmatprep.mubr.bf16.mxu0 %v4593_v20  ;;  %vm999_vm12 = vmor %vm3824_vm2, %vm979_vm10 }
  0xab   : > { %3097 = vmatprep.mubr.msk.bf16.mxu1 %vm5083_vm13, %v4434_v26  ;;  %3426 = vmatpush3.bf16.msra.mxu1 %v3538_v27  ;;  %v940_v8 = vmax.f32 %v898_v0, %v900_v10  ;;  %vm4767_vm7 = vmand %vm959_vm1, %vm999_vm12 }
  0xac   : > { %3395 = vmatpush3.bf16.msra.mxu0 %v3540_v46  ;;  %3419 = vmatprep.subr.bf16.mxu1 %v3539_v15  ;;  %v1099_v1 = vsel %vm4767_vm7, %v4697_v62, 0.0  ;;  %vm3083_vm2 = vmpackc.low %vm4618_vm9, %vm4614_vm5 }
  0xad   : > { %3396 = vmatprep.subr.bf16.mxu0 %v3541_v59  ;;  %vm980_vm14 = vcmp.lt.f32.partialorder %v874_v44, %v940_v8  ;;  %vm960_vm8 = vcmp.eq.f32.partialorder %v4699_v45, %v940_v8 }
  0xae   : > { %vm1000_vm6 = vmor %vm3828_vm3, %vm980_vm14 }
  0xaf   : > { %3427 = vmatpush3.bf16.msra.mxu1 %v3539_v15 }
  0xb0   : > { %3420 = vmatprep.subr.bf16.mxu1 %v3540_v46  ;;  %3397 = vmatpush3.bf16.msra.mxu0 %v3541_v59 }
  0xb1   : > { %3076 = vmatmul.mubr.msk.bf16.gmra.mrb[48].mxu0 %vm5083_vm13, %v4434_v26  ;;  %v1220_v26 = vrot.slane %v1171_v35, 1  ;;  %vm4774_vm13 = vmand %vm960_vm8, %vm1000_vm6 }
  0xb2   : > { %2322 = vmatmul.mubr.bf16.gmra.mrb[44].mxu1 %v4564_v6  ;;  %2240 = vmatprep.mubr.bf16.mxu0 %v4633_v48  ;;  %vm3107_vm3 = vmpackc.low %vm4774_vm13, %vm4767_vm7 }
  0xb3   : > { %3100 = vmatprep.mubr.msk.bf16.mxu1 %vm5084_vm15, %v4465_v36  ;;  %3428 = vmatpush3.bf16.msra.mxu1 %v3540_v46  ;;  %v1221_v57 = vor.u32 %v1220_v26, %v1168_v2 }
  0xb4   : > { %3421 = vmatprep.subr.bf16.mxu1 %v3541_v59 }
  0xb5   : > { %v1245_v31 = vsel %vm5059_vm0, %v1221_v57, 0 }
  0xb7   : > { %3429 = vmatpush3.bf16.msra.mxu1 %v3541_v59 }
  0xb9   : > { %3079 = vmatmul.mubr.msk.bf16.gmra.mrb[52].mxu0 %vm5084_vm15, %v4465_v36  ;;  %v1100_v36 = vsel %vm4774_vm13, %v4699_v45, 0.0 }
  0xba   : > { %2330 = vmatmul.mubr.bf16.gmra.mrb[48].mxu1 %v4589_v13  ;;  %2248 = vmatprep.mubr.bf16.mxu0 %v4657_v51  ;;  %v1110_v6 = vpack.c.bf16 %v1100_v36, %v1099_v1 }
  0xbb   : > { %3103 = vmatprep.mubr.msk.bf16.mxu1 %vm4598_vm4, %v4585_v11 }
  0xbc   : > { %v1175_v13 = vshrl.u32 %v1110_v6, 16  ;;  %v1178_v35 = vshll.u32 %v1110_v6, 16 }
  0xbe   : > { %v1177_v2 = vrot.slane %v1175_v13, 7  ;;  %v1222_v29 = vrot.slane %v1178_v35, 1 }
  0xc1   : > { %3082 = vmatmul.mubr.msk.bf16.gmra.mrb[56].mxu0 %vm4598_vm4, %v4585_v11  ;;  %v1180_v11 = vor.u32 %v1178_v35, %v1177_v2 }
  0xc2   : > { %2338 = vmatmul.mubr.bf16.gmra.mrb[52].mxu1 %v4639_v18  ;;  %2256 = vmatprep.mubr.bf16.mxu0 %v1245_v31 }
  0xc3   : > { %3106 = vmatprep.mubr.msk.bf16.mxu1 %vm3083_vm2, %v4575_v12  ;;  %v1203_v25 = vsel %vm5062_vm11, 0, %v1180_v11 }
  0xc9   : > { %3085 = vmatmul.mubr.msk.bf16.gmra.mrb[60].mxu0 %vm3083_vm2, %v4575_v12  ;;  %v1223_v12 = vor.u32 %v1222_v29, %v1175_v13 }
  0xca   : > { %2346 = vmatmul.mubr.bf16.gmra.mrb[56].mxu1 %v4653_v50  ;;  %3398 = vmatprep.mubr.bf16.mxu0 %v4230_v61 }
  0xcb   : > { %3109 = vmatprep.mubr.msk.bf16.mxu1 %vm3107_vm3, %v3108_v33  ;;  %v1246_v61 = vsel %vm5059_vm0, %v1223_v12, 0 }
  0xd1   : > { %3399 = vmatmul.mubr.bf16.vlgmr.msra.gmra.mrb[64].mxu0 %v4430_v58 }
  0xd2   : > { %2354 = vmatmul.mubr.bf16.gmra.mrb[60].mxu1 %v1203_v25  ;;  %3402 = vmatprep.mubr.bf16.mxu0 %v4550_v19  ;;  %v4823_v19 = vld [vmem:[%s4965_s4] ss:$0 sm:$0xff] }
  0xd3   : > { %3406 = vmatprep.mubr.bf16.mxu1 %v4633_v48 }
  0xd9   : > { %3403 = vmatmul.mubr.bf16.gmra.mrb[68].mxu0 %v4593_v20 }
  0xda   : > { %3407 = vmatmul.mubr.bf16.vlgmr.msra.gmra.mrb[64].mxu1 %v4657_v51 }
  0xdb   : > { %3410 = vmatprep.mubr.bf16.mxu1 %v1245_v31 }
  0xe2   : > { %3411 = vmatmul.mubr.bf16.gmra.mrb[68].mxu1 %v1246_v61 }
 0x111   : > { %v3126_v30 = vpop.f32.mrb[0].mxu0 }
 0x112   : > { %v3127_v17 = vpop.f32.mrb[1].mxu0 }
 0x113   : > { %v3128_v18 = vadd.f32 %v3127_v17, %v3126_v30  ;;  %v3129_v58 = vpop.f32.mrb[2].mxu0 }
 0x114   : > { %v3130_v50 = vpop.f32.mrb[3].mxu0 }
 0x115   : > { %v3131_v9 = vadd.f32 %v3130_v50, %v3129_v58  ;;  %v2009_v20 = vadd.f32 %v3128_v18, %v4823_v19 }
 0x117   : > { %v2012_v32 = vadd.f32 %v3131_v9, %v4823_v19 }
 0x119   : > { %v3190_v48 = vpop.f32.mrb[0].mxu1  ;;  %v3132_v51 = vpop.f32.mrb[4].mxu0 }
 0x11a   : > { %v3191_v5 = vpop.f32.mrb[1].mxu1  ;;  %v3133_v16 = vpop.f32.mrb[5].mxu0 }
 0x11b   : > { %v3192_v62 = vadd.f32 %v3191_v5, %v3190_v48  ;;  %v3193_v45 = vpop.f32.mrb[2].mxu1  ;;  %v3134_v23 = vadd.f32 %v3133_v16, %v3132_v51  ;;  %v3135_v40 = vpop.f32.mrb[6].mxu0 }
 0x11c   : > { %v3194_v27 = vpop.f32.mrb[3].mxu1  ;;  %v3136_v55 = vpop.f32.mrb[7].mxu0 }
 0x11d   : > { %v4827_v22 = vadd.f32 %v3192_v62, %v2009_v20  ;;  %v3195_v7 = vadd.f32 %v3194_v27, %v3193_v45  ;;  %v3137_v43 = vadd.f32 %v3136_v55, %v3135_v40  ;;  %v2017_v37 = vadd.f32 %v3134_v23, %v4823_v19 }
 0x11f   : > { %v4829_v3 = vadd.f32 %v3195_v7, %v2012_v32  ;;  %v2020_v47 = vadd.f32 %v3137_v43, %v4823_v19 }
 0x121   : > { %v3196_v15 = vpop.f32.mrb[4].mxu1  ;;  %v3138_v49 = vpop.f32.mrb[8].mxu0 }
 0x122   : > { %v3197_v52 = vpop.f32.mrb[5].mxu1  ;;  %v3139_v4 = vpop.f32.mrb[9].mxu0 }
 0x123   : > { %v3198_v39 = vadd.f32 %v3197_v52, %v3196_v15  ;;  %v3199_v60 = vpop.f32.mrb[6].mxu1  ;;  %v3140_v46 = vadd.f32 %v3139_v4, %v3138_v49  ;;  %v3141_v54 = vpop.f32.mrb[10].mxu0 }
 0x124   : > { %v3200_v63 = vpop.f32.mrb[7].mxu1  ;;  %v3142_v53 = vpop.f32.mrb[11].mxu0 }
 0x125   : > { %v4833_v21 = vadd.f32 %v3198_v39, %v2017_v37  ;;  %v3201_v24 = vadd.f32 %v3200_v63, %v3199_v60  ;;  %v3143_v38 = vadd.f32 %v3142_v53, %v3141_v54  ;;  %v2025_v59 = vadd.f32 %v3140_v46, %v4823_v19 }
 0x127   : > { %v4835_v44 = vadd.f32 %v3201_v24, %v2020_v47  ;;  %v2028_v8 = vadd.f32 %v3143_v38, %v4823_v19 }
 0x130   : > { %v3144_v14 = vpop.f32.mrb[12].mxu0 }
 0x131   : > { %v3202_v41 = vpop.f32.mrb[8].mxu1  ;;  %v3145_v42 = vpop.f32.mrb[13].mxu0 }
 0x132   : > { %v3203_v0 = vpop.f32.mrb[9].mxu1  ;;  %v3146_v10 = vadd.f32 %v3145_v42, %v3144_v14  ;;  %v3147_v28 = vpop.f32.mrb[14].mxu0 }
 0x133   : > { %v3204_v26 = vadd.f32 %v3203_v0, %v3202_v41  ;;  %v3205_v34 = vpop.f32.mrb[10].mxu1  ;;  %v3148_v56 = vpop.f32.mrb[15].mxu0 }
 0x134   : > { %v3206_v57 = vpop.f32.mrb[11].mxu1  ;;  %v3149_v1 = vadd.f32 %v3148_v56, %v3147_v28  ;;  %v2033_v33 = vadd.f32 %v3146_v10, %v4823_v19 }
 0x135   : > { %v4839_v36 = vadd.f32 %v3204_v26, %v2025_v59  ;;  %v3207_v31 = vadd.f32 %v3206_v57, %v3205_v34 }
 0x136   : > { %v2036_v12 = vadd.f32 %v3149_v1, %v4823_v19 }
 0x137   : > { %v4841_v6 = vadd.f32 %v3207_v31, %v2028_v8 }
 0x138   : > { %v3150_v13 = vpop.f32.mrb[16].mxu0 }
 0x139   : > { %v3208_v2 = vpop.f32.mrb[12].mxu1  ;;  %v3151_v35 = vpop.f32.mrb[17].mxu0 }
 0x13a   : > { %v3209_v11 = vpop.f32.mrb[13].mxu1  ;;  %v3152_v25 = vadd.f32 %v3151_v35, %v3150_v13  ;;  %v3153_v29 = vpop.f32.mrb[18].mxu0 }
 0x13b   : > { %v3210_v61 = vadd.f32 %v3209_v11, %v3208_v2  ;;  %v3211_v30 = vpop.f32.mrb[14].mxu1  ;;  %v3154_v17 = vpop.f32.mrb[19].mxu0 }
 0x13c   : > { %v3212_v18 = vpop.f32.mrb[15].mxu1  ;;  %v3155_v58 = vadd.f32 %v3154_v17, %v3153_v29  ;;  %v2041_v51 = vadd.f32 %v3152_v25, %v4823_v19 }
 0x13d   : > { %v4845_v50 = vadd.f32 %v3210_v61, %v2033_v33  ;;  %v3213_v9 = vadd.f32 %v3212_v18, %v3211_v30 }
 0x13e   : > { %v2044_v23 = vadd.f32 %v3155_v58, %v4823_v19 }
 0x13f   : > { %v4847_v20 = vadd.f32 %v3213_v9, %v2036_v12 }
 0x149   : > { %v3156_v48 = vpop.f32.mrb[20].mxu0 }
 0x14a   : > { %v3214_v5 = vpop.f32.mrb[16].mxu1  ;;  %v3157_v16 = vpop.f32.mrb[21].mxu0 }
 0x14b   : > { %v3215_v32 = vpop.f32.mrb[17].mxu1  ;;  %v3158_v62 = vadd.f32 %v3157_v16, %v3156_v48  ;;  %v3159_v45 = vpop.f32.mrb[22].mxu0 }
 0x14c   : > { %v3216_v40 = vadd.f32 %v3215_v32, %v3214_v5  ;;  %v3217_v27 = vpop.f32.mrb[18].mxu1  ;;  %v3160_v55 = vpop.f32.mrb[23].mxu0 }
 0x14d   : > { %v3218_v7 = vpop.f32.mrb[19].mxu1  ;;  %v3161_v43 = vadd.f32 %v3160_v55, %v3159_v45  ;;  %v2049_v4 = vadd.f32 %v3158_v62, %v4823_v19 }
 0x14e   : > { %v4851_v37 = vadd.f32 %v3216_v40, %v2041_v51  ;;  %v3219_v15 = vadd.f32 %v3218_v7, %v3217_v27 }
 0x14f   : > { %v2052_v63 = vadd.f32 %v3161_v43, %v4823_v19 }
 0x150   : > { %v4853_v49 = vadd.f32 %v3219_v15, %v2044_v23 }
 0x153   : > { %v3162_v52 = vpop.f32.mrb[24].mxu0 }
 0x154   : > { %v3220_v47 = vpop.f32.mrb[20].mxu1  ;;  %v3163_v39 = vpop.f32.mrb[25].mxu0 }
 0x155   : > { %v3221_v60 = vpop.f32.mrb[21].mxu1  ;;  %v3164_v46 = vadd.f32 %v3163_v39, %v3162_v52  ;;  %v3165_v54 = vpop.f32.mrb[26].mxu0 }
 0x156   : > { %v3222_v53 = vadd.f32 %v3221_v60, %v3220_v47  ;;  %v3223_v24 = vpop.f32.mrb[22].mxu1  ;;  %v3166_v38 = vpop.f32.mrb[27].mxu0 }
 0x157   : > { %v3224_v14 = vpop.f32.mrb[23].mxu1  ;;  %v3167_v59 = vadd.f32 %v3166_v38, %v3165_v54  ;;  %v2057_v28 = vadd.f32 %v3164_v46, %v4823_v19 }
 0x158   : > { %v4857_v41 = vadd.f32 %v3222_v53, %v2049_v4  ;;  %v3225_v42 = vadd.f32 %v3224_v14, %v3223_v24 }
 0x159   : > { %v2060_v1 = vadd.f32 %v3167_v59, %v4823_v19 }
 0x15a   : > { %v4859_v0 = vadd.f32 %v3225_v42, %v2052_v63 }
 0x15c   : > { %v3168_v10 = vpop.f32.mrb[28].mxu0 }
 0x15d   : > { %v3226_v8 = vpop.f32.mrb[24].mxu1  ;;  %v3169_v26 = vpop.f32.mrb[29].mxu0 }
 0x15e   : > { %v3227_v34 = vpop.f32.mrb[25].mxu1  ;;  %v3170_v56 = vadd.f32 %v3169_v26, %v3168_v10  ;;  %v3171_v57 = vpop.f32.mrb[30].mxu0 }
 0x15f   : > { %v3228_v31 = vadd.f32 %v3227_v34, %v3226_v8  ;;  %v3229_v13 = vpop.f32.mrb[26].mxu1  ;;  %v3172_v33 = vpop.f32.mrb[31].mxu0 }
 0x160   : > { %v3230_v2 = vpop.f32.mrb[27].mxu1  ;;  %v3173_v35 = vadd.f32 %v3172_v33, %v3171_v57  ;;  %v2065_v61 = vadd.f32 %v3170_v56, %v4823_v19 }
 0x161   : > { %v4863_v11 = vadd.f32 %v3228_v31, %v2057_v28  ;;  %v3231_v25 = vadd.f32 %v3230_v2, %v3229_v13 }
 0x162   : > { %v2068_v48 = vadd.f32 %v3173_v35, %v4823_v19 }
 0x163   : > { %v4865_v29 = vadd.f32 %v3231_v25, %v2060_v1 }
 0x164   : > { %v3254_v12 = vpop.f32.mrb[32].mxu0 }
 0x165   : > { %v3232_v30 = vpop.f32.mrb[28].mxu1  ;;  %v3255_v17 = vpop.f32.mrb[33].mxu0 }
 0x166   : > { %v3233_v18 = vpop.f32.mrb[29].mxu1  ;;  %v3256_v58 = vadd.f32 %v3255_v17, %v3254_v12  ;;  %v3257_v9 = vpop.f32.mrb[34].mxu0 }
 0x167   : > { %v3234_v51 = vadd.f32 %v3233_v18, %v3232_v30  ;;  %v3235_v5 = vpop.f32.mrb[30].mxu1  ;;  %v3258_v16 = vpop.f32.mrb[35].mxu0 }
 0x168   : > { %v3236_v32 = vpop.f32.mrb[31].mxu1  ;;  %v2203_v62 = vadd.f32 %v3256_v58, %v4827_v22  ;;  %v3259_v45 = vadd.f32 %v3258_v16, %v3257_v9 }
 0x169   : > { %v4870_v23 = vadd.f32 %v3234_v51, %v2065_v61  ;;  %v3237_v40 = vadd.f32 %v3236_v32, %v3235_v5 }
 0x16a   : > { %v2206_v27 = vadd.f32 %v3259_v45, %v4829_v3 }
 0x16b   : > { %v4873_v55 = vadd.f32 %v3237_v40, %v2068_v48 }
 0x16c   : > { %v3260_v7 = vpop.f32.mrb[36].mxu0 }
 0x16d   : > { %v3318_v43 = vpop.f32.mrb[32].mxu1  ;;  %v3261_v15 = vpop.f32.mrb[37].mxu0 }
 0x16e   : > { %v3319_v52 = vpop.f32.mrb[33].mxu1  ;;  %v3262_v4 = vadd.f32 %v3261_v15, %v3260_v7  ;;  %v3263_v19 = vpop.f32.mrb[38].mxu0 }
 0x16f   : > { %v3320_v47 = vadd.f32 %v3319_v52, %v3318_v43  ;;  %v3321_v39 = vpop.f32.mrb[34].mxu1  ;;  %v3264_v60 = vpop.f32.mrb[39].mxu0 }
 0x170   : > { %v3322_v46 = vpop.f32.mrb[35].mxu1  ;;  %v2211_v22 = vadd.f32 %v3262_v4, %v4833_v21  ;;  %v3265_v54 = vadd.f32 %v3264_v60, %v3263_v19 }
 0x171   : > { %v3323_v63 = vadd.f32 %v3322_v46, %v3321_v39  ;;  %v4876_v53 = vadd.f32 %v3320_v47, %v2203_v62 }
 0x172   : > { %v2214_v3 = vadd.f32 %v3265_v54, %v4835_v44 }
 0x173   : > { %v4879_v24 = vadd.f32 %v3323_v63, %v2206_v27 }
 0x174   : > { %v3266_v38 = vpop.f32.mrb[40].mxu0 }
 0x175   : > { %v3324_v14 = vpop.f32.mrb[36].mxu1  ;;  %v3267_v59 = vpop.f32.mrb[41].mxu0 }
 0x176   : > { %v3325_v42 = vpop.f32.mrb[37].mxu1  ;;  %v3268_v10 = vadd.f32 %v3267_v59, %v3266_v38  ;;  %v3269_v28 = vpop.f32.mrb[42].mxu0 }
 0x177   : > { %v3326_v8 = vadd.f32 %v3325_v42, %v3324_v14  ;;  %v3327_v26 = vpop.f32.mrb[38].mxu1  ;;  %v3270_v34 = vpop.f32.mrb[43].mxu0 }
 0x178   : > { %v3328_v56 = vpop.f32.mrb[39].mxu1  ;;  %v2219_v21 = vadd.f32 %v3268_v10, %v4839_v36  ;;  %v3271_v57 = vadd.f32 %v3270_v34, %v3269_v28 }
 0x179   : > { %v3329_v1 = vadd.f32 %v3328_v56, %v3327_v26  ;;  %v4882_v31 = vadd.f32 %v3326_v8, %v2211_v22 }
 0x17a   : > { %v2222_v44 = vadd.f32 %v3271_v57, %v4841_v6 }
 0x17b   : > { %v4885_v13 = vadd.f32 %v3329_v1, %v2214_v3 }
 0x17c   : > { %v3272_v33 = vpop.f32.mrb[44].mxu0 }
 0x17d   : > { %v3330_v2 = vpop.f32.mrb[40].mxu1  ;;  %v3273_v35 = vpop.f32.mrb[45].mxu0 }
 0x17e   : > { %v3331_v25 = vpop.f32.mrb[41].mxu1  ;;  %v3274_v12 = vadd.f32 %v3273_v35, %v3272_v33  ;;  %v3275_v61 = vpop.f32.mrb[46].mxu0 }
 0x17f   : > { %v3332_v30 = vadd.f32 %v3331_v25, %v3330_v2  ;;  %v3333_v17 = vpop.f32.mrb[42].mxu1  ;;  %v3276_v18 = vpop.f32.mrb[47].mxu0 }
 0x180   : > { %v3334_v58 = vpop.f32.mrb[43].mxu1  ;;  %v2227_v36 = vadd.f32 %v3274_v12, %v4845_v50  ;;  %v3277_v9 = vadd.f32 %v3276_v18, %v3275_v61 }
 0x181   : > { %v3335_v48 = vadd.f32 %v3334_v58, %v3333_v17  ;;  %v4888_v51 = vadd.f32 %v3332_v30, %v2219_v21 }
 0x182   : > { %v2230_v6 = vadd.f32 %v3277_v9, %v4847_v20 }
 0x183   : > { %v4891_v5 = vadd.f32 %v3335_v48, %v2222_v44 }
 0x184   : > { %v3278_v16 = vpop.f32.mrb[48].mxu0 }
 0x185   : > { %v3336_v32 = vpop.f32.mrb[44].mxu1  ;;  %v3279_v62 = vpop.f32.mrb[49].mxu0 }
 0x186   : > { %v3337_v45 = vpop.f32.mrb[45].mxu1  ;;  %v3280_v40 = vadd.f32 %v3279_v62, %v3278_v16  ;;  %v3281_v27 = vpop.f32.mrb[50].mxu0 }
 0x187   : > { %v3338_v7 = vadd.f32 %v3337_v45, %v3336_v32  ;;  %v3339_v43 = vpop.f32.mrb[46].mxu1  ;;  %v3282_v15 = vpop.f32.mrb[51].mxu0 }
 0x188   : > { %v3340_v52 = vpop.f32.mrb[47].mxu1  ;;  %v2235_v50 = vadd.f32 %v3280_v40, %v4851_v37  ;;  %v3283_v4 = vadd.f32 %v3282_v15, %v3281_v27 }
 0x189   : > { %v3341_v19 = vadd.f32 %v3340_v52, %v3339_v43  ;;  %v4894_v47 = vadd.f32 %v3338_v7, %v2227_v36 }
 0x18a   : > { %v2238_v20 = vadd.f32 %v3283_v4, %v4853_v49 }
 0x18b   : > { %v4897_v39 = vadd.f32 %v3341_v19, %v2230_v6 }
 0x18c   : > { %v3284_v60 = vpop.f32.mrb[52].mxu0 }
 0x18d   : > { %v3342_v46 = vpop.f32.mrb[48].mxu1  ;;  %v3285_v22 = vpop.f32.mrb[53].mxu0 }
 0x18e   : > { %v3343_v54 = vpop.f32.mrb[49].mxu1  ;;  %v3286_v63 = vadd.f32 %v3285_v22, %v3284_v60  ;;  %v3287_v3 = vpop.f32.mrb[54].mxu0 }
 0x18f   : > { %v3344_v38 = vadd.f32 %v3343_v54, %v3342_v46  ;;  %v3345_v14 = vpop.f32.mrb[50].mxu1  ;;  %v3288_v59 = vpop.f32.mrb[55].mxu0 }
 0x190   : > { %v3346_v42 = vpop.f32.mrb[51].mxu1  ;;  %v2243_v37 = vadd.f32 %v3286_v63, %v4857_v41  ;;  %v3289_v10 = vadd.f32 %v3288_v59, %v3287_v3 }
 0x191   : > { %v3347_v28 = vadd.f32 %v3346_v42, %v3345_v14  ;;  %v4900_v8 = vadd.f32 %v3344_v38, %v2235_v50 }
 0x192   : > { %v2246_v49 = vadd.f32 %v3289_v10, %v4859_v0 }
 0x193   : > { %v4903_v26 = vadd.f32 %v3347_v28, %v2238_v20 }
 0x194   : > { %v3290_v34 = vpop.f32.mrb[56].mxu0 }
 0x195   : > { %v3348_v56 = vpop.f32.mrb[52].mxu1  ;;  %v3291_v21 = vpop.f32.mrb[57].mxu0 }
 0x196   : > { %v3349_v57 = vpop.f32.mrb[53].mxu1  ;;  %v3292_v1 = vadd.f32 %v3291_v21, %v3290_v34  ;;  %v3293_v44 = vpop.f32.mrb[58].mxu0 }
 0x197   : > { %v3350_v33 = vadd.f32 %v3349_v57, %v3348_v56  ;;  %v3351_v2 = vpop.f32.mrb[54].mxu1  ;;  %v3294_v35 = vpop.f32.mrb[59].mxu0 }
 0x198   : > { %v3352_v25 = vpop.f32.mrb[55].mxu1  ;;  %v2251_v41 = vadd.f32 %v3292_v1, %v4863_v11  ;;  %v3295_v12 = vadd.f32 %v3294_v35, %v3293_v44 }
 0x199   : > { %v3353_v61 = vadd.f32 %v3352_v25, %v3351_v2  ;;  %v2340_v30 = vadd.f32 %v3350_v33, %v2243_v37 }
 0x19a   : > { %v2254_v17 = vadd.f32 %v3295_v12, %v4865_v29 }
 0x19b   : > { %v2343_v0 = vadd.f32 %v3353_v61, %v2246_v49 }
 0x19c   : > { %v3296_v18 = vpop.f32.mrb[60].mxu0 }
 0x19d   : > { %v3354_v58 = vpop.f32.mrb[56].mxu1  ;;  %v3297_v36 = vpop.f32.mrb[61].mxu0 }
 0x19e   : > { %v3355_v9 = vpop.f32.mrb[57].mxu1  ;;  %v3298_v48 = vadd.f32 %v3297_v36, %v3296_v18  ;;  %v3299_v6 = vpop.f32.mrb[62].mxu0 }
 0x19f   : > { %v3356_v16 = vadd.f32 %v3355_v9, %v3354_v58  ;;  %v3357_v32 = vpop.f32.mrb[58].mxu1  ;;  %v3300_v62 = vpop.f32.mrb[63].mxu0 }
 0x1a0   : > { %v3358_v45 = vpop.f32.mrb[59].mxu1  ;;  %v2259_v40 = vadd.f32 %v3298_v48, %v4870_v23  ;;  %v3301_v27 = vadd.f32 %v3300_v62, %v3299_v6 }
 0x1a1   : > { %v3359_v11 = vadd.f32 %v3358_v45, %v3357_v32  ;;  %v4908_v7 = vadd.f32 %v3356_v16, %v2251_v41 }
 0x1a2   : > { %v2262_v29 = vadd.f32 %v3301_v27, %v4873_v55 }
 0x1a3   : > { %v4911_v43 = vadd.f32 %v3359_v11, %v2254_v17 }
 0x1a4   : > { %v3400_v15 = vpop.f32.mrb[64].mxu0 }
 0x1a5   : > { %v3360_v52 = vpop.f32.mrb[60].mxu1  ;;  %v2405_v50 = vadd.f32 %v3400_v15, %v4882_v31  ;;  %v2396_v4 = vpop.f32.mrb[65].mxu0 }
 0x1a6   : > { %v3361_v19 = vpop.f32.mrb[61].mxu1  ;;  %v2397_v20 = vadd.f32 %v2396_v4, %v4876_v53  ;;  %v3401_v60 = vpop.f32.mrb[66].mxu0 }
 0x1a7   : > { %v3362_v46 = vadd.f32 %v3361_v19, %v3360_v52  ;;  %v3363_v23 = vpop.f32.mrb[62].mxu1  ;;  %v2408_v22 = vadd.f32 %v3401_v60, %v4885_v13  ;;  %v2399_v54 = vpop.f32.mrb[67].mxu0  ;;  %v2483_v37 = vmul.f32 %v2405_v50, %v2405_v50 }
 0x1a8   : > { %v3364_v63 = vpop.f32.mrb[63].mxu1  ;;  %v2400_v55 = vadd.f32 %v2399_v54, %v4879_v24  ;;  %v2481_v38 = vmul.f32 %v2397_v20, %v2397_v20 }
 0x1a9   : > { %v3365_v31 = vadd.f32 %v3364_v63, %v3363_v23  ;;  %v2990_v3 = vpack.c.bf16 %v2408_v22, %v2405_v50  ;;  %v2356_v53 = vadd.f32 %v3362_v46, %v2259_v40  ;;  %v2484_v25 = vmul.f32 %v2408_v22, %v2408_v22 }
 0x1aa   : > { %v2459_v14 = vadd.f32 %v2400_v55, %v2397_v20  ;;  %v2482_v59 = vmul.f32 %v2400_v55, %v2400_v55  ;;  %v2985_v42 = vpack.c.bf16 %v2400_v55, %v2397_v20 }
 0x1ab   : > { %3031 = vst [vmem:[%s4921_s15 + $0x8] sm:$0xff] %v2990_v3   ;;  %v2359_v13 = vadd.f32 %v3365_v31, %v2262_v29 }
 0x1ac   : > { %v2460_v10 = vadd.f32 %v2459_v14, %v2405_v50  ;;  %v2497_v28 = vadd.f32 %v2482_v59, %v2481_v38  ;;  %2986 = vst [vmem:[%s4921_s15] sm:$0xff] %v2985_v42   ;;  %v3404_v49 = vpop.f32.mrb[68].mxu0 }
 0x1ad   : > { %v3408_v34 = vpop.f32.mrb[64].mxu1  ;;  %v2421_v56 = vadd.f32 %v3404_v49, %v4894_v47  ;;  %v2412_v21 = vpop.f32.mrb[69].mxu0 }
 0x1ae   : > { %v2437_v57 = vadd.f32 %v3408_v34, %v2340_v30  ;;  %v2428_v24 = vpop.f32.mrb[65].mxu1  ;;  %v2498_v1 = vadd.f32 %v2497_v28, %v2483_v37  ;;  %v2413_v44 = vadd.f32 %v2412_v21, %v4888_v51  ;;  %v2461_v33 = vadd.f32 %v2460_v10, %v2408_v22  ;;  %v3405_v2 = vpop.f32.mrb[70].mxu0 }
 0x1af   : > { %v2429_v35 = vadd.f32 %v2428_v24, %v4900_v8  ;;  %v3409_v41 = vpop.f32.mrb[66].mxu1  ;;  %v2424_v12 = vadd.f32 %v3405_v2, %v4897_v39  ;;  %v2415_v61 = vpop.f32.mrb[71].mxu0  ;;  %v2487_v62 = vmul.f32 %v2421_v56, %v2421_v56 }
 0x1b0   : > { %v2440_v17 = vadd.f32 %v3409_v41, %v2343_v0  ;;  %v2431_v47 = vpop.f32.mrb[67].mxu1  ;;  %v2462_v18 = vadd.f32 %v2461_v33, %v2413_v44  ;;  %v2485_v30 = vmul.f32 %v2413_v44, %v2413_v44  ;;  %v2499_v36 = vadd.f32 %v2498_v1, %v2484_v25 }
 0x1b1   : > { %v2432_v58 = vadd.f32 %v2431_v47, %v4903_v26  ;;  %v3000_v9 = vpack.c.bf16 %v2424_v12, %v2421_v56  ;;  %v2416_v8 = vadd.f32 %v2415_v61, %v4891_v5  ;;  %v2488_v5 = vmul.f32 %v2424_v12, %v2424_v12 }
 0x1b2   : > { %v3010_v51 = vpack.c.bf16 %v2440_v17, %v2437_v57  ;;  %v2500_v6 = vadd.f32 %v2499_v36, %v2485_v30  ;;  %v2489_v20 = vmul.f32 %v2429_v35, %v2429_v35 }
 0x1b3   : > { %v3005_v48 = vpack.c.bf16 %v2432_v58, %v2429_v35  ;;  %3033 = vst [vmem:[%s4921_s15 + $0x18] sm:$0xff] %v3000_v9   ;;  %v2463_v16 = vadd.f32 %v2462_v18, %v2416_v8  ;;  %v2486_v39 = vmul.f32 %v2416_v8, %v2416_v8  ;;  %v2995_v32 = vpack.c.bf16 %v2416_v8, %v2413_v44 }
 0x1b4   : > { %3035 = vst [vmem:[%s4921_s15 + $0x28] sm:$0xff] %v3010_v51   ;;  %v2490_v54 = vmul.f32 %v2432_v58, %v2432_v58 }
 0x1b5   : > { %3034 = vst [vmem:[%s4921_s15 + $0x20] sm:$0xff] %v3005_v48   ;;  %v3412_v0 = vpop.f32.mrb[68].mxu1  ;;  %v2464_v27 = vadd.f32 %v2463_v16, %v2421_v56  ;;  %v2501_v26 = vadd.f32 %v2500_v6, %v2486_v39  ;;  %3032 = vst [vmem:[%s4921_s15 + $0x10] sm:$0xff] %v2995_v32  }
 0x1b6   : > { %v2453_v45 = vadd.f32 %v3412_v0, %v2356_v53  ;;  %v2444_v40 = vpop.f32.mrb[69].mxu1  ;;  %v2492_v53 = vmul.f32 %v2440_v17, %v2440_v17 }
 0x1b7   : > { %v2445_v11 = vadd.f32 %v2444_v40, %v4908_v7  ;;  %v3413_v29 = vpop.f32.mrb[70].mxu1  ;;  %v2465_v52 = vadd.f32 %v2464_v27, %v2424_v12  ;;  %v2502_v50 = vadd.f32 %v2501_v26, %v2487_v62  ;;  %v2491_v7 = vmul.f32 %v2437_v57, %v2437_v57 }
 0x1b8   : > { %v2456_v15 = vadd.f32 %v3413_v29, %v2359_v13  ;;  %v2447_v4 = vpop.f32.mrb[71].mxu1  ;;  %v2495_v28 = vmul.f32 %v2453_v45, %v2453_v45 }
 0x1b9   : > { %v2448_v19 = vadd.f32 %v2447_v4, %v4911_v43  ;;  %v2466_v46 = vadd.f32 %v2465_v52, %v2429_v35  ;;  %v2503_v23 = vadd.f32 %v2502_v50, %v2488_v5  ;;  %v2493_v43 = vmul.f32 %v2445_v11, %v2445_v11 }
 0x1ba   : > { %v3020_v60 = vpack.c.bf16 %v2456_v15, %v2453_v45  ;;  %v2496_v56 = vmul.f32 %v2456_v15, %v2456_v15 }
 0x1bb   : > { %v3015_v22 = vpack.c.bf16 %v2448_v19, %v2445_v11  ;;  %v2504_v63 = vadd.f32 %v2503_v23, %v2489_v20  ;;  %v2467_v55 = vadd.f32 %v2466_v46, %v2432_v58  ;;  %v2494_v37 = vmul.f32 %v2448_v19, %v2448_v19 }
 0x1bc   : > { %3037 = vst [vmem:[%s4921_s15 + $0x38] sm:$0xff] %v3020_v60  }
 0x1bd   : > { %3036 = vst [vmem:[%s4921_s15 + $0x30] sm:$0xff] %v3015_v22   ;;  %v2468_v31 = vadd.f32 %v2467_v55, %v2437_v57  ;;  %v2505_v3 = vadd.f32 %v2504_v63, %v2490_v54 }
 0x1bf   : > { %v2469_v38 = vadd.f32 %v2468_v31, %v2440_v17  ;;  %v2506_v14 = vadd.f32 %v2505_v3, %v2491_v7 }
 0x1c1   : > { %v2470_v59 = vadd.f32 %v2469_v38, %v2445_v11  ;;  %v2507_v42 = vadd.f32 %v2506_v14, %v2492_v53 }
 0x1c3   : > { %v2471_v13 = vadd.f32 %v2470_v59, %v2448_v19  ;;  %v2508_v10 = vadd.f32 %v2507_v42, %v2493_v43 }
 0x1c5   : > { %v2472_v49 = vadd.f32 %v2471_v13, %v2453_v45  ;;  %v2509_v34 = vadd.f32 %v2508_v10, %v2494_v37 }
 0x1c7   : > { %v2473_v21 = vadd.f32 %v2472_v49, %v2456_v15  ;;  %v2510_v24 = vadd.f32 %v2509_v34, %v2495_v28 }
 0x1c9   : > { %v2474_v57 = vrot.slane %v2473_v21, 4  ;;  %v2511_v1 = vadd.f32 %v2510_v24, %v2496_v56 }
 0x1cb   : > { %v2475_v44 = vadd.f32 %v2474_v57, %v2473_v21  ;;  %v2512_v33 = vrot.slane %v2511_v1, 4 }
 0x1cd   : > { %v2476_v2 = vrot.slane %v2475_v44, 2  ;;  %v2513_v35 = vadd.f32 %v2512_v33, %v2511_v1 }
 0x1cf   : > { %v2477_v25 = vadd.f32 %v2476_v2, %v2475_v44  ;;  %v2514_v41 = vrot.slane %v2513_v35, 2 }
 0x1d1   : > { %v2478_v12 = vrot.slane %v2477_v25, 1  ;;  %v2515_v61 = vadd.f32 %v2514_v41, %v2513_v35 }
 0x1d3   : > { %v2479_v17 = vadd.f32 %v2478_v12, %v2477_v25  ;;  %v2516_v47 = vrot.slane %v2515_v61, 1 }
 0x1d5   : > { %2480 = vst [vmem:[%s504_s26] sm:$0x1] %v2479_v17  ;;  %v2517_v18 = vadd.f32 %v2516_v47, %v2515_v61 }
 0x1d7   : > { %2518 = vst [vmem:[%s504_s26 + $0x1] sm:$0x1] %v2517_v18 }
 0x1d8 PF: > { %s19_s9 = sadd.s32 1, %s3582_s9   ;;  %s5089_s27 = smov %s3574_s29 }
 0x1d9   : > { %p16_p0 = scmp.ge.s32.totalorder %s19_s9, 6   ;;  %s5090_s28 = smov %s3578_s30 }
 0x1da   : > { %s5091_s29 = smov %s5094_s10  ;;  %s5092_s30 = smov %s5098_s11 }
 0x1db   :  { %18 = sbr.rel (!%p16_p0) target bundleno = 3 (0x3), region = 96 }

</bundles_post_ra>
